<compile_context>
chip_gen: v7x
topology: tpu7x:2x2x1
jax: 0.10.0
libtpu: 0.0.40
codegen_flags: <defaults>
</compile_context>

<pallas_src>
import math
import jax
import jax.numpy as jnp
from jax.experimental import pallas as pl
from jax.experimental.pallas import tpu as pltpu

# ----------------------------- configuration --------------------------------
UNITS = 32            # C_in / C_out
MEM_UNITS = 32        # C_mem
HIDDEN = 64           # FFN hidden size (>= UNITS, used as the packed-vector lane width)
HEADS = 4
HEAD_DIM = UNITS // HEADS
NUM_LAYERS = 2
EPS = 1e-5

BATCH = 2
SEQ = 8
MEM_LEN = 8


# ------------------------------ kernel helpers -------------------------------
def _layernorm(x, g, b):
    mu = jnp.mean(x, axis=-1, keepdims=True)
    var = jnp.mean(jnp.square(x - mu), axis=-1, keepdims=True)
    return (x - mu) * jax.lax.rsqrt(var + EPS) * g + b


# ------------------------- fused full-decoder kernel -------------------------
def decoder_kernel(x_ref, mem_ref, masks_ref,
                   wqkv_ref, wqx_ref, wkv_ref, wo_ref,
                   wffn1_ref, wffn2_ref, vec_ref,
                   out_ref):
    B, T, TM = masks_ref.shape
    M = TM - T
    N, U = x_ref.shape                    # N = B*T
    H = HEADS
    D = U // H
    L = wffn1_ref.shape[0]
    PREC = jax.lax.Precision.HIGHEST
    neg = float(jnp.finfo(x_ref.dtype).min) / 2.0   # bf16/f32-safe masked-score fill

    x = x_ref[...]                        # (B*T, U) activation, resident across layers
    mem = mem_ref[...]                    # (B*M, C_mem) memory, NOT duplicated per head
    masks = masks_ref[...]                # (B, T, T+M) packed masks
    smask = masks[:, :, :T]               # (B, T, T)
    mmask = masks[:, :, T:]               # (B, T, M)

    def heads_split(z, S):
        """(B*S, H*D) -> (H*B, S, D) via lane slices + leading-axis stack (no transposes)."""
        zh = jnp.stack([z[:, h * D:(h + 1) * D] for h in range(H)], axis=0)  # (H, B*S, D)
        return zh.reshape(H * B, S, D)

    def heads_merge(z):
        """(H*B, T, D) -> (B*T, H*D): lane-concat the per-head blocks in head order."""
        z = z.reshape(H, B * T, D)
        return jnp.concatenate([z[h] for h in range(H)], axis=-1)

    def mask_heads(m, S):
        """(B, T, S) -> (H*B, T, S) broadcast over heads, done once in VMEM (no mask DMA x4)."""
        return jnp.broadcast_to(m[None], (H, B, T, S)).reshape(H * B, T, S)

    smask_h = mask_heads(smask, T)        # hoisted: identical for every layer
    mmask_h = mask_heads(mmask, M)

    def attention(q2, k2, v2, mask_h, S, wo):
        """q2:(B*T,U) k2,v2:(B*S,U) mask_h:(H*B,T,S) -> (B*T, U).

        Q is already scaled (1/sqrt(D) folded into the weights at pack time)."""
        q = heads_split(q2, T)
        k = heads_split(k2, S)
        v = heads_split(v2, S)
        s = jnp.einsum('xtd,xsd->xts', q, k,
                       preferred_element_type=jnp.float32, precision=PREC)
        s = jnp.where(mask_h > 0.0, s, neg)
        # open-coded masked softmax; denominator reciprocal on the EUP slot
        e = jnp.exp(s - jnp.max(s, axis=-1, keepdims=True))
        r = pl.reciprocal(jnp.sum(e, axis=-1, keepdims=True), approx=True)
        p = e * r * mask_h                # GluonNLP masked_softmax semantics
        ctx = jnp.einsum('xts,xsd->xtd', p, v,
                         preferred_element_type=jnp.float32, precision=PREC)
        # single output projection: cross-head reduction happens inside the MXU
        return jnp.dot(heads_merge(ctx), wo,
                       preferred_element_type=jnp.float32, precision=PREC)

    # Layers statically unrolled (fine at L=2; switch to lax.fori_loop + dynamic slab
    # indexing if NUM_LAYERS grows, to bound live ranges / compile time).
    for l in range(L):
        vec = vec_ref[l]                  # (16, HIDDEN); width-U params live in [:, :U]

        # ---- masked causal self-attention (post-norm); fused QKV projection ----
        qkv = jnp.dot(x, wqkv_ref[l], preferred_element_type=jnp.float32,
                      precision=PREC)                                  # (B*T, 3U)
        o = attention(qkv[:, :U] + vec[0:1, :U],
                      qkv[:, U:2 * U] + vec[1:2, :U],
                      qkv[:, 2 * U:] + vec[2:3, :U],
                      smask_h, T, wo_ref[l, 0]) + vec[6:7, :U]
        x = _layernorm(o + x, vec[7:8, :U], vec[8:9, :U])

        # ---- cross (memory) attention (post-norm); fused KV projection from memory ----
        q = jnp.dot(x, wqx_ref[l], preferred_element_type=jnp.float32,
                    precision=PREC) + vec[3:4, :U]                     # (B*T, U)
        kv = jnp.dot(mem, wkv_ref[l], preferred_element_type=jnp.float32,
                     precision=PREC)                                   # (B*M, 2U)
        o = attention(q,
                      kv[:, :U] + vec[4:5, :U],
                      kv[:, U:] + vec[5:6, :U],
                      mmask_h, M, wo_ref[l, 1]) + vec[9:10, :U]
        x = _layernorm(o + x, vec[10:11, :U], vec[11:12, :U])

        # ---- position-wise FFN (relu, post-norm) ----
        hmid = jnp.maximum(
            jnp.dot(x, wffn1_ref[l], preferred_element_type=jnp.float32,
                    precision=PREC) + vec[12:13, :], 0.0)
        y = jnp.dot(hmid, wffn2_ref[l], preferred_element_type=jnp.float32,
                    precision=PREC) + vec[13:14, :U]
        x = _layernorm(y + x, vec[14:15, :U], vec[15:16, :U])

    # flat (B*T, U) store (wrapper reshapes back to (B, T, U))
    out_ref[...] = x.astype(out_ref.dtype)
    # TODO(synk): dropout / attention_dropout / activation_dropout are identity (eval mode).


def _decoder_pallas_call(x, mem, masks, packed):
    N, U = x.shape
    inputs = (x, mem, masks,
              packed["w_qkv"], packed["w_qx"], packed["w_kv"], packed["w_o"],
              packed["w_ffn1"], packed["w_ffn2"], packed["vec"])
    return pl.pallas_call(
        decoder_kernel,
        out_shape=jax.ShapeDtypeStruct((N, U), x.dtype),
        # single grid step, everything resident in VMEM.  Working set here is <1 MiB;
        # if reused at larger T/B/HIDDEN, re-derive residency against v7x's 64 MiB VMEM
        # (32 MiB default scoped limit), not the 128 MiB of v5e/v6e.
        in_specs=[pl.BlockSpec(memory_space=pltpu.MemorySpace.VMEM) for _ in inputs],
        out_specs=pl.BlockSpec(memory_space=pltpu.MemorySpace.VMEM),
        # TODO(synk): on v7x (2 TensorCores) benchmark a 2-wide 'parallel' batch grid
        # against this single-step version once B/T grow; neutral at B=2, T=8.
    )(*inputs)


# ------------------------------- mask helpers --------------------------------
def gen_self_attn_mask_causal(valid_length, T):
    steps = jnp.arange(T)
    causal = steps[None, :] <= steps[:, None]                              # (T, T)
    valid = steps[None, None, :] < valid_length[:, None, None]             # (B, 1, T)
    return (causal[None, :, :] & valid).astype(jnp.float32)                # (B, T, T)


def gen_mem_attn_mask(valid_length, mem_valid_length, T, M):
    t = jnp.arange(T)
    m = jnp.arange(M)
    q_valid = t[None, :, None] < valid_length[:, None, None]               # (B, T, 1)
    m_valid = m[None, None, :] < mem_valid_length[:, None, None]           # (B, 1, M)
    return (q_valid & m_valid).astype(jnp.float32)                         # (B, T, M)


# ---------------------------- decoder forward --------------------------------
@jax.jit
def transformer_decoder(data, valid_length, mem_data, mem_valid_length, packed):
    """TransformerDecoder.forward with defaults (data_norm=False, pre_norm=False,
    recurrent=False, layout='NT', dropout in eval mode)."""
    B, T, U = data.shape
    M = mem_data.shape[1]
    smask = gen_self_attn_mask_causal(valid_length, T)                     # (B, T, T)
    mmask = gen_mem_attn_mask(valid_length, mem_valid_length, T, M)        # (B, T, M)
    masks = jnp.concatenate([smask, mmask], axis=-1)                       # (B, T, T+M)
    x = data.reshape(B * T, U)                                             # flat activation
    mem = mem_data.reshape(B * M, mem_data.shape[-1])                      # flat memory
    out = _decoder_pallas_call(x, mem, masks, packed)
    return out.reshape(B, T, U)


# ----------------------------- parameter init --------------------------------
def _xavier_uniform(key, fan_in, fan_out):
    limit = math.sqrt(6.0 / (fan_in + fan_out))
    return jax.random.uniform(key, (fan_in, fan_out), jnp.float32, -limit, limit)


def init_layer_params(key):
    ks = jax.random.split(key, 8)
    p = {}
    p["qkv_w"] = _xavier_uniform(ks[0], UNITS, 3 * UNITS)
    p["qkv_b"] = jnp.zeros((1, 3 * UNITS), jnp.float32)
    p["proj_in_w"] = _xavier_uniform(ks[1], UNITS, UNITS)
    p["proj_in_b"] = jnp.zeros((1, UNITS), jnp.float32)
    p["ln_in_g"] = jnp.ones((1, UNITS), jnp.float32)
    p["ln_in_b"] = jnp.zeros((1, UNITS), jnp.float32)
    p["q_w"] = _xavier_uniform(ks[2], UNITS, UNITS)
    p["q_b"] = jnp.zeros((1, UNITS), jnp.float32)
    p["k_w"] = _xavier_uniform(ks[3], MEM_UNITS, UNITS)
    p["k_b"] = jnp.zeros((1, UNITS), jnp.float32)
    p["v_w"] = _xavier_uniform(ks[4], MEM_UNITS, UNITS)
    p["v_b"] = jnp.zeros((1, UNITS), jnp.float32)
    p["proj_inter_w"] = _xavier_uniform(ks[5], UNITS, UNITS)
    p["proj_inter_b"] = jnp.zeros((1, UNITS), jnp.float32)
    p["ln_inter_g"] = jnp.ones((1, UNITS), jnp.float32)
    p["ln_inter_b"] = jnp.zeros((1, UNITS), jnp.float32)
    p["ffn1_w"] = _xavier_uniform(ks[6], UNITS, HIDDEN)
    p["ffn1_b"] = jnp.zeros((1, HIDDEN), jnp.float32)
    p["ffn2_w"] = _xavier_uniform(ks[7], HIDDEN, UNITS)
    p["ffn2_b"] = jnp.zeros((1, UNITS), jnp.float32)
    p["ffn_ln_g"] = jnp.ones((1, UNITS), jnp.float32)
    p["ffn_ln_b"] = jnp.zeros((1, UNITS), jnp.float32)
    return p


def pack_decoder_params(layer_params):
    """Pack per-layer weights into a few stacked slabs (one-time, off the hot path).

    No batch/head duplication.  The 1/sqrt(head_dim) attention scale is folded into the
    Q weights/biases.  All width-U biases / LN params plus the width-HIDDEN ffn1 bias are
    packed into one (L, 16, HIDDEN) slab (width-U rows zero-padded and sliced in-kernel).
    """
    assert HIDDEN >= UNITS
    U, Hd = UNITS, HIDDEN
    inv = 1.0 / math.sqrt(HEAD_DIM)

    def pad(r):                            # (U,) -> (HIDDEN,)
        return jnp.pad(r, (0, Hd - r.shape[0]))

    w_qkv, w_qx, w_kv, w_o, w_f1, w_f2, vec = [], [], [], [], [], [], []
    for p in layer_params:
        # self-attn fused QKV weight, Q columns pre-scaled
        w_qkv.append(jnp.concatenate(
            [p["qkv_w"][:, :U] * inv, p["qkv_w"][:, U:2 * U], p["qkv_w"][:, 2 * U:]],
            axis=1))
        # cross-attn Q (pre-scaled) and fused KV (acting on raw memory)
        w_qx.append(p["q_w"] * inv)
        w_kv.append(jnp.concatenate([p["k_w"], p["v_w"]], axis=1))
        # output projections: [self, cross]
        w_o.append(jnp.stack([p["proj_in_w"], p["proj_inter_w"]], axis=0))
        w_f1.append(p["ffn1_w"])
        w_f2.append(p["ffn2_w"])
        vec.append(jnp.stack([
            pad(p["qkv_b"][0, :U] * inv),          # 0: self q bias (scaled)
            pad(p["qkv_b"][0, U:2 * U]),           # 1: self k bias
            pad(p["qkv_b"][0, 2 * U:]),            # 2: self v bias
            pad(p["q_b"][0] * inv),                # 3: cross q bias (scaled)
            pad(p["k_b"][0]),                      # 4: cross k bias
            pad(p["v_b"][0]),                      # 5: cross v bias
            pad(p["proj_in_b"][0]),                # 6
            pad(p["ln_in_g"][0]),                  # 7
            pad(p["ln_in_b"][0]),                  # 8
            pad(p["proj_inter_b"][0]),             # 9
            pad(p["ln_inter_g"][0]),               # 10
            pad(p["ln_inter_b"][0]),               # 11
            p["ffn1_b"][0],                        # 12 (full HIDDEN width)
            pad(p["ffn2_b"][0]),                   # 13
            pad(p["ffn_ln_g"][0]),                 # 14
            pad(p["ffn_ln_b"][0]),                 # 15
        ], axis=0))
    return {
        "w_qkv": jnp.stack(w_qkv),    # (L, U, 3U)
        "w_qx": jnp.stack(w_qx),      # (L, U, U)
        "w_kv": jnp.stack(w_kv),      # (L, C_mem, 2U)
        "w_o": jnp.stack(w_o),        # (L, 2, U, U)
        "w_ffn1": jnp.stack(w_f1),    # (L, U, HIDDEN)
        "w_ffn2": jnp.stack(w_f2),    # (L, HIDDEN, U)
        "vec": jnp.stack(vec),        # (L, 16, HIDDEN)
    }


# ------------------------- pure-JAX reference (check) -------------------------
def _reference_layer(x, mem, smask, mmask, p):
    P = jax.lax.Precision.HIGHEST

    def ln(z, g, b):
        mu = jnp.mean(z, axis=-1, keepdims=True)
        var = jnp.mean(jnp.square(z - mu), axis=-1, keepdims=True)
        return (z - mu) * jax.lax.rsqrt(var + EPS) * g + b

    def mha(q, k, v, mask):
        Bq, Tq, _ = q.shape
        S = k.shape[1]
        qh = q.reshape(Bq, Tq, HEADS, HEAD_DIM)
        kh = k.reshape(Bq, S, HEADS, HEAD_DIM)
        vh = v.reshape(Bq, S, HEADS, HEAD_DIM)
        s = jnp.einsum("bthd,bshd->bhts", qh, kh, precision=P) / math.sqrt(HEAD_DIM)
        s = jnp.where(mask[:, None] > 0, s, -1e30)
        w = jax.nn.softmax(s, axis=-1) * mask[:, None]
        o = jnp.einsum("bhts,bshd->bthd", w, vh, precision=P)
        return o.reshape(Bq, Tq, HEADS * HEAD_DIM)

    res = x
    qkv = jnp.einsum("btu,uv->btv", x, p["qkv_w"], precision=P) + p["qkv_b"]
    q, k, v = qkv[..., :UNITS], qkv[..., UNITS:2 * UNITS], qkv[..., 2 * UNITS:]
    o = jnp.einsum("btu,uv->btv", mha(q, k, v, smask), p["proj_in_w"],
                   precision=P) + p["proj_in_b"]
    x = ln(o + res, p["ln_in_g"], p["ln_in_b"])

    res = x
    q = jnp.einsum("btu,uv->btv", x, p["q_w"], precision=P) + p["q_b"]
    k = jnp.einsum("bmu,uv->bmv", mem, p["k_w"], precision=P) + p["k_b"]
    v = jnp.einsum("bmu,uv->bmv", mem, p["v_w"], precision=P) + p["v_b"]
    o = jnp.einsum("btu,uv->btv", mha(q, k, v, mmask), p["proj_inter_w"],
                   precision=P) + p["proj_inter_b"]
    x = ln(o + res, p["ln_inter_g"], p["ln_inter_b"])

    res = x
    hmid = jax.nn.relu(jnp.einsum("btu,uh->bth", x, p["ffn1_w"], precision=P) + p["ffn1_b"])
    y = jnp.einsum("bth,hu->btu", hmid, p["ffn2_w"], precision=P) + p["ffn2_b"]
    return ln(y + res, p["ffn_ln_g"], p["ffn_ln_b"])


def transformer_decoder_reference(data, valid_length, mem_data, mem_valid_length,
                                  layer_params):
    T = data.shape[1]
    M = mem_data.shape[1]
    smask = gen_self_attn_mask_causal(valid_length, T)
    mmask = gen_mem_attn_mask(valid_length, mem_valid_length, T, M)
    x = data
    for p in layer_params:
        x = _reference_layer(x, mem_data, smask, mmask, p)
    return x


# --------------------------------- main ---------------------------------------
if __name__ == "__main__":
    key = jax.random.PRNGKey(0)
    k_data, k_mem, k_params = jax.random.split(key, 3)

    data = jax.random.normal(k_data, (BATCH, SEQ, UNITS), jnp.float32)
    mem = jax.random.normal(k_mem, (BATCH, MEM_LEN, MEM_UNITS), jnp.float32)
    valid_length = jnp.array([SEQ, 5], jnp.int32)
    mem_valid_length = jnp.array([MEM_LEN, 6], jnp.int32)

    layer_params = [init_layer_params(k)
                    for k in jax.random.split(k_params, NUM_LAYERS)]
    packed = pack_decoder_params(layer_params)   # one-time packing, off the hot path

    out = transformer_decoder(data, valid_length, mem, mem_valid_length, packed)
    out = jax.block_until_ready(out)
    assert out.shape == (BATCH, SEQ, UNITS)
    assert bool(jnp.all(jnp.isfinite(out)))

    ref = transformer_decoder_reference(data, valid_length, mem, mem_valid_length,
                                        layer_params)
    max_err = float(jnp.max(jnp.abs(out - ref)))
    assert jnp.allclose(out, ref, atol=1e-2, rtol=1e-2), f"max_abs_err={max_err}"

    print("KERNEL_OK")
</pallas_src>

<mosaic_0001>
module attributes {stable_mosaic.version = 11 : i64} {
  func.func @decoder_kernel(%arg0: memref<16x32xf32, #tpu.memory_space<vmem>>, %arg1: memref<16x32xf32, #tpu.memory_space<vmem>>, %arg2: memref<2x8x16xf32, #tpu.memory_space<vmem>>, %arg3: memref<2x32x96xf32, #tpu.memory_space<vmem>>, %arg4: memref<2x32x32xf32, #tpu.memory_space<vmem>>, %arg5: memref<2x32x64xf32, #tpu.memory_space<vmem>>, %arg6: memref<2x2x32x32xf32, #tpu.memory_space<vmem>>, %arg7: memref<2x32x64xf32, #tpu.memory_space<vmem>>, %arg8: memref<2x64x32xf32, #tpu.memory_space<vmem>>, %arg9: memref<2x16x64xf32, #tpu.memory_space<vmem>>, %arg10: memref<16x32xf32, #tpu.memory_space<vmem>>) attributes {dimension_semantics = [], scalar_prefetch = 0 : i64, scratch_operands = 0 : i64, tpu.core_type = #tpu.core_type<tc>} {
    %c0 = arith.constant 0 : index
    %c0_0 = arith.constant 0 : index
    %0 = vector.load %arg0[%c0, %c0_0] : memref<16x32xf32, #tpu.memory_space<vmem>>, vector<16x32xf32>
    %c0_1 = arith.constant 0 : index
    %c0_2 = arith.constant 0 : index
    %1 = vector.load %arg1[%c0_1, %c0_2] : memref<16x32xf32, #tpu.memory_space<vmem>>, vector<16x32xf32>
    %c0_3 = arith.constant 0 : index
    %c0_4 = arith.constant 0 : index
    %c0_5 = arith.constant 0 : index
    %2 = vector.load %arg2[%c0_3, %c0_4, %c0_5] : memref<2x8x16xf32, #tpu.memory_space<vmem>>, vector<2x8x16xf32>
    %3 = vector.extract_strided_slice %2 {offsets = [0, 0, 0], sizes = [2, 8, 8], strides = [1, 1, 1]} : vector<2x8x16xf32> to vector<2x8x8xf32>
    %4 = vector.extract_strided_slice %2 {offsets = [0, 0, 8], sizes = [2, 8, 8], strides = [1, 1, 1]} : vector<2x8x16xf32> to vector<2x8x8xf32>
    %5 = vector.shape_cast %3 : vector<2x8x8xf32> to vector<1x2x8x8xf32>
    %6 = vector.shape_cast %5 : vector<1x2x8x8xf32> to vector<1x2x8x8xf32>
    %7 = vector.broadcast %6 : vector<1x2x8x8xf32> to vector<4x2x8x8xf32>
    %8 = vector.shape_cast %7 : vector<4x2x8x8xf32> to vector<8x8x8xf32>
    %9 = vector.shape_cast %4 : vector<2x8x8xf32> to vector<1x2x8x8xf32>
    %10 = vector.shape_cast %9 : vector<1x2x8x8xf32> to vector<1x2x8x8xf32>
    %11 = vector.broadcast %10 : vector<1x2x8x8xf32> to vector<4x2x8x8xf32>
    %12 = vector.shape_cast %11 : vector<4x2x8x8xf32> to vector<8x8x8xf32>
    %c0_6 = arith.constant 0 : index
    %c0_7 = arith.constant 0 : index
    %c0_8 = arith.constant 0 : index
    %13 = vector.load %arg9[%c0_6, %c0_7, %c0_8] : memref<2x16x64xf32, #tpu.memory_space<vmem>>, vector<1x16x64xf32>
    %14 = vector.shape_cast %13 : vector<1x16x64xf32> to vector<16x64xf32>
    %c0_9 = arith.constant 0 : index
    %c0_10 = arith.constant 0 : index
    %c0_11 = arith.constant 0 : index
    %15 = vector.load %arg3[%c0_9, %c0_10, %c0_11] : memref<2x32x96xf32, #tpu.memory_space<vmem>>, vector<1x32x96xf32>
    %16 = vector.shape_cast %15 : vector<1x32x96xf32> to vector<32x96xf32>
    %cst = arith.constant dense<0.000000e+00> : vector<16x96xf32>
    %17 = tpu.matmul %0, %16, %cst {dimension_numbers = #tpu.dot_dimension_numbers<[1], [0], [0], [1], [0, 0, 1, 1], [], []>, precision = #tpu.contract_precision<fp32>} : vector<16x32xf32>, vector<32x96xf32>, vector<16x96xf32> -> vector<16x96xf32>
    %18 = vector.extract_strided_slice %17 {offsets = [0, 0], sizes = [16, 32], strides = [1, 1]} : vector<16x96xf32> to vector<16x32xf32>
    %19 = vector.extract_strided_slice %14 {offsets = [0, 0], sizes = [1, 32], strides = [1, 1]} : vector<16x64xf32> to vector<1x32xf32>
    %20 = vector.broadcast %19 : vector<1x32xf32> to vector<16x32xf32>
    %21 = arith.addf %18, %20 : vector<16x32xf32>
    %22 = vector.extract_strided_slice %17 {offsets = [0, 32], sizes = [16, 32], strides = [1, 1]} : vector<16x96xf32> to vector<16x32xf32>
    %23 = vector.extract_strided_slice %14 {offsets = [1, 0], sizes = [1, 32], strides = [1, 1]} : vector<16x64xf32> to vector<1x32xf32>
    %24 = vector.broadcast %23 : vector<1x32xf32> to vector<16x32xf32>
    %25 = arith.addf %22, %24 : vector<16x32xf32>
    %26 = vector.extract_strided_slice %17 {offsets = [0, 64], sizes = [16, 32], strides = [1, 1]} : vector<16x96xf32> to vector<16x32xf32>
    %27 = vector.extract_strided_slice %14 {offsets = [2, 0], sizes = [1, 32], strides = [1, 1]} : vector<16x64xf32> to vector<1x32xf32>
    %28 = vector.broadcast %27 : vector<1x32xf32> to vector<16x32xf32>
    %29 = arith.addf %26, %28 : vector<16x32xf32>
    %c0_12 = arith.constant 0 : index
    %c0_13 = arith.constant 0 : index
    %c0_14 = arith.constant 0 : index
    %c0_15 = arith.constant 0 : index
    %30 = vector.load %arg6[%c0_12, %c0_13, %c0_14, %c0_15] : memref<2x2x32x32xf32, #tpu.memory_space<vmem>>, vector<1x1x32x32xf32>
    %31 = vector.shape_cast %30 : vector<1x1x32x32xf32> to vector<32x32xf32>
    %32 = vector.extract_strided_slice %21 {offsets = [0, 0], sizes = [16, 8], strides = [1, 1]} : vector<16x32xf32> to vector<16x8xf32>
    %33 = vector.extract_strided_slice %21 {offsets = [0, 8], sizes = [16, 8], strides = [1, 1]} : vector<16x32xf32> to vector<16x8xf32>
    %34 = vector.extract_strided_slice %21 {offsets = [0, 16], sizes = [16, 8], strides = [1, 1]} : vector<16x32xf32> to vector<16x8xf32>
    %35 = vector.extract_strided_slice %21 {offsets = [0, 24], sizes = [16, 8], strides = [1, 1]} : vector<16x32xf32> to vector<16x8xf32>
    %36 = vector.shape_cast %32 : vector<16x8xf32> to vector<1x16x8xf32>
    %37 = vector.shape_cast %33 : vector<16x8xf32> to vector<1x16x8xf32>
    %38 = vector.shape_cast %34 : vector<16x8xf32> to vector<1x16x8xf32>
    %39 = vector.shape_cast %35 : vector<16x8xf32> to vector<1x16x8xf32>
    %40 = tpu.concatenate %36, %37, %38, %39 in 0 : vector<1x16x8xf32>, vector<1x16x8xf32>, vector<1x16x8xf32>, vector<1x16x8xf32> -> vector<4x16x8xf32>
    %41 = vector.shape_cast %40 : vector<4x16x8xf32> to vector<8x8x8xf32>
    %42 = vector.extract_strided_slice %25 {offsets = [0, 0], sizes = [16, 8], strides = [1, 1]} : vector<16x32xf32> to vector<16x8xf32>
    %43 = vector.extract_strided_slice %25 {offsets = [0, 8], sizes = [16, 8], strides = [1, 1]} : vector<16x32xf32> to vector<16x8xf32>
    %44 = vector.extract_strided_slice %25 {offsets = [0, 16], sizes = [16, 8], strides = [1, 1]} : vector<16x32xf32> to vector<16x8xf32>
    %45 = vector.extract_strided_slice %25 {offsets = [0, 24], sizes = [16, 8], strides = [1, 1]} : vector<16x32xf32> to vector<16x8xf32>
    %46 = vector.shape_cast %42 : vector<16x8xf32> to vector<1x16x8xf32>
    %47 = vector.shape_cast %43 : vector<16x8xf32> to vector<1x16x8xf32>
    %48 = vector.shape_cast %44 : vector<16x8xf32> to vector<1x16x8xf32>
    %49 = vector.shape_cast %45 : vector<16x8xf32> to vector<1x16x8xf32>
    %50 = tpu.concatenate %46, %47, %48, %49 in 0 : vector<1x16x8xf32>, vector<1x16x8xf32>, vector<1x16x8xf32>, vector<1x16x8xf32> -> vector<4x16x8xf32>
    %51 = vector.shape_cast %50 : vector<4x16x8xf32> to vector<8x8x8xf32>
    %52 = vector.extract_strided_slice %29 {offsets = [0, 0], sizes = [16, 8], strides = [1, 1]} : vector<16x32xf32> to vector<16x8xf32>
    %53 = vector.extract_strided_slice %29 {offsets = [0, 8], sizes = [16, 8], strides = [1, 1]} : vector<16x32xf32> to vector<16x8xf32>
    %54 = vector.extract_strided_slice %29 {offsets = [0, 16], sizes = [16, 8], strides = [1, 1]} : vector<16x32xf32> to vector<16x8xf32>
    %55 = vector.extract_strided_slice %29 {offsets = [0, 24], sizes = [16, 8], strides = [1, 1]} : vector<16x32xf32> to vector<16x8xf32>
    %56 = vector.shape_cast %52 : vector<16x8xf32> to vector<1x16x8xf32>
    %57 = vector.shape_cast %53 : vector<16x8xf32> to vector<1x16x8xf32>
    %58 = vector.shape_cast %54 : vector<16x8xf32> to vector<1x16x8xf32>
    %59 = vector.shape_cast %55 : vector<16x8xf32> to vector<1x16x8xf32>
    %60 = tpu.concatenate %56, %57, %58, %59 in 0 : vector<1x16x8xf32>, vector<1x16x8xf32>, vector<1x16x8xf32>, vector<1x16x8xf32> -> vector<4x16x8xf32>
    %61 = vector.shape_cast %60 : vector<4x16x8xf32> to vector<8x8x8xf32>
    "tpu.trace_start"() <{level = 10 : i32, message = "xtd,xsd->xts"}> : () -> ()
    %cst_16 = arith.constant dense<0.000000e+00> : vector<8x8x8xf32>
    %62 = tpu.matmul %41, %51, %cst_16 {dimension_numbers = #tpu.dot_dimension_numbers<[2], [2], [1], [1], [0, 0, 0, 1, 1, 1], [0], [0]>, precision = #tpu.contract_precision<fp32>} : vector<8x8x8xf32>, vector<8x8x8xf32>, vector<8x8x8xf32> -> vector<8x8x8xf32>
    %cst_17 = arith.constant 0.000000e+00 : f32
    "tpu.trace_stop"() : () -> ()
    %63 = vector.broadcast %cst_17 : f32 to vector<8x8x8xf32>
    %64 = arith.cmpf ogt, %8, %63 : vector<8x8x8xf32>
    %cst_18 = arith.constant -1.70141173E+38 : f32
    %65 = vector.broadcast %cst_18 : f32 to vector<8x8x8xf32>
    %66 = arith.select %64, %62, %65 : vector<8x8x8xi1>, vector<8x8x8xf32>
    %cst_19 = arith.constant dense<0xFF800000> : vector<8x8xf32>
    %67 = vector.multi_reduction <maximumf>, %66, %cst_19 [2] : vector<8x8x8xf32> to vector<8x8xf32>
    %68 = vector.shape_cast %67 : vector<8x8xf32> to vector<8x8x1xf32>
    %69 = vector.broadcast %68 : vector<8x8x1xf32> to vector<8x8x8xf32>
    %70 = arith.subf %66, %69 : vector<8x8x8xf32>
    %71 = math.exp %70 : vector<8x8x8xf32>
    %cst_20 = arith.constant dense<0.000000e+00> : vector<8x8xf32>
    %72 = vector.multi_reduction <add>, %71, %cst_20 [2] : vector<8x8x8xf32> to vector<8x8xf32>
    %73 = vector.shape_cast %72 : vector<8x8xf32> to vector<8x8x1xf32>
    %74 = tpu.reciprocal %73 {approx = true} : vector<8x8x1xf32> -> vector<8x8x1xf32>
    %75 = vector.broadcast %74 : vector<8x8x1xf32> to vector<8x8x8xf32>
    %76 = arith.mulf %71, %75 : vector<8x8x8xf32>
    %77 = arith.mulf %76, %8 : vector<8x8x8xf32>
    "tpu.trace_start"() <{level = 10 : i32, message = "xts,xsd->xtd"}> : () -> ()
    %cst_21 = arith.constant dense<0.000000e+00> : vector<8x8x8xf32>
    %78 = tpu.matmul %77, %61, %cst_21 {dimension_numbers = #tpu.dot_dimension_numbers<[2], [1], [1], [2], [0, 0, 0, 1, 1, 2], [0], [0]>, precision = #tpu.contract_precision<fp32>} : vector<8x8x8xf32>, vector<8x8x8xf32>, vector<8x8x8xf32> -> vector<8x8x8xf32>
    "tpu.trace_stop"() : () -> ()
    %79 = vector.shape_cast %78 : vector<8x8x8xf32> to vector<4x16x8xf32>
    %80 = vector.extract_strided_slice %79 {offsets = [0, 0, 0], sizes = [1, 16, 8], strides = [1, 1, 1]} : vector<4x16x8xf32> to vector<1x16x8xf32>
    %81 = vector.shape_cast %80 : vector<1x16x8xf32> to vector<16x8xf32>
    %82 = vector.extract_strided_slice %79 {offsets = [1, 0, 0], sizes = [1, 16, 8], strides = [1, 1, 1]} : vector<4x16x8xf32> to vector<1x16x8xf32>
    %83 = vector.shape_cast %82 : vector<1x16x8xf32> to vector<16x8xf32>
    %84 = vector.extract_strided_slice %79 {offsets = [2, 0, 0], sizes = [1, 16, 8], strides = [1, 1, 1]} : vector<4x16x8xf32> to vector<1x16x8xf32>
    %85 = vector.shape_cast %84 : vector<1x16x8xf32> to vector<16x8xf32>
    %86 = vector.extract_strided_slice %79 {offsets = [3, 0, 0], sizes = [1, 16, 8], strides = [1, 1, 1]} : vector<4x16x8xf32> to vector<1x16x8xf32>
    %87 = vector.shape_cast %86 : vector<1x16x8xf32> to vector<16x8xf32>
    %88 = tpu.concatenate %81, %83, %85, %87 in 1 : vector<16x8xf32>, vector<16x8xf32>, vector<16x8xf32>, vector<16x8xf32> -> vector<16x32xf32>
    %cst_22 = arith.constant dense<0.000000e+00> : vector<16x32xf32>
    %89 = tpu.matmul %88, %31, %cst_22 {dimension_numbers = #tpu.dot_dimension_numbers<[1], [0], [0], [1], [0, 0, 1, 1], [], []>, precision = #tpu.contract_precision<fp32>} : vector<16x32xf32>, vector<32x32xf32>, vector<16x32xf32> -> vector<16x32xf32>
    %90 = vector.extract_strided_slice %14 {offsets = [6, 0], sizes = [1, 32], strides = [1, 1]} : vector<16x64xf32> to vector<1x32xf32>
    %91 = vector.broadcast %90 : vector<1x32xf32> to vector<16x32xf32>
    %92 = arith.addf %89, %91 : vector<16x32xf32>
    %93 = arith.addf %92, %0 : vector<16x32xf32>
    %94 = vector.extract_strided_slice %14 {offsets = [7, 0], sizes = [1, 32], strides = [1, 1]} : vector<16x64xf32> to vector<1x32xf32>
    %95 = vector.extract_strided_slice %14 {offsets = [8, 0], sizes = [1, 32], strides = [1, 1]} : vector<16x64xf32> to vector<1x32xf32>
    %cst_23 = arith.constant dense<0.000000e+00> : vector<16xf32>
    %96 = vector.multi_reduction <add>, %93, %cst_23 [1] : vector<16x32xf32> to vector<16xf32>
    %97 = vector.shape_cast %96 : vector<16xf32> to vector<16x1xf32>
    %cst_24 = arith.constant 3.200000e+01 : f32
    %98 = vector.broadcast %cst_24 : f32 to vector<16x1xf32>
    %99 = arith.divf %97, %98 : vector<16x1xf32>
    %100 = vector.broadcast %99 : vector<16x1xf32> to vector<16x32xf32>
    %101 = arith.subf %93, %100 : vector<16x32xf32>
    %102 = arith.mulf %101, %101 : vector<16x32xf32>
    %cst_25 = arith.constant dense<0.000000e+00> : vector<16xf32>
    %103 = vector.multi_reduction <add>, %102, %cst_25 [1] : vector<16x32xf32> to vector<16xf32>
    %104 = vector.shape_cast %103 : vector<16xf32> to vector<16x1xf32>
    %cst_26 = arith.constant 3.200000e+01 : f32
    %105 = vector.broadcast %cst_26 : f32 to vector<16x1xf32>
    %106 = arith.divf %104, %105 : vector<16x1xf32>
    %107 = vector.broadcast %99 : vector<16x1xf32> to vector<16x32xf32>
    %108 = arith.subf %93, %107 : vector<16x32xf32>
    %cst_27 = arith.constant 9.99999974E-6 : f32
    %109 = vector.broadcast %cst_27 : f32 to vector<16x1xf32>
    %110 = arith.addf %106, %109 : vector<16x1xf32>
    %111 = math.rsqrt %110 : vector<16x1xf32>
    %112 = vector.broadcast %111 : vector<16x1xf32> to vector<16x32xf32>
    %113 = arith.mulf %108, %112 : vector<16x32xf32>
    %114 = vector.broadcast %94 : vector<1x32xf32> to vector<16x32xf32>
    %115 = arith.mulf %113, %114 : vector<16x32xf32>
    %116 = vector.broadcast %95 : vector<1x32xf32> to vector<16x32xf32>
    %117 = arith.addf %115, %116 : vector<16x32xf32>
    %c0_28 = arith.constant 0 : index
    %c0_29 = arith.constant 0 : index
    %c0_30 = arith.constant 0 : index
    %118 = vector.load %arg4[%c0_28, %c0_29, %c0_30] : memref<2x32x32xf32, #tpu.memory_space<vmem>>, vector<1x32x32xf32>
    %119 = vector.shape_cast %118 : vector<1x32x32xf32> to vector<32x32xf32>
    %cst_31 = arith.constant dense<0.000000e+00> : vector<16x32xf32>
    %120 = tpu.matmul %117, %119, %cst_31 {dimension_numbers = #tpu.dot_dimension_numbers<[1], [0], [0], [1], [0, 0, 1, 1], [], []>, precision = #tpu.contract_precision<fp32>} : vector<16x32xf32>, vector<32x32xf32>, vector<16x32xf32> -> vector<16x32xf32>
    %121 = vector.extract_strided_slice %14 {offsets = [3, 0], sizes = [1, 32], strides = [1, 1]} : vector<16x64xf32> to vector<1x32xf32>
    %122 = vector.broadcast %121 : vector<1x32xf32> to vector<16x32xf32>
    %123 = arith.addf %120, %122 : vector<16x32xf32>
    %c0_32 = arith.constant 0 : index
    %c0_33 = arith.constant 0 : index
    %c0_34 = arith.constant 0 : index
    %124 = vector.load %arg5[%c0_32, %c0_33, %c0_34] : memref<2x32x64xf32, #tpu.memory_space<vmem>>, vector<1x32x64xf32>
    %125 = vector.shape_cast %124 : vector<1x32x64xf32> to vector<32x64xf32>
    %cst_35 = arith.constant dense<0.000000e+00> : vector<16x64xf32>
    %126 = tpu.matmul %1, %125, %cst_35 {dimension_numbers = #tpu.dot_dimension_numbers<[1], [0], [0], [1], [0, 0, 1, 1], [], []>, precision = #tpu.contract_precision<fp32>} : vector<16x32xf32>, vector<32x64xf32>, vector<16x64xf32> -> vector<16x64xf32>
    %127 = vector.extract_strided_slice %126 {offsets = [0, 0], sizes = [16, 32], strides = [1, 1]} : vector<16x64xf32> to vector<16x32xf32>
    %128 = vector.extract_strided_slice %14 {offsets = [4, 0], sizes = [1, 32], strides = [1, 1]} : vector<16x64xf32> to vector<1x32xf32>
    %129 = vector.broadcast %128 : vector<1x32xf32> to vector<16x32xf32>
    %130 = arith.addf %127, %129 : vector<16x32xf32>
    %131 = vector.extract_strided_slice %126 {offsets = [0, 32], sizes = [16, 32], strides = [1, 1]} : vector<16x64xf32> to vector<16x32xf32>
    %132 = vector.extract_strided_slice %14 {offsets = [5, 0], sizes = [1, 32], strides = [1, 1]} : vector<16x64xf32> to vector<1x32xf32>
    %133 = vector.broadcast %132 : vector<1x32xf32> to vector<16x32xf32>
    %134 = arith.addf %131, %133 : vector<16x32xf32>
    %c0_36 = arith.constant 0 : index
    %c1 = arith.constant 1 : index
    %c0_37 = arith.constant 0 : index
    %c0_38 = arith.constant 0 : index
    %135 = vector.load %arg6[%c0_36, %c1, %c0_37, %c0_38] : memref<2x2x32x32xf32, #tpu.memory_space<vmem>>, vector<1x1x32x32xf32>
    %136 = vector.shape_cast %135 : vector<1x1x32x32xf32> to vector<32x32xf32>
    %137 = vector.extract_strided_slice %123 {offsets = [0, 0], sizes = [16, 8], strides = [1, 1]} : vector<16x32xf32> to vector<16x8xf32>
    %138 = vector.extract_strided_slice %123 {offsets = [0, 8], sizes = [16, 8], strides = [1, 1]} : vector<16x32xf32> to vector<16x8xf32>
    %139 = vector.extract_strided_slice %123 {offsets = [0, 16], sizes = [16, 8], strides = [1, 1]} : vector<16x32xf32> to vector<16x8xf32>
    %140 = vector.extract_strided_slice %123 {offsets = [0, 24], sizes = [16, 8], strides = [1, 1]} : vector<16x32xf32> to vector<16x8xf32>
    %141 = vector.shape_cast %137 : vector<16x8xf32> to vector<1x16x8xf32>
    %142 = vector.shape_cast %138 : vector<16x8xf32> to vector<1x16x8xf32>
    %143 = vector.shape_cast %139 : vector<16x8xf32> to vector<1x16x8xf32>
    %144 = vector.shape_cast %140 : vector<16x8xf32> to vector<1x16x8xf32>
    %145 = tpu.concatenate %141, %142, %143, %144 in 0 : vector<1x16x8xf32>, vector<1x16x8xf32>, vector<1x16x8xf32>, vector<1x16x8xf32> -> vector<4x16x8xf32>
    %146 = vector.shape_cast %145 : vector<4x16x8xf32> to vector<8x8x8xf32>
    %147 = vector.extract_strided_slice %130 {offsets = [0, 0], sizes = [16, 8], strides = [1, 1]} : vector<16x32xf32> to vector<16x8xf32>
    %148 = vector.extract_strided_slice %130 {offsets = [0, 8], sizes = [16, 8], strides = [1, 1]} : vector<16x32xf32> to vector<16x8xf32>
    %149 = vector.extract_strided_slice %130 {offsets = [0, 16], sizes = [16, 8], strides = [1, 1]} : vector<16x32xf32> to vector<16x8xf32>
    %150 = vector.extract_strided_slice %130 {offsets = [0, 24], sizes = [16, 8], strides = [1, 1]} : vector<16x32xf32> to vector<16x8xf32>
    %151 = vector.shape_cast %147 : vector<16x8xf32> to vector<1x16x8xf32>
    %152 = vector.shape_cast %148 : vector<16x8xf32> to vector<1x16x8xf32>
    %153 = vector.shape_cast %149 : vector<16x8xf32> to vector<1x16x8xf32>
    %154 = vector.shape_cast %150 : vector<16x8xf32> to vector<1x16x8xf32>
    %155 = tpu.concatenate %151, %152, %153, %154 in 0 : vector<1x16x8xf32>, vector<1x16x8xf32>, vector<1x16x8xf32>, vector<1x16x8xf32> -> vector<4x16x8xf32>
    %156 = vector.shape_cast %155 : vector<4x16x8xf32> to vector<8x8x8xf32>
    %157 = vector.extract_strided_slice %134 {offsets = [0, 0], sizes = [16, 8], strides = [1, 1]} : vector<16x32xf32> to vector<16x8xf32>
    %158 = vector.extract_strided_slice %134 {offsets = [0, 8], sizes = [16, 8], strides = [1, 1]} : vector<16x32xf32> to vector<16x8xf32>
    %159 = vector.extract_strided_slice %134 {offsets = [0, 16], sizes = [16, 8], strides = [1, 1]} : vector<16x32xf32> to vector<16x8xf32>
    %160 = vector.extract_strided_slice %134 {offsets = [0, 24], sizes = [16, 8], strides = [1, 1]} : vector<16x32xf32> to vector<16x8xf32>
    %161 = vector.shape_cast %157 : vector<16x8xf32> to vector<1x16x8xf32>
    %162 = vector.shape_cast %158 : vector<16x8xf32> to vector<1x16x8xf32>
    %163 = vector.shape_cast %159 : vector<16x8xf32> to vector<1x16x8xf32>
    %164 = vector.shape_cast %160 : vector<16x8xf32> to vector<1x16x8xf32>
    %165 = tpu.concatenate %161, %162, %163, %164 in 0 : vector<1x16x8xf32>, vector<1x16x8xf32>, vector<1x16x8xf32>, vector<1x16x8xf32> -> vector<4x16x8xf32>
    %166 = vector.shape_cast %165 : vector<4x16x8xf32> to vector<8x8x8xf32>
    "tpu.trace_start"() <{level = 10 : i32, message = "xtd,xsd->xts"}> : () -> ()
    %cst_39 = arith.constant dense<0.000000e+00> : vector<8x8x8xf32>
    %167 = tpu.matmul %146, %156, %cst_39 {dimension_numbers = #tpu.dot_dimension_numbers<[2], [2], [1], [1], [0, 0, 0, 1, 1, 1], [0], [0]>, precision = #tpu.contract_precision<fp32>} : vector<8x8x8xf32>, vector<8x8x8xf32>, vector<8x8x8xf32> -> vector<8x8x8xf32>
    %cst_40 = arith.constant 0.000000e+00 : f32
    "tpu.trace_stop"() : () -> ()
    %168 = vector.broadcast %cst_40 : f32 to vector<8x8x8xf32>
    %169 = arith.cmpf ogt, %12, %168 : vector<8x8x8xf32>
    %cst_41 = arith.constant -1.70141173E+38 : f32
    %170 = vector.broadcast %cst_41 : f32 to vector<8x8x8xf32>
    %171 = arith.select %169, %167, %170 : vector<8x8x8xi1>, vector<8x8x8xf32>
    %cst_42 = arith.constant dense<0xFF800000> : vector<8x8xf32>
    %172 = vector.multi_reduction <maximumf>, %171, %cst_42 [2] : vector<8x8x8xf32> to vector<8x8xf32>
    %173 = vector.shape_cast %172 : vector<8x8xf32> to vector<8x8x1xf32>
    %174 = vector.broadcast %173 : vector<8x8x1xf32> to vector<8x8x8xf32>
    %175 = arith.subf %171, %174 : vector<8x8x8xf32>
    %176 = math.exp %175 : vector<8x8x8xf32>
    %cst_43 = arith.constant dense<0.000000e+00> : vector<8x8xf32>
    %177 = vector.multi_reduction <add>, %176, %cst_43 [2] : vector<8x8x8xf32> to vector<8x8xf32>
    %178 = vector.shape_cast %177 : vector<8x8xf32> to vector<8x8x1xf32>
    %179 = tpu.reciprocal %178 {approx = true} : vector<8x8x1xf32> -> vector<8x8x1xf32>
    %180 = vector.broadcast %179 : vector<8x8x1xf32> to vector<8x8x8xf32>
    %181 = arith.mulf %176, %180 : vector<8x8x8xf32>
    %182 = arith.mulf %181, %12 : vector<8x8x8xf32>
    "tpu.trace_start"() <{level = 10 : i32, message = "xts,xsd->xtd"}> : () -> ()
    %cst_44 = arith.constant dense<0.000000e+00> : vector<8x8x8xf32>
    %183 = tpu.matmul %182, %166, %cst_44 {dimension_numbers = #tpu.dot_dimension_numbers<[2], [1], [1], [2], [0, 0, 0, 1, 1, 2], [0], [0]>, precision = #tpu.contract_precision<fp32>} : vector<8x8x8xf32>, vector<8x8x8xf32>, vector<8x8x8xf32> -> vector<8x8x8xf32>
    "tpu.trace_stop"() : () -> ()
    %184 = vector.shape_cast %183 : vector<8x8x8xf32> to vector<4x16x8xf32>
    %185 = vector.extract_strided_slice %184 {offsets = [0, 0, 0], sizes = [1, 16, 8], strides = [1, 1, 1]} : vector<4x16x8xf32> to vector<1x16x8xf32>
    %186 = vector.shape_cast %185 : vector<1x16x8xf32> to vector<16x8xf32>
    %187 = vector.extract_strided_slice %184 {offsets = [1, 0, 0], sizes = [1, 16, 8], strides = [1, 1, 1]} : vector<4x16x8xf32> to vector<1x16x8xf32>
    %188 = vector.shape_cast %187 : vector<1x16x8xf32> to vector<16x8xf32>
    %189 = vector.extract_strided_slice %184 {offsets = [2, 0, 0], sizes = [1, 16, 8], strides = [1, 1, 1]} : vector<4x16x8xf32> to vector<1x16x8xf32>
    %190 = vector.shape_cast %189 : vector<1x16x8xf32> to vector<16x8xf32>
    %191 = vector.extract_strided_slice %184 {offsets = [3, 0, 0], sizes = [1, 16, 8], strides = [1, 1, 1]} : vector<4x16x8xf32> to vector<1x16x8xf32>
    %192 = vector.shape_cast %191 : vector<1x16x8xf32> to vector<16x8xf32>
    %193 = tpu.concatenate %186, %188, %190, %192 in 1 : vector<16x8xf32>, vector<16x8xf32>, vector<16x8xf32>, vector<16x8xf32> -> vector<16x32xf32>
    %cst_45 = arith.constant dense<0.000000e+00> : vector<16x32xf32>
    %194 = tpu.matmul %193, %136, %cst_45 {dimension_numbers = #tpu.dot_dimension_numbers<[1], [0], [0], [1], [0, 0, 1, 1], [], []>, precision = #tpu.contract_precision<fp32>} : vector<16x32xf32>, vector<32x32xf32>, vector<16x32xf32> -> vector<16x32xf32>
    %195 = vector.extract_strided_slice %14 {offsets = [9, 0], sizes = [1, 32], strides = [1, 1]} : vector<16x64xf32> to vector<1x32xf32>
    %196 = vector.broadcast %195 : vector<1x32xf32> to vector<16x32xf32>
    %197 = arith.addf %194, %196 : vector<16x32xf32>
    %198 = arith.addf %197, %117 : vector<16x32xf32>
    %199 = vector.extract_strided_slice %14 {offsets = [10, 0], sizes = [1, 32], strides = [1, 1]} : vector<16x64xf32> to vector<1x32xf32>
    %200 = vector.extract_strided_slice %14 {offsets = [11, 0], sizes = [1, 32], strides = [1, 1]} : vector<16x64xf32> to vector<1x32xf32>
    %cst_46 = arith.constant dense<0.000000e+00> : vector<16xf32>
    %201 = vector.multi_reduction <add>, %198, %cst_46 [1] : vector<16x32xf32> to vector<16xf32>
    %202 = vector.shape_cast %201 : vector<16xf32> to vector<16x1xf32>
    %cst_47 = arith.constant 3.200000e+01 : f32
    %203 = vector.broadcast %cst_47 : f32 to vector<16x1xf32>
    %204 = arith.divf %202, %203 : vector<16x1xf32>
    %205 = vector.broadcast %204 : vector<16x1xf32> to vector<16x32xf32>
    %206 = arith.subf %198, %205 : vector<16x32xf32>
    %207 = arith.mulf %206, %206 : vector<16x32xf32>
    %cst_48 = arith.constant dense<0.000000e+00> : vector<16xf32>
    %208 = vector.multi_reduction <add>, %207, %cst_48 [1] : vector<16x32xf32> to vector<16xf32>
    %209 = vector.shape_cast %208 : vector<16xf32> to vector<16x1xf32>
    %cst_49 = arith.constant 3.200000e+01 : f32
    %210 = vector.broadcast %cst_49 : f32 to vector<16x1xf32>
    %211 = arith.divf %209, %210 : vector<16x1xf32>
    %212 = vector.broadcast %204 : vector<16x1xf32> to vector<16x32xf32>
    %213 = arith.subf %198, %212 : vector<16x32xf32>
    %cst_50 = arith.constant 9.99999974E-6 : f32
    %214 = vector.broadcast %cst_50 : f32 to vector<16x1xf32>
    %215 = arith.addf %211, %214 : vector<16x1xf32>
    %216 = math.rsqrt %215 : vector<16x1xf32>
    %217 = vector.broadcast %216 : vector<16x1xf32> to vector<16x32xf32>
    %218 = arith.mulf %213, %217 : vector<16x32xf32>
    %219 = vector.broadcast %199 : vector<1x32xf32> to vector<16x32xf32>
    %220 = arith.mulf %218, %219 : vector<16x32xf32>
    %221 = vector.broadcast %200 : vector<1x32xf32> to vector<16x32xf32>
    %222 = arith.addf %220, %221 : vector<16x32xf32>
    %c0_51 = arith.constant 0 : index
    %c0_52 = arith.constant 0 : index
    %c0_53 = arith.constant 0 : index
    %223 = vector.load %arg7[%c0_51, %c0_52, %c0_53] : memref<2x32x64xf32, #tpu.memory_space<vmem>>, vector<1x32x64xf32>
    %224 = vector.shape_cast %223 : vector<1x32x64xf32> to vector<32x64xf32>
    %cst_54 = arith.constant dense<0.000000e+00> : vector<16x64xf32>
    %225 = tpu.matmul %222, %224, %cst_54 {dimension_numbers = #tpu.dot_dimension_numbers<[1], [0], [0], [1], [0, 0, 1, 1], [], []>, precision = #tpu.contract_precision<fp32>} : vector<16x32xf32>, vector<32x64xf32>, vector<16x64xf32> -> vector<16x64xf32>
    %226 = vector.extract_strided_slice %14 {offsets = [12, 0], sizes = [1, 64], strides = [1, 1]} : vector<16x64xf32> to vector<1x64xf32>
    %227 = vector.broadcast %226 : vector<1x64xf32> to vector<16x64xf32>
    %228 = arith.addf %225, %227 : vector<16x64xf32>
    %cst_55 = arith.constant 0.000000e+00 : f32
    %229 = vector.broadcast %cst_55 : f32 to vector<16x64xf32>
    %230 = arith.maximumf %228, %229 : vector<16x64xf32>
    %c0_56 = arith.constant 0 : index
    %c0_57 = arith.constant 0 : index
    %c0_58 = arith.constant 0 : index
    %231 = vector.load %arg8[%c0_56, %c0_57, %c0_58] : memref<2x64x32xf32, #tpu.memory_space<vmem>>, vector<1x64x32xf32>
    %232 = vector.shape_cast %231 : vector<1x64x32xf32> to vector<64x32xf32>
    %cst_59 = arith.constant dense<0.000000e+00> : vector<16x32xf32>
    %233 = tpu.matmul %230, %232, %cst_59 {dimension_numbers = #tpu.dot_dimension_numbers<[1], [0], [0], [1], [0, 0, 1, 1], [], []>, precision = #tpu.contract_precision<fp32>} : vector<16x64xf32>, vector<64x32xf32>, vector<16x32xf32> -> vector<16x32xf32>
    %234 = vector.extract_strided_slice %14 {offsets = [13, 0], sizes = [1, 32], strides = [1, 1]} : vector<16x64xf32> to vector<1x32xf32>
    %235 = vector.broadcast %234 : vector<1x32xf32> to vector<16x32xf32>
    %236 = arith.addf %233, %235 : vector<16x32xf32>
    %237 = arith.addf %236, %222 : vector<16x32xf32>
    %238 = vector.extract_strided_slice %14 {offsets = [14, 0], sizes = [1, 32], strides = [1, 1]} : vector<16x64xf32> to vector<1x32xf32>
    %239 = vector.extract_strided_slice %14 {offsets = [15, 0], sizes = [1, 32], strides = [1, 1]} : vector<16x64xf32> to vector<1x32xf32>
    %cst_60 = arith.constant dense<0.000000e+00> : vector<16xf32>
    %240 = vector.multi_reduction <add>, %237, %cst_60 [1] : vector<16x32xf32> to vector<16xf32>
    %241 = vector.shape_cast %240 : vector<16xf32> to vector<16x1xf32>
    %cst_61 = arith.constant 3.200000e+01 : f32
    %242 = vector.broadcast %cst_61 : f32 to vector<16x1xf32>
    %243 = arith.divf %241, %242 : vector<16x1xf32>
    %244 = vector.broadcast %243 : vector<16x1xf32> to vector<16x32xf32>
    %245 = arith.subf %237, %244 : vector<16x32xf32>
    %246 = arith.mulf %245, %245 : vector<16x32xf32>
    %cst_62 = arith.constant dense<0.000000e+00> : vector<16xf32>
    %247 = vector.multi_reduction <add>, %246, %cst_62 [1] : vector<16x32xf32> to vector<16xf32>
    %248 = vector.shape_cast %247 : vector<16xf32> to vector<16x1xf32>
    %cst_63 = arith.constant 3.200000e+01 : f32
    %249 = vector.broadcast %cst_63 : f32 to vector<16x1xf32>
    %250 = arith.divf %248, %249 : vector<16x1xf32>
    %251 = vector.broadcast %243 : vector<16x1xf32> to vector<16x32xf32>
    %252 = arith.subf %237, %251 : vector<16x32xf32>
    %cst_64 = arith.constant 9.99999974E-6 : f32
    %253 = vector.broadcast %cst_64 : f32 to vector<16x1xf32>
    %254 = arith.addf %250, %253 : vector<16x1xf32>
    %255 = math.rsqrt %254 : vector<16x1xf32>
    %256 = vector.broadcast %255 : vector<16x1xf32> to vector<16x32xf32>
    %257 = arith.mulf %252, %256 : vector<16x32xf32>
    %258 = vector.broadcast %238 : vector<1x32xf32> to vector<16x32xf32>
    %259 = arith.mulf %257, %258 : vector<16x32xf32>
    %260 = vector.broadcast %239 : vector<1x32xf32> to vector<16x32xf32>
    %261 = arith.addf %259, %260 : vector<16x32xf32>
    %c1_65 = arith.constant 1 : index
    %c0_66 = arith.constant 0 : index
    %c0_67 = arith.constant 0 : index
    %262 = vector.load %arg9[%c1_65, %c0_66, %c0_67] : memref<2x16x64xf32, #tpu.memory_space<vmem>>, vector<1x16x64xf32>
    %263 = vector.shape_cast %262 : vector<1x16x64xf32> to vector<16x64xf32>
    %c1_68 = arith.constant 1 : index
    %c0_69 = arith.constant 0 : index
    %c0_70 = arith.constant 0 : index
    %264 = vector.load %arg3[%c1_68, %c0_69, %c0_70] : memref<2x32x96xf32, #tpu.memory_space<vmem>>, vector<1x32x96xf32>
    %265 = vector.shape_cast %264 : vector<1x32x96xf32> to vector<32x96xf32>
    %cst_71 = arith.constant dense<0.000000e+00> : vector<16x96xf32>
    %266 = tpu.matmul %261, %265, %cst_71 {dimension_numbers = #tpu.dot_dimension_numbers<[1], [0], [0], [1], [0, 0, 1, 1], [], []>, precision = #tpu.contract_precision<fp32>} : vector<16x32xf32>, vector<32x96xf32>, vector<16x96xf32> -> vector<16x96xf32>
    %267 = vector.extract_strided_slice %266 {offsets = [0, 0], sizes = [16, 32], strides = [1, 1]} : vector<16x96xf32> to vector<16x32xf32>
    %268 = vector.extract_strided_slice %263 {offsets = [0, 0], sizes = [1, 32], strides = [1, 1]} : vector<16x64xf32> to vector<1x32xf32>
    %269 = vector.broadcast %268 : vector<1x32xf32> to vector<16x32xf32>
    %270 = arith.addf %267, %269 : vector<16x32xf32>
    %271 = vector.extract_strided_slice %266 {offsets = [0, 32], sizes = [16, 32], strides = [1, 1]} : vector<16x96xf32> to vector<16x32xf32>
    %272 = vector.extract_strided_slice %263 {offsets = [1, 0], sizes = [1, 32], strides = [1, 1]} : vector<16x64xf32> to vector<1x32xf32>
    %273 = vector.broadcast %272 : vector<1x32xf32> to vector<16x32xf32>
    %274 = arith.addf %271, %273 : vector<16x32xf32>
    %275 = vector.extract_strided_slice %266 {offsets = [0, 64], sizes = [16, 32], strides = [1, 1]} : vector<16x96xf32> to vector<16x32xf32>
    %276 = vector.extract_strided_slice %263 {offsets = [2, 0], sizes = [1, 32], strides = [1, 1]} : vector<16x64xf32> to vector<1x32xf32>
    %277 = vector.broadcast %276 : vector<1x32xf32> to vector<16x32xf32>
    %278 = arith.addf %275, %277 : vector<16x32xf32>
    %c1_72 = arith.constant 1 : index
    %c0_73 = arith.constant 0 : index
    %c0_74 = arith.constant 0 : index
    %c0_75 = arith.constant 0 : index
    %279 = vector.load %arg6[%c1_72, %c0_73, %c0_74, %c0_75] : memref<2x2x32x32xf32, #tpu.memory_space<vmem>>, vector<1x1x32x32xf32>
    %280 = vector.shape_cast %279 : vector<1x1x32x32xf32> to vector<32x32xf32>
    %281 = vector.extract_strided_slice %270 {offsets = [0, 0], sizes = [16, 8], strides = [1, 1]} : vector<16x32xf32> to vector<16x8xf32>
    %282 = vector.extract_strided_slice %270 {offsets = [0, 8], sizes = [16, 8], strides = [1, 1]} : vector<16x32xf32> to vector<16x8xf32>
    %283 = vector.extract_strided_slice %270 {offsets = [0, 16], sizes = [16, 8], strides = [1, 1]} : vector<16x32xf32> to vector<16x8xf32>
    %284 = vector.extract_strided_slice %270 {offsets = [0, 24], sizes = [16, 8], strides = [1, 1]} : vector<16x32xf32> to vector<16x8xf32>
    %285 = vector.shape_cast %281 : vector<16x8xf32> to vector<1x16x8xf32>
    %286 = vector.shape_cast %282 : vector<16x8xf32> to vector<1x16x8xf32>
    %287 = vector.shape_cast %283 : vector<16x8xf32> to vector<1x16x8xf32>
    %288 = vector.shape_cast %284 : vector<16x8xf32> to vector<1x16x8xf32>
    %289 = tpu.concatenate %285, %286, %287, %288 in 0 : vector<1x16x8xf32>, vector<1x16x8xf32>, vector<1x16x8xf32>, vector<1x16x8xf32> -> vector<4x16x8xf32>
    %290 = vector.shape_cast %289 : vector<4x16x8xf32> to vector<8x8x8xf32>
    %291 = vector.extract_strided_slice %274 {offsets = [0, 0], sizes = [16, 8], strides = [1, 1]} : vector<16x32xf32> to vector<16x8xf32>
    %292 = vector.extract_strided_slice %274 {offsets = [0, 8], sizes = [16, 8], strides = [1, 1]} : vector<16x32xf32> to vector<16x8xf32>
    %293 = vector.extract_strided_slice %274 {offsets = [0, 16], sizes = [16, 8], strides = [1, 1]} : vector<16x32xf32> to vector<16x8xf32>
    %294 = vector.extract_strided_slice %274 {offsets = [0, 24], sizes = [16, 8], strides = [1, 1]} : vector<16x32xf32> to vector<16x8xf32>
    %295 = vector.shape_cast %291 : vector<16x8xf32> to vector<1x16x8xf32>
    %296 = vector.shape_cast %292 : vector<16x8xf32> to vector<1x16x8xf32>
    %297 = vector.shape_cast %293 : vector<16x8xf32> to vector<1x16x8xf32>
    %298 = vector.shape_cast %294 : vector<16x8xf32> to vector<1x16x8xf32>
    %299 = tpu.concatenate %295, %296, %297, %298 in 0 : vector<1x16x8xf32>, vector<1x16x8xf32>, vector<1x16x8xf32>, vector<1x16x8xf32> -> vector<4x16x8xf32>
    %300 = vector.shape_cast %299 : vector<4x16x8xf32> to vector<8x8x8xf32>
    %301 = vector.extract_strided_slice %278 {offsets = [0, 0], sizes = [16, 8], strides = [1, 1]} : vector<16x32xf32> to vector<16x8xf32>
    %302 = vector.extract_strided_slice %278 {offsets = [0, 8], sizes = [16, 8], strides = [1, 1]} : vector<16x32xf32> to vector<16x8xf32>
    %303 = vector.extract_strided_slice %278 {offsets = [0, 16], sizes = [16, 8], strides = [1, 1]} : vector<16x32xf32> to vector<16x8xf32>
    %304 = vector.extract_strided_slice %278 {offsets = [0, 24], sizes = [16, 8], strides = [1, 1]} : vector<16x32xf32> to vector<16x8xf32>
    %305 = vector.shape_cast %301 : vector<16x8xf32> to vector<1x16x8xf32>
    %306 = vector.shape_cast %302 : vector<16x8xf32> to vector<1x16x8xf32>
    %307 = vector.shape_cast %303 : vector<16x8xf32> to vector<1x16x8xf32>
    %308 = vector.shape_cast %304 : vector<16x8xf32> to vector<1x16x8xf32>
    %309 = tpu.concatenate %305, %306, %307, %308 in 0 : vector<1x16x8xf32>, vector<1x16x8xf32>, vector<1x16x8xf32>, vector<1x16x8xf32> -> vector<4x16x8xf32>
    %310 = vector.shape_cast %309 : vector<4x16x8xf32> to vector<8x8x8xf32>
    "tpu.trace_start"() <{level = 10 : i32, message = "xtd,xsd->xts"}> : () -> ()
    %cst_76 = arith.constant dense<0.000000e+00> : vector<8x8x8xf32>
    %311 = tpu.matmul %290, %300, %cst_76 {dimension_numbers = #tpu.dot_dimension_numbers<[2], [2], [1], [1], [0, 0, 0, 1, 1, 1], [0], [0]>, precision = #tpu.contract_precision<fp32>} : vector<8x8x8xf32>, vector<8x8x8xf32>, vector<8x8x8xf32> -> vector<8x8x8xf32>
    %cst_77 = arith.constant 0.000000e+00 : f32
    "tpu.trace_stop"() : () -> ()
    %312 = vector.broadcast %cst_77 : f32 to vector<8x8x8xf32>
    %313 = arith.cmpf ogt, %8, %312 : vector<8x8x8xf32>
    %cst_78 = arith.constant -1.70141173E+38 : f32
    %314 = vector.broadcast %cst_78 : f32 to vector<8x8x8xf32>
    %315 = arith.select %313, %311, %314 : vector<8x8x8xi1>, vector<8x8x8xf32>
    %cst_79 = arith.constant dense<0xFF800000> : vector<8x8xf32>
    %316 = vector.multi_reduction <maximumf>, %315, %cst_79 [2] : vector<8x8x8xf32> to vector<8x8xf32>
    %317 = vector.shape_cast %316 : vector<8x8xf32> to vector<8x8x1xf32>
    %318 = vector.broadcast %317 : vector<8x8x1xf32> to vector<8x8x8xf32>
    %319 = arith.subf %315, %318 : vector<8x8x8xf32>
    %320 = math.exp %319 : vector<8x8x8xf32>
    %cst_80 = arith.constant dense<0.000000e+00> : vector<8x8xf32>
    %321 = vector.multi_reduction <add>, %320, %cst_80 [2] : vector<8x8x8xf32> to vector<8x8xf32>
    %322 = vector.shape_cast %321 : vector<8x8xf32> to vector<8x8x1xf32>
    %323 = tpu.reciprocal %322 {approx = true} : vector<8x8x1xf32> -> vector<8x8x1xf32>
    %324 = vector.broadcast %323 : vector<8x8x1xf32> to vector<8x8x8xf32>
    %325 = arith.mulf %320, %324 : vector<8x8x8xf32>
    %326 = arith.mulf %325, %8 : vector<8x8x8xf32>
    "tpu.trace_start"() <{level = 10 : i32, message = "xts,xsd->xtd"}> : () -> ()
    %cst_81 = arith.constant dense<0.000000e+00> : vector<8x8x8xf32>
    %327 = tpu.matmul %326, %310, %cst_81 {dimension_numbers = #tpu.dot_dimension_numbers<[2], [1], [1], [2], [0, 0, 0, 1, 1, 2], [0], [0]>, precision = #tpu.contract_precision<fp32>} : vector<8x8x8xf32>, vector<8x8x8xf32>, vector<8x8x8xf32> -> vector<8x8x8xf32>
    "tpu.trace_stop"() : () -> ()
    %328 = vector.shape_cast %327 : vector<8x8x8xf32> to vector<4x16x8xf32>
    %329 = vector.extract_strided_slice %328 {offsets = [0, 0, 0], sizes = [1, 16, 8], strides = [1, 1, 1]} : vector<4x16x8xf32> to vector<1x16x8xf32>
    %330 = vector.shape_cast %329 : vector<1x16x8xf32> to vector<16x8xf32>
    %331 = vector.extract_strided_slice %328 {offsets = [1, 0, 0], sizes = [1, 16, 8], strides = [1, 1, 1]} : vector<4x16x8xf32> to vector<1x16x8xf32>
    %332 = vector.shape_cast %331 : vector<1x16x8xf32> to vector<16x8xf32>
    %333 = vector.extract_strided_slice %328 {offsets = [2, 0, 0], sizes = [1, 16, 8], strides = [1, 1, 1]} : vector<4x16x8xf32> to vector<1x16x8xf32>
    %334 = vector.shape_cast %333 : vector<1x16x8xf32> to vector<16x8xf32>
    %335 = vector.extract_strided_slice %328 {offsets = [3, 0, 0], sizes = [1, 16, 8], strides = [1, 1, 1]} : vector<4x16x8xf32> to vector<1x16x8xf32>
    %336 = vector.shape_cast %335 : vector<1x16x8xf32> to vector<16x8xf32>
    %337 = tpu.concatenate %330, %332, %334, %336 in 1 : vector<16x8xf32>, vector<16x8xf32>, vector<16x8xf32>, vector<16x8xf32> -> vector<16x32xf32>
    %cst_82 = arith.constant dense<0.000000e+00> : vector<16x32xf32>
    %338 = tpu.matmul %337, %280, %cst_82 {dimension_numbers = #tpu.dot_dimension_numbers<[1], [0], [0], [1], [0, 0, 1, 1], [], []>, precision = #tpu.contract_precision<fp32>} : vector<16x32xf32>, vector<32x32xf32>, vector<16x32xf32> -> vector<16x32xf32>
    %339 = vector.extract_strided_slice %263 {offsets = [6, 0], sizes = [1, 32], strides = [1, 1]} : vector<16x64xf32> to vector<1x32xf32>
    %340 = vector.broadcast %339 : vector<1x32xf32> to vector<16x32xf32>
    %341 = arith.addf %338, %340 : vector<16x32xf32>
    %342 = arith.addf %341, %261 : vector<16x32xf32>
    %343 = vector.extract_strided_slice %263 {offsets = [7, 0], sizes = [1, 32], strides = [1, 1]} : vector<16x64xf32> to vector<1x32xf32>
    %344 = vector.extract_strided_slice %263 {offsets = [8, 0], sizes = [1, 32], strides = [1, 1]} : vector<16x64xf32> to vector<1x32xf32>
    %cst_83 = arith.constant dense<0.000000e+00> : vector<16xf32>
    %345 = vector.multi_reduction <add>, %342, %cst_83 [1] : vector<16x32xf32> to vector<16xf32>
    %346 = vector.shape_cast %345 : vector<16xf32> to vector<16x1xf32>
    %cst_84 = arith.constant 3.200000e+01 : f32
    %347 = vector.broadcast %cst_84 : f32 to vector<16x1xf32>
    %348 = arith.divf %346, %347 : vector<16x1xf32>
    %349 = vector.broadcast %348 : vector<16x1xf32> to vector<16x32xf32>
    %350 = arith.subf %342, %349 : vector<16x32xf32>
    %351 = arith.mulf %350, %350 : vector<16x32xf32>
    %cst_85 = arith.constant dense<0.000000e+00> : vector<16xf32>
    %352 = vector.multi_reduction <add>, %351, %cst_85 [1] : vector<16x32xf32> to vector<16xf32>
    %353 = vector.shape_cast %352 : vector<16xf32> to vector<16x1xf32>
    %cst_86 = arith.constant 3.200000e+01 : f32
    %354 = vector.broadcast %cst_86 : f32 to vector<16x1xf32>
    %355 = arith.divf %353, %354 : vector<16x1xf32>
    %356 = vector.broadcast %348 : vector<16x1xf32> to vector<16x32xf32>
    %357 = arith.subf %342, %356 : vector<16x32xf32>
    %cst_87 = arith.constant 9.99999974E-6 : f32
    %358 = vector.broadcast %cst_87 : f32 to vector<16x1xf32>
    %359 = arith.addf %355, %358 : vector<16x1xf32>
    %360 = math.rsqrt %359 : vector<16x1xf32>
    %361 = vector.broadcast %360 : vector<16x1xf32> to vector<16x32xf32>
    %362 = arith.mulf %357, %361 : vector<16x32xf32>
    %363 = vector.broadcast %343 : vector<1x32xf32> to vector<16x32xf32>
    %364 = arith.mulf %362, %363 : vector<16x32xf32>
    %365 = vector.broadcast %344 : vector<1x32xf32> to vector<16x32xf32>
    %366 = arith.addf %364, %365 : vector<16x32xf32>
    %c1_88 = arith.constant 1 : index
    %c0_89 = arith.constant 0 : index
    %c0_90 = arith.constant 0 : index
    %367 = vector.load %arg4[%c1_88, %c0_89, %c0_90] : memref<2x32x32xf32, #tpu.memory_space<vmem>>, vector<1x32x32xf32>
    %368 = vector.shape_cast %367 : vector<1x32x32xf32> to vector<32x32xf32>
    %cst_91 = arith.constant dense<0.000000e+00> : vector<16x32xf32>
    %369 = tpu.matmul %366, %368, %cst_91 {dimension_numbers = #tpu.dot_dimension_numbers<[1], [0], [0], [1], [0, 0, 1, 1], [], []>, precision = #tpu.contract_precision<fp32>} : vector<16x32xf32>, vector<32x32xf32>, vector<16x32xf32> -> vector<16x32xf32>
    %370 = vector.extract_strided_slice %263 {offsets = [3, 0], sizes = [1, 32], strides = [1, 1]} : vector<16x64xf32> to vector<1x32xf32>
    %371 = vector.broadcast %370 : vector<1x32xf32> to vector<16x32xf32>
    %372 = arith.addf %369, %371 : vector<16x32xf32>
    %c1_92 = arith.constant 1 : index
    %c0_93 = arith.constant 0 : index
    %c0_94 = arith.constant 0 : index
    %373 = vector.load %arg5[%c1_92, %c0_93, %c0_94] : memref<2x32x64xf32, #tpu.memory_space<vmem>>, vector<1x32x64xf32>
    %374 = vector.shape_cast %373 : vector<1x32x64xf32> to vector<32x64xf32>
    %cst_95 = arith.constant dense<0.000000e+00> : vector<16x64xf32>
    %375 = tpu.matmul %1, %374, %cst_95 {dimension_numbers = #tpu.dot_dimension_numbers<[1], [0], [0], [1], [0, 0, 1, 1], [], []>, precision = #tpu.contract_precision<fp32>} : vector<16x32xf32>, vector<32x64xf32>, vector<16x64xf32> -> vector<16x64xf32>
    %376 = vector.extract_strided_slice %375 {offsets = [0, 0], sizes = [16, 32], strides = [1, 1]} : vector<16x64xf32> to vector<16x32xf32>
    %377 = vector.extract_strided_slice %263 {offsets = [4, 0], sizes = [1, 32], strides = [1, 1]} : vector<16x64xf32> to vector<1x32xf32>
    %378 = vector.broadcast %377 : vector<1x32xf32> to vector<16x32xf32>
    %379 = arith.addf %376, %378 : vector<16x32xf32>
    %380 = vector.extract_strided_slice %375 {offsets = [0, 32], sizes = [16, 32], strides = [1, 1]} : vector<16x64xf32> to vector<16x32xf32>
    %381 = vector.extract_strided_slice %263 {offsets = [5, 0], sizes = [1, 32], strides = [1, 1]} : vector<16x64xf32> to vector<1x32xf32>
    %382 = vector.broadcast %381 : vector<1x32xf32> to vector<16x32xf32>
    %383 = arith.addf %380, %382 : vector<16x32xf32>
    %c1_96 = arith.constant 1 : index
    %c1_97 = arith.constant 1 : index
    %c0_98 = arith.constant 0 : index
    %c0_99 = arith.constant 0 : index
    %384 = vector.load %arg6[%c1_96, %c1_97, %c0_98, %c0_99] : memref<2x2x32x32xf32, #tpu.memory_space<vmem>>, vector<1x1x32x32xf32>
    %385 = vector.shape_cast %384 : vector<1x1x32x32xf32> to vector<32x32xf32>
    %386 = vector.extract_strided_slice %372 {offsets = [0, 0], sizes = [16, 8], strides = [1, 1]} : vector<16x32xf32> to vector<16x8xf32>
    %387 = vector.extract_strided_slice %372 {offsets = [0, 8], sizes = [16, 8], strides = [1, 1]} : vector<16x32xf32> to vector<16x8xf32>
    %388 = vector.extract_strided_slice %372 {offsets = [0, 16], sizes = [16, 8], strides = [1, 1]} : vector<16x32xf32> to vector<16x8xf32>
    %389 = vector.extract_strided_slice %372 {offsets = [0, 24], sizes = [16, 8], strides = [1, 1]} : vector<16x32xf32> to vector<16x8xf32>
    %390 = vector.shape_cast %386 : vector<16x8xf32> to vector<1x16x8xf32>
    %391 = vector.shape_cast %387 : vector<16x8xf32> to vector<1x16x8xf32>
    %392 = vector.shape_cast %388 : vector<16x8xf32> to vector<1x16x8xf32>
    %393 = vector.shape_cast %389 : vector<16x8xf32> to vector<1x16x8xf32>
    %394 = tpu.concatenate %390, %391, %392, %393 in 0 : vector<1x16x8xf32>, vector<1x16x8xf32>, vector<1x16x8xf32>, vector<1x16x8xf32> -> vector<4x16x8xf32>
    %395 = vector.shape_cast %394 : vector<4x16x8xf32> to vector<8x8x8xf32>
    %396 = vector.extract_strided_slice %379 {offsets = [0, 0], sizes = [16, 8], strides = [1, 1]} : vector<16x32xf32> to vector<16x8xf32>
    %397 = vector.extract_strided_slice %379 {offsets = [0, 8], sizes = [16, 8], strides = [1, 1]} : vector<16x32xf32> to vector<16x8xf32>
    %398 = vector.extract_strided_slice %379 {offsets = [0, 16], sizes = [16, 8], strides = [1, 1]} : vector<16x32xf32> to vector<16x8xf32>
    %399 = vector.extract_strided_slice %379 {offsets = [0, 24], sizes = [16, 8], strides = [1, 1]} : vector<16x32xf32> to vector<16x8xf32>
    %400 = vector.shape_cast %396 : vector<16x8xf32> to vector<1x16x8xf32>
    %401 = vector.shape_cast %397 : vector<16x8xf32> to vector<1x16x8xf32>
    %402 = vector.shape_cast %398 : vector<16x8xf32> to vector<1x16x8xf32>
    %403 = vector.shape_cast %399 : vector<16x8xf32> to vector<1x16x8xf32>
    %404 = tpu.concatenate %400, %401, %402, %403 in 0 : vector<1x16x8xf32>, vector<1x16x8xf32>, vector<1x16x8xf32>, vector<1x16x8xf32> -> vector<4x16x8xf32>
    %405 = vector.shape_cast %404 : vector<4x16x8xf32> to vector<8x8x8xf32>
    %406 = vector.extract_strided_slice %383 {offsets = [0, 0], sizes = [16, 8], strides = [1, 1]} : vector<16x32xf32> to vector<16x8xf32>
    %407 = vector.extract_strided_slice %383 {offsets = [0, 8], sizes = [16, 8], strides = [1, 1]} : vector<16x32xf32> to vector<16x8xf32>
    %408 = vector.extract_strided_slice %383 {offsets = [0, 16], sizes = [16, 8], strides = [1, 1]} : vector<16x32xf32> to vector<16x8xf32>
    %409 = vector.extract_strided_slice %383 {offsets = [0, 24], sizes = [16, 8], strides = [1, 1]} : vector<16x32xf32> to vector<16x8xf32>
    %410 = vector.shape_cast %406 : vector<16x8xf32> to vector<1x16x8xf32>
    %411 = vector.shape_cast %407 : vector<16x8xf32> to vector<1x16x8xf32>
    %412 = vector.shape_cast %408 : vector<16x8xf32> to vector<1x16x8xf32>
    %413 = vector.shape_cast %409 : vector<16x8xf32> to vector<1x16x8xf32>
    %414 = tpu.concatenate %410, %411, %412, %413 in 0 : vector<1x16x8xf32>, vector<1x16x8xf32>, vector<1x16x8xf32>, vector<1x16x8xf32> -> vector<4x16x8xf32>
    %415 = vector.shape_cast %414 : vector<4x16x8xf32> to vector<8x8x8xf32>
    "tpu.trace_start"() <{level = 10 : i32, message = "xtd,xsd->xts"}> : () -> ()
    %cst_100 = arith.constant dense<0.000000e+00> : vector<8x8x8xf32>
    %416 = tpu.matmul %395, %405, %cst_100 {dimension_numbers = #tpu.dot_dimension_numbers<[2], [2], [1], [1], [0, 0, 0, 1, 1, 1], [0], [0]>, precision = #tpu.contract_precision<fp32>} : vector<8x8x8xf32>, vector<8x8x8xf32>, vector<8x8x8xf32> -> vector<8x8x8xf32>
    %cst_101 = arith.constant 0.000000e+00 : f32
    "tpu.trace_stop"() : () -> ()
    %417 = vector.broadcast %cst_101 : f32 to vector<8x8x8xf32>
    %418 = arith.cmpf ogt, %12, %417 : vector<8x8x8xf32>
    %cst_102 = arith.constant -1.70141173E+38 : f32
    %419 = vector.broadcast %cst_102 : f32 to vector<8x8x8xf32>
    %420 = arith.select %418, %416, %419 : vector<8x8x8xi1>, vector<8x8x8xf32>
    %cst_103 = arith.constant dense<0xFF800000> : vector<8x8xf32>
    %421 = vector.multi_reduction <maximumf>, %420, %cst_103 [2] : vector<8x8x8xf32> to vector<8x8xf32>
    %422 = vector.shape_cast %421 : vector<8x8xf32> to vector<8x8x1xf32>
    %423 = vector.broadcast %422 : vector<8x8x1xf32> to vector<8x8x8xf32>
    %424 = arith.subf %420, %423 : vector<8x8x8xf32>
    %425 = math.exp %424 : vector<8x8x8xf32>
    %cst_104 = arith.constant dense<0.000000e+00> : vector<8x8xf32>
    %426 = vector.multi_reduction <add>, %425, %cst_104 [2] : vector<8x8x8xf32> to vector<8x8xf32>
    %427 = vector.shape_cast %426 : vector<8x8xf32> to vector<8x8x1xf32>
    %428 = tpu.reciprocal %427 {approx = true} : vector<8x8x1xf32> -> vector<8x8x1xf32>
    %429 = vector.broadcast %428 : vector<8x8x1xf32> to vector<8x8x8xf32>
    %430 = arith.mulf %425, %429 : vector<8x8x8xf32>
    %431 = arith.mulf %430, %12 : vector<8x8x8xf32>
    "tpu.trace_start"() <{level = 10 : i32, message = "xts,xsd->xtd"}> : () -> ()
    %cst_105 = arith.constant dense<0.000000e+00> : vector<8x8x8xf32>
    %432 = tpu.matmul %431, %415, %cst_105 {dimension_numbers = #tpu.dot_dimension_numbers<[2], [1], [1], [2], [0, 0, 0, 1, 1, 2], [0], [0]>, precision = #tpu.contract_precision<fp32>} : vector<8x8x8xf32>, vector<8x8x8xf32>, vector<8x8x8xf32> -> vector<8x8x8xf32>
    "tpu.trace_stop"() : () -> ()
    %433 = vector.shape_cast %432 : vector<8x8x8xf32> to vector<4x16x8xf32>
    %434 = vector.extract_strided_slice %433 {offsets = [0, 0, 0], sizes = [1, 16, 8], strides = [1, 1, 1]} : vector<4x16x8xf32> to vector<1x16x8xf32>
    %435 = vector.shape_cast %434 : vector<1x16x8xf32> to vector<16x8xf32>
    %436 = vector.extract_strided_slice %433 {offsets = [1, 0, 0], sizes = [1, 16, 8], strides = [1, 1, 1]} : vector<4x16x8xf32> to vector<1x16x8xf32>
    %437 = vector.shape_cast %436 : vector<1x16x8xf32> to vector<16x8xf32>
    %438 = vector.extract_strided_slice %433 {offsets = [2, 0, 0], sizes = [1, 16, 8], strides = [1, 1, 1]} : vector<4x16x8xf32> to vector<1x16x8xf32>
    %439 = vector.shape_cast %438 : vector<1x16x8xf32> to vector<16x8xf32>
    %440 = vector.extract_strided_slice %433 {offsets = [3, 0, 0], sizes = [1, 16, 8], strides = [1, 1, 1]} : vector<4x16x8xf32> to vector<1x16x8xf32>
    %441 = vector.shape_cast %440 : vector<1x16x8xf32> to vector<16x8xf32>
    %442 = tpu.concatenate %435, %437, %439, %441 in 1 : vector<16x8xf32>, vector<16x8xf32>, vector<16x8xf32>, vector<16x8xf32> -> vector<16x32xf32>
    %cst_106 = arith.constant dense<0.000000e+00> : vector<16x32xf32>
    %443 = tpu.matmul %442, %385, %cst_106 {dimension_numbers = #tpu.dot_dimension_numbers<[1], [0], [0], [1], [0, 0, 1, 1], [], []>, precision = #tpu.contract_precision<fp32>} : vector<16x32xf32>, vector<32x32xf32>, vector<16x32xf32> -> vector<16x32xf32>
    %444 = vector.extract_strided_slice %263 {offsets = [9, 0], sizes = [1, 32], strides = [1, 1]} : vector<16x64xf32> to vector<1x32xf32>
    %445 = vector.broadcast %444 : vector<1x32xf32> to vector<16x32xf32>
    %446 = arith.addf %443, %445 : vector<16x32xf32>
    %447 = arith.addf %446, %366 : vector<16x32xf32>
    %448 = vector.extract_strided_slice %263 {offsets = [10, 0], sizes = [1, 32], strides = [1, 1]} : vector<16x64xf32> to vector<1x32xf32>
    %449 = vector.extract_strided_slice %263 {offsets = [11, 0], sizes = [1, 32], strides = [1, 1]} : vector<16x64xf32> to vector<1x32xf32>
    %cst_107 = arith.constant dense<0.000000e+00> : vector<16xf32>
    %450 = vector.multi_reduction <add>, %447, %cst_107 [1] : vector<16x32xf32> to vector<16xf32>
    %451 = vector.shape_cast %450 : vector<16xf32> to vector<16x1xf32>
    %cst_108 = arith.constant 3.200000e+01 : f32
    %452 = vector.broadcast %cst_108 : f32 to vector<16x1xf32>
    %453 = arith.divf %451, %452 : vector<16x1xf32>
    %454 = vector.broadcast %453 : vector<16x1xf32> to vector<16x32xf32>
    %455 = arith.subf %447, %454 : vector<16x32xf32>
    %456 = arith.mulf %455, %455 : vector<16x32xf32>
    %cst_109 = arith.constant dense<0.000000e+00> : vector<16xf32>
    %457 = vector.multi_reduction <add>, %456, %cst_109 [1] : vector<16x32xf32> to vector<16xf32>
    %458 = vector.shape_cast %457 : vector<16xf32> to vector<16x1xf32>
    %cst_110 = arith.constant 3.200000e+01 : f32
    %459 = vector.broadcast %cst_110 : f32 to vector<16x1xf32>
    %460 = arith.divf %458, %459 : vector<16x1xf32>
    %461 = vector.broadcast %453 : vector<16x1xf32> to vector<16x32xf32>
    %462 = arith.subf %447, %461 : vector<16x32xf32>
    %cst_111 = arith.constant 9.99999974E-6 : f32
    %463 = vector.broadcast %cst_111 : f32 to vector<16x1xf32>
    %464 = arith.addf %460, %463 : vector<16x1xf32>
    %465 = math.rsqrt %464 : vector<16x1xf32>
    %466 = vector.broadcast %465 : vector<16x1xf32> to vector<16x32xf32>
    %467 = arith.mulf %462, %466 : vector<16x32xf32>
    %468 = vector.broadcast %448 : vector<1x32xf32> to vector<16x32xf32>
    %469 = arith.mulf %467, %468 : vector<16x32xf32>
    %470 = vector.broadcast %449 : vector<1x32xf32> to vector<16x32xf32>
    %471 = arith.addf %469, %470 : vector<16x32xf32>
    %c1_112 = arith.constant 1 : index
    %c0_113 = arith.constant 0 : index
    %c0_114 = arith.constant 0 : index
    %472 = vector.load %arg7[%c1_112, %c0_113, %c0_114] : memref<2x32x64xf32, #tpu.memory_space<vmem>>, vector<1x32x64xf32>
    %473 = vector.shape_cast %472 : vector<1x32x64xf32> to vector<32x64xf32>
    %cst_115 = arith.constant dense<0.000000e+00> : vector<16x64xf32>
    %474 = tpu.matmul %471, %473, %cst_115 {dimension_numbers = #tpu.dot_dimension_numbers<[1], [0], [0], [1], [0, 0, 1, 1], [], []>, precision = #tpu.contract_precision<fp32>} : vector<16x32xf32>, vector<32x64xf32>, vector<16x64xf32> -> vector<16x64xf32>
    %475 = vector.extract_strided_slice %263 {offsets = [12, 0], sizes = [1, 64], strides = [1, 1]} : vector<16x64xf32> to vector<1x64xf32>
    %476 = vector.broadcast %475 : vector<1x64xf32> to vector<16x64xf32>
    %477 = arith.addf %474, %476 : vector<16x64xf32>
    %cst_116 = arith.constant 0.000000e+00 : f32
    %478 = vector.broadcast %cst_116 : f32 to vector<16x64xf32>
    %479 = arith.maximumf %477, %478 : vector<16x64xf32>
    %c1_117 = arith.constant 1 : index
    %c0_118 = arith.constant 0 : index
    %c0_119 = arith.constant 0 : index
    %480 = vector.load %arg8[%c1_117, %c0_118, %c0_119] : memref<2x64x32xf32, #tpu.memory_space<vmem>>, vector<1x64x32xf32>
    %481 = vector.shape_cast %480 : vector<1x64x32xf32> to vector<64x32xf32>
    %cst_120 = arith.constant dense<0.000000e+00> : vector<16x32xf32>
    %482 = tpu.matmul %479, %481, %cst_120 {dimension_numbers = #tpu.dot_dimension_numbers<[1], [0], [0], [1], [0, 0, 1, 1], [], []>, precision = #tpu.contract_precision<fp32>} : vector<16x64xf32>, vector<64x32xf32>, vector<16x32xf32> -> vector<16x32xf32>
    %483 = vector.extract_strided_slice %263 {offsets = [13, 0], sizes = [1, 32], strides = [1, 1]} : vector<16x64xf32> to vector<1x32xf32>
    %484 = vector.broadcast %483 : vector<1x32xf32> to vector<16x32xf32>
    %485 = arith.addf %482, %484 : vector<16x32xf32>
    %486 = arith.addf %485, %471 : vector<16x32xf32>
    %487 = vector.extract_strided_slice %263 {offsets = [14, 0], sizes = [1, 32], strides = [1, 1]} : vector<16x64xf32> to vector<1x32xf32>
    %488 = vector.extract_strided_slice %263 {offsets = [15, 0], sizes = [1, 32], strides = [1, 1]} : vector<16x64xf32> to vector<1x32xf32>
    %cst_121 = arith.constant dense<0.000000e+00> : vector<16xf32>
    %489 = vector.multi_reduction <add>, %486, %cst_121 [1] : vector<16x32xf32> to vector<16xf32>
    %490 = vector.shape_cast %489 : vector<16xf32> to vector<16x1xf32>
    %cst_122 = arith.constant 3.200000e+01 : f32
    %491 = vector.broadcast %cst_122 : f32 to vector<16x1xf32>
    %492 = arith.divf %490, %491 : vector<16x1xf32>
    %493 = vector.broadcast %492 : vector<16x1xf32> to vector<16x32xf32>
    %494 = arith.subf %486, %493 : vector<16x32xf32>
    %495 = arith.mulf %494, %494 : vector<16x32xf32>
    %cst_123 = arith.constant dense<0.000000e+00> : vector<16xf32>
    %496 = vector.multi_reduction <add>, %495, %cst_123 [1] : vector<16x32xf32> to vector<16xf32>
    %497 = vector.shape_cast %496 : vector<16xf32> to vector<16x1xf32>
    %cst_124 = arith.constant 3.200000e+01 : f32
    %498 = vector.broadcast %cst_124 : f32 to vector<16x1xf32>
    %499 = arith.divf %497, %498 : vector<16x1xf32>
    %500 = vector.broadcast %492 : vector<16x1xf32> to vector<16x32xf32>
    %501 = arith.subf %486, %500 : vector<16x32xf32>
    %cst_125 = arith.constant 9.99999974E-6 : f32
    %502 = vector.broadcast %cst_125 : f32 to vector<16x1xf32>
    %503 = arith.addf %499, %502 : vector<16x1xf32>
    %504 = math.rsqrt %503 : vector<16x1xf32>
    %505 = vector.broadcast %504 : vector<16x1xf32> to vector<16x32xf32>
    %506 = arith.mulf %501, %505 : vector<16x32xf32>
    %507 = vector.broadcast %487 : vector<1x32xf32> to vector<16x32xf32>
    %508 = arith.mulf %506, %507 : vector<16x32xf32>
    %509 = vector.broadcast %488 : vector<1x32xf32> to vector<16x32xf32>
    %510 = arith.addf %508, %509 : vector<16x32xf32>
    %c0_126 = arith.constant 0 : index
    %c0_127 = arith.constant 0 : index
    %511 = vector.load %arg10[%c0_126, %c0_127] : memref<16x32xf32, #tpu.memory_space<vmem>>, vector<16x32xf32>
    tpu.vector_store %arg10[%c0_126, %c0_127], %510 {strides = array<i32>} : memref<16x32xf32, #tpu.memory_space<vmem>>, vector<16x32xf32>,
    return
  }
}

</mosaic_0001>

<bundles_post_ra>
// kernel: transformer_decoder.1
= control target key start
LH: loop header
LB: loop body
LE: loop exit
PB: predicated region body
PF: predicated region fallthrough
CT: control target
= control target key end

     0   :  { %15 = vsyncpa [#allocation3], 0  ;;  %s47548_s0 = inlined_call_operand.vmem [shape: f32[16,32], index: 0, kind: input, shape index: {}]   ;;  %s47549_s1 = inlined_call_operand.hbm [shape: f32[16,32], index: 1, kind: input, shape index: {}]   ;;  %s47550_s2 = inlined_call_operand.vmem [shape: f32[2,8,16], index: 2, kind: input, shape index: {}]   ;;  %s47551_s3 = inlined_call_operand.vmem [shape: f32[2,32,96], index: 3, kind: input, shape index: {}]   ;;  %s47552_s4 = inlined_call_operand.hbm [shape: f32[2,32,32], index: 4, kind: input, shape index: {}]   ;;  %s47553_s5 = inlined_call_operand.hbm [shape: f32[2,32,64], index: 5, kind: input, shape index: {}]   ;;  %s47554_s6 = inlined_call_operand.vmem [shape: f32[2,2,32,32], index: 6, kind: input, shape index: {}]   ;;  %s47555_s7 = inlined_call_operand.hbm [shape: f32[2,32,64], index: 7, kind: input, shape index: {}]   ;;  %s47556_s8 = inlined_call_operand.vmem [shape: f32[2,64,32], index: 8, kind: input, shape index: {}]   ;;  %s47557_s9 = inlined_call_operand.hbm [shape: f32[2,16,64], index: 9, kind: input, shape index: {}]   ;;  %s47558_s10 = inlined_call_operand.hbm [shape: f32[16,32], index: 10, kind: output, shape index: {}]  }
   0x1   :  { %16 = vsyncpa [#allocation6], 0 }
   0x2   :  { %17 = vsyncpa [#allocation9], 0 }
   0x3   :  { %18 = vsyncpa [#allocation4], 0  ;;  %s44093_s13 = smov [#allocation5]   ;;  %s44094_s15 = smov [#allocation8]  }
   0x4   :  { %s42_s14 = sshll.u32 %s44093_s13, 4  ;;  %s68_s16 = sshll.u32 %s44094_s15, 4  ;;  %s43_s14 = int_to_ptr.vmem [resolvable:$true] %s42_s14  ;;  %s44166_s16 = int_to_ptr.vmem [resolvable:$true] %s68_s16 }
   0x5   :  { %s43953_s19 = scalar_lea.hbm %s47552_s4, 1024 }
   0x6   :  { %p43954_p0 = scmp.ne.s32.totalorder %s47552_s4, %s43953_s19  ;;  %p43957_p1 = scmp.lt.u32.totalorder %s43953_s19, %s47552_s4 }
   0x8   :  { %p43959_p2 = pnand %p43957_p1, %p43954_p0 }
   0xa   :  { %43962 = shalt.err (!%p43959_p2)
}
   0xb   :  { %s43963_s24 = scalar_lea.vmem %s43_s14, 1024  ;;  %p43968_p4 = scmp.lt.s32.totalorder %s43_s14, %s43_s14 }
   0xc   :  { %p43964_p3 = scmp.ne.s32.totalorder %s43_s14, %s43963_s24  ;;  %p43969_p5 = scmp.lt.s32.totalorder %s43963_s24, %s43963_s24 }
   0xe   :  { %p43970_p6 = por %p43969_p5, %p43968_p4 }
  0x10   :  { %p43971_p7 = pnand %p43970_p6, %p43964_p3 }
  0x12   :  { %43974 = shalt.err (!%p43971_p7)
}
  0x13   :  { %s44095_s25 = smov 128   ;;  %s44096_s26 = smov 8  }
  0x14   :  { %48 = dma.hbm_to_vmem [thread:$0]  %s47552_s4, 1024, %s43_s14, [#allocation6], %s44095_s25, %s44095_s25, %s44096_s26  }
  0x15   :  { %s43975_s11 = scalar_lea.hbm %s47555_s7, 1024 }
  0x16   :  { %p43976_p8 = scmp.ne.s32.totalorder %s47555_s7, %s43975_s11  ;;  %p43979_p9 = scmp.lt.u32.totalorder %s43975_s11, %s47555_s7 }
  0x18   :  { %p43981_p10 = pnand %p43979_p9, %p43976_p8 }
  0x1a   :  { %43984 = shalt.err (!%p43981_p10)
}
  0x1b   :  { %s43985_s18 = scalar_lea.vmem %s44166_s16, 1024  ;;  %p43990_p12 = scmp.lt.s32.totalorder %s44166_s16, %s44166_s16 }
  0x1c   :  { %p43986_p11 = scmp.ne.s32.totalorder %s44166_s16, %s43985_s18  ;;  %p43991_p13 = scmp.lt.s32.totalorder %s43985_s18, %s43985_s18 }
  0x1e   :  { %p43992_p0 = por %p43991_p13, %p43990_p12 }
  0x20   :  { %p43993_p1 = pnand %p43992_p0, %p43986_p11 }
  0x22   :  { %43996 = shalt.err (!%p43993_p1)
}
  0x23   :  { %74 = dma.hbm_to_vmem [thread:$0]  %s47555_s7, 1024, %s44166_s16, [#allocation9], %s44095_s25, %s44095_s25, %s44096_s26  }
  0x24   :  { %s44097_s19 = smov [#allocation2]   ;;  %s44098_s21 = smov [#allocation7]  }
  0x25   :  { %s26_s20 = sshll.u32 %s44097_s19, 4  ;;  %s54_s22 = sshll.u32 %s44098_s21, 4  ;;  %s27_s20 = int_to_ptr.vmem [resolvable:$true] %s26_s20  ;;  %s44203_s22 = int_to_ptr.vmem [resolvable:$true] %s54_s22 }
  0x26   :  { %s43997_s27 = scalar_lea.hbm %s47549_s1, 256 }
  0x27   :  { %p43998_p2 = scmp.ne.s32.totalorder %s47549_s1, %s43997_s27  ;;  %p44001_p3 = scmp.lt.u32.totalorder %s43997_s27, %s47549_s1 }
  0x29   :  { %p44003_p4 = pnand %p44001_p3, %p43998_p2 }
  0x2b   :  { %44006 = shalt.err (!%p44003_p4)
}
  0x2c   :  { %s44007_s7 = scalar_lea.vmem %s27_s20, 256  ;;  %p44012_p6 = scmp.lt.s32.totalorder %s27_s20, %s27_s20 }
  0x2d   :  { %p44008_p5 = scmp.ne.s32.totalorder %s27_s20, %s44007_s7  ;;  %p44013_p7 = scmp.lt.s32.totalorder %s44007_s7, %s44007_s7 }
  0x2f   :  { %p44014_p8 = por %p44013_p7, %p44012_p6 }
  0x31   :  { %p44015_p9 = pnand %p44014_p8, %p44008_p5 }
  0x33   :  { %44018 = shalt.err (!%p44015_p9)
}
  0x34   :  { %32 = dma.hbm_to_vmem [thread:$0]  %s47549_s1, 256, %s27_s20, [#allocation3], %s44095_s25, %s44095_s25, %s44096_s26  }
  0x35   :  { %s44019_s17 = scalar_lea.hbm %s47553_s5, 1024 }
  0x36   :  { %p44020_p10 = scmp.ne.s32.totalorder %s47553_s5, %s44019_s17  ;;  %p44023_p11 = scmp.lt.u32.totalorder %s44019_s17, %s47553_s5 }
  0x38   :  { %p44025_p12 = pnand %p44023_p11, %p44020_p10 }
  0x3a   :  { %44028 = shalt.err (!%p44025_p12)
}
  0x3b   :  { %s44029_s21 = scalar_lea.vmem %s44203_s22, 1024  ;;  %p44034_p0 = scmp.lt.s32.totalorder %s44203_s22, %s44203_s22 }
  0x3c   :  { %p44030_p13 = scmp.ne.s32.totalorder %s44203_s22, %s44029_s21  ;;  %p44035_p1 = scmp.lt.s32.totalorder %s44029_s21, %s44029_s21 }
  0x3e   :  { %p44036_p2 = por %p44035_p1, %p44034_p0 }
  0x40   :  { %p44037_p3 = pnand %p44036_p2, %p44030_p13 }
  0x42   :  { %44040 = shalt.err (!%p44037_p3)
}
  0x43   :  { %60 = dma.hbm_to_vmem [thread:$0]  %s47553_s5, 1024, %s44203_s22, [#allocation6], %s44095_s25, %s44095_s25, %s44096_s26  }
  0x44   :  { %s44099_s23 = smov [#allocation10]   ;;  %s44041_s29 = scalar_lea.hbm %s47557_s9, 512 }
  0x45   :  { %s82_s24 = sshll.u32 %s44099_s23, 4  ;;  %p44042_p4 = scmp.ne.s32.totalorder %s47557_s9, %s44041_s29  ;;  %s83_s24 = int_to_ptr.vmem [resolvable:$true] %s82_s24 }
  0x46   :  { %p44045_p5 = scmp.lt.u32.totalorder %s44041_s29, %s47557_s9 }
  0x48   :  { %p44047_p6 = pnand %p44045_p5, %p44042_p4 }
  0x4a   :  { %44050 = shalt.err (!%p44047_p6)
}
  0x4b   :  { %s44051_s12 = scalar_lea.vmem %s83_s24, 512  ;;  %p44056_p8 = scmp.lt.s32.totalorder %s83_s24, %s83_s24 }
  0x4c   :  { %p44052_p7 = scmp.ne.s32.totalorder %s83_s24, %s44051_s12  ;;  %p44057_p9 = scmp.lt.s32.totalorder %s44051_s12, %s44051_s12 }
  0x4e   :  { %p44058_p10 = por %p44057_p9, %p44056_p8 }
  0x50   :  { %p44059_p11 = pnand %p44058_p10, %p44052_p7 }
  0x52   :  { %44062 = shalt.err (!%p44059_p11)
}
  0x53   :  { %88 = dma.hbm_to_vmem [thread:$0]  %s47557_s9, 512, %s83_s24, [#allocation9], %s44095_s25, %s44095_s25, %s44096_s26  }
  0x54   :  { %44085 = dma.done.wait [#allocation3], 256  }
  0x55   :  { %44086 = vsyncadd [#allocation3], 4294967040 }
  0x56   :  { %44087 = dma.done.wait [#allocation6], 2048  }
  0x57   :  { %44088 = vsyncadd [#allocation6], 4294965248 }
  0x58   :  { %44089 = dma.done.wait [#allocation9], 1536  }
  0x59   :  { %44090 = vsyncadd [#allocation9], 4294965760  ;;  %v651_v0 = vlaneseq  ;;  %vm116_vm0 = vcmask 261120   ;;  %v112_v2 = vld [vmem:[%s47551_s3] sm:$0xff]  ;;  %v113_v3 = vld [vmem:[%s47551_s3 + $0x8] sm:$0xff]  ;;  %s44100_s24 = smov 32  }
  0x5a   :  { %v114_v4 = vld [vmem:[%s47551_s3 + $0x10] sm:$0xff]  ;;  %v124_v6 = vand.u32 4294901760, %v112_v2  ;;  %v127_v7 = vand.u32 4294901760, %v113_v3  ;;  %v115_v8 = vld [vmem:[%s47551_s3 + $0x18] sm:$0xff]  ;;  %v104_v10 = vld [vmem:[%s47548_s0] sm:$0xff]  ;;  %v44101_v51 = vmov 0.0  }
  0x5b   :  { %v44255_v1 = vshrl.u32 %v651_v0, 7  ;;  %v130_v9 = vand.u32 4294901760, %v114_v4  ;;  %v105_v11 = vld [vmem:[%s47548_s0 + $0x8] sm:$0xff]  ;;  %v133_v12 = vand.u32 4294901760, %v115_v8  ;;  %v118_v13 = vsel %vm116_vm0, %v104_v10, 0  ;;  %v44280_v15 = vld [vmem:[#allocation10] sm:$0xff]  ;;  %39329 = vmatprep.subr.mxu1 %v44101_v51 }
  0x5c   :  { %v121_v14 = vsel %vm116_vm0, %v105_v11, 0  ;;  %v44282_v16 = vpack.c.bf16 %v127_v7, %v124_v6  ;;  %v44284_v17 = vand.u32 4294901760, %v118_v13  ;;  %v214_v19 = vsub.f32 %v112_v2, %v124_v6  ;;  %s44103_s27 = smov 120   ;;  %s44104_s28 = smov 96  }
  0x5d   :  { %v44267_v5 = vsub.s32 1, %v44255_v1  ;;  %v44286_v18 = vand.u32 4294901760, %v121_v14  ;;  %v44288_v20 = vpack.c.bf16 %v133_v12, %v130_v9  ;;  %v221_v21 = vsub.f32 %v113_v3, %v127_v7  ;;  %s44105_s29 = smov 112   ;;  %s44106_s30 = smov 104  }
  0x5e   :  { %v228_v22 = vsub.f32 %v114_v4, %v130_v9  ;;  %v235_v23 = vsub.f32 %v115_v8, %v133_v12  ;;  %42204 = vmatprep.subr.bf16.mxu0 %v44282_v16  ;;  %v193_v24 = vsub.f32 %v118_v13, %v44284_v17  ;;  %v215_v26 = vand.u32 4294901760, %v214_v19  ;;  %s44107_s5 = smov 64   ;;  %s44108_s22 = smov 16  }
  0x5f   :  { %v203_v25 = vsub.f32 %v121_v14, %v44286_v18  ;;  %v660_v27 = vrot.slane %v44280_v15, %v44267_v5  ;;  %42206 = vmatpush3.bf16.msra.mxu0 %v44282_v16  ;;  %v222_v28 = vand.u32 4294901760, %v221_v21  ;;  %v42219_v47 = vpack.c.bf16 %v221_v21, %v214_v19  ;;  %s44109_s21 = smov 24  }
  0x60   :  { %v229_v29 = vand.u32 4294901760, %v228_v22  ;;  %v236_v30 = vand.u32 4294901760, %v235_v23  ;;  %42208 = vmatprep.subr.bf16.mxu0 %v44288_v20  ;;  %v194_v31 = vand.u32 4294901760, %v193_v24  ;;  %v216_v33 = vsub.f32 %v214_v19, %v215_v26 }
  0x61   :  { %v204_v32 = vand.u32 4294901760, %v203_v25  ;;  %662 = vrot.lane.b32.xlu0 %v660_v27, %s44100_s24  ;;  %v223_v34 = vsub.f32 %v221_v21, %v222_v28  ;;  %v42223_v48 = vpack.c.bf16 %v235_v23, %v228_v22  ;;  %v42235_v49 = vpack.c.bf16 %v222_v28, %v215_v26 }
  0x62   :  { %v230_v35 = vsub.f32 %v228_v22, %v229_v29  ;;  %v237_v36 = vsub.f32 %v235_v23, %v236_v30  ;;  %v195_v37 = vsub.f32 %v193_v24, %v194_v31  ;;  %v217_v39 = vand.u32 4294901760, %v216_v33 }
  0x63   :  { %v205_v38 = vsub.f32 %v203_v25, %v204_v32  ;;  %42210 = vmatpush3.bf16.msra.mxu0 %v44288_v20  ;;  %v224_v40 = vand.u32 4294901760, %v223_v34  ;;  %v42239_v50 = vpack.c.bf16 %v236_v30, %v229_v29  ;;  %vm44102_vm1 = vmmov 0  }
  0x64   :  { %v231_v41 = vand.u32 4294901760, %v230_v35  ;;  %v238_v42 = vand.u32 4294901760, %v237_v36  ;;  %v196_v43 = vand.u32 4294901760, %v195_v37  ;;  %39331 = vmatprep.mubr.msk.f32.mxu1 %vm44102_vm1, %v44101_v51  ;;  %v44327_v56 = vsub.s32 0, %v44255_v1 }
  0x65   :  { %v206_v44 = vand.u32 4294901760, %v205_v38  ;;  %v42211_v45 = vpack.c.bf16 %v224_v40, %v217_v39  ;;  %vm725_vm2 = vcmask 64512   ;;  %vm8088_vm5 = vcmask 130048  }
  0x66   :  { %v42215_v46 = vpack.c.bf16 %v238_v42, %v231_v41  ;;  %39271 = vmatprep.mubr.f32.mxu0 %v196_v43  ;;  %v654_v58 = vrot.slane %v44280_v15, %v44327_v56  ;;  %vm8091_vm6 = vcmask 195584   ;;  %vm13456_vm7 = vcmask 130112  }
  0x67   :  { %39272 = vmatmul.mubr.f32.vlgmr.msra.gmra.mrb[0].mxu0 %v206_v44  ;;  %42212 = vmatprep.subr.bf16.mxu0 %v42211_v45  ;;  %vm18381_vm8 = vcmask 523264  }
  0x68   :  { %42214 = vmatpush3.bf16.msra.mxu0 %v42211_v45  ;;  %39282 = vmatprep.mubr.f32.mxu0 %v44284_v17 }
  0x69   :  { %42216 = vmatprep.subr.bf16.mxu0 %v42215_v46 }
  0x6c   :  { %42218 = vmatpush3.bf16.msra.mxu0 %v42215_v46 }
  0x6d   :  { %42220 = vmatprep.subr.bf16.mxu0 %v42219_v47 }
  0x6f   :  { %39283 = vmatmul.mubr.f32.vlgmr.msra.gmra.mrb[0].mxu0 %v44286_v18 }
  0x70   :  { %42222 = vmatpush3.bf16.msra.mxu0 %v42219_v47  ;;  %39293 = vmatprep.mubr.f32.mxu0 %v193_v24 }
  0x71   :  { %42224 = vmatprep.subr.bf16.mxu0 %v42223_v48 }
  0x74   :  { %42226 = vmatpush3.bf16.msra.mxu0 %v42223_v48 }
  0x75   :  { %42228 = vmatprep.subr.bf16.mxu0 %v44282_v16 }
  0x77   :  { %39294 = vmatmul.mubr.f32.vlgmr.msra.gmra.mrb[0].mxu0 %v203_v25 }
  0x78   :  { %42230 = vmatpush3.bf16.msra.mxu0 %v44282_v16  ;;  %39304 = vmatprep.mubr.f32.mxu0 %v194_v31 }
  0x79   :  { %42232 = vmatprep.subr.bf16.mxu0 %v44288_v20 }
  0x7c   :  { %42234 = vmatpush3.bf16.msra.mxu0 %v44288_v20 }
  0x7d   :  { %42236 = vmatprep.subr.bf16.mxu0 %v42235_v49 }
  0x7f   :  { %39305 = vmatmul.mubr.f32.vlgmr.msra.gmra.mrb[0].mxu0 %v204_v32 }
  0x80   :  { %42238 = vmatpush3.bf16.msra.mxu0 %v42235_v49  ;;  %39315 = vmatprep.mubr.f32.mxu0 %v44284_v17 }
  0x81   :  { %42240 = vmatprep.subr.bf16.mxu0 %v42239_v50 }
  0x84   :  { %42242 = vmatpush3.bf16.msra.mxu0 %v42239_v50 }
  0x85   :  { %42244 = vmatprep.subr.bf16.mxu0 %v44282_v16 }
  0x87   :  { %39316 = vmatmul.mubr.f32.vlgmr.msra.gmra.mrb[0].mxu0 %v44286_v18 }
  0x88   :  { %42246 = vmatpush3.bf16.msra.mxu0 %v44282_v16  ;;  %39326 = vmatprep.mubr.f32.mxu0 %v44284_v17 }
  0x89   :  { %42248 = vmatprep.subr.bf16.mxu0 %v44288_v20 }
  0x8c   :  { %42250 = vmatpush3.bf16.msra.mxu0 %v44288_v20 }
  0x8d   :  { %39389 = vmatprep.subr.mxu0 %v44101_v51 }
  0x8f   :  { %39327 = vmatmul.mubr.f32.vlgmr.msra.gmra.mrb[0].mxu0 %v44286_v18 }
  0x90   :  { %39391 = vmatprep.mubr.msk.f32.mxu0 %vm44102_vm1, %v44101_v51 }
  0xd3   :  { %v663_v52 = vpop.permute.xlu0 %662 }
 0x162   :  { %v44319_v53 = vpop.f32.mrb[0].mxu0 }
 0x163   :  { %v44321_v54 = vpop.f32.mrb[1].mxu0  ;;  %v666_v57 = vadd.f32 %v44319_v53, %v663_v52  ;;  %v656_v59 = vadd.f32 %v44319_v53, %v654_v58 }
 0x164   :  { %v665_v55 = vadd.f32 %v663_v52, %v44321_v54  ;;  %v655_v60 = vadd.f32 %v654_v58, %v44321_v54 }
 0x165   :  { %v1178_v18 = vsel %vm725_vm2, %v656_v59, 0 }
 0x166   :  { %697 = vrot.lane.b32.xlu1 %v665_v55, %s44103_s27  ;;  %723 = vrot.lane.b32.xlu0 %v665_v55, %s44104_s28  ;;  %v726_v61 = vsel %vm725_vm2, %v655_v60, 0  ;;  %v1248_v20 = vand.u32 4294901760, %v1178_v18 }
 0x167   :  { %v796_v62 = vand.u32 4294901760, %v726_v61 }
 0x168   :  { %v1249_v22 = vsub.f32 %v1178_v18, %v1248_v20 }
 0x169   :  { %v797_v63 = vsub.f32 %v726_v61, %v796_v62 }
 0x16a   :  { %699 = vrot.lane.b32.xlu1 %v666_v57, %s44103_s27  ;;  %1176 = vrot.lane.b32.xlu0 %v666_v57, %s44104_s28  ;;  %v1250_v24 = vand.u32 4294901760, %v1249_v22 }
 0x16b   :  { %v798_v0 = vand.u32 4294901760, %v797_v63 }
 0x16c   :  { %v1251_v26 = vsub.f32 %v1249_v22, %v1250_v24 }
 0x16d   :  { %v799_v6 = vsub.f32 %v797_v63, %v798_v0 }
 0x16e   :  { %701 = vrot.lane.b32.xlu1 %v665_v55, %s44105_s29  ;;  %703 = vrot.lane.b32.xlu0 %v666_v57, %s44105_s29  ;;  %v1252_v28 = vand.u32 4294901760, %v1251_v26 }
 0x16f   :  { %v800_v10 = vand.u32 4294901760, %v799_v6 }
 0x172   :  { %685 = vrot.lane.b32.xlu0 %v656_v59, %s44103_s27  ;;  %683 = vrot.lane.b32.xlu1 %v655_v60, %s44103_s27 }
 0x1d8   :  { %v698_v2 = vpop.permute.xlu1 %697  ;;  %v724_v3 = vpop.permute.xlu0 %723 }
 0x1d9   :  { %v728_v4 = vsel %vm725_vm2, %v724_v3, 0  ;;  %1628 = vrot.lane.b32.xlu1 %v698_v2, %s44104_s28 }
 0x1da   :  { %v731_v7 = vand.u32 4294901760, %v728_v4 }
 0x1dc   :  { %v808_v8 = vsub.f32 %v728_v4, %v731_v7  ;;  %v700_v9 = vpop.permute.xlu1 %699  ;;  %39330 = vmatpush3.xpose.msra.mxu1 %v731_v7  ;;  %v1177_v13 = vpop.permute.xlu0 %1176 }
 0x1dd   :  { %2080 = vrot.lane.b32.xlu0 %v700_v9, %s44104_s28  ;;  %705 = vrot.lane.b32.xlu1 %v665_v55, %s44106_s30  ;;  %v1180_v19 = vsel %vm725_vm2, %v1177_v13, 0 }
 0x1de   :  { %v809_v11 = vand.u32 4294901760, %v808_v8  ;;  %39334 = vmatprep.subr.mxu1 %v44101_v51  ;;  %v1183_v21 = vand.u32 4294901760, %v1180_v19 }
 0x1df   :  { %39332 = vmatmul.mubr.f32.vlgmr.msra.gmra.mrb[0].mxu1 %v800_v10 }
 0x1e0   :  { %v810_v12 = vsub.f32 %v808_v8, %v809_v11  ;;  %39336 = vmatprep.mubr.msk.f32.mxu1 %vm44102_vm1, %v44101_v51  ;;  %v702_v16 = vpop.permute.xlu1 %701  ;;  %v704_v17 = vpop.permute.xlu0 %703  ;;  %v1260_v23 = vsub.f32 %v1180_v19, %v1183_v21 }
 0x1e1   :  { %707 = vrot.lane.b32.xlu0 %v666_v57, %s44106_s30  ;;  %687 = vrot.lane.b32.xlu1 %v655_v60, %s44105_s29 }
 0x1e2   :  { %v811_v14 = vand.u32 4294901760, %v810_v12  ;;  %v1261_v25 = vand.u32 4294901760, %v1260_v23 }
 0x1e4   :  { %39335 = vmatpush3.xpose.msra.mxu1 %v811_v14  ;;  %v1262_v27 = vsub.f32 %v1260_v23, %v1261_v25  ;;  %v684_v30 = vpop.permute.xlu1 %683  ;;  %v686_v32 = vpop.permute.xlu0 %685 }
 0x1e5   :  { %689 = vrot.lane.b32.xlu0 %v656_v59, %s44105_s29  ;;  %2532 = vrot.lane.b32.xlu1 %v702_v16, %s44104_s28  ;;  %v1630_v31 = vsel %vm725_vm2, %v684_v30, 0  ;;  %v2082_v34 = vsel %vm725_vm2, %v686_v32, 0 }
 0x1e6   :  { %39339 = vmatprep.subr.mxu1 %v44101_v51  ;;  %v1263_v29 = vand.u32 4294901760, %v1262_v27  ;;  %v44391_v33 = vand.u32 4294901760, %v1630_v31  ;;  %v44394_v35 = vand.u32 4294901760, %v2082_v34 }
 0x1e7   :  { %39337 = vmatmul.mubr.f32.vlgmr.msra.gmra.mrb[0].mxu1 %v796_v62 }
 0x1e8   :  { %39340 = vmatpush3.xpose.msra.mxu1 %v808_v8  ;;  %39341 = vmatprep.mubr.msk.f32.mxu1 %vm44102_vm1, %v44101_v51  ;;  %v1701_v36 = vsub.f32 %v1630_v31, %v44391_v33  ;;  %v44398_v37 = vsub.f32 %v2082_v34, %v44394_v35 }
 0x1e9   :  { %2984 = vrot.lane.b32.xlu0 %v704_v17, %s44104_s28  ;;  %691 = vrot.lane.b32.xlu1 %v655_v60, %s44106_s30 }
 0x1ea   :  { %39344 = vmatprep.subr.mxu1 %v44101_v51  ;;  %v1702_v38 = vand.u32 4294901760, %v1701_v36  ;;  %v2154_v40 = vand.u32 4294901760, %v44398_v37 }
 0x1ec   :  { %v1703_v41 = vsub.f32 %v1701_v36, %v1702_v38  ;;  %v2155_v47 = vsub.f32 %v44398_v37, %v2154_v40 }
 0x1ed   :  { %693 = vrot.lane.b32.xlu0 %v656_v59, %s44106_s30 }
 0x1ee   :  { %v1704_v49 = vand.u32 4294901760, %v1703_v41  ;;  %v2156_v59 = vand.u32 4294901760, %v2155_v47 }
 0x1ef   :  { %39342 = vmatmul.mubr.f32.vlgmr.msra.gmra.mrb[0].mxu1 %v797_v63 }
 0x1f0   :  { %39345 = vmatpush3.xpose.msra.mxu1 %v731_v7  ;;  %39346 = vmatprep.mubr.msk.f32.mxu1 %vm44102_vm1, %v44101_v51 }
 0x1f1   :  { %39349 = vmatprep.subr.mxu1 %v44101_v51 }
 0x1f7   :  { %39347 = vmatmul.mubr.f32.vlgmr.msra.gmra.mrb[0].mxu1 %v798_v0 }
 0x1f8   :  { %39350 = vmatpush3.xpose.msra.mxu1 %v809_v11  ;;  %39351 = vmatprep.mubr.msk.f32.mxu1 %vm44102_vm1, %v44101_v51 }
 0x1f9   :  { %39354 = vmatprep.subr.mxu1 %v44101_v51 }
 0x1ff   :  { %39352 = vmatmul.mubr.f32.vlgmr.msra.gmra.mrb[0].mxu1 %v796_v62 }
 0x200   :  { %39355 = vmatpush3.xpose.msra.mxu1 %v731_v7  ;;  %39356 = vmatprep.mubr.msk.f32.mxu1 %vm44102_vm1, %v44101_v51 }
 0x201   :  { %39359 = vmatprep.subr.mxu1 %v44101_v51 }
 0x207   :  { %39357 = vmatmul.mubr.f32.vlgmr.msra.gmra.mrb[0].mxu1 %v796_v62 }
 0x208   :  { %39360 = vmatpush3.xpose.msra.mxu1 %v1183_v21  ;;  %39361 = vmatprep.mubr.msk.f32.mxu1 %vm44102_vm1, %v44101_v51 }
 0x209   :  { %39364 = vmatprep.subr.mxu1 %v44101_v51 }
 0x20b   :  { %39362 = vmatmul.mubr.f32.vlgmr.msra.gmra.mrb[2].mxu1 %v1252_v28 }
 0x20c   :  { %39365 = vmatpush3.xpose.msra.mxu1 %v1263_v29  ;;  %39366 = vmatprep.mubr.msk.f32.mxu1 %vm44102_vm1, %v44101_v51 }
 0x20d   :  { %39369 = vmatprep.subr.mxu1 %v44101_v51 }
 0x213   :  { %39367 = vmatmul.mubr.f32.vlgmr.msra.gmra.mrb[2].mxu1 %v1248_v20 }
 0x214   :  { %39370 = vmatpush3.xpose.msra.mxu1 %v1260_v23  ;;  %39371 = vmatprep.mubr.msk.f32.mxu1 %vm44102_vm1, %v44101_v51 }
 0x215   :  { %39374 = vmatprep.subr.mxu1 %v44101_v51 }
 0x21b   :  { %39372 = vmatmul.mubr.f32.vlgmr.msra.gmra.mrb[2].mxu1 %v1249_v22 }
 0x21c   :  { %39375 = vmatpush3.xpose.msra.mxu1 %v1183_v21  ;;  %39376 = vmatprep.mubr.msk.f32.mxu1 %vm44102_vm1, %v44101_v51 }
 0x21d   :  { %39379 = vmatprep.subr.mxu1 %v44101_v51 }
 0x223   :  { %39377 = vmatmul.mubr.f32.vlgmr.msra.gmra.mrb[2].mxu1 %v1250_v24 }
 0x224   :  { %39380 = vmatpush3.xpose.msra.mxu1 %v1261_v25  ;;  %39381 = vmatprep.mubr.msk.f32.mxu1 %vm44102_vm1, %v44101_v51 }
 0x225   :  { %39384 = vmatprep.subr.mxu1 %v44101_v51 }
 0x22b   :  { %39382 = vmatmul.mubr.f32.vlgmr.msra.gmra.mrb[2].mxu1 %v1248_v20 }
 0x22c   :  { %39385 = vmatpush3.xpose.msra.mxu1 %v1183_v21  ;;  %39386 = vmatprep.mubr.msk.f32.mxu1 %vm44102_vm1, %v44101_v51 }
 0x22d   :  { %39419 = vmatprep.subr.mxu1 %v44101_v51 }
 0x233   :  { %39387 = vmatmul.mubr.f32.vlgmr.msra.gmra.mrb[2].mxu1 %v1248_v20 }
 0x234   :  { %39421 = vmatprep.mubr.msk.f32.mxu1 %vm44102_vm1, %v44101_v51 }
 0x24b   :  { %v1629_v39 = vpop.permute.xlu1 %1628 }
 0x24c   :  { %v1632_v42 = vsel %vm725_vm2, %v1629_v39, 0 }
 0x24d   :  { %v44402_v43 = vand.u32 4294901760, %v1632_v42 }
 0x24f   :  { %v1712_v44 = vsub.f32 %v1632_v42, %v44402_v43  ;;  %v2081_v45 = vpop.permute.xlu0 %2080  ;;  %39390 = vmatpush3.xpose.msra.mxu0 %v44402_v43  ;;  %v706_v46 = vpop.permute.xlu1 %705 }
 0x250   :  { %v2084_v48 = vsel %vm725_vm2, %v2081_v45, 0  ;;  %3436 = vrot.lane.b32.xlu1 %v706_v46, %s44104_s28  ;;  %39394 = vmatprep.subr.mxu0 %v44101_v51 }
 0x251   :  { %v1713_v50 = vand.u32 4294901760, %v1712_v44  ;;  %v44412_v52 = vand.u32 4294901760, %v2084_v48 }
 0x252   :  { %39392 = vmatmul.mubr.f32.vlgmr.msra.gmra.mrb[2].mxu0 %v1704_v49 }
 0x253   :  { %v1714_v55 = vsub.f32 %v1712_v44, %v1713_v50  ;;  %v2164_v57 = vsub.f32 %v2084_v48, %v44412_v52  ;;  %v708_v58 = vpop.permute.xlu0 %707  ;;  %39420 = vmatpush3.xpose.msra.mxu1 %v44412_v52  ;;  %39396 = vmatprep.mubr.msk.f32.mxu0 %vm44102_vm1, %v44101_v51  ;;  %v688_v0 = vpop.permute.xlu1 %687 }
 0x254   :  { %3888 = vrot.lane.b32.xlu0 %v708_v58, %s44104_s28  ;;  %39424 = vmatprep.subr.mxu1 %v44101_v51  ;;  %v2534_v4 = vsel %vm725_vm2, %v688_v0, 0 }
 0x255   :  { %v2165_v60 = vand.u32 4294901760, %v2164_v57  ;;  %v1715_v61 = vand.u32 4294901760, %v1714_v55  ;;  %v44445_v8 = vand.u32 4294901760, %v2534_v4 }
 0x256   :  { %39422 = vmatmul.mubr.f32.vlgmr.msra.gmra.mrb[4].mxu1 %v2156_v59 }
 0x257   :  { %v2166_v62 = vsub.f32 %v2164_v57, %v2165_v60  ;;  %39395 = vmatpush3.xpose.msra.mxu0 %v1715_v61  ;;  %39426 = vmatprep.mubr.msk.f32.mxu1 %vm44102_vm1, %v44101_v51  ;;  %v690_v2 = vpop.permute.xlu0 %689  ;;  %v2533_v3 = vpop.permute.xlu1 %2532  ;;  %v2605_v12 = vsub.f32 %v2534_v4, %v44445_v8 }
 0x258   :  { %39399 = vmatprep.subr.mxu0 %v44101_v51  ;;  %v2536_v6 = vsel %vm725_vm2, %v2533_v3, 0  ;;  %v2986_v9 = vsel %vm725_vm2, %v690_v2, 0 }
 0x259   :  { %v2167_v63 = vand.u32 4294901760, %v2166_v62  ;;  %v44449_v10 = vand.u32 4294901760, %v2536_v6  ;;  %v44457_v13 = vand.u32 4294901760, %v2986_v9  ;;  %v2606_v17 = vand.u32 4294901760, %v2605_v12 }
 0x25a   :  { %39397 = vmatmul.mubr.f32.vlgmr.msra.gmra.mrb[2].mxu0 %v44391_v33 }
 0x25b   :  { %39400 = vmatpush3.xpose.msra.mxu0 %v1712_v44  ;;  %39425 = vmatpush3.xpose.msra.mxu1 %v2167_v63  ;;  %v2985_v7 = vpop.permute.xlu0 %2984  ;;  %v2616_v14 = vsub.f32 %v2536_v6, %v44449_v10  ;;  %v3057_v18 = vsub.f32 %v2986_v9, %v44457_v13  ;;  %v2607_v21 = vsub.f32 %v2605_v12, %v2606_v17  ;;  %v692_v31 = vpop.permute.xlu1 %691  ;;  %v44555_v63 = vld [vmem:[%s47550_s2] sm:$0xff]  ;;  %v44596_v6 = vld [vmem:[%s47550_s2 + $0x8] sm:$0xff] }
 0x25c   :  { %39429 = vmatprep.subr.mxu1 %v44101_v51  ;;  %39401 = vmatprep.mubr.msk.f32.mxu0 %vm44102_vm1, %v44101_v51  ;;  %v2988_v11 = vsel %vm725_vm2, %v2985_v7, 0  ;;  %v3438_v32 = vsel %vm725_vm2, %v692_v31, 0  ;;  %vm4340_vm3 = vcmp.gt.f32.partialorder %v44555_v63, 0.0  ;;  %vm4341_vm4 = vcmp.gt.f32.partialorder %v44596_v6, 0.0 }
 0x25d   :  { %39404 = vmatprep.subr.mxu0 %v44101_v51  ;;  %v44461_v16 = vand.u32 4294901760, %v2988_v11  ;;  %v2617_v19 = vand.u32 4294901760, %v2616_v14  ;;  %v3058_v22 = vand.u32 4294901760, %v3057_v18  ;;  %v2608_v26 = vand.u32 4294901760, %v2607_v21 }
 0x25e   :  { %39427 = vmatmul.mubr.f32.vlgmr.msra.gmra.mrb[4].mxu1 %v44394_v35  ;;  %v44530_v34 = vand.u32 4294901760, %v3438_v32 }
 0x25f   :  { %39430 = vmatpush3.xpose.msra.mxu1 %v2164_v57  ;;  %39431 = vmatprep.mubr.msk.f32.mxu1 %vm44102_vm1, %v44101_v51  ;;  %v3068_v20 = vsub.f32 %v2988_v11, %v44461_v16  ;;  %v2618_v23 = vsub.f32 %v2616_v14, %v2617_v19  ;;  %v3059_v25 = vsub.f32 %v3057_v18, %v3058_v22  ;;  %v44603_v11 = vsub.s32 2, %v44255_v1 }
 0x260   :  { %39434 = vmatprep.subr.mxu1 %v44101_v51 }
 0x261   :  { %v3069_v24 = vand.u32 4294901760, %v3068_v20  ;;  %v2619_v28 = vand.u32 4294901760, %v2618_v23  ;;  %v3060_v29 = vand.u32 4294901760, %v3059_v25 }
 0x262   :  { %39402 = vmatmul.mubr.f32.vlgmr.msra.gmra.mrb[2].mxu0 %v1701_v36  ;;  %v3509_v36 = vsub.f32 %v3438_v32, %v44530_v34 }
 0x263   :  { %39405 = vmatpush3.xpose.msra.mxu0 %v44402_v43  ;;  %39406 = vmatprep.mubr.msk.f32.mxu0 %vm44102_vm1, %v44101_v51  ;;  %v3070_v27 = vsub.f32 %v3068_v20, %v3069_v24 }
 0x264   :  { %39409 = vmatprep.subr.mxu0 %v44101_v51 }
 0x265   :  { %v3071_v30 = vand.u32 4294901760, %v3070_v27 }
 0x266   :  { %39432 = vmatmul.mubr.f32.vlgmr.msra.gmra.mrb[4].mxu1 %v44398_v37 }
 0x267   :  { %39435 = vmatpush3.xpose.msra.mxu1 %v44412_v52  ;;  %39436 = vmatprep.mubr.msk.f32.mxu1 %vm44102_vm1, %v44101_v51 }
 0x268   :  { %39439 = vmatprep.subr.mxu1 %v44101_v51 }
 0x26a   :  { %39407 = vmatmul.mubr.f32.vlgmr.msra.gmra.mrb[2].mxu0 %v1702_v38  ;;  %v3510_v38 = vand.u32 4294901760, %v3509_v36 }
 0x26b   :  { %39410 = vmatpush3.xpose.msra.mxu0 %v1713_v50  ;;  %39411 = vmatprep.mubr.msk.f32.mxu0 %vm44102_vm1, %v44101_v51 }
 0x26c   :  { %39414 = vmatprep.subr.mxu0 %v44101_v51  ;;  %v3511_v41 = vsub.f32 %v3509_v36, %v3510_v38 }
 0x26e   :  { %39437 = vmatmul.mubr.f32.vlgmr.msra.gmra.mrb[4].mxu1 %v2154_v40  ;;  %v3512_v49 = vand.u32 4294901760, %v3511_v41 }
 0x26f   :  { %39440 = vmatpush3.xpose.msra.mxu1 %v2165_v60  ;;  %39441 = vmatprep.mubr.msk.f32.mxu1 %vm44102_vm1, %v44101_v51 }
 0x270   :  { %39444 = vmatprep.subr.mxu1 %v44101_v51 }
 0x272   :  { %39412 = vmatmul.mubr.f32.vlgmr.msra.gmra.mrb[2].mxu0 %v44391_v33 }
 0x273   :  { %39415 = vmatpush3.xpose.msra.mxu0 %v44402_v43  ;;  %39416 = vmatprep.mubr.msk.f32.mxu0 %vm44102_vm1, %v44101_v51 }
 0x274   :  { %39449 = vmatprep.subr.mxu0 %v44101_v51 }
 0x276   :  { %39442 = vmatmul.mubr.f32.vlgmr.msra.gmra.mrb[4].mxu1 %v44394_v35 }
 0x277   :  { %39445 = vmatpush3.xpose.msra.mxu1 %v44412_v52  ;;  %39446 = vmatprep.mubr.msk.f32.mxu1 %vm44102_vm1, %v44101_v51 }
 0x278   :  { %39479 = vmatprep.subr.mxu1 %v44101_v51 }
 0x27a   :  { %39417 = vmatmul.mubr.f32.vlgmr.msra.gmra.mrb[2].mxu0 %v44391_v33  ;;  %v694_v33 = vpop.permute.xlu0 %693 }
 0x27b   :  { %39450 = vmatpush3.xpose.msra.mxu0 %v44449_v10  ;;  %39451 = vmatprep.mubr.msk.f32.mxu0 %vm44102_vm1, %v44101_v51 }
 0x27c   :  { %39454 = vmatprep.subr.mxu0 %v44101_v51 }
 0x27e   :  { %39447 = vmatmul.mubr.f32.vlgmr.msra.gmra.mrb[4].mxu1 %v44394_v35  ;;  %39452 = vmatmul.mubr.f32.vlgmr.msra.gmra.mrb[4].mxu0 %v2608_v26  ;;  %v3890_v35 = vsel %vm725_vm2, %v694_v33, 0 }
 0x27f   :  { %39455 = vmatpush3.xpose.msra.mxu0 %v2619_v28  ;;  %39480 = vmatpush3.xpose.msra.mxu1 %v44461_v16  ;;  %v44534_v37 = vand.u32 4294901760, %v3890_v35 }
 0x280   :  { %39481 = vmatprep.mubr.msk.f32.mxu1 %vm44102_vm1, %v44101_v51  ;;  %39484 = vmatprep.subr.mxu1 %v44101_v51 }
 0x281   :  { %39456 = vmatprep.mubr.msk.f32.mxu0 %vm44102_vm1, %v44101_v51  ;;  %39459 = vmatprep.subr.mxu0 %v44101_v51  ;;  %v3961_v39 = vsub.f32 %v3890_v35, %v44534_v37 }
 0x282   :  { %39482 = vmatmul.mubr.f32.vlgmr.msra.gmra.mrb[6].mxu1 %v3060_v29 }
 0x283   :  { %39485 = vmatpush3.xpose.msra.mxu1 %v3071_v30  ;;  %39486 = vmatprep.mubr.msk.f32.mxu1 %vm44102_vm1, %v44101_v51  ;;  %v3962_v42 = vand.u32 4294901760, %v3961_v39 }
 0x284   :  { %39489 = vmatprep.subr.mxu1 %v44101_v51 }
 0x285   :  { %v3963_v47 = vsub.f32 %v3961_v39, %v3962_v42 }
 0x286   :  { %39457 = vmatmul.mubr.f32.vlgmr.msra.gmra.mrb[4].mxu0 %v44445_v8 }
 0x287   :  { %39460 = vmatpush3.xpose.msra.mxu0 %v2616_v14  ;;  %39461 = vmatprep.mubr.msk.f32.mxu0 %vm44102_vm1, %v44101_v51  ;;  %v3964_v58 = vand.u32 4294901760, %v3963_v47 }
 0x288   :  { %39464 = vmatprep.subr.mxu0 %v44101_v51 }
 0x28a   :  { %39487 = vmatmul.mubr.f32.vlgmr.msra.gmra.mrb[6].mxu1 %v44457_v13 }
 0x28b   :  { %39490 = vmatpush3.xpose.msra.mxu1 %v3068_v20  ;;  %39491 = vmatprep.mubr.msk.f32.mxu1 %vm44102_vm1, %v44101_v51 }
 0x28c   :  { %39494 = vmatprep.subr.mxu1 %v44101_v51 }
 0x28e   :  { %39462 = vmatmul.mubr.f32.vlgmr.msra.gmra.mrb[4].mxu0 %v2605_v12  ;;  %v670_v12 = vrot.slane %v44280_v15, %v44603_v11 }
 0x28f   :  { %39465 = vmatpush3.xpose.msra.mxu0 %v44449_v10  ;;  %39466 = vmatprep.mubr.msk.f32.mxu0 %vm44102_vm1, %v44101_v51 }
 0x290   :  { %39469 = vmatprep.subr.mxu0 %v44101_v51 }
 0x292   :  { %39492 = vmatmul.mubr.f32.vlgmr.msra.gmra.mrb[6].mxu1 %v3057_v18 }
 0x293   :  { %39495 = vmatpush3.xpose.msra.mxu1 %v44461_v16  ;;  %39496 = vmatprep.mubr.msk.f32.mxu1 %vm44102_vm1, %v44101_v51 }
 0x294   :  { %39499 = vmatprep.subr.mxu1 %v44101_v51 }
 0x296   :  { %39467 = vmatmul.mubr.f32.vlgmr.msra.gmra.mrb[4].mxu0 %v2606_v17 }
 0x297   :  { %39470 = vmatpush3.xpose.msra.mxu0 %v2617_v19  ;;  %39471 = vmatprep.mubr.msk.f32.mxu0 %vm44102_vm1, %v44101_v51 }
 0x298   :  { %39474 = vmatprep.subr.mxu0 %v44101_v51 }
 0x29a   :  { %39497 = vmatmul.mubr.f32.vlgmr.msra.gmra.mrb[6].mxu1 %v3058_v22 }
 0x29b   :  { %39500 = vmatpush3.xpose.msra.mxu1 %v3069_v24  ;;  %39501 = vmatprep.mubr.msk.f32.mxu1 %vm44102_vm1, %v44101_v51 }
 0x29c   :  { %39504 = vmatprep.subr.mxu1 %v44101_v51 }
 0x29e   :  { %39472 = vmatmul.mubr.f32.vlgmr.msra.gmra.mrb[4].mxu0 %v44445_v8 }
 0x29f   :  { %39475 = vmatpush3.xpose.msra.mxu0 %v44449_v10  ;;  %39476 = vmatprep.mubr.msk.f32.mxu0 %vm44102_vm1, %v44101_v51 }
 0x2a0   :  { %39509 = vmatprep.subr.mxu0 %v44101_v51 }
 0x2a2   :  { %39502 = vmatmul.mubr.f32.vlgmr.msra.gmra.mrb[6].mxu1 %v44457_v13 }
 0x2a3   :  { %39505 = vmatpush3.xpose.msra.mxu1 %v44461_v16  ;;  %39506 = vmatprep.mubr.msk.f32.mxu1 %vm44102_vm1, %v44101_v51 }
 0x2a4   :  { %39539 = vmatprep.subr.mxu1 %v44101_v51 }
 0x2a6   :  { %39477 = vmatmul.mubr.f32.vlgmr.msra.gmra.mrb[4].mxu0 %v44445_v8 }
 0x2a7   :  { %39511 = vmatprep.mubr.msk.f32.mxu0 %vm44102_vm1, %v44101_v51 }
 0x2aa   :  { %39507 = vmatmul.mubr.f32.vlgmr.msra.gmra.mrb[6].mxu1 %v44457_v13 }
 0x2ab   :  { %39541 = vmatprep.mubr.msk.f32.mxu1 %vm44102_vm1, %v44101_v51 }
 0x2c2   :  { %v3437_v40 = vpop.permute.xlu1 %3436 }
 0x2c3   :  { %v3440_v43 = vsel %vm725_vm2, %v3437_v40, 0 }
 0x2c4   :  { %v3443_v44 = vand.u32 4294901760, %v3440_v43 }
 0x2c6   :  { %v3520_v45 = vsub.f32 %v3440_v43, %v3443_v44  ;;  %v3889_v46 = vpop.permute.xlu0 %3888  ;;  %39510 = vmatpush3.xpose.msra.mxu0 %v3443_v44 }
 0x2c7   :  { %v3892_v48 = vsel %vm725_vm2, %v3889_v46, 0  ;;  %39514 = vmatprep.subr.mxu0 %v44101_v51 }
 0x2c8   :  { %v3521_v50 = vand.u32 4294901760, %v3520_v45  ;;  %v3895_v52 = vand.u32 4294901760, %v3892_v48 }
 0x2c9   :  { %39512 = vmatmul.mubr.f32.vlgmr.msra.gmra.mrb[6].mxu0 %v3512_v49 }
 0x2ca   :  { %v3522_v55 = vsub.f32 %v3520_v45, %v3521_v50  ;;  %v3972_v57 = vsub.f32 %v3892_v48, %v3895_v52  ;;  %39540 = vmatpush3.xpose.msra.mxu1 %v3895_v52  ;;  %39516 = vmatprep.mubr.msk.f32.mxu0 %vm44102_vm1, %v44101_v51 }
 0x2cb   :  { %39544 = vmatprep.subr.mxu1 %v44101_v51 }
 0x2cc   :  { %v3973_v59 = vand.u32 4294901760, %v3972_v57  ;;  %v3523_v60 = vand.u32 4294901760, %v3522_v55 }
 0x2cd   :  { %39542 = vmatmul.mubr.f32.vlgmr.msra.gmra.mrb[8].mxu1 %v3964_v58 }
 0x2ce   :  { %v3974_v61 = vsub.f32 %v3972_v57, %v3973_v59  ;;  %39515 = vmatpush3.xpose.msra.mxu0 %v3523_v60  ;;  %39546 = vmatprep.mubr.msk.f32.mxu1 %vm44102_vm1, %v44101_v51 }
 0x2cf   :  { %39519 = vmatprep.subr.mxu0 %v44101_v51 }
 0x2d0   :  { %v3975_v62 = vand.u32 4294901760, %v3974_v61 }
 0x2d1   :  { %39517 = vmatmul.mubr.f32.vlgmr.msra.gmra.mrb[6].mxu0 %v44530_v34 }
 0x2d2   :  { %39520 = vmatpush3.xpose.msra.mxu0 %v3520_v45  ;;  %39545 = vmatpush3.xpose.msra.mxu1 %v3975_v62 }
 0x2d3   :  { %39549 = vmatprep.subr.mxu1 %v44101_v51  ;;  %39521 = vmatprep.mubr.msk.f32.mxu0 %vm44102_vm1, %v44101_v51 }
 0x2d4   :  { %39524 = vmatprep.subr.mxu0 %v44101_v51 }
 0x2d5   :  { %39547 = vmatmul.mubr.f32.vlgmr.msra.gmra.mrb[8].mxu1 %v44534_v37 }
 0x2d6   :  { %39550 = vmatpush3.xpose.msra.mxu1 %v3972_v57  ;;  %39551 = vmatprep.mubr.msk.f32.mxu1 %vm44102_vm1, %v44101_v51 }
 0x2d7   :  { %39554 = vmatprep.subr.mxu1 %v44101_v51 }
 0x2d9   :  { %39522 = vmatmul.mubr.f32.vlgmr.msra.gmra.mrb[6].mxu0 %v3509_v36 }
 0x2da   :  { %39525 = vmatpush3.xpose.msra.mxu0 %v3443_v44  ;;  %v1172_v0 = vpop.f32.mrb[0].mxu1  ;;  %39526 = vmatprep.mubr.msk.f32.mxu0 %vm44102_vm1, %v44101_v51 }
 0x2db   :  { %v44565_v2 = vsel %vm4340_vm3, %v1172_v0, -1.7014117e+38  ;;  %v39358_v3 = vpop.f32.mrb[1].mxu1  ;;  %39529 = vmatprep.subr.mxu0 %v44101_v51 }
 0x2dc   :  { %v4350_v4 = vsel %vm725_vm2, %v44565_v2, -inf }
 0x2dd   :  { %39552 = vmatmul.mubr.f32.vlgmr.msra.gmra.mrb[8].mxu1 %v3961_v39  ;;  %4351 = vmax.xlane.f32.xlu1 %v4350_v4 }
 0x2de   :  { %39555 = vmatpush3.xpose.msra.mxu1 %v3895_v52  ;;  %39556 = vmatprep.mubr.msk.f32.mxu1 %vm44102_vm1, %v44101_v51 }
 0x2df   :  { %39559 = vmatprep.subr.mxu1 %v44101_v51 }
 0x2e1   :  { %39527 = vmatmul.mubr.f32.vlgmr.msra.gmra.mrb[6].mxu0 %v3510_v38 }
 0x2e2   :  { %39530 = vmatpush3.xpose.msra.mxu0 %v3521_v50  ;;  %39531 = vmatprep.mubr.msk.f32.mxu0 %vm44102_vm1, %v44101_v51 }
 0x2e3   :  { %39534 = vmatprep.subr.mxu0 %v44101_v51 }
 0x2e5   :  { %39557 = vmatmul.mubr.f32.vlgmr.msra.gmra.mrb[8].mxu1 %v3962_v42 }
 0x2e6   :  { %39560 = vmatpush3.xpose.msra.mxu1 %v3973_v59  ;;  %39561 = vmatprep.mubr.msk.f32.mxu1 %vm44102_vm1, %v44101_v51 }
 0x2e7   :  { %39564 = vmatprep.subr.mxu1 %v44101_v51 }
 0x2e9   :  { %39532 = vmatmul.mubr.f32.vlgmr.msra.gmra.mrb[6].mxu0 %v44530_v34 }
 0x2ea   :  { %39535 = vmatpush3.xpose.msra.mxu0 %v3443_v44  ;;  %39536 = vmatprep.mubr.msk.f32.mxu0 %vm44102_vm1, %v44101_v51 }
 0x2eb   :  { %39569 = vmatprep.subr.mxu0 %v44101_v51 }
 0x2ed   :  { %39562 = vmatmul.mubr.f32.vlgmr.msra.gmra.mrb[8].mxu1 %v44534_v37 }
 0x2ee   :  { %39565 = vmatpush3.xpose.msra.mxu1 %v3895_v52  ;;  %39566 = vmatprep.mubr.msk.f32.mxu1 %vm44102_vm1, %v44101_v51 }
 0x2ef   :  { %39599 = vmatprep.subr.mxu1 %v44101_v51 }
 0x2f1   :  { %39537 = vmatmul.mubr.f32.vlgmr.msra.gmra.mrb[6].mxu0 %v44530_v34 }
 0x2f2   :  { %39571 = vmatprep.mubr.msk.f32.mxu0 %vm44102_vm1, %v44101_v51 }
 0x2f5   :  { %39567 = vmatmul.mubr.f32.vlgmr.msra.gmra.mrb[8].mxu1 %v44534_v37 }
 0x2f6   :  { %39601 = vmatprep.mubr.msk.f32.mxu1 %vm44102_vm1, %v44101_v51 }
 0x306   :  { %v1624_v7 = vpop.f32.mrb[2].mxu1 }
 0x307   :  { %v4343_v8 = vsel %vm4341_vm4, %v1624_v7, -1.7014117e+38  ;;  %v39388_v9 = vpop.f32.mrb[3].mxu1 }
 0x308   :  { %v4353_v10 = vsel %vm725_vm2, %v4343_v8, -inf }
 0x309   :  { %4354 = vmax.xlane.f32.xlu0 %v4353_v10 }
 0x31f   :  { %672 = vrot.lane.b32.xlu0 %v670_v12, %s44107_s5 }
 0x34d   :  { %v2076_v13 = vpop.f32.mrb[2].mxu0 }
 0x34e   :  { %v44610_v14 = vsel %vm4340_vm3, %v2076_v13, -1.7014117e+38  ;;  %v39418_v16 = vpop.f32.mrb[3].mxu0 }
 0x34f   :  { %v4356_v17 = vsel %vm725_vm2, %v44610_v14, -inf }
 0x350   :  { %4357 = vmax.xlane.f32.xlu0 %v4356_v17 }
 0x351   :  { %v2528_v18 = vpop.f32.mrb[4].mxu1 }
 0x352   :  { %v39448_v19 = vpop.f32.mrb[5].mxu1 }
 0x36a   :  { %v4352_v35 = vpop.xlane.xlu1 %4351 }
 0x36b   :  { %v4374_v43 = vsub.f32 %v44565_v2, %v4352_v35 }
 0x36d   :  { %v4382_v44 = vmul.f32 1.442695, %v4374_v43 }
 0x36f   :  { %43789 = vpow2.f32 %v4382_v44 }
 0x379   :  { %v2980_v20 = vpop.f32.mrb[4].mxu0  ;;  %v43790_v47 = vpop.eup %43789 }
 0x37a   :  { %v39478_v21 = vpop.f32.mrb[5].mxu0  ;;  %v4398_v48 = vsel %vm725_vm2, %v43790_v47, 0.0  ;;  %v4346_v52 = vsel %vm4340_vm3, %v2980_v20, -1.7014117e+38 }
 0x37b   :  { %v4362_v55 = vsel %vm725_vm2, %v4346_v52, -inf }
 0x37d   :  { %v3432_v22 = vpop.f32.mrb[6].mxu1 }
 0x37e   :  { %v39508_v23 = vpop.f32.mrb[7].mxu1  ;;  %v4347_v49 = vsel %vm4341_vm4, %v3432_v22, -1.7014117e+38 }
 0x37f   :  { %v4365_v50 = vsel %vm725_vm2, %v4347_v49, -inf }
 0x396   :  { %v4355_v15 = vpop.xlane.xlu0 %4354 }
 0x397   :  { %v4375_v45 = vsub.f32 %v4343_v8, %v4355_v15 }
 0x399   :  { %v4384_v46 = vmul.f32 1.442695, %v4375_v45 }
 0x39a   :  { %v673_v24 = vpop.permute.xlu0 %672 }
 0x39b   :  { %v44615_v25 = vadd.f32 %v673_v24, %v44321_v54  ;;  %v44618_v26 = vadd.f32 %v44319_v53, %v673_v24  ;;  %v4345_v54 = vsel %vm4341_vm4, %v2528_v18, -1.7014117e+38  ;;  %43791 = vpow2.f32 %v4384_v46 }
 0x39c   :  { %v4359_v53 = vsel %vm725_vm2, %v4345_v54, -inf }
 0x39d   :  { %713 = vrot.lane.b32.xlu0 %v44618_v26, %s44103_s27  ;;  %711 = vrot.lane.b32.xlu1 %v44615_v25, %s44103_s27 }
 0x3a1   :  { %4446 = vrot.lane.b32.xlu0 %v44615_v25, %s44107_s5 }
 0x3a5   :  { %4898 = vrot.lane.b32.xlu0 %v44618_v26, %s44107_s5  ;;  %v43792_v57 = vpop.eup %43791 }
 0x3a6   :  { %v4401_v58 = vsel %vm725_vm2, %v43792_v57, 0.0 }
 0x3a9   :  { %717 = vrot.lane.b32.xlu0 %v44618_v26, %s44105_s29 }
 0x3c1   :  { %4360 = vmax.xlane.f32.xlu1 %v4359_v53 }
 0x3c4   :  { %v3884_v27 = vpop.f32.mrb[6].mxu0 }
 0x3c5   :  { %v39538_v28 = vpop.f32.mrb[7].mxu0  ;;  %v44641_v33 = vsel %vm4340_vm3, %v3884_v27, -1.7014117e+38 }
 0x3c6   :  { %v4368_v34 = vsel %vm725_vm2, %v44641_v33, -inf }
 0x3c8   :  { %v4336_v29 = vpop.f32.mrb[8].mxu1 }
 0x3c9   :  { %v44635_v30 = vsel %vm4341_vm4, %v4336_v29, -1.7014117e+38  ;;  %v39568_v31 = vpop.f32.mrb[9].mxu1 }
 0x3ca   :  { %v4371_v32 = vsel %vm725_vm2, %v44635_v30, -inf }
 0x3cb   :  { %4372 = vmax.xlane.f32.xlu0 %v4371_v32 }
 0x3cf   :  { %4369 = vmax.xlane.f32.xlu0 %v4368_v34 }
 0x3d2   :  { %715 = vrot.lane.b32.xlu1 %v44615_v25, %s44105_s29 }
 0x3dd   :  { %v4358_v36 = vpop.xlane.xlu0 %4357 }
 0x3de   :  { %v4376_v2 = vsub.f32 %v44610_v14, %v4358_v36 }
 0x3e0   :  { %v4386_v3 = vmul.f32 1.442695, %v4376_v2 }
 0x40f   :  { %v712_v37 = vpop.permute.xlu1 %711  ;;  %v714_v38 = vpop.permute.xlu0 %713 }
 0x410   :  { %5350 = vrot.lane.b32.xlu1 %v712_v37, %s44107_s5 }
 0x413   :  { %v4447_v39 = vpop.permute.xlu0 %4446 }
 0x414   :  { %v44648_v40 = vand.u32 4294901760, %v4447_v39 }
 0x416   :  { %39570 = vmatpush3.msra.mxu0 %v44648_v40  ;;  %v4530_v22 = vsub.f32 %v4447_v39, %v44648_v40 }
 0x417   :  { %v44651_v41 = vpop.permute.xlu0 %4898  ;;  %39574 = vmatprep.subr.mxu0 %v44101_v51 }
 0x418   :  { %v44655_v42 = vand.u32 4294901760, %v44651_v41 }
 0x41a   :  { %39600 = vmatpush3.msra.mxu1 %v44655_v42 }
 0x41b   :  { %39604 = vmatprep.subr.mxu1 %v44101_v51  ;;  %v718_v43 = vpop.permute.xlu0 %717 }
 0x434   :  { %4399 = vadd.xlane.f32.xlu1 %v4398_v48 }
 0x438   :  { %4366 = vmax.xlane.f32.xlu1 %v4365_v50 }
 0x43c   :  { %4363 = vmax.xlane.f32.xlu1 %v4362_v55 }
 0x440   :  { %4402 = vadd.xlane.f32.xlu1 %v4401_v58 }
 0x44e   :  { %v4361_v59 = vpop.xlane.xlu1 %4360 }
 0x44f   :  { %v4377_v60 = vsub.f32 %v4345_v54, %v4361_v59 }
 0x451   :  { %v4388_v61 = vmul.f32 1.442695, %v4377_v60  ;;  %5802 = vrot.lane.b32.xlu1 %v714_v38, %s44107_s5  ;;  %v4982_v38 = vsub.f32 %v44651_v41, %v44655_v42 }
 0x452   :  { %v44682_v8 = vpop.permute.xlu1 %715 }
 0x453   :  { %43793 = vpow2.f32 %v4388_v61  ;;  %v4983_v46 = vand.u32 4294901760, %v4982_v38 }
 0x454   :  { %43795 = vpow2.f32 %v4386_v3 }
 0x455   :  { %v4984_v41 = vsub.f32 %v4982_v38, %v4983_v46 }
 0x458   :  { %v4373_v48 = vpop.xlane.xlu0 %4372 }
 0x459   :  { %v4381_v59 = vsub.f32 %v44635_v30, %v4373_v48 }
 0x45c   :  { %v4370_v55 = vpop.xlane.xlu0 %4369 }
 0x45d   :  { %v44669_v62 = vpop.eup %43793  ;;  %v4380_v2 = vsub.f32 %v44641_v33, %v4370_v55 }
 0x45e   :  { %v4407_v0 = vsel %vm725_vm2, %v44669_v62, 0.0  ;;  %v44674_v4 = vpop.eup %43795 }
 0x45f   :  { %4408 = vadd.xlane.f32.xlu0 %v4407_v0  ;;  %v4404_v7 = vsel %vm725_vm2, %v44674_v4, 0.0  ;;  %v4396_v0 = vmul.f32 1.442695, %v4381_v59  ;;  %v4394_v3 = vmul.f32 1.442695, %v4380_v2 }
 0x475   :  { %4405 = vadd.xlane.f32.xlu1 %v4404_v7  ;;  %719 = vrot.lane.b32.xlu0 %v44615_v25, %s44106_s30  ;;  %v4531_v25 = vand.u32 4294901760, %v4530_v22 }
 0x477   :  { %v4532_v28 = vsub.f32 %v4530_v22, %v4531_v25 }
 0x479   :  { %v4533_v37 = vand.u32 4294901760, %v4532_v28 }
 0x482   :  { %v44684_v9 = vpop.permute.xlu1 %5350 }
 0x486   :  { %721 = vrot.lane.b32.xlu1 %v44618_v26, %s44106_s30 }
 0x4c1   :  { %v4400_v10 = vpop.xlane.xlu1 %4399 }
 0x4c2   :  { %43797 = vrcp.f32 %v4400_v10 }
 0x4c5   :  { %v4367_v12 = vpop.xlane.xlu1 %4366 }
 0x4c6   :  { %v4379_v13 = vsub.f32 %v4347_v49, %v4367_v12 }
 0x4c8   :  { %v4392_v14 = vmul.f32 1.442695, %v4379_v13 }
 0x4c9   :  { %v4364_v16 = vpop.xlane.xlu1 %4363 }
 0x4ca   :  { %43799 = vpow2.f32 %v4392_v14  ;;  %v4378_v17 = vsub.f32 %v4346_v52, %v4364_v16 }
 0x4cc   :  { %v43798_v18 = vpop.eup %43797  ;;  %v4390_v19 = vmul.f32 1.442695, %v4378_v17 }
 0x4cd   :  { %v4430_v20 = vmul.f32 %v43798_v18, %v43790_v47  ;;  %v4403_v21 = vpop.xlane.xlu1 %4402 }
 0x4ce   :  { %43801 = vpow2.f32 %v4390_v19 }
 0x4cf   :  { %v4438_v23 = vmul.f32 %v4430_v20, %v44555_v63  ;;  %43803 = vrcp.f32 %v4403_v21 }
 0x4d1   :  { %v4450_v15 = vsel %vm725_vm2, %v4438_v23, 0  ;;  %v5803_v33 = vpop.permute.xlu1 %5802 }
 0x4d2   :  { %v44689_v24 = vand.u32 4294901760, %v4450_v15  ;;  %v44753_v10 = vand.u32 4294901760, %v5803_v33 }
 0x4d4   :  { %v44691_v26 = vpop.eup %43799  ;;  %v4519_v54 = vsub.f32 %v4450_v15, %v44689_v24  ;;  %v5886_v14 = vsub.f32 %v5803_v33, %v44753_v10 }
 0x4d5   :  { %v4413_v53 = vsel %vm725_vm2, %v44691_v26, 0.0 }
 0x4d6   :  { %4414 = vadd.xlane.f32.xlu1 %v4413_v53  ;;  %v4520_v27 = vand.u32 4294901760, %v4519_v54  ;;  %v5887_v19 = vand.u32 4294901760, %v5886_v14 }
 0x4d8   :  { %v44696_v29 = vpop.eup %43801  ;;  %v4521_v31 = vsub.f32 %v4519_v54, %v4520_v27 }
 0x4d9   :  { %v43804_v32 = vpop.eup %43803  ;;  %v4410_v34 = vsel %vm725_vm2, %v44696_v29, 0.0 }
 0x4da   :  { %v4431_v35 = vmul.f32 %v43804_v32, %v43792_v57  ;;  %4411 = vadd.xlane.f32.xlu0 %v4410_v34  ;;  %v4522_v36 = vand.u32 4294901760, %v4521_v31  ;;  %v4985_v57 = vand.u32 4294901760, %v4984_v41 }
 0x4dc   :  { %v4439_v39 = vmul.f32 %v4431_v35, %v44596_v6  ;;  %39572 = vmatmul.mubr.f32.vlgmr.msra.gmra.mrb[8].mxu0 %v4522_v36 }
 0x4dd   :  { %39575 = vmatpush3.msra.mxu0 %v4533_v37  ;;  %39576 = vmatprep.mubr.msk.f32.mxu0 %vm44102_vm1, %v44101_v51 }
 0x4de   :  { %39579 = vmatprep.subr.mxu0 %v44101_v51  ;;  %v4902_v44 = vsel %vm725_vm2, %v4439_v39, 0 }
 0x4df   :  { %v44707_v45 = vand.u32 4294901760, %v4902_v44 }
 0x4e1   :  { %v4971_v47 = vsub.f32 %v4902_v44, %v44707_v45 }
 0x4e3   :  { %v4972_v49 = vand.u32 4294901760, %v4971_v47 }
 0x4e4   :  { %39577 = vmatmul.mubr.f32.vlgmr.msra.gmra.mrb[8].mxu0 %v44689_v24 }
 0x4e5   :  { %39580 = vmatpush3.msra.mxu0 %v4530_v22  ;;  %v4973_v50 = vsub.f32 %v4971_v47, %v4972_v49  ;;  %39581 = vmatprep.mubr.msk.f32.mxu0 %vm44102_vm1, %v44101_v51 }
 0x4e6   :  { %39584 = vmatprep.subr.mxu0 %v44101_v51 }
 0x4e7   :  { %6706 = vrot.lane.b32.xlu1 %v718_v43, %s44107_s5  ;;  %v4974_v52 = vand.u32 4294901760, %v4973_v50 }
 0x4e9   :  { %39602 = vmatmul.mubr.f32.vlgmr.msra.gmra.mrb[10].mxu1 %v4974_v52 }
 0x4ea   :  { %39605 = vmatpush3.msra.mxu1 %v4985_v57  ;;  %39606 = vmatprep.mubr.msk.f32.mxu1 %vm44102_vm1, %v44101_v51 }
 0x4eb   :  { %39609 = vmatprep.subr.mxu1 %v44101_v51 }
 0x4ec   :  { %39582 = vmatmul.mubr.f32.vlgmr.msra.gmra.mrb[8].mxu0 %v4519_v54  ;;  %v4409_v58 = vpop.xlane.xlu0 %4408 }
 0x4ed   :  { %39585 = vmatpush3.msra.mxu0 %v44648_v40  ;;  %43805 = vrcp.f32 %v4409_v58  ;;  %39586 = vmatprep.mubr.msk.f32.mxu0 %vm44102_vm1, %v44101_v51 }
 0x4ee   :  { %39589 = vmatprep.subr.mxu0 %v44101_v51  ;;  %43807 = vpow2.f32 %v4396_v0 }
 0x4ef   :  { %43809 = vpow2.f32 %v4394_v3 }
 0x4f0   :  { %6254 = vrot.lane.b32.xlu0 %v44682_v8, %s44107_s5  ;;  %v44748_v8 = vand.u32 4294901760, %v44684_v9  ;;  %v720_v37 = vpop.permute.xlu0 %719 }
 0x4f1   :  { %39607 = vmatmul.mubr.f32.vlgmr.msra.gmra.mrb[10].mxu1 %v44707_v45 }
 0x4f2   :  { %39610 = vmatpush3.msra.mxu1 %v4982_v38  ;;  %39611 = vmatprep.mubr.msk.f32.mxu1 %vm44102_vm1, %v44101_v51  ;;  %v5434_v23 = vsub.f32 %v44684_v9, %v44748_v8 }
 0x4f3   :  { %39614 = vmatprep.subr.mxu1 %v44101_v51 }
 0x4f4   :  { %39587 = vmatmul.mubr.f32.vlgmr.msra.gmra.mrb[8].mxu0 %v4520_v27  ;;  %v5435_v53 = vand.u32 4294901760, %v5434_v23 }
 0x4f5   :  { %39590 = vmatpush3.msra.mxu0 %v4531_v25  ;;  %39591 = vmatprep.mubr.msk.f32.mxu0 %vm44102_vm1, %v44101_v51 }
 0x4f6   :  { %39594 = vmatprep.subr.mxu0 %v44101_v51  ;;  %v5436_v31 = vsub.f32 %v5434_v23, %v5435_v53 }
 0x4f7   :  { %v43806_v60 = vpop.eup %43805 }
 0x4f8   :  { %v4433_v61 = vmul.f32 %v43806_v60, %v44669_v62  ;;  %v44760_v12 = vpop.eup %43807  ;;  %v5437_v36 = vand.u32 4294901760, %v5436_v31 }
 0x4f9   :  { %39612 = vmatmul.mubr.f32.vlgmr.msra.gmra.mrb[10].mxu1 %v4971_v47  ;;  %v4419_v16 = vsel %vm725_vm2, %v44760_v12, 0.0  ;;  %v44770_v17 = vpop.eup %43809 }
 0x4fa   :  { %39615 = vmatpush3.msra.mxu1 %v44655_v42  ;;  %39616 = vmatprep.mubr.msk.f32.mxu1 %vm44102_vm1, %v44101_v51  ;;  %v4441_v30 = vmul.f32 %v4433_v61, %v44596_v6  ;;  %v4416_v22 = vsel %vm725_vm2, %v44770_v17, 0.0 }
 0x4fb   :  { %39619 = vmatprep.subr.mxu1 %v44101_v51 }
 0x4fc   :  { %39592 = vmatmul.mubr.f32.vlgmr.msra.gmra.mrb[8].mxu0 %v44689_v24  ;;  %v5806_v62 = vsel %vm725_vm2, %v4441_v30, 0 }
 0x4fd   :  { %39595 = vmatpush3.msra.mxu0 %v44648_v40  ;;  %39596 = vmatprep.mubr.msk.f32.mxu0 %vm44102_vm1, %v44101_v51  ;;  %v44751_v40 = vand.u32 4294901760, %v5806_v62 }
 0x4fe   :  { %39629 = vmatprep.subr.mxu0 %v44101_v51 }
 0x4ff   :  { %v5875_v13 = vsub.f32 %v5806_v62, %v44751_v40 }
 0x501   :  { %39617 = vmatmul.mubr.f32.vlgmr.msra.gmra.mrb[10].mxu1 %v4972_v49  ;;  %v5876_v18 = vand.u32 4294901760, %v5875_v13 }
 0x502   :  { %39620 = vmatpush3.msra.mxu1 %v4983_v46  ;;  %v4406_v7 = vpop.xlane.xlu1 %4405  ;;  %39621 = vmatprep.mubr.msk.f32.mxu1 %vm44102_vm1, %v44101_v51 }
 0x503   :  { %43811 = vrcp.f32 %v4406_v7  ;;  %39624 = vmatprep.subr.mxu1 %v44101_v51 }
 0x504   :  { %39597 = vmatmul.mubr.f32.vlgmr.msra.gmra.mrb[8].mxu0 %v44689_v24  ;;  %v5888_v24 = vsub.f32 %v5886_v14, %v5887_v19 }
 0x505   :  { %39630 = vmatpush3.msra.mxu0 %v44748_v8  ;;  %39631 = vmatprep.mubr.msk.f32.mxu0 %vm44102_vm1, %v44101_v51 }
 0x506   :  { %39634 = vmatprep.subr.mxu0 %v44101_v51  ;;  %v5889_v27 = vand.u32 4294901760, %v5888_v24  ;;  %v722_v34 = vpop.permute.xlu1 %721 }
 0x509   :  { %39622 = vmatmul.mubr.f32.vlgmr.msra.gmra.mrb[10].mxu1 %v44707_v45 }
 0x50a   :  { %39625 = vmatpush3.msra.mxu1 %v44655_v42  ;;  %39626 = vmatprep.mubr.msk.f32.mxu1 %vm44102_vm1, %v44101_v51  ;;  %v5877_v42 = vsub.f32 %v5875_v13, %v5876_v18 }
 0x50b   :  { %4420 = vadd.xlane.f32.xlu1 %v4419_v16  ;;  %39659 = vmatprep.subr.mxu1 %v44101_v51 }
 0x50c   :  { %v5878_v25 = vand.u32 4294901760, %v5877_v42 }
 0x50d   :  { %v43812_v20 = vpop.eup %43811 }
 0x50e   :  { %v4432_v21 = vmul.f32 %v43812_v20, %v44674_v4 }
 0x50f   :  { %4417 = vadd.xlane.f32.xlu0 %v4416_v22 }
 0x510   :  { %v4440_v15 = vmul.f32 %v4432_v21, %v44555_v63 }
 0x511   :  { %39627 = vmatmul.mubr.f32.vlgmr.msra.gmra.mrb[10].mxu1 %v44707_v45 }
 0x512   :  { %39660 = vmatpush3.msra.mxu1 %v44753_v10  ;;  %39661 = vmatprep.mubr.msk.f32.mxu1 %vm44102_vm1, %v44101_v51  ;;  %v5354_v4 = vsel %vm725_vm2, %v4440_v15, 0 }
 0x513   :  { %39664 = vmatprep.subr.mxu1 %v44101_v51  ;;  %v5422_v54 = vand.u32 4294901760, %v5354_v4 }
 0x515   :  { %39662 = vmatmul.mubr.f32.vlgmr.msra.gmra.mrb[12].mxu1 %v5878_v25  ;;  %v5423_v9 = vsub.f32 %v5354_v4, %v5422_v54 }
 0x516   :  { %39665 = vmatpush3.msra.mxu1 %v5889_v27  ;;  %39666 = vmatprep.mubr.msk.f32.mxu1 %vm44102_vm1, %v44101_v51 }
 0x517   :  { %39669 = vmatprep.subr.mxu1 %v44101_v51  ;;  %v5424_v28 = vand.u32 4294901760, %v5423_v9 }
 0x519   :  { %v5425_v32 = vsub.f32 %v5423_v9, %v5424_v28 }
 0x51b   :  { %v5426_v35 = vand.u32 4294901760, %v5425_v32 }
 0x51c   :  { %7610 = vrot.lane.b32.xlu1 %v722_v34, %s44107_s5 }
 0x51d   :  { %39667 = vmatmul.mubr.f32.vlgmr.msra.gmra.mrb[12].mxu1 %v44751_v40  ;;  %39632 = vmatmul.mubr.f32.vlgmr.msra.gmra.mrb[10].mxu0 %v5426_v35 }
 0x51e   :  { %39670 = vmatpush3.msra.mxu1 %v5886_v14  ;;  %39635 = vmatpush3.msra.mxu0 %v5437_v36 }
 0x51f   :  { %39671 = vmatprep.mubr.msk.f32.mxu1 %vm44102_vm1, %v44101_v51  ;;  %39674 = vmatprep.subr.mxu1 %v44101_v51 }
 0x520   :  { %39636 = vmatprep.mubr.msk.f32.mxu0 %vm44102_vm1, %v44101_v51  ;;  %39639 = vmatprep.subr.mxu0 %v44101_v51 }
 0x525   :  { %39672 = vmatmul.mubr.f32.vlgmr.msra.gmra.mrb[12].mxu1 %v5875_v13  ;;  %39637 = vmatmul.mubr.f32.vlgmr.msra.gmra.mrb[10].mxu0 %v5422_v54 }
 0x526   :  { %39675 = vmatpush3.msra.mxu1 %v44753_v10  ;;  %39640 = vmatpush3.msra.mxu0 %v5434_v23 }
 0x527   :  { %7158 = vrot.lane.b32.xlu0 %v720_v37, %s44107_s5  ;;  %39676 = vmatprep.mubr.msk.f32.mxu1 %vm44102_vm1, %v44101_v51 }
 0x528   :  { %39679 = vmatprep.subr.mxu1 %v44101_v51  ;;  %39641 = vmatprep.mubr.msk.f32.mxu0 %vm44102_vm1, %v44101_v51 }
 0x529   :  { %39644 = vmatprep.subr.mxu0 %v44101_v51 }
 0x52d   :  { %39677 = vmatmul.mubr.f32.vlgmr.msra.gmra.mrb[12].mxu1 %v5876_v18  ;;  %39642 = vmatmul.mubr.f32.vlgmr.msra.gmra.mrb[10].mxu0 %v5423_v9 }
 0x52e   :  { %39680 = vmatpush3.msra.mxu1 %v5887_v19  ;;  %39645 = vmatpush3.msra.mxu0 %v44748_v8 }
 0x52f   :  { %39681 = vmatprep.mubr.msk.f32.mxu1 %vm44102_vm1, %v44101_v51  ;;  %39684 = vmatprep.subr.mxu1 %v44101_v51 }
 0x530   :  { %39646 = vmatprep.mubr.msk.f32.mxu0 %vm44102_vm1, %v44101_v51  ;;  %39649 = vmatprep.subr.mxu0 %v44101_v51 }
 0x535   :  { %39682 = vmatmul.mubr.f32.vlgmr.msra.gmra.mrb[12].mxu1 %v44751_v40  ;;  %39647 = vmatmul.mubr.f32.vlgmr.msra.gmra.mrb[10].mxu0 %v5424_v28 }
 0x536   :  { %39685 = vmatpush3.msra.mxu1 %v44753_v10  ;;  %39650 = vmatpush3.msra.mxu0 %v5435_v53 }
 0x537   :  { %39686 = vmatprep.mubr.msk.f32.mxu1 %vm44102_vm1, %v44101_v51  ;;  %39651 = vmatprep.mubr.msk.f32.mxu0 %vm44102_vm1, %v44101_v51 }
 0x538   :  { %39654 = vmatprep.subr.mxu0 %v44101_v51  ;;  %39719 = vmatprep.subr.mxu1 %v44101_v51 }
 0x53d   :  { %39687 = vmatmul.mubr.f32.vlgmr.msra.gmra.mrb[12].mxu1 %v44751_v40  ;;  %39652 = vmatmul.mubr.f32.vlgmr.msra.gmra.mrb[10].mxu0 %v5422_v54 }
 0x53e   :  { %39655 = vmatpush3.msra.mxu0 %v44748_v8  ;;  %39656 = vmatprep.mubr.msk.f32.mxu0 %vm44102_vm1, %v44101_v51 }
 0x53f   :  { %39689 = vmatprep.subr.mxu0 %v44101_v51  ;;  %39721 = vmatprep.mubr.msk.f32.mxu1 %vm44102_vm1, %v44101_v51 }
 0x545   :  { %39657 = vmatmul.mubr.f32.vlgmr.msra.gmra.mrb[10].mxu0 %v5422_v54 }
 0x546   :  { %39691 = vmatprep.mubr.msk.f32.mxu0 %vm44102_vm1, %v44101_v51 }
 0x563   :  { %v4415_v38 = vpop.xlane.xlu1 %4414 }
 0x564   :  { %43813 = vrcp.f32 %v4415_v38 }
 0x567   :  { %v6707_v39 = vpop.permute.xlu1 %6706  ;;  %v4412_v43 = vpop.xlane.xlu0 %4411 }
 0x568   :  { %v44828_v44 = vand.u32 4294901760, %v6707_v39  ;;  %43815 = vrcp.f32 %v4412_v43 }
 0x56a   :  { %39720 = vmatpush3.msra.mxu1 %v44828_v44  ;;  %v6790_v41 = vsub.f32 %v6707_v39, %v44828_v44 }
 0x56b   :  { %v6255_v45 = vpop.permute.xlu0 %6254  ;;  %39724 = vmatprep.subr.mxu1 %v44101_v51 }
 0x56c   :  { %v44832_v46 = vand.u32 4294901760, %v6255_v45  ;;  %v6791_v58 = vand.u32 4294901760, %v6790_v41 }
 0x56e   :  { %v43814_v47 = vpop.eup %43813  ;;  %39690 = vmatpush3.msra.mxu0 %v44832_v46  ;;  %v6338_v60 = vsub.f32 %v6255_v45, %v44832_v46  ;;  %v6792_v3 = vsub.f32 %v6790_v41, %v6791_v58 }
 0x56f   :  { %v4435_v48 = vmul.f32 %v43814_v47, %v44691_v26  ;;  %39694 = vmatprep.subr.mxu0 %v44101_v51 }
 0x570   :  { %v6339_v30 = vand.u32 4294901760, %v6338_v60  ;;  %v6793_v8 = vand.u32 4294901760, %v6792_v3 }
 0x571   :  { %v4443_v49 = vmul.f32 %v4435_v48, %v44596_v6 }
 0x572   :  { %v43816_v50 = vpop.eup %43815  ;;  %v6340_v40 = vsub.f32 %v6338_v60, %v6339_v30 }
 0x573   :  { %v4434_v52 = vmul.f32 %v43816_v50, %v44696_v29  ;;  %v6710_v55 = vsel %vm725_vm2, %v4443_v49, 0 }
 0x574   :  { %v44841_v57 = vand.u32 4294901760, %v6710_v55  ;;  %v6341_v14 = vand.u32 4294901760, %v6340_v40 }
 0x575   :  { %v4442_v59 = vmul.f32 %v4434_v52, %v44555_v63 }
 0x576   :  { %v6779_v26 = vsub.f32 %v6710_v55, %v44841_v57 }
 0x577   :  { %v6258_v61 = vsel %vm725_vm2, %v4442_v59, 0 }
 0x578   :  { %v6780_v0 = vand.u32 4294901760, %v6779_v26  ;;  %v44847_v2 = vand.u32 4294901760, %v6258_v61 }
 0x57a   :  { %v6781_v33 = vsub.f32 %v6779_v26, %v6780_v0  ;;  %v6327_v29 = vsub.f32 %v6258_v61, %v44847_v2 }
 0x57c   :  { %v6782_v62 = vand.u32 4294901760, %v6781_v33  ;;  %v6328_v7 = vand.u32 4294901760, %v6327_v29  ;;  %v679_v33 = vld [vmem:[%s47554_s6 + $0x10] sm:$0xff] }
 0x57e   :  { %39722 = vmatmul.mubr.f32.vlgmr.msra.gmra.mrb[14].mxu1 %v6782_v62  ;;  %v6329_v10 = vsub.f32 %v6327_v29, %v6328_v7 }
 0x57f   :  { %39725 = vmatpush3.msra.mxu1 %v6793_v8  ;;  %39726 = vmatprep.mubr.msk.f32.mxu1 %vm44102_vm1, %v44101_v51 }
 0x580   :  { %v6330_v13 = vand.u32 4294901760, %v6329_v10  ;;  %39729 = vmatprep.subr.mxu1 %v44101_v51 }
 0x582   :  { %39692 = vmatmul.mubr.f32.vlgmr.msra.gmra.mrb[12].mxu0 %v6330_v13 }
 0x583   :  { %39695 = vmatpush3.msra.mxu0 %v6341_v14  ;;  %39696 = vmatprep.mubr.msk.f32.mxu0 %vm44102_vm1, %v44101_v51 }
 0x584   :  { %39699 = vmatprep.subr.mxu0 %v44101_v51 }
 0x586   :  { %39727 = vmatmul.mubr.f32.vlgmr.msra.gmra.mrb[14].mxu1 %v44841_v57 }
 0x587   :  { %39730 = vmatpush3.msra.mxu1 %v6790_v41  ;;  %39731 = vmatprep.mubr.msk.f32.mxu1 %vm44102_vm1, %v44101_v51 }
 0x588   :  { %39734 = vmatprep.subr.mxu1 %v44101_v51 }
 0x58a   :  { %39697 = vmatmul.mubr.f32.vlgmr.msra.gmra.mrb[12].mxu0 %v44847_v2 }
 0x58b   :  { %39700 = vmatpush3.msra.mxu0 %v6338_v60  ;;  %39701 = vmatprep.mubr.msk.f32.mxu0 %vm44102_vm1, %v44101_v51 }
 0x58c   :  { %39704 = vmatprep.subr.mxu0 %v44101_v51 }
 0x58e   :  { %39732 = vmatmul.mubr.f32.vlgmr.msra.gmra.mrb[14].mxu1 %v6779_v26 }
 0x58f   :  { %39735 = vmatpush3.msra.mxu1 %v44828_v44  ;;  %39736 = vmatprep.mubr.msk.f32.mxu1 %vm44102_vm1, %v44101_v51 }
 0x590   :  { %39739 = vmatprep.subr.mxu1 %v44101_v51 }
 0x592   :  { %39702 = vmatmul.mubr.f32.vlgmr.msra.gmra.mrb[12].mxu0 %v6327_v29  ;;  %v680_v29 = vld [vmem:[%s47554_s6 + $0x18] sm:$0xff] }
 0x593   :  { %39705 = vmatpush3.msra.mxu0 %v44832_v46  ;;  %39706 = vmatprep.mubr.msk.f32.mxu0 %vm44102_vm1, %v44101_v51  ;;  %v8114_v8 = vand.u32 4294901760, %v680_v29 }
 0x594   :  { %39709 = vmatprep.subr.mxu0 %v44101_v51 }
 0x596   :  { %39737 = vmatmul.mubr.f32.vlgmr.msra.gmra.mrb[14].mxu1 %v6780_v0  ;;  %v677_v0 = vld [vmem:[%s47554_s6] sm:$0xff] }
 0x597   :  { %39740 = vmatpush3.msra.mxu1 %v6791_v58  ;;  %39741 = vmatprep.mubr.msk.f32.mxu1 %vm44102_vm1, %v44101_v51 }
 0x598   :  { %v4421_v16 = vpop.xlane.xlu1 %4420  ;;  %39744 = vmatprep.subr.mxu1 %v44101_v51 }
 0x599   :  { %43817 = vrcp.f32 %v4421_v16 }
 0x59a   :  { %39707 = vmatmul.mubr.f32.vlgmr.msra.gmra.mrb[12].mxu0 %v6328_v7  ;;  %v8111_v7 = vand.u32 4294901760, %v679_v33 }
 0x59b   :  { %39710 = vmatpush3.msra.mxu0 %v6339_v30  ;;  %39711 = vmatprep.mubr.msk.f32.mxu0 %vm44102_vm1, %v44101_v51  ;;  %v8105_v30 = vand.u32 4294901760, %v677_v0 }
 0x59c   :  { %v4418_v18 = vpop.xlane.xlu0 %4417  ;;  %39714 = vmatprep.subr.mxu0 %v44101_v51  ;;  %v7611_v19 = vpop.permute.xlu1 %7610  ;;  %v44971_v13 = vpack.c.bf16 %v8114_v8, %v8111_v7 }
 0x59d   :  { %43819 = vrcp.f32 %v4418_v18  ;;  %v44883_v20 = vand.u32 4294901760, %v7611_v19  ;;  %v8195_v40 = vsub.f32 %v677_v0, %v8105_v30 }
 0x59e   :  { %39742 = vmatmul.mubr.f32.vlgmr.msra.gmra.mrb[14].mxu1 %v44841_v57 }
 0x59f   :  { %39745 = vmatpush3.msra.mxu1 %v44828_v44  ;;  %39746 = vmatprep.mubr.msk.f32.mxu1 %vm44102_vm1, %v44101_v51  ;;  %v7694_v15 = vsub.f32 %v7611_v19, %v44883_v20  ;;  %v8196_v14 = vand.u32 4294901760, %v8195_v40 }
 0x5a0   :  { %39779 = vmatprep.subr.mxu1 %v44101_v51  ;;  %v7159_v22 = vpop.permute.xlu0 %7158 }
 0x5a1   :  { %v44893_v24 = vand.u32 4294901760, %v7159_v22  ;;  %v7695_v53 = vand.u32 4294901760, %v7694_v15 }
 0x5a2   :  { %39712 = vmatmul.mubr.f32.vlgmr.msra.gmra.mrb[12].mxu0 %v44847_v2 }
 0x5a3   :  { %v43818_v21 = vpop.eup %43817  ;;  %39715 = vmatpush3.msra.mxu0 %v44832_v46  ;;  %39716 = vmatprep.mubr.msk.f32.mxu0 %vm44102_vm1, %v44101_v51  ;;  %v7242_v9 = vsub.f32 %v7159_v22, %v44893_v24  ;;  %v7696_v35 = vsub.f32 %v7694_v15, %v7695_v53  ;;  %v8216_v22 = vsub.f32 %v680_v29, %v8114_v8 }
 0x5a4   :  { %v4437_v42 = vmul.f32 %v43818_v21, %v44760_v12  ;;  %39749 = vmatprep.subr.mxu0 %v44101_v51  ;;  %v8209_v21 = vsub.f32 %v679_v33, %v8111_v7  ;;  %v44999_v33 = vld [vmem:[#allocation10] sm:$0xff] }
 0x5a5   :  { %v7243_v34 = vand.u32 4294901760, %v7242_v9  ;;  %v7697_v43 = vand.u32 4294901760, %v7696_v35 }
 0x5a6   :  { %v4445_v23 = vmul.f32 %v4437_v42, %v44596_v6  ;;  %39747 = vmatmul.mubr.f32.vlgmr.msra.gmra.mrb[14].mxu1 %v44841_v57 }
 0x5a7   :  { %v43820_v4 = vpop.eup %43819  ;;  %39780 = vmatpush3.msra.mxu1 %v44883_v20  ;;  %39781 = vmatprep.mubr.msk.f32.mxu1 %vm44102_vm1, %v44101_v51  ;;  %v7244_v44 = vsub.f32 %v7242_v9, %v7243_v34 }
 0x5a8   :  { %v4436_v25 = vmul.f32 %v43820_v4, %v44770_v17  ;;  %39784 = vmatprep.subr.mxu1 %v44101_v51  ;;  %v7614_v12 = vsel %vm725_vm2, %v4445_v23, 0 }
 0x5a9   :  { %v44902_v54 = vand.u32 4294901760, %v7614_v12  ;;  %v7245_v47 = vand.u32 4294901760, %v7244_v44 }
 0x5aa   :  { %v4444_v27 = vmul.f32 %v4436_v25, %v44555_v63  ;;  %39717 = vmatmul.mubr.f32.vlgmr.msra.gmra.mrb[12].mxu0 %v44847_v2  ;;  %v678_v2 = vld [vmem:[%s47554_s6 + $0x8] sm:$0xff] }
 0x5ab   :  { %39750 = vmatpush3.msra.mxu0 %v44893_v24  ;;  %v7683_v28 = vsub.f32 %v7614_v12, %v44902_v54  ;;  %39751 = vmatprep.mubr.msk.f32.mxu0 %vm44102_vm1, %v44101_v51  ;;  %v8108_v3 = vand.u32 4294901760, %v678_v2 }
 0x5ac   :  { %39754 = vmatprep.subr.mxu0 %v44101_v51  ;;  %v7162_v17 = vsel %vm725_vm2, %v4444_v27, 0 }
 0x5ad   :  { %v7684_v31 = vand.u32 4294901760, %v7683_v28  ;;  %v7230_v32 = vand.u32 4294901760, %v7162_v17  ;;  %v44968_v62 = vpack.c.bf16 %v8108_v3, %v8105_v30  ;;  %v8202_v10 = vsub.f32 %v678_v2, %v8108_v3 }
 0x5af   :  { %v7685_v36 = vsub.f32 %v7683_v28, %v7684_v31  ;;  %v7231_v37 = vsub.f32 %v7162_v17, %v7230_v32  ;;  %v8203_v18 = vand.u32 4294901760, %v8202_v10 }
 0x5b1   :  { %v7686_v38 = vand.u32 4294901760, %v7685_v36  ;;  %v7232_v39 = vand.u32 4294901760, %v7231_v37  ;;  %v8204_v42 = vsub.f32 %v8202_v10, %v8203_v18 }
 0x5b3   :  { %39782 = vmatmul.mubr.f32.vlgmr.msra.gmra.mrb[16].mxu1 %v7686_v38  ;;  %v7233_v45 = vsub.f32 %v7231_v37, %v7232_v39  ;;  %v8205_v25 = vand.u32 4294901760, %v8204_v42 }
 0x5b4   :  { %39785 = vmatpush3.msra.mxu1 %v7697_v43  ;;  %39786 = vmatprep.mubr.msk.f32.mxu1 %vm44102_vm1, %v44101_v51 }
 0x5b5   :  { %v7234_v46 = vand.u32 4294901760, %v7233_v45  ;;  %39789 = vmatprep.subr.mxu1 %v44101_v51 }
 0x5b7   :  { %39752 = vmatmul.mubr.f32.vlgmr.msra.gmra.mrb[14].mxu0 %v7234_v46 }
 0x5b8   :  { %39755 = vmatpush3.msra.mxu0 %v7245_v47  ;;  %39756 = vmatprep.mubr.msk.f32.mxu0 %vm44102_vm1, %v44101_v51 }
 0x5b9   :  { %39759 = vmatprep.subr.mxu0 %v44101_v51 }
 0x5bb   :  { %39787 = vmatmul.mubr.f32.vlgmr.msra.gmra.mrb[16].mxu1 %v44902_v54 }
 0x5bc   :  { %39790 = vmatpush3.msra.mxu1 %v7694_v15  ;;  %39791 = vmatprep.mubr.msk.f32.mxu1 %vm44102_vm1, %v44101_v51  ;;  %v8210_v15 = vand.u32 4294901760, %v8209_v21 }
 0x5bd   :  { %39794 = vmatprep.subr.mxu1 %v44101_v51 }
 0x5bf   :  { %39757 = vmatmul.mubr.f32.vlgmr.msra.gmra.mrb[14].mxu0 %v7230_v32 }
 0x5c0   :  { %39760 = vmatpush3.msra.mxu0 %v7242_v9  ;;  %39761 = vmatprep.mubr.msk.f32.mxu0 %vm44102_vm1, %v44101_v51 }
 0x5c1   :  { %39764 = vmatprep.subr.mxu0 %v44101_v51 }
 0x5c3   :  { %39792 = vmatmul.mubr.f32.vlgmr.msra.gmra.mrb[16].mxu1 %v7683_v28 }
 0x5c4   :  { %39795 = vmatpush3.msra.mxu1 %v44883_v20  ;;  %39796 = vmatprep.mubr.msk.f32.mxu1 %vm44102_vm1, %v44101_v51 }
 0x5c5   :  { %39799 = vmatprep.subr.mxu1 %v44101_v51 }
 0x5c7   :  { %39762 = vmatmul.mubr.f32.vlgmr.msra.gmra.mrb[14].mxu0 %v7231_v37 }
 0x5c8   :  { %39765 = vmatpush3.msra.mxu0 %v44893_v24  ;;  %39766 = vmatprep.mubr.msk.f32.mxu0 %vm44102_vm1, %v44101_v51 }
 0x5c9   :  { %39769 = vmatprep.subr.mxu0 %v44101_v51 }
 0x5cb   :  { %39797 = vmatmul.mubr.f32.vlgmr.msra.gmra.mrb[16].mxu1 %v7684_v31  ;;  %v42267_v31 = vpack.c.bf16 %v8202_v10, %v8195_v40 }
 0x5cc   :  { %39800 = vmatpush3.msra.mxu1 %v7695_v53  ;;  %39801 = vmatprep.mubr.msk.f32.mxu1 %vm44102_vm1, %v44101_v51 }
 0x5cd   :  { %39804 = vmatprep.subr.mxu1 %v44101_v51 }
 0x5cf   :  { %39767 = vmatmul.mubr.f32.vlgmr.msra.gmra.mrb[14].mxu0 %v7232_v39 }
 0x5d0   :  { %39770 = vmatpush3.msra.mxu0 %v7243_v34  ;;  %39771 = vmatprep.mubr.msk.f32.mxu0 %vm44102_vm1, %v44101_v51  ;;  %v42283_v34 = vpack.c.bf16 %v8203_v18, %v8196_v14 }
 0x5d1   :  { %39774 = vmatprep.subr.mxu0 %v44101_v51 }
 0x5d3   :  { %39802 = vmatmul.mubr.f32.vlgmr.msra.gmra.mrb[16].mxu1 %v44902_v54 }
 0x5d4   :  { %39805 = vmatpush3.msra.mxu1 %v44883_v20  ;;  %39806 = vmatprep.mubr.msk.f32.mxu1 %vm44102_vm1, %v44101_v51  ;;  %v8197_v20 = vsub.f32 %v8195_v40, %v8196_v14 }
 0x5d6   :  { %v8198_v23 = vand.u32 4294901760, %v8197_v20  ;;  %v9215_v20 = vld [vmem:[#allocation7] sm:$0xff] }
 0x5d7   :  { %v44944_v48 = vpop.f32.mrb[8].mxu0  ;;  %39772 = vmatmul.mubr.f32.vlgmr.msra.gmra.mrb[14].mxu0 %v7230_v32  ;;  %v9226_v42 = vand.u32 4294901760, %v9215_v20 }
 0x5d8   :  { %39775 = vmatpush3.msra.mxu0 %v44893_v24  ;;  %v39598_v49 = vpop.f32.mrb[9].mxu0  ;;  %39776 = vmatprep.mubr.msk.f32.mxu0 %vm44102_vm1, %v44101_v51  ;;  %v8217_v24 = vand.u32 4294901760, %v8216_v22  ;;  %v42259_v27 = vpack.c.bf16 %v8205_v25, %v8198_v23  ;;  %v107_v25 = vld [vmem:[#allocation2 + $0x8] sm:$0xff] }
 0x5d9   :  { %42252 = vmatprep.subr.bf16.mxu0 %v44968_v62 }
 0x5da   :  { %v8218_v53 = vsub.f32 %v8216_v22, %v8217_v24  ;;  %v42287_v35 = vpack.c.bf16 %v8217_v24, %v8210_v15 }
 0x5db   :  { %39807 = vmatmul.mubr.f32.vlgmr.msra.gmra.mrb[16].mxu1 %v44902_v54  ;;  %v8211_v54 = vsub.f32 %v8209_v21, %v8210_v15  ;;  %v9218_v15 = vld [vmem:[#allocation7 + $0x18] sm:$0xff] }
 0x5dc   :  { %v8219_v28 = vand.u32 4294901760, %v8218_v53  ;;  %v9223_v53 = vsel %vm116_vm0, %v107_v25, 0 }
 0x5dd   :  { %v8212_v9 = vand.u32 4294901760, %v8211_v54 }
 0x5df   :  { %39777 = vmatmul.mubr.f32.vlgmr.msra.gmra.mrb[14].mxu0 %v7230_v32  ;;  %v42263_v17 = vpack.c.bf16 %v8219_v28, %v8212_v9  ;;  %v42271_v32 = vpack.c.bf16 %v8216_v22, %v8209_v21  ;;  %v9216_v21 = vld [vmem:[#allocation7 + $0x8] sm:$0xff]  ;;  %v9217_v22 = vld [vmem:[#allocation7 + $0x10] sm:$0xff]  ;;  %v45017_v28 = vand.u32 4294901760, %v9223_v53 }
 0x5e0   :  { %42254 = vmatpush3.bf16.msra.mxu0 %v44968_v62  ;;  %v9229_v23 = vand.u32 4294901760, %v9216_v21  ;;  %v9232_v24 = vand.u32 4294901760, %v9217_v22 }
 0x5e1   :  { %42256 = vmatprep.subr.bf16.mxu0 %v44971_v13 }
 0x5e4   :  { %v44950_v41 = vpop.f32.mrb[10].mxu1  ;;  %42258 = vmatpush3.bf16.msra.mxu0 %v44971_v13 }
 0x5e5   :  { %v39628_v50 = vpop.f32.mrb[11].mxu1  ;;  %42260 = vmatprep.subr.bf16.mxu0 %v42259_v27 }
 0x610   :  { %v6250_v52 = vpop.f32.mrb[12].mxu1 }
 0x611   :  { %8066 = vrot.lane.b32.xlu1 %v6250_v52, %s44096_s26  ;;  %v39688_v55 = vpop.f32.mrb[13].mxu1 }
 0x618   :  { %v5798_v57 = vpop.f32.mrb[10].mxu0 }
 0x619   :  { %v39658_v58 = vpop.f32.mrb[11].mxu0  ;;  %8064 = vrot.lane.b32.xlu0 %v5798_v57, %s44096_s26 }
 0x679   :  { %v7154_v59 = vpop.f32.mrb[14].mxu1 }
 0x67a   :  { %8074 = vrot.lane.b32.xlu1 %v7154_v59, %s44108_s22  ;;  %v39748_v60 = vpop.f32.mrb[15].mxu1 }
 0x67d   :  { %v6702_v26 = vpop.f32.mrb[12].mxu0 }
 0x67e   :  { %8072 = vrot.lane.b32.xlu0 %v6702_v26, %s44108_s22  ;;  %v39718_v61 = vpop.f32.mrb[13].mxu0 }
 0x683   :  { %v8067_v36 = vpop.permute.xlu1 %8066 }
 0x684   :  { %v8087_v39 = vsel %vm725_vm2, %v44950_v41, %v8067_v36 }
 0x68b   :  { %v8065_v37 = vpop.permute.xlu0 %8064 }
 0x68c   :  { %v8086_v49 = vsel %vm725_vm2, %v44944_v48, %v8065_v37  ;;  %v44997_v48 = vsub.s32 6, %v44255_v1 }
 0x68e   :  { %v8097_v29 = vrot.slane %v44999_v33, %v44997_v48 }
 0x6ae   :  { %v8058_v16 = vpop.f32.mrb[16].mxu1 }
 0x6af   :  { %8082 = vrot.lane.b32.xlu1 %v8058_v16, %s44109_s21  ;;  %v39808_v19 = vpop.f32.mrb[17].mxu1 }
 0x6b2   :  { %v7606_v4 = vpop.f32.mrb[14].mxu0 }
 0x6b3   :  { %8080 = vrot.lane.b32.xlu0 %v7606_v4, %s44109_s21  ;;  %v39778_v12 = vpop.f32.mrb[15].mxu0  ;;  %v106_v4 = vld [vmem:[#allocation2] sm:$0xff] }
 0x6b4   :  { %v9235_v12 = vand.u32 4294901760, %v9218_v15  ;;  %v9220_v54 = vsel %vm116_vm0, %v106_v4, 0 }
 0x6b5   :  { %v45015_v9 = vand.u32 4294901760, %v9220_v54 }
 0x6ec   :  { %v8075_v38 = vpop.permute.xlu1 %8074 }
 0x6ed   :  { %v8090_v43 = vsel %vm8088_vm5, %v8087_v39, %v8075_v38 }
 0x6f0   :  { %v8073_v44 = vpop.permute.xlu0 %8072 }
 0x6f1   :  { %v8089_v52 = vsel %vm8088_vm5, %v8086_v49, %v8073_v44 }
 0x721   :  { %v8083_v45 = vpop.permute.xlu1 %8082 }
 0x722   :  { %v8093_v46 = vsel %vm8091_vm6, %v8090_v43, %v8083_v45 }
 0x723   :  { %v8102_v47 = vsel %vm116_vm0, %v8093_v46, 0 }
 0x724   :  { %v8183_v50 = vand.u32 4294901760, %v8102_v47 }
 0x725   :  { %v8081_v55 = vpop.permute.xlu0 %8080 }
 0x726   :  { %v8184_v57 = vsub.f32 %v8102_v47, %v8183_v50  ;;  %v8092_v58 = vsel %vm8091_vm6, %v8089_v52, %v8081_v55 }
 0x727   :  { %v8099_v41 = vsel %vm116_vm0, %v8092_v58, 0 }
 0x728   :  { %v8173_v59 = vand.u32 4294901760, %v8099_v41  ;;  %v8185_v60 = vand.u32 4294901760, %v8184_v57 }
 0x72a   :  { %v8174_v26 = vsub.f32 %v8099_v41, %v8173_v59  ;;  %v8186_v0 = vsub.f32 %v8184_v57, %v8185_v60 }
 0x72c   :  { %v8175_v61 = vand.u32 4294901760, %v8174_v26  ;;  %v8187_v3 = vand.u32 4294901760, %v8186_v0 }
 0x72e   :  { %v8176_v2 = vsub.f32 %v8174_v26, %v8175_v61 }
 0x730   :  { %v8177_v30 = vand.u32 4294901760, %v8176_v2 }
 0x732   :  { %39817 = vmatprep.mubr.f32.mxu0 %v8177_v30 }
 0x733   :  { %39818 = vmatmul.mubr.f32.vlgmr.msra.gmra.mrb[16].mxu0 %v8187_v3  ;;  %v9330_v3 = vsub.f32 %v9217_v22, %v9232_v24  ;;  %v8674_v22 = vld [vmem:[#allocation5 + $0x8] sm:$0xff] }
 0x734   :  { %42262 = vmatpush3.bf16.msra.mxu0 %v42259_v27  ;;  %39828 = vmatprep.mubr.f32.mxu0 %v8173_v59  ;;  %v45013_v27 = vpack.c.bf16 %v9229_v23, %v9226_v42 }
 0x735   :  { %42264 = vmatprep.subr.bf16.mxu0 %v42263_v17 }
 0x738   :  { %42266 = vmatpush3.bf16.msra.mxu0 %v42263_v17  ;;  %v45019_v17 = vsub.f32 %v9215_v20, %v9226_v42  ;;  %v8675_v42 = vld [vmem:[#allocation5 + $0x10] sm:$0xff] }
 0x739   :  { %42268 = vmatprep.subr.bf16.mxu0 %v42267_v31  ;;  %v8694_v4 = vand.u32 4294901760, %v8675_v42 }
 0x73a   :  { %v9317_v36 = vand.u32 4294901760, %v45019_v17 }
 0x73b   :  { %39829 = vmatmul.mubr.f32.vlgmr.msra.gmra.mrb[16].mxu0 %v8183_v50 }
 0x73c   :  { %42270 = vmatpush3.bf16.msra.mxu0 %v42267_v31  ;;  %39839 = vmatprep.mubr.f32.mxu0 %v8174_v26  ;;  %v45021_v31 = vpack.c.bf16 %v9235_v12, %v9232_v24  ;;  %v9318_v43 = vsub.f32 %v45019_v17, %v9317_v36  ;;  %v8676_v24 = vld [vmem:[#allocation5 + $0x18] sm:$0xff] }
 0x73d   :  { %42272 = vmatprep.subr.bf16.mxu0 %v42271_v32  ;;  %v8697_v25 = vand.u32 4294901760, %v8676_v24 }
 0x73e   :  { %v9319_v47 = vand.u32 4294901760, %v9318_v43 }
 0x740   :  { %42274 = vmatpush3.bf16.msra.mxu0 %v42271_v32  ;;  %v45023_v32 = vsub.f32 %v9216_v21, %v9229_v23  ;;  %v8673_v21 = vld [vmem:[#allocation5] sm:$0xff] }
 0x741   :  { %42276 = vmatprep.subr.bf16.mxu0 %v44968_v62  ;;  %v8688_v23 = vand.u32 4294901760, %v8673_v21 }
 0x742   :  { %v9324_v37 = vand.u32 4294901760, %v45023_v32 }
 0x743   :  { %39840 = vmatmul.mubr.f32.vlgmr.msra.gmra.mrb[16].mxu0 %v8184_v57 }
 0x744   :  { %42278 = vmatpush3.bf16.msra.mxu0 %v44968_v62  ;;  %39850 = vmatprep.mubr.f32.mxu0 %v8175_v61  ;;  %v9325_v44 = vsub.f32 %v45023_v32, %v9324_v37 }
 0x745   :  { %42280 = vmatprep.subr.bf16.mxu0 %v44971_v13 }
 0x746   :  { %v9326_v49 = vand.u32 4294901760, %v9325_v44  ;;  %v8792_v44 = vsub.f32 %v8675_v42, %v8694_v4 }
 0x748   :  { %42282 = vmatpush3.bf16.msra.mxu0 %v44971_v13  ;;  %v42355_v55 = vpack.c.bf16 %v9326_v49, %v9319_v47  ;;  %v8793_v49 = vand.u32 4294901760, %v8792_v44 }
 0x749   :  { %42284 = vmatprep.subr.bf16.mxu0 %v42283_v34 }
 0x74b   :  { %39851 = vmatmul.mubr.f32.vlgmr.msra.gmra.mrb[16].mxu0 %v8185_v60 }
 0x74c   :  { %42286 = vmatpush3.bf16.msra.mxu0 %v42283_v34  ;;  %39861 = vmatprep.mubr.f32.mxu0 %v8173_v59  ;;  %v45027_v34 = vsub.f32 %v9220_v54, %v45015_v9  ;;  %v45080_v54 = vpack.c.bf16 %v8697_v25, %v8694_v4 }
 0x74d   :  { %42288 = vmatprep.subr.bf16.mxu0 %v42287_v35 }
 0x74e   :  { %v45037_v38 = vand.u32 4294901760, %v45027_v34 }
 0x750   :  { %42290 = vmatpush3.bf16.msra.mxu0 %v42287_v35  ;;  %v45030_v35 = vsub.f32 %v9223_v53, %v45017_v28  ;;  %v9297_v45 = vsub.f32 %v45027_v34, %v45037_v38  ;;  %v8778_v53 = vsub.f32 %v8673_v21, %v8688_v23 }
 0x751   :  { %42292 = vmatprep.subr.bf16.mxu0 %v44968_v62 }
 0x752   :  { %v45040_v39 = vand.u32 4294901760, %v45030_v35 }
 0x753   :  { %39862 = vmatmul.mubr.f32.vlgmr.msra.gmra.mrb[16].mxu0 %v8183_v50 }
 0x754   :  { %42294 = vmatpush3.bf16.msra.mxu0 %v44968_v62  ;;  %39872 = vmatprep.mubr.f32.mxu0 %v8173_v59  ;;  %v43942_v62 = vld [vmem:[%s47548_s0 + $0x8] sm:$0xff]  ;;  %v9307_v46 = vsub.f32 %v45030_v35, %v45040_v39 }
 0x755   :  { %42296 = vmatprep.subr.bf16.mxu0 %v44971_v13 }
 0x756   :  { %v45051_v52 = vand.u32 4294901760, %v9307_v46 }
 0x758   :  { %42298 = vmatpush3.bf16.msra.mxu0 %v44971_v13  ;;  %v43943_v13 = vld [vmem:[%s47548_s0] sm:$0xff] }
 0x759   :  { %42348 = vmatprep.subr.bf16.mxu0 %v45013_v27 }
 0x75b   :  { %39873 = vmatmul.mubr.f32.vlgmr.msra.gmra.mrb[16].mxu0 %v8183_v50  ;;  %v45049_v50 = vand.u32 4294901760, %v9297_v45  ;;  %v8799_v45 = vsub.f32 %v8676_v24, %v8697_v25 }
 0x75c   :  { %42350 = vmatpush3.bf16.msra.mxu0 %v45013_v27 }
 0x75d   :  { %42352 = vmatprep.subr.bf16.mxu0 %v45021_v31  ;;  %39949 = vmatprep.mubr.f32.mxu0 %v45049_v50 }
 0x760   :  { %42354 = vmatpush3.bf16.msra.mxu0 %v45021_v31 }
 0x761   :  { %42356 = vmatprep.subr.bf16.mxu0 %v42355_v55 }
 0x763   :  { %39950 = vmatmul.mubr.f32.vlgmr.msra.gmra.mrb[18].mxu0 %v45051_v52 }
 0x764   :  { %42358 = vmatpush3.bf16.msra.mxu0 %v42355_v55  ;;  %39960 = vmatprep.mubr.f32.mxu0 %v45015_v9  ;;  %v8800_v55 = vand.u32 4294901760, %v8799_v45 }
 0x82e   :  { %v39874_v7 = vpop.f32.mrb[16].mxu0 }
 0x82f   :  { %v42971_v8 = vadd.f32 %v39874_v7, %v8097_v29  ;;  %v8622_v40 = vpop.f32.mrb[17].mxu0  ;;  %v9331_v7 = vand.u32 4294901760, %v9330_v3 }
 0x830   :  { %v42972_v10 = vadd.f32 %v8622_v40, %v8097_v29  ;;  %v9337_v29 = vsub.f32 %v9218_v15, %v9235_v12  ;;  %v8691_v15 = vand.u32 4294901760, %v8674_v22 }
 0x831   :  { %v8633_v14 = vadd.f32 %v43942_v62, %v42971_v8  ;;  %v9332_v40 = vsub.f32 %v9330_v3, %v9331_v7 }
 0x832   :  { %v8632_v16 = vadd.f32 %v43943_v13, %v42972_v10  ;;  %v9338_v8 = vand.u32 4294901760, %v9337_v29  ;;  %v45078_v12 = vpack.c.bf16 %v8691_v15, %v8688_v23 }
 0x833   :  { %v8637_v18 = vsel %vm116_vm0, %v8633_v14, 0.0  ;;  %v9333_v62 = vand.u32 4294901760, %v9332_v40 }
 0x834   :  { %8638 = vadd.xlane.f32.xlu1 %v8637_v18  ;;  %v8634_v19 = vsel %vm116_vm0, %v8632_v16, 0.0  ;;  %v9339_v10 = vsub.f32 %v9337_v29, %v9338_v8  ;;  %v42367_v18 = vpack.c.bf16 %v9337_v29, %v9330_v3  ;;  %v42383_v20 = vpack.c.bf16 %v9338_v8, %v9331_v7  ;;  %42300 = vmatprep.subr.bf16.mxu1 %v45078_v12 }
 0x835   :  { %8635 = vadd.xlane.f32.xlu0 %v8634_v19  ;;  %v42379_v19 = vpack.c.bf16 %v9324_v37, %v9317_v36  ;;  %42302 = vmatpush3.bf16.msra.mxu1 %v45078_v12  ;;  %v42335_v3 = vpack.c.bf16 %v8800_v55, %v8793_v49 }
 0x836   :  { %42304 = vmatprep.subr.bf16.mxu1 %v45080_v54 }
 0x839   :  { %42306 = vmatpush3.bf16.msra.mxu1 %v45080_v54 }
 0x8c1   :  { %v8639_v57 = vpop.xlane.xlu1 %8638 }
 0x8c2   :  { %v8642_v58 = vmul.f32 0.03125, %v8639_v57  ;;  %v8636_v41 = vpop.xlane.xlu0 %8635 }
 0x8c3   :  { %v8641_v59 = vmul.f32 0.03125, %v8636_v41 }
 0x8c4   :  { %v45056_v60 = vsub.f32 %v8633_v14, %v8642_v58  ;;  %v9340_v14 = vand.u32 4294901760, %v9339_v10  ;;  %v8794_v58 = vsub.f32 %v8792_v44, %v8793_v49 }
 0x8c5   :  { %v45058_v26 = vsub.f32 %v8632_v16, %v8641_v59  ;;  %v42363_v16 = vpack.c.bf16 %v45023_v32, %v45019_v17  ;;  %v8785_v17 = vsub.f32 %v8674_v22, %v8691_v15  ;;  %v8779_v32 = vand.u32 4294901760, %v8778_v53 }
 0x8c6   :  { %v8646_v2 = vmul.f32 %v45056_v60, %v45056_v60  ;;  %v42359_v13 = vpack.c.bf16 %v9340_v14, %v9333_v62  ;;  %v8795_v41 = vand.u32 4294901760, %v8794_v58  ;;  %v45097_v62 = vsub.s32 7, %v44255_v1  ;;  %v111_v14 = vld [vmem:[#allocation10 + $0x8] sm:$0xff] }
 0x8c7   :  { %v8645_v61 = vmul.f32 %v45058_v26, %v45058_v26  ;;  %v8786_v36 = vand.u32 4294901760, %v8785_v17  ;;  %v8780_v37 = vsub.f32 %v8778_v53, %v8779_v32  ;;  %v45137_v58 = vsub.s32 3, %v44255_v1 }
 0x8c8   :  { %v8650_v30 = vsel %vm116_vm0, %v8646_v2, 0.0  ;;  %42360 = vmatprep.subr.bf16.mxu0 %v42359_v13  ;;  %v42319_v2 = vpack.c.bf16 %v8799_v45, %v8792_v44 }
 0x8c9   :  { %v8647_v0 = vsel %vm116_vm0, %v8645_v61, 0.0  ;;  %42362 = vmatpush3.bf16.msra.mxu0 %v42359_v13  ;;  %v8787_v43 = vsub.f32 %v8785_v17, %v8786_v36  ;;  %v8781_v46 = vand.u32 4294901760, %v8780_v37  ;;  %v8664_v13 = vrot.slane %v44999_v33, %v45097_v62 }
 0x8ca   :  { %8648 = vadd.xlane.f32.xlu0 %v8647_v0  ;;  %42364 = vmatprep.subr.bf16.mxu0 %v42363_v16  ;;  %v42315_v0 = vpack.c.bf16 %v8785_v17, %v8778_v53 }
 0x8cb   :  { %v8788_v47 = vand.u32 4294901760, %v8787_v43 }
 0x8cc   :  { %39961 = vmatmul.mubr.f32.vlgmr.msra.gmra.mrb[18].mxu0 %v45017_v28 }
 0x8cd   :  { %42366 = vmatpush3.bf16.msra.mxu0 %v42363_v16  ;;  %39971 = vmatprep.mubr.f32.mxu0 %v45027_v34  ;;  %v42307_v57 = vpack.c.bf16 %v8788_v47, %v8781_v46 }
 0x8ce   :  { %8651 = vadd.xlane.f32.xlu0 %v8650_v30  ;;  %42368 = vmatprep.subr.bf16.mxu0 %v42367_v18  ;;  %v42331_v30 = vpack.c.bf16 %v8786_v36, %v8779_v32 }
 0x8cf   :  { %42308 = vmatprep.subr.bf16.mxu1 %v42307_v57 }
 0x8d1   :  { %42370 = vmatpush3.bf16.msra.mxu0 %v42367_v18 }
 0x8d2   :  { %42372 = vmatprep.subr.bf16.mxu0 %v45013_v27 }
 0x8d4   :  { %39972 = vmatmul.mubr.f32.vlgmr.msra.gmra.mrb[18].mxu0 %v45030_v35 }
 0x8d5   :  { %42374 = vmatpush3.bf16.msra.mxu0 %v45013_v27  ;;  %39982 = vmatprep.mubr.f32.mxu0 %v45037_v38 }
 0x8d6   :  { %42376 = vmatprep.subr.bf16.mxu0 %v45021_v31 }
 0x8d9   :  { %42378 = vmatpush3.bf16.msra.mxu0 %v45021_v31 }
 0x8da   :  { %42380 = vmatprep.subr.bf16.mxu0 %v42379_v19 }
 0x8dc   :  { %39983 = vmatmul.mubr.f32.vlgmr.msra.gmra.mrb[18].mxu0 %v45040_v39 }
 0x8dd   :  { %42382 = vmatpush3.bf16.msra.mxu0 %v42379_v19  ;;  %39993 = vmatprep.mubr.f32.mxu0 %v45015_v9  ;;  %v8670_v19 = vrot.slane %v111_v14, %v44327_v56 }
 0x8de   :  { %42384 = vmatprep.subr.bf16.mxu0 %v42383_v20 }
 0x8e1   :  { %42386 = vmatpush3.bf16.msra.mxu0 %v42383_v20 }
 0x8e2   :  { %42388 = vmatprep.subr.bf16.mxu0 %v45013_v27 }
 0x8e4   :  { %39994 = vmatmul.mubr.f32.vlgmr.msra.gmra.mrb[18].mxu0 %v45017_v28 }
 0x8e5   :  { %42390 = vmatpush3.bf16.msra.mxu0 %v45013_v27  ;;  %40004 = vmatprep.mubr.f32.mxu0 %v45015_v9  ;;  %v8801_v27 = vsub.f32 %v8799_v45, %v8800_v55  ;;  %v45124_v45 = vsub.s32 4, %v44255_v1 }
 0x8e6   :  { %42392 = vmatprep.subr.bf16.mxu0 %v45021_v31 }
 0x8e7   :  { %v8802_v59 = vand.u32 4294901760, %v8801_v27  ;;  %v9756_v46 = vrot.slane %v44999_v33, %v45124_v45  ;;  %v8680_v27 = vrot.slane %v44999_v33, %v45137_v58 }
 0x8e9   :  { %42394 = vmatpush3.bf16.msra.mxu0 %v45021_v31  ;;  %v42311_v61 = vpack.c.bf16 %v8802_v59, %v8795_v41 }
 0x8ea   :  { %40067 = vmatprep.subr.mxu0 %v44101_v51 }
 0x8ec   :  { %40005 = vmatmul.mubr.f32.vlgmr.msra.gmra.mrb[18].mxu0 %v45017_v28 }
 0x8ed   :  { %40069 = vmatprep.mubr.msk.f32.mxu0 %vm44102_vm1, %v44101_v51 }
 0x957   :  { %v8649_v31 = vpop.xlane.xlu0 %8648 }
 0x958   :  { %v8653_v29 = vmul.f32 0.03125, %v8649_v31 }
 0x95a   :  { %v8655_v7 = vadd.f32 1e-05, %v8653_v29 }
 0x95b   :  { %v8652_v8 = vpop.xlane.xlu0 %8651 }
 0x95c   :  { %43821 = vrsqrt.f32 %v8655_v7  ;;  %v8654_v40 = vmul.f32 0.03125, %v8652_v8 }
 0x95e   :  { %v8656_v10 = vadd.f32 1e-05, %v8654_v40 }
 0x960   :  { %43823 = vrsqrt.f32 %v8656_v10 }
 0x966   :  { %v43822_v16 = vpop.eup %43821 }
 0x967   :  { %v8659_v18 = vmul.f32 %v43822_v16, %v45058_v26 }
 0x969   :  { %v8665_v20 = vmul.f32 %v8664_v13, %v8659_v18 }
 0x96a   :  { %v43824_v21 = vpop.eup %43823 }
 0x96b   :  { %v8660_v22 = vmul.f32 %v43824_v21, %v45056_v60  ;;  %v45104_v42 = vadd.f32 %v8670_v19, %v8665_v20 }
 0x96d   :  { %v8666_v23 = vmul.f32 %v8664_v13, %v8660_v22  ;;  %v8682_v15 = vsel %vm116_vm0, %v45104_v42, 0  ;;  %v45157_v13 = vsub.s32 5, %v44255_v1 }
 0x96e   :  { %v8756_v24 = vand.u32 4294901760, %v8682_v15 }
 0x96f   :  { %v45108_v4 = vadd.f32 %v8670_v19, %v8666_v23  ;;  %v9762_v16 = vrot.slane %v44999_v33, %v45157_v13 }
 0x970   :  { %v8757_v25 = vsub.f32 %v8682_v15, %v8756_v24 }
 0x971   :  { %v8685_v53 = vsel %vm116_vm0, %v45108_v4, 0 }
 0x972   :  { %v8758_v26 = vand.u32 4294901760, %v8757_v25  ;;  %v8766_v17 = vand.u32 4294901760, %v8685_v53 }
 0x974   :  { %v8759_v32 = vsub.f32 %v8757_v25, %v8758_v26  ;;  %v8767_v36 = vsub.f32 %v8685_v53, %v8766_v17 }
 0x976   :  { %v8760_v37 = vand.u32 4294901760, %v8759_v32  ;;  %v8768_v43 = vand.u32 4294901760, %v8767_v36 }
 0x978   :  { %39883 = vmatprep.mubr.f32.mxu1 %v8760_v37  ;;  %v8769_v60 = vsub.f32 %v8767_v36, %v8768_v43 }
 0x97a   :  { %v8770_v44 = vand.u32 4294901760, %v8769_v60 }
 0x97c   :  { %39884 = vmatmul.mubr.f32.vlgmr.msra.gmra.mrb[18].mxu1 %v8770_v44 }
 0x97d   :  { %42310 = vmatpush3.bf16.msra.mxu1 %v42307_v57  ;;  %39894 = vmatprep.mubr.f32.mxu1 %v8756_v24 }
 0x97e   :  { %42312 = vmatprep.subr.bf16.mxu1 %v42311_v61 }
 0x981   :  { %42314 = vmatpush3.bf16.msra.mxu1 %v42311_v61 }
 0x982   :  { %42316 = vmatprep.subr.bf16.mxu1 %v42315_v0 }
 0x984   :  { %39895 = vmatmul.mubr.f32.vlgmr.msra.gmra.mrb[18].mxu1 %v8766_v17 }
 0x985   :  { %42318 = vmatpush3.bf16.msra.mxu1 %v42315_v0  ;;  %39905 = vmatprep.mubr.f32.mxu1 %v8757_v25 }
 0x986   :  { %42320 = vmatprep.subr.bf16.mxu1 %v42319_v2 }
 0x989   :  { %42322 = vmatpush3.bf16.msra.mxu1 %v42319_v2 }
 0x98a   :  { %42324 = vmatprep.subr.bf16.mxu1 %v45078_v12 }
 0x98c   :  { %39906 = vmatmul.mubr.f32.vlgmr.msra.gmra.mrb[18].mxu1 %v8767_v36 }
 0x98d   :  { %42326 = vmatpush3.bf16.msra.mxu1 %v45078_v12  ;;  %39916 = vmatprep.mubr.f32.mxu1 %v8758_v26 }
 0x98e   :  { %42328 = vmatprep.subr.bf16.mxu1 %v45080_v54 }
 0x991   :  { %42330 = vmatpush3.bf16.msra.mxu1 %v45080_v54 }
 0x992   :  { %42332 = vmatprep.subr.bf16.mxu1 %v42331_v30 }
 0x994   :  { %39917 = vmatmul.mubr.f32.vlgmr.msra.gmra.mrb[18].mxu1 %v8768_v43 }
 0x995   :  { %42334 = vmatpush3.bf16.msra.mxu1 %v42331_v30  ;;  %39927 = vmatprep.mubr.f32.mxu1 %v8756_v24 }
 0x996   :  { %42336 = vmatprep.subr.bf16.mxu1 %v42335_v3 }
 0x999   :  { %42338 = vmatpush3.bf16.msra.mxu1 %v42335_v3 }
 0x99a   :  { %42340 = vmatprep.subr.bf16.mxu1 %v45078_v12 }
 0x99c   :  { %39928 = vmatmul.mubr.f32.vlgmr.msra.gmra.mrb[18].mxu1 %v8766_v17 }
 0x99d   :  { %42342 = vmatpush3.bf16.msra.mxu1 %v45078_v12  ;;  %39938 = vmatprep.mubr.f32.mxu1 %v8756_v24 }
 0x99e   :  { %42344 = vmatprep.subr.bf16.mxu1 %v45080_v54 }
 0x9a1   :  { %42346 = vmatpush3.bf16.msra.mxu1 %v45080_v54 }
 0x9a2   :  { %40007 = vmatprep.subr.mxu1 %v44101_v51 }
 0x9a4   :  { %39939 = vmatmul.mubr.f32.vlgmr.msra.gmra.mrb[18].mxu1 %v8766_v17 }
 0x9a5   :  { %40009 = vmatprep.mubr.msk.f32.mxu1 %vm44102_vm1, %v44101_v51 }
 0x9bf   :  { %v45128_v47 = vpop.f32.mrb[18].mxu0 }
 0x9c0   :  { %v9758_v12 = vadd.f32 %v45128_v47, %v9756_v46  ;;  %v45131_v49 = vpop.f32.mrb[19].mxu0 }
 0x9c1   :  { %v9757_v54 = vadd.f32 %v9756_v46, %v45131_v49 }
 0x9c2   :  { %v10268_v18 = vsel %vm725_vm2, %v9758_v12, 0 }
 0x9c3   :  { %v9818_v55 = vsel %vm725_vm2, %v9757_v54, 0  ;;  %v10271_v33 = vand.u32 4294901760, %v10268_v18 }
 0x9c4   :  { %v9821_v57 = vand.u32 4294901760, %v9818_v55 }
 0x9c5   :  { %v10348_v21 = vsub.f32 %v10268_v18, %v10271_v33 }
 0x9c6   :  { %40008 = vmatpush3.xpose.msra.mxu1 %v9821_v57  ;;  %v9898_v0 = vsub.f32 %v9818_v55, %v9821_v57 }
 0x9c7   :  { %40012 = vmatprep.subr.mxu1 %v44101_v51  ;;  %v10349_v23 = vand.u32 4294901760, %v10348_v21 }
 0x9c8   :  { %v9899_v31 = vand.u32 4294901760, %v9898_v0 }
 0x9c9   :  { %v10350_v24 = vsub.f32 %v10348_v21, %v10349_v23 }
 0x9ca   :  { %v9900_v8 = vsub.f32 %v9898_v0, %v9899_v31 }
 0x9cb   :  { %v10351_v53 = vand.u32 4294901760, %v10350_v24 }
 0x9cc   :  { %v9901_v14 = vand.u32 4294901760, %v9900_v8 }
 0xa77   :  { %v39940_v41 = vpop.f32.mrb[18].mxu1 }
 0xa78   :  { %v42973_v59 = vadd.f32 %v39940_v41, %v8680_v27  ;;  %v9205_v61 = vpop.f32.mrb[19].mxu1 }
 0xa79   :  { %v42974_v2 = vadd.f32 %v9205_v61, %v8680_v27 }
 0xa7a   :  { %9778 = vrot.lane.b32.xlu0 %v42973_v59, %s44103_s27  ;;  %v10266_v1 = vsel %vm725_vm2, %v42973_v59, 0 }
 0xa7b   :  { %v9816_v30 = vsel %vm725_vm2, %v42974_v2, 0  ;;  %9776 = vrot.lane.b32.xlu1 %v42974_v2, %s44103_s27  ;;  %v10336_v19 = vand.u32 4294901760, %v10266_v1 }
 0xa7c   :  { %v9886_v3 = vand.u32 4294901760, %v9816_v30 }
 0xa7d   :  { %v10337_v20 = vsub.f32 %v10266_v1, %v10336_v19 }
 0xa7e   :  { %v9887_v29 = vsub.f32 %v9816_v30, %v9886_v3  ;;  %9780 = vrot.lane.b32.xlu0 %v42974_v2, %s44105_s29 }
 0xa7f   :  { %9790 = vrot.lane.b32.xlu1 %v9757_v54, %s44103_s27  ;;  %v10338_v22 = vand.u32 4294901760, %v10337_v20 }
 0xa80   :  { %v9888_v7 = vand.u32 4294901760, %v9887_v29 }
 0xa81   :  { %v10339_v15 = vsub.f32 %v10337_v20, %v10338_v22 }
 0xa82   :  { %9794 = vrot.lane.b32.xlu0 %v9757_v54, %s44105_s29  ;;  %v9889_v40 = vsub.f32 %v9887_v29, %v9888_v7 }
 0xa83   :  { %9792 = vrot.lane.b32.xlu1 %v9758_v12, %s44103_s27  ;;  %v10340_v25 = vand.u32 4294901760, %v10339_v15 }
 0xa84   :  { %v9890_v10 = vand.u32 4294901760, %v9889_v40 }
 0xa86   :  { %9784 = vrot.lane.b32.xlu0 %v42974_v2, %s44106_s30  ;;  %40010 = vmatmul.mubr.f32.vlgmr.msra.gmra.mrb[20].mxu1 %v9890_v10 }
 0xa87   :  { %40013 = vmatpush3.xpose.msra.mxu1 %v9901_v14  ;;  %9782 = vrot.lane.b32.xlu1 %v42973_v59, %s44105_s29 }
 0xa88   :  { %40014 = vmatprep.mubr.msk.f32.mxu1 %vm44102_vm1, %v44101_v51  ;;  %40017 = vmatprep.subr.mxu1 %v44101_v51 }
 0xa8a   :  { %9798 = vrot.lane.b32.xlu0 %v9757_v54, %s44106_s30 }
 0xa8b   :  { %9796 = vrot.lane.b32.xlu1 %v9758_v12, %s44105_s29 }
 0xa8e   :  { %40015 = vmatmul.mubr.f32.vlgmr.msra.gmra.mrb[20].mxu1 %v9886_v3 }
 0xa8f   :  { %40018 = vmatpush3.xpose.msra.mxu1 %v9898_v0  ;;  %9786 = vrot.lane.b32.xlu1 %v42973_v59, %s44106_s30 }
 0xa90   :  { %40019 = vmatprep.mubr.msk.f32.mxu1 %vm44102_vm1, %v44101_v51  ;;  %40022 = vmatprep.subr.mxu1 %v44101_v51 }
 0xa93   :  { %9800 = vrot.lane.b32.xlu1 %v9758_v12, %s44106_s30 }
 0xa96   :  { %40020 = vmatmul.mubr.f32.vlgmr.msra.gmra.mrb[20].mxu1 %v9887_v29 }
 0xa97   :  { %40023 = vmatpush3.xpose.msra.mxu1 %v9821_v57  ;;  %9764 = vrot.lane.b32.xlu1 %v9762_v16, %s44100_s24 }
 0xa98   :  { %40024 = vmatprep.mubr.msk.f32.mxu1 %vm44102_vm1, %v44101_v51  ;;  %40027 = vmatprep.subr.mxu1 %v44101_v51 }
 0xa9e   :  { %40025 = vmatmul.mubr.f32.vlgmr.msra.gmra.mrb[20].mxu1 %v9888_v7 }
 0xa9f   :  { %40028 = vmatpush3.xpose.msra.mxu1 %v9899_v31  ;;  %40029 = vmatprep.mubr.msk.f32.mxu1 %vm44102_vm1, %v44101_v51 }
 0xaa0   :  { %40032 = vmatprep.subr.mxu1 %v44101_v51 }
 0xaa6   :  { %40030 = vmatmul.mubr.f32.vlgmr.msra.gmra.mrb[20].mxu1 %v9886_v3 }
 0xaa7   :  { %40033 = vmatpush3.xpose.msra.mxu1 %v9821_v57  ;;  %40034 = vmatprep.mubr.msk.f32.mxu1 %vm44102_vm1, %v44101_v51 }
 0xaa8   :  { %40037 = vmatprep.subr.mxu1 %v44101_v51 }
 0xaae   :  { %40035 = vmatmul.mubr.f32.vlgmr.msra.gmra.mrb[20].mxu1 %v9886_v3 }
 0xaaf   :  { %40038 = vmatpush3.xpose.msra.mxu1 %v10271_v33  ;;  %40039 = vmatprep.mubr.msk.f32.mxu1 %vm44102_vm1, %v44101_v51 }
 0xab0   :  { %40042 = vmatprep.subr.mxu1 %v44101_v51 }
 0xab2   :  { %40040 = vmatmul.mubr.f32.vlgmr.msra.gmra.mrb[22].mxu1 %v10340_v25 }
 0xab3   :  { %40043 = vmatpush3.xpose.msra.mxu1 %v10351_v53  ;;  %40044 = vmatprep.mubr.msk.f32.mxu1 %vm44102_vm1, %v44101_v51 }
 0xab4   :  { %40047 = vmatprep.subr.mxu1 %v44101_v51 }
 0xaba   :  { %40045 = vmatmul.mubr.f32.vlgmr.msra.gmra.mrb[22].mxu1 %v10336_v19 }
 0xabb   :  { %40048 = vmatpush3.xpose.msra.mxu1 %v10348_v21  ;;  %40049 = vmatprep.mubr.msk.f32.mxu1 %vm44102_vm1, %v44101_v51 }
 0xabc   :  { %40052 = vmatprep.subr.mxu1 %v44101_v51 }
 0xac2   :  { %40050 = vmatmul.mubr.f32.vlgmr.msra.gmra.mrb[22].mxu1 %v10337_v20 }
 0xac3   :  { %40053 = vmatpush3.xpose.msra.mxu1 %v10271_v33  ;;  %40054 = vmatprep.mubr.msk.f32.mxu1 %vm44102_vm1, %v44101_v51 }
 0xac4   :  { %40057 = vmatprep.subr.mxu1 %v44101_v51 }
 0xaca   :  { %40055 = vmatmul.mubr.f32.vlgmr.msra.gmra.mrb[22].mxu1 %v10338_v22 }
 0xacb   :  { %40058 = vmatpush3.xpose.msra.mxu1 %v10349_v23  ;;  %40059 = vmatprep.mubr.msk.f32.mxu1 %vm44102_vm1, %v44101_v51 }
 0xacc   :  { %40062 = vmatprep.subr.mxu1 %v44101_v51 }
 0xad2   :  { %40060 = vmatmul.mubr.f32.vlgmr.msra.gmra.mrb[22].mxu1 %v10336_v19 }
 0xad3   :  { %40063 = vmatpush3.xpose.msra.mxu1 %v10271_v33  ;;  %40064 = vmatprep.mubr.msk.f32.mxu1 %vm44102_vm1, %v44101_v51 }
 0xad4   :  { %40097 = vmatprep.subr.mxu1 %v44101_v51 }
 0xada   :  { %40065 = vmatmul.mubr.f32.vlgmr.msra.gmra.mrb[22].mxu1 %v10336_v19 }
 0xadb   :  { %40099 = vmatprep.mubr.msk.f32.mxu1 %vm44102_vm1, %v44101_v51 }
 0xaec   :  { %v9779_v26 = vpop.permute.xlu0 %9778 }
 0xaed   :  { %v11166_v17 = vsel %vm725_vm2, %v9779_v26, 0  ;;  %v9777_v32 = vpop.permute.xlu1 %9776 }
 0xaee   :  { %v45198_v36 = vand.u32 4294901760, %v11166_v17  ;;  %v10716_v37 = vsel %vm725_vm2, %v9777_v32, 0 }
 0xaef   :  { %v45201_v43 = vand.u32 4294901760, %v10716_v37 }
 0xaf0   :  { %v45204_v60 = vsub.f32 %v11166_v17, %v45198_v36  ;;  %v9781_v33 = vpop.permute.xlu0 %9780 }
 0xaf1   :  { %v45207_v44 = vsub.f32 %v10716_v37, %v45201_v43  ;;  %v9791_v46 = vpop.permute.xlu1 %9790 }
 0xaf2   :  { %v11238_v12 = vand.u32 4294901760, %v45204_v60  ;;  %v10718_v54 = vsel %vm725_vm2, %v9791_v46, 0 }
 0xaf3   :  { %v10788_v55 = vand.u32 4294901760, %v45207_v44  ;;  %v45212_v57 = vand.u32 4294901760, %v10718_v54 }
 0xaf4   :  { %v11239_v61 = vsub.f32 %v45204_v60, %v11238_v12  ;;  %v9795_v23 = vpop.permute.xlu0 %9794 }
 0xaf5   :  { %v10789_v27 = vsub.f32 %v45207_v44, %v10788_v55  ;;  %v10798_v41 = vsub.f32 %v10718_v54, %v45212_v57  ;;  %40068 = vmatpush3.xpose.msra.mxu0 %v45212_v57  ;;  %v9793_v59 = vpop.permute.xlu1 %9792 }
 0xaf6   :  { %v11168_v0 = vsel %vm725_vm2, %v9793_v59, 0  ;;  %40072 = vmatprep.subr.mxu0 %v44101_v51  ;;  %v11240_v8 = vand.u32 4294901760, %v11239_v61 }
 0xaf7   :  { %v10799_v2 = vand.u32 4294901760, %v10798_v41  ;;  %v45222_v30 = vand.u32 4294901760, %v11168_v0  ;;  %v10790_v3 = vand.u32 4294901760, %v10789_v27 }
 0xaf9   :  { %v10800_v31 = vsub.f32 %v10798_v41, %v10799_v2  ;;  %v11248_v29 = vsub.f32 %v11168_v0, %v45222_v30  ;;  %40070 = vmatmul.mubr.f32.vlgmr.msra.gmra.mrb[20].mxu0 %v10790_v3  ;;  %v9783_v7 = vpop.permute.xlu1 %9782  ;;  %40098 = vmatpush3.xpose.msra.mxu1 %v45222_v30 }
 0xafa   :  { %40074 = vmatprep.mubr.msk.f32.mxu0 %vm44102_vm1, %v44101_v51  ;;  %40102 = vmatprep.subr.mxu1 %v44101_v51  ;;  %v12066_v25 = vsel %vm725_vm2, %v9783_v7, 0 }
 0xafb   :  { %v11249_v40 = vand.u32 4294901760, %v11248_v29  ;;  %v10801_v10 = vand.u32 4294901760, %v10800_v31  ;;  %v45287_v17 = vand.u32 4294901760, %v12066_v25 }
 0xafc   :  { %40100 = vmatmul.mubr.f32.vlgmr.msra.gmra.mrb[24].mxu1 %v11240_v8 }
 0xafd   :  { %v11250_v14 = vsub.f32 %v11248_v29, %v11249_v40  ;;  %40073 = vmatpush3.xpose.msra.mxu0 %v10801_v10  ;;  %v9797_v16 = vpop.permute.xlu1 %9796  ;;  %40104 = vmatprep.mubr.msk.f32.mxu1 %vm44102_vm1, %v44101_v51 }
 0xafe   :  { %40077 = vmatprep.subr.mxu0 %v44101_v51  ;;  %v12068_v53 = vsel %vm725_vm2, %v9797_v16, 0 }
 0xaff   :  { %v11251_v1 = vand.u32 4294901760, %v11250_v14  ;;  %v45291_v37 = vand.u32 4294901760, %v12068_v53 }
 0xb01   :  { %40075 = vmatmul.mubr.f32.vlgmr.msra.gmra.mrb[20].mxu0 %v45201_v43  ;;  %v45233_v18 = vpop.permute.xlu1 %9786  ;;  %40103 = vmatpush3.xpose.msra.mxu1 %v11251_v1 }
 0xb02   :  { %40078 = vmatpush3.xpose.msra.mxu0 %v10798_v41  ;;  %40107 = vmatprep.subr.mxu1 %v44101_v51  ;;  %v12966_v8 = vsel %vm725_vm2, %v45233_v18, 0 }
 0xb03   :  { %40079 = vmatprep.mubr.msk.f32.mxu0 %vm44102_vm1, %v44101_v51  ;;  %40082 = vmatprep.subr.mxu0 %v44101_v51  ;;  %v45356_v14 = vand.u32 4294901760, %v12966_v8 }
 0xb04   :  { %40105 = vmatmul.mubr.f32.vlgmr.msra.gmra.mrb[24].mxu1 %v45198_v36 }
 0xb05   :  { %v45240_v19 = vpop.permute.xlu1 %9800  ;;  %40108 = vmatpush3.xpose.msra.mxu1 %v11248_v29  ;;  %40109 = vmatprep.mubr.msk.f32.mxu1 %vm44102_vm1, %v44101_v51 }
 0xb06   :  { %40112 = vmatprep.subr.mxu1 %v44101_v51 }
 0xb09   :  { %40080 = vmatmul.mubr.f32.vlgmr.msra.gmra.mrb[20].mxu0 %v45207_v44  ;;  %v9765_v20 = vpop.permute.xlu1 %9764  ;;  %v12137_v44 = vsub.f32 %v12066_v25, %v45287_v17 }
 0xb0a   :  { %40083 = vmatpush3.xpose.msra.mxu0 %v45212_v57  ;;  %v45248_v21 = vadd.f32 %v9765_v20, %v45131_v49  ;;  %v45251_v22 = vadd.f32 %v45128_v47, %v9765_v20  ;;  %40084 = vmatprep.mubr.msk.f32.mxu0 %vm44102_vm1, %v44101_v51  ;;  %v11616_v47 = vsel %vm725_vm2, %v9781_v33, 0  ;;  %v11618_v49 = vsel %vm725_vm2, %v9795_v23, 0 }
 0xb0b   :  { %40087 = vmatprep.subr.mxu0 %v44101_v51  ;;  %v45273_v15 = vand.u32 4294901760, %v11616_v47  ;;  %v45276_v24 = vand.u32 4294901760, %v11618_v49 }
 0xb0c   :  { %9806 = vrot.lane.b32.xlu0 %v45251_v22, %s44103_s27  ;;  %9804 = vrot.lane.b32.xlu1 %v45248_v21, %s44103_s27 }
 0xb0d   :  { %40110 = vmatmul.mubr.f32.vlgmr.msra.gmra.mrb[24].mxu1 %v45204_v60  ;;  %v45285_v26 = vsub.f32 %v11616_v47, %v45273_v15  ;;  %v11698_v32 = vsub.f32 %v11618_v49, %v45276_v24 }
 0xb0e   :  { %40113 = vmatpush3.xpose.msra.mxu1 %v45222_v30  ;;  %40114 = vmatprep.mubr.msk.f32.mxu1 %vm44102_vm1, %v44101_v51 }
 0xb0f   :  { %40117 = vmatprep.subr.mxu1 %v44101_v51  ;;  %v11688_v60 = vand.u32 4294901760, %v45285_v26  ;;  %v11699_v46 = vand.u32 4294901760, %v11698_v32 }
 0xb10   :  { %13588 = vrot.lane.b32.xlu0 %v45248_v21, %s44104_s28  ;;  %14042 = vrot.lane.b32.xlu1 %v45251_v22, %s44104_s28 }
 0xb11   :  { %40085 = vmatmul.mubr.f32.vlgmr.msra.gmra.mrb[20].mxu0 %v10788_v55  ;;  %v11689_v54 = vsub.f32 %v45285_v26, %v11688_v60  ;;  %v12138_v55 = vand.u32 4294901760, %v12137_v44 }
 0xb12   :  { %40088 = vmatpush3.xpose.msra.mxu0 %v10799_v2  ;;  %40089 = vmatprep.mubr.msk.f32.mxu0 %vm44102_vm1, %v44101_v51 }
 0xb13   :  { %40092 = vmatprep.subr.mxu0 %v44101_v51  ;;  %v12139_v41 = vsub.f32 %v12137_v44, %v12138_v55  ;;  %v11690_v59 = vand.u32 4294901760, %v11689_v54 }
 0xb15   :  { %40115 = vmatmul.mubr.f32.vlgmr.msra.gmra.mrb[24].mxu1 %v11238_v12  ;;  %v12148_v12 = vsub.f32 %v12068_v53, %v45291_v37 }
 0xb16   :  { %40118 = vmatpush3.xpose.msra.mxu1 %v11249_v40  ;;  %40119 = vmatprep.mubr.msk.f32.mxu1 %vm44102_vm1, %v44101_v51  ;;  %v12968_v40 = vsel %vm725_vm2, %v45240_v19, 0  ;;  %v13037_v19 = vsub.f32 %v12966_v8, %v45356_v14 }
 0xb17   :  { %40122 = vmatprep.subr.mxu1 %v44101_v51  ;;  %v12149_v27 = vand.u32 4294901760, %v12148_v12  ;;  %v45360_v1 = vand.u32 4294901760, %v12968_v40 }
 0xb18   :  { %v13038_v47 = vand.u32 4294901760, %v13037_v19 }
 0xb19   :  { %40090 = vmatmul.mubr.f32.vlgmr.msra.gmra.mrb[20].mxu0 %v45201_v43  ;;  %v12150_v61 = vsub.f32 %v12148_v12, %v12149_v27  ;;  %v13048_v20 = vsub.f32 %v12968_v40, %v45360_v1 }
 0xb1a   :  { %40093 = vmatpush3.xpose.msra.mxu0 %v45212_v57  ;;  %40094 = vmatprep.mubr.msk.f32.mxu0 %vm44102_vm1, %v44101_v51  ;;  %v11700_v57 = vsub.f32 %v11698_v32, %v11699_v46  ;;  %v13039_v25 = vsub.f32 %v13037_v19, %v13038_v47 }
 0xb1b   :  { %40127 = vmatprep.subr.mxu0 %v44101_v51  ;;  %v12151_v2 = vand.u32 4294901760, %v12150_v61 }
 0xb1c   :  { %v11701_v0 = vand.u32 4294901760, %v11700_v57 }
 0xb1d   :  { %40120 = vmatmul.mubr.f32.vlgmr.msra.gmra.mrb[24].mxu1 %v45198_v36 }
 0xb1e   :  { %40123 = vmatpush3.xpose.msra.mxu1 %v45222_v30  ;;  %40124 = vmatprep.mubr.msk.f32.mxu1 %vm44102_vm1, %v44101_v51 }
 0xb1f   :  { %40157 = vmatprep.subr.mxu1 %v44101_v51 }
 0xb21   :  { %40095 = vmatmul.mubr.f32.vlgmr.msra.gmra.mrb[20].mxu0 %v45201_v43  ;;  %v12140_v43 = vand.u32 4294901760, %v12139_v41 }
 0xb22   :  { %40128 = vmatpush3.xpose.msra.mxu0 %v45276_v24  ;;  %40129 = vmatprep.mubr.msk.f32.mxu0 %vm44102_vm1, %v44101_v51 }
 0xb23   :  { %40132 = vmatprep.subr.mxu0 %v44101_v51 }
 0xb25   :  { %40125 = vmatmul.mubr.f32.vlgmr.msra.gmra.mrb[24].mxu1 %v45198_v36  ;;  %40130 = vmatmul.mubr.f32.vlgmr.msra.gmra.mrb[22].mxu0 %v11690_v59  ;;  %v9785_v36 = vpop.permute.xlu0 %9784 }
 0xb26   :  { %40158 = vmatpush3.xpose.msra.mxu1 %v45291_v37  ;;  %40133 = vmatpush3.xpose.msra.mxu0 %v11701_v0  ;;  %v12516_v3 = vsel %vm725_vm2, %v9785_v36, 0 }
 0xb27   :  { %40159 = vmatprep.mubr.msk.f32.mxu1 %vm44102_vm1, %v44101_v51  ;;  %40162 = vmatprep.subr.mxu1 %v44101_v51  ;;  %v45344_v29 = vand.u32 4294901760, %v12516_v3 }
 0xb28   :  { %40134 = vmatprep.mubr.msk.f32.mxu0 %vm44102_vm1, %v44101_v51  ;;  %40137 = vmatprep.subr.mxu0 %v44101_v51 }
 0xb29   :  { %40160 = vmatmul.mubr.f32.vlgmr.msra.gmra.mrb[26].mxu1 %v12140_v43  ;;  %v9799_v30 = vpop.permute.xlu0 %9798  ;;  %v12587_v10 = vsub.f32 %v12516_v3, %v45344_v29 }
 0xb2a   :  { %40163 = vmatpush3.xpose.msra.mxu1 %v12151_v2  ;;  %40164 = vmatprep.mubr.msk.f32.mxu1 %vm44102_vm1, %v44101_v51  ;;  %v12518_v31 = vsel %vm725_vm2, %v9799_v30, 0 }
 0xb2b   :  { %40167 = vmatprep.subr.mxu1 %v44101_v51  ;;  %v45347_v7 = vand.u32 4294901760, %v12518_v31  ;;  %v12588_v18 = vand.u32 4294901760, %v12587_v10 }
 0xb2d   :  { %40135 = vmatmul.mubr.f32.vlgmr.msra.gmra.mrb[22].mxu0 %v45273_v15  ;;  %v12598_v16 = vsub.f32 %v12518_v31, %v45347_v7  ;;  %v12589_v23 = vsub.f32 %v12587_v10, %v12588_v18 }
 0xb2e   :  { %40138 = vmatpush3.xpose.msra.mxu0 %v11698_v32  ;;  %40139 = vmatprep.mubr.msk.f32.mxu0 %vm44102_vm1, %v44101_v51 }
 0xb2f   :  { %40142 = vmatprep.subr.mxu0 %v44101_v51  ;;  %v12599_v33 = vand.u32 4294901760, %v12598_v16  ;;  %v12590_v53 = vand.u32 4294901760, %v12589_v23 }
 0xb31   :  { %40165 = vmatmul.mubr.f32.vlgmr.msra.gmra.mrb[26].mxu1 %v45287_v17  ;;  %v12600_v49 = vsub.f32 %v12598_v16, %v12599_v33 }
 0xb32   :  { %40168 = vmatpush3.xpose.msra.mxu1 %v12148_v12  ;;  %40169 = vmatprep.mubr.msk.f32.mxu1 %vm44102_vm1, %v44101_v51 }
 0xb33   :  { %40172 = vmatprep.subr.mxu1 %v44101_v51  ;;  %v12601_v32 = vand.u32 4294901760, %v12600_v49 }
 0xb35   :  { %40140 = vmatmul.mubr.f32.vlgmr.msra.gmra.mrb[22].mxu0 %v45285_v26 }
 0xb36   :  { %40143 = vmatpush3.xpose.msra.mxu0 %v45276_v24  ;;  %40144 = vmatprep.mubr.msk.f32.mxu0 %vm44102_vm1, %v44101_v51 }
 0xb37   :  { %40147 = vmatprep.subr.mxu0 %v44101_v51 }
 0xb39   :  { %40170 = vmatmul.mubr.f32.vlgmr.msra.gmra.mrb[26].mxu1 %v12137_v44 }
 0xb3a   :  { %40173 = vmatpush3.xpose.msra.mxu1 %v45291_v37  ;;  %40174 = vmatprep.mubr.msk.f32.mxu1 %vm44102_vm1, %v44101_v51 }
 0xb3b   :  { %40177 = vmatprep.subr.mxu1 %v44101_v51 }
 0xb3d   :  { %40145 = vmatmul.mubr.f32.vlgmr.msra.gmra.mrb[22].mxu0 %v11688_v60 }
 0xb3e   :  { %40148 = vmatpush3.xpose.msra.mxu0 %v11699_v46  ;;  %40149 = vmatprep.mubr.msk.f32.mxu0 %vm44102_vm1, %v44101_v51 }
 0xb3f   :  { %40152 = vmatprep.subr.mxu0 %v44101_v51 }
 0xb41   :  { %40175 = vmatmul.mubr.f32.vlgmr.msra.gmra.mrb[26].mxu1 %v12138_v55 }
 0xb42   :  { %40178 = vmatpush3.xpose.msra.mxu1 %v12149_v27  ;;  %40179 = vmatprep.mubr.msk.f32.mxu1 %vm44102_vm1, %v44101_v51 }
 0xb43   :  { %40182 = vmatprep.subr.mxu1 %v44101_v51 }
 0xb45   :  { %40150 = vmatmul.mubr.f32.vlgmr.msra.gmra.mrb[22].mxu0 %v45273_v15 }
 0xb46   :  { %40153 = vmatpush3.xpose.msra.mxu0 %v45276_v24  ;;  %40154 = vmatprep.mubr.msk.f32.mxu0 %vm44102_vm1, %v44101_v51  ;;  %v13049_v24 = vand.u32 4294901760, %v13048_v20 }
 0xb47   :  { %40187 = vmatprep.subr.mxu0 %v44101_v51 }
 0xb48   :  { %v13050_v26 = vsub.f32 %v13048_v20, %v13049_v24 }
 0xb49   :  { %40180 = vmatmul.mubr.f32.vlgmr.msra.gmra.mrb[26].mxu1 %v45287_v17 }
 0xb4a   :  { %40183 = vmatpush3.xpose.msra.mxu1 %v45291_v37  ;;  %40184 = vmatprep.mubr.msk.f32.mxu1 %vm44102_vm1, %v44101_v51  ;;  %v13051_v37 = vand.u32 4294901760, %v13050_v26 }
 0xb4b   :  { %40217 = vmatprep.subr.mxu1 %v44101_v51 }
 0xb4d   :  { %40155 = vmatmul.mubr.f32.vlgmr.msra.gmra.mrb[22].mxu0 %v45273_v15  ;;  %v13040_v15 = vand.u32 4294901760, %v13039_v25 }
 0xb4e   :  { %40188 = vmatpush3.xpose.msra.mxu0 %v45347_v7  ;;  %40189 = vmatprep.mubr.msk.f32.mxu0 %vm44102_vm1, %v44101_v51 }
 0xb4f   :  { %40192 = vmatprep.subr.mxu0 %v44101_v51 }
 0xb51   :  { %40185 = vmatmul.mubr.f32.vlgmr.msra.gmra.mrb[26].mxu1 %v45287_v17  ;;  %40190 = vmatmul.mubr.f32.vlgmr.msra.gmra.mrb[24].mxu0 %v12590_v53 }
 0xb52   :  { %40218 = vmatpush3.xpose.msra.mxu1 %v45360_v1  ;;  %40193 = vmatpush3.xpose.msra.mxu0 %v12601_v32 }
 0xb53   :  { %40219 = vmatprep.mubr.msk.f32.mxu1 %vm44102_vm1, %v44101_v51  ;;  %40222 = vmatprep.subr.mxu1 %v44101_v51 }
 0xb54   :  { %40194 = vmatprep.mubr.msk.f32.mxu0 %vm44102_vm1, %v44101_v51  ;;  %40197 = vmatprep.subr.mxu0 %v44101_v51 }
 0xb55   :  { %40220 = vmatmul.mubr.f32.vlgmr.msra.gmra.mrb[28].mxu1 %v13040_v15 }
 0xb56   :  { %40223 = vmatpush3.xpose.msra.mxu1 %v13051_v37  ;;  %40224 = vmatprep.mubr.msk.f32.mxu1 %vm44102_vm1, %v44101_v51 }
 0xb57   :  { %40227 = vmatprep.subr.mxu1 %v44101_v51 }
 0xb59   :  { %40195 = vmatmul.mubr.f32.vlgmr.msra.gmra.mrb[24].mxu0 %v45344_v29 }
 0xb5a   :  { %40198 = vmatpush3.xpose.msra.mxu0 %v12598_v16  ;;  %40199 = vmatprep.mubr.msk.f32.mxu0 %vm44102_vm1, %v44101_v51 }
 0xb5b   :  { %40202 = vmatprep.subr.mxu0 %v44101_v51 }
 0xb5d   :  { %40225 = vmatmul.mubr.f32.vlgmr.msra.gmra.mrb[28].mxu1 %v45356_v14 }
 0xb5e   :  { %40228 = vmatpush3.xpose.msra.mxu1 %v13048_v20  ;;  %40229 = vmatprep.mubr.msk.f32.mxu1 %vm44102_vm1, %v44101_v51 }
 0xb5f   :  { %40232 = vmatprep.subr.mxu1 %v44101_v51 }
 0xb61   :  { %40200 = vmatmul.mubr.f32.vlgmr.msra.gmra.mrb[24].mxu0 %v12587_v10 }
 0xb62   :  { %40203 = vmatpush3.xpose.msra.mxu0 %v45347_v7  ;;  %40204 = vmatprep.mubr.msk.f32.mxu0 %vm44102_vm1, %v44101_v51 }
 0xb63   :  { %40207 = vmatprep.subr.mxu0 %v44101_v51 }
 0xb65   :  { %40230 = vmatmul.mubr.f32.vlgmr.msra.gmra.mrb[28].mxu1 %v13037_v19 }
 0xb66   :  { %40233 = vmatpush3.xpose.msra.mxu1 %v45360_v1  ;;  %40234 = vmatprep.mubr.msk.f32.mxu1 %vm44102_vm1, %v44101_v51 }
 0xb67   :  { %40237 = vmatprep.subr.mxu1 %v44101_v51 }
 0xb69   :  { %40205 = vmatmul.mubr.f32.vlgmr.msra.gmra.mrb[24].mxu0 %v12588_v18 }
 0xb6a   :  { %40208 = vmatpush3.xpose.msra.mxu0 %v12599_v33  ;;  %40209 = vmatprep.mubr.msk.f32.mxu0 %vm44102_vm1, %v44101_v51 }
 0xb6b   :  { %40212 = vmatprep.subr.mxu0 %v44101_v51 }
 0xb6d   :  { %40235 = vmatmul.mubr.f32.vlgmr.msra.gmra.mrb[28].mxu1 %v13038_v47 }
 0xb6e   :  { %40238 = vmatpush3.xpose.msra.mxu1 %v13049_v24  ;;  %40239 = vmatprep.mubr.msk.f32.mxu1 %vm44102_vm1, %v44101_v51 }
 0xb6f   :  { %40242 = vmatprep.subr.mxu1 %v44101_v51 }
 0xb71   :  { %40210 = vmatmul.mubr.f32.vlgmr.msra.gmra.mrb[24].mxu0 %v45344_v29 }
 0xb72   :  { %40213 = vmatpush3.xpose.msra.mxu0 %v45347_v7  ;;  %40214 = vmatprep.mubr.msk.f32.mxu0 %vm44102_vm1, %v44101_v51 }
 0xb73   :  { %40247 = vmatprep.subr.mxu0 %v44101_v51 }
 0xb75   :  { %40240 = vmatmul.mubr.f32.vlgmr.msra.gmra.mrb[28].mxu1 %v45356_v14 }
 0xb76   :  { %40243 = vmatpush3.xpose.msra.mxu1 %v45360_v1  ;;  %40244 = vmatprep.mubr.msk.f32.mxu1 %vm44102_vm1, %v44101_v51 }
 0xb77   :  { %40277 = vmatprep.subr.mxu1 %v44101_v51 }
 0xb79   :  { %40215 = vmatmul.mubr.f32.vlgmr.msra.gmra.mrb[24].mxu0 %v45344_v29 }
 0xb7a   :  { %40249 = vmatprep.mubr.msk.f32.mxu0 %vm44102_vm1, %v44101_v51 }
 0xb7d   :  { %40245 = vmatmul.mubr.f32.vlgmr.msra.gmra.mrb[28].mxu1 %v45356_v14 }
 0xb7e   :  { %v45426_v17 = vpop.permute.xlu0 %9806  ;;  %v45428_v60 = vpop.permute.xlu1 %9804  ;;  %40279 = vmatprep.mubr.msk.f32.mxu1 %vm44102_vm1, %v44101_v51 }
 0xb81   :  { %v10262_v44 = vpop.f32.mrb[20].mxu1 }
 0xb82   :  { %v45432_v46 = vpop.permute.xlu0 %13588  ;;  %v45434_v12 = vpop.permute.xlu1 %14042  ;;  %13424 = vrot.lane.b32.xlu0 %v10262_v44, %s44096_s26 }
 0xb83   :  { %v45438_v54 = vand.u32 4294901760, %v45432_v46  ;;  %v45441_v55 = vand.u32 4294901760, %v45434_v12  ;;  %v40036_v57 = vpop.f32.mrb[21].mxu1 }
 0xb85   :  { %40248 = vmatpush3.msra.mxu0 %v45438_v54  ;;  %40278 = vmatpush3.msra.mxu1 %v45441_v55 }
 0xb86   :  { %40252 = vmatprep.subr.mxu0 %v44101_v51  ;;  %40282 = vmatprep.subr.mxu1 %v44101_v51 }
 0xbad   :  { %v10712_v27 = vpop.f32.mrb[22].mxu1 }
 0xbae   :  { %13426 = vrot.lane.b32.xlu1 %v10712_v27, %s44096_s26  ;;  %v40066_v41 = vpop.f32.mrb[23].mxu1 }
 0xbf4   :  { %v11162_v59 = vpop.f32.mrb[20].mxu0  ;;  %v13425_v2 = vpop.permute.xlu0 %13424 }
 0xbf5   :  { %v40096_v61 = vpop.f32.mrb[21].mxu0  ;;  %13428 = vrot.lane.b32.xlu0 %v11162_v59, %s44096_s26  ;;  %v13448_v36 = vsel %vm4340_vm3, %v13425_v2, -1.7014117e+38 }
 0xbf6   :  { %v13457_v30 = vsel %vm13456_vm7, %v13448_v36, -inf }
 0xbf8   :  { %v11612_v0 = vpop.f32.mrb[24].mxu1 }
 0xbf9   :  { %13430 = vrot.lane.b32.xlu1 %v11612_v0, %s44096_s26  ;;  %v40126_v43 = vpop.f32.mrb[25].mxu1 }
 0xc14   :  { %13458 = vmax.xlane.f32.xlu0 %v13457_v30 }
 0xc20   :  { %v12062_v3 = vpop.f32.mrb[22].mxu0  ;;  %v13427_v8 = vpop.permute.xlu1 %13426 }
 0xc21   :  { %v40156_v31 = vpop.f32.mrb[23].mxu0  ;;  %v13449_v40 = vsel %vm4341_vm4, %v13427_v8, -1.7014117e+38 }
 0xc22   :  { %v13460_v10 = vsel %vm13456_vm7, %v13449_v40, -inf }
 0xc24   :  { %v12512_v29 = vpop.f32.mrb[26].mxu1 }
 0xc25   :  { %13434 = vrot.lane.b32.xlu1 %v12512_v29, %s44096_s26  ;;  %v40186_v7 = vpop.f32.mrb[27].mxu1 }
 0xc2a   :  { %13432 = vrot.lane.b32.xlu0 %v12062_v3, %s44096_s26 }
 0xc49   :  { %13461 = vmax.xlane.f32.xlu1 %v13460_v10 }
 0xc4c   :  { %v12962_v14 = vpop.f32.mrb[24].mxu0 }
 0xc4d   :  { %v40216_v16 = vpop.f32.mrb[25].mxu0  ;;  %13436 = vrot.lane.b32.xlu0 %v12962_v14, %s44096_s26 }
 0xc50   :  { %v13412_v1 = vpop.f32.mrb[28].mxu1 }
 0xc51   :  { %v40246_v18 = vpop.f32.mrb[29].mxu1 }
 0xc5a   :  { %13438 = vrot.lane.b32.xlu1 %v13412_v1, %s44096_s26 }
 0xc67   :  { %v13429_v19 = vpop.permute.xlu0 %13428 }
 0xc68   :  { %v13450_v33 = vsel %vm4340_vm3, %v13429_v19, -1.7014117e+38 }
 0xc69   :  { %v13463_v20 = vsel %vm13456_vm7, %v13450_v33, -inf }
 0xc6b   :  { %v13431_v23 = vpop.permute.xlu1 %13430 }
 0xc6c   :  { %13464 = vmax.xlane.f32.xlu0 %v13463_v20  ;;  %v13451_v47 = vsel %vm4341_vm4, %v13431_v23, -1.7014117e+38 }
 0xc6d   :  { %v13466_v49 = vsel %vm13456_vm7, %v13451_v47, -inf }
 0xc7e   :  { %13467 = vmax.xlane.f32.xlu1 %v13466_v49 }
 0xc97   :  { %v13435_v44 = vpop.permute.xlu1 %13434 }
 0xc98   :  { %v13453_v57 = vsel %vm4341_vm4, %v13435_v44, -1.7014117e+38 }
 0xc99   :  { %v13472_v27 = vsel %vm13456_vm7, %v13453_v57, -inf }
 0xca1   :  { %v13459_v24 = vpop.xlane.xlu0 %13458 }
 0xca2   :  { %v13481_v25 = vsub.f32 %v13448_v36, %v13459_v24 }
 0xca4   :  { %v13489_v53 = vmul.f32 1.442695, %v13481_v25 }
 0xca5   :  { %v13433_v26 = vpop.permute.xlu0 %13432 }
 0xca6   :  { %43825 = vpow2.f32 %v13489_v53  ;;  %v13452_v32 = vsel %vm4340_vm3, %v13433_v26, -1.7014117e+38 }
 0xca7   :  { %v13469_v15 = vsel %vm13456_vm7, %v13452_v32, -inf }
 0xca8   :  { %13470 = vmax.xlane.f32.xlu1 %v13469_v15 }
 0xcb0   :  { %v45469_v37 = vpop.eup %43825 }
 0xcb1   :  { %13513 = vrot.lane.b32.xlu0 %v45469_v37, %s44103_s27 }
 0xcbf   :  { %v13437_v30 = vpop.permute.xlu0 %13436 }
 0xcc0   :  { %v13454_v7 = vsel %vm4340_vm3, %v13437_v30, -1.7014117e+38 }
 0xcc1   :  { %v13475_v8 = vsel %vm13456_vm7, %v13454_v7, -inf }
 0xcd0   :  { %13473 = vmax.xlane.f32.xlu0 %v13472_v27 }
 0xcd6   :  { %v13462_v41 = vpop.xlane.xlu1 %13461 }
 0xcd7   :  { %v13482_v59 = vsub.f32 %v13449_v40, %v13462_v41 }
 0xcd9   :  { %v13491_v61 = vmul.f32 1.442695, %v13482_v59 }
 0xcda   :  { %v13439_v0 = vpop.permute.xlu1 %13438 }
 0xcdb   :  { %43827 = vpow2.f32 %v13491_v61  ;;  %v13455_v43 = vsel %vm4341_vm4, %v13439_v0, -1.7014117e+38 }
 0xcdc   :  { %v13478_v2 = vsel %vm13456_vm7, %v13455_v43, -inf }
 0xcdd   :  { %13479 = vmax.xlane.f32.xlu1 %v13478_v2 }
 0xce5   :  { %v45479_v36 = vpop.eup %43827 }
 0xce6   :  { %13515 = vrot.lane.b32.xlu0 %v45479_v36, %s44103_s27 }
 0xcf9   :  { %v13465_v3 = vpop.xlane.xlu0 %13464 }
 0xcfa   :  { %v13483_v31 = vsub.f32 %v13450_v33, %v13465_v3 }
 0xcfc   :  { %v13493_v29 = vmul.f32 1.442695, %v13483_v31 }
 0xcfe   :  { %43829 = vpow2.f32 %v13493_v29 }
 0xd05   :  { %13476 = vmax.xlane.f32.xlu0 %v13475_v8  ;;  %v45518_v8 = vld [vmem:[%s47550_s2] sm:$0xff] }
 0xd08   :  { %v45486_v40 = vpop.eup %43829 }
 0xd09   :  { %13517 = vrot.lane.b32.xlu1 %v45486_v40, %s44103_s27 }
 0xd0b   :  { %v13468_v10 = vpop.xlane.xlu1 %13467 }
 0xd0c   :  { %v13484_v14 = vsub.f32 %v13451_v47, %v13468_v10 }
 0xd0e   :  { %v13495_v16 = vmul.f32 1.442695, %v13484_v14 }
 0xd10   :  { %43831 = vpow2.f32 %v13495_v16 }
 0xd1a   :  { %v45490_v1 = vpop.eup %43831 }
 0xd1b   :  { %13519 = vrot.lane.b32.xlu0 %v45490_v1, %s44103_s27 }
 0xd23   :  { %v13514_v18 = vpop.permute.xlu0 %13513 }
 0xd24   :  { %v13537_v19 = vsel %vm725_vm2, %v13514_v18, 0.0 }
 0xd35   :  { %v13471_v33 = vpop.xlane.xlu1 %13470 }
 0xd36   :  { %v13485_v20 = vsub.f32 %v13452_v32, %v13471_v33 }
 0xd38   :  { %v13497_v23 = vmul.f32 1.442695, %v13485_v20 }
 0xd3a   :  { %13538 = vadd.xlane.f32.xlu0 %v13537_v19  ;;  %43833 = vpow2.f32 %v13497_v23 }
 0xd44   :  { %v45495_v49 = vpop.eup %43833 }
 0xd50   :  { %13521 = vrot.lane.b32.xlu0 %v45495_v49, %s44103_s27 }
 0xd5d   :  { %v13474_v47 = vpop.xlane.xlu0 %13473 }
 0xd5e   :  { %v13486_v24 = vsub.f32 %v13453_v57, %v13474_v47 }
 0xd60   :  { %v13499_v25 = vmul.f32 1.442695, %v13486_v24  ;;  %v45533_v24 = vld [vmem:[%s47550_s2 + $0x8] sm:$0xff] }
 0xd61   :  { %v13516_v15 = vpop.permute.xlu0 %13515 }
 0xd62   :  { %43835 = vpow2.f32 %v13499_v25  ;;  %v13540_v32 = vsel %vm725_vm2, %v13516_v15, 0.0 }
 0xd6a   :  { %v13480_v26 = vpop.xlane.xlu1 %13479 }
 0xd6b   :  { %v13488_v44 = vsub.f32 %v13455_v43, %v13480_v26 }
 0xd6c   :  { %v45499_v53 = vpop.eup %43835 }
 0xd6d   :  { %13523 = vrot.lane.b32.xlu1 %v45499_v53, %s44103_s27  ;;  %v13503_v27 = vmul.f32 1.442695, %v13488_v44  ;;  %v13671_v44 = vsub.f32 %v45432_v46, %v45438_v54 }
 0xd6f   :  { %43837 = vpow2.f32 %v13503_v27 }
 0xd79   :  { %v45504_v57 = vpop.eup %43837 }
 0xd7b   :  { %v13518_v30 = vpop.permute.xlu1 %13517 }
 0xd7c   :  { %v13543_v3 = vsel %vm725_vm2, %v13518_v30, 0.0 }
 0xd91   :  { %13541 = vadd.xlane.f32.xlu1 %v13540_v32 }
 0xd92   :  { %v13477_v41 = vpop.xlane.xlu0 %13476 }
 0xd93   :  { %v13487_v59 = vsub.f32 %v13454_v7, %v13477_v41 }
 0xd95   :  { %v13501_v61 = vmul.f32 1.442695, %v13487_v59 }
 0xd96   :  { %v13520_v43 = vpop.permute.xlu0 %13519 }
 0xd97   :  { %43839 = vpow2.f32 %v13501_v61  ;;  %v13546_v2 = vsel %vm725_vm2, %v13520_v43, 0.0 }
 0xda1   :  { %v45506_v0 = vpop.eup %43839 }
 0xda2   :  { %13525 = vrot.lane.b32.xlu0 %v45506_v0, %s44103_s27  ;;  %13527 = vrot.lane.b32.xlu1 %v45504_v57, %s44103_s27 }
 0xdc1   :  { %13547 = vadd.xlane.f32.xlu0 %v13546_v2 }
 0xdc6   :  { %13544 = vadd.xlane.f32.xlu1 %v13543_v3 }
 0xdc7   :  { %v13539_v31 = vpop.xlane.xlu0 %13538 }
 0xdc8   :  { %43841 = vrcp.f32 %v13539_v31 }
 0xdcb   :  { %v13522_v14 = vpop.permute.xlu0 %13521 }
 0xdcc   :  { %v13549_v16 = vsel %vm725_vm2, %v13522_v14, 0.0 }
 0xdd2   :  { %v43842_v29 = vpop.eup %43841 }
 0xdd3   :  { %v13569_v7 = vmul.f32 %v43842_v29, %v45469_v37 }
 0xdd5   :  { %v13577_v10 = vmul.f32 %v45518_v8, %v13569_v7 }
 0xdd7   :  { %9808 = vrot.lane.b32.xlu0 %v45248_v21, %s44105_s29  ;;  %13586 = vrot.lane.b32.xlu1 %v13577_v10, %s44103_s27 }
 0xddf   :  { %v13524_v18 = vpop.permute.xlu1 %13523 }
 0xde0   :  { %v13552_v19 = vsel %vm725_vm2, %v13524_v18, 0.0 }
 0xdf6   :  { %13550 = vadd.xlane.f32.xlu0 %v13549_v16 }
 0xdfb   :  { %13553 = vadd.xlane.f32.xlu1 %v13552_v19 }
 0xe0c   :  { %9810 = vrot.lane.b32.xlu0 %v45251_v22, %s44105_s29 }
 0xe14   :  { %v13526_v33 = vpop.permute.xlu0 %13525 }
 0xe15   :  { %v13555_v23 = vsel %vm725_vm2, %v13526_v33, 0.0 }
 0xe1e   :  { %v13542_v37 = vpop.xlane.xlu1 %13541 }
 0xe1f   :  { %43843 = vrcp.f32 %v13542_v37 }
 0xe22   :  { %v13528_v26 = vpop.permute.xlu1 %13527 }
 0xe23   :  { %v13558_v10 = vsel %vm725_vm2, %v13528_v26, 0.0 }
 0xe29   :  { %v43844_v20 = vpop.eup %43843 }
 0xe2a   :  { %v13570_v47 = vmul.f32 %v43844_v20, %v45479_v36 }
 0xe2b   :  { %13556 = vadd.xlane.f32.xlu0 %v13555_v23  ;;  %v14125_v23 = vsub.f32 %v45434_v12, %v45441_v55 }
 0xe2c   :  { %v13578_v25 = vmul.f32 %v45533_v24, %v13570_v47 }
 0xe2e   :  { %14040 = vrot.lane.b32.xlu1 %v13578_v25, %s44103_s27  ;;  %v14126_v25 = vand.u32 4294901760, %v14125_v23 }
 0xe30   :  { %v14127_v26 = vsub.f32 %v14125_v23, %v14126_v25 }
 0xe41   :  { %14496 = vrot.lane.b32.xlu0 %v45428_v60, %s44104_s28  ;;  %v13672_v60 = vand.u32 4294901760, %v13671_v44 }
 0xe43   :  { %v13673_v30 = vsub.f32 %v13671_v44, %v13672_v60 }
 0xe45   :  { %9812 = vrot.lane.b32.xlu0 %v45248_v21, %s44106_s30  ;;  %v13674_v7 = vand.u32 4294901760, %v13673_v30 }
 0xe49   :  { %9814 = vrot.lane.b32.xlu0 %v45251_v22, %s44106_s30 }
 0xe4e   :  { %v13548_v36 = vpop.xlane.xlu0 %13547 }
 0xe4f   :  { %43845 = vrcp.f32 %v13548_v36 }
 0xe53   :  { %v13545_v15 = vpop.xlane.xlu1 %13544 }
 0xe54   :  { %43847 = vrcp.f32 %v13545_v15 }
 0xe57   :  { %v13587_v32 = vpop.permute.xlu1 %13586 }
 0xe58   :  { %v13591_v27 = vsel %vm725_vm2, %v13587_v32, 0  ;;  %v14128_v32 = vand.u32 4294901760, %v14127_v26 }
 0xe59   :  { %v43846_v41 = vpop.eup %43845  ;;  %v13659_v59 = vand.u32 4294901760, %v13591_v27 }
 0xe5a   :  { %v13572_v61 = vmul.f32 %v43846_v41, %v45490_v1 }
 0xe5b   :  { %v13660_v21 = vsub.f32 %v13591_v27, %v13659_v59 }
 0xe5c   :  { %v13580_v43 = vmul.f32 %v45533_v24, %v13572_v61 }
 0xe5d   :  { %v13661_v22 = vand.u32 4294901760, %v13660_v21 }
 0xe5e   :  { %v43848_v2 = vpop.eup %43847  ;;  %14948 = vrot.lane.b32.xlu1 %v13580_v43, %s44103_s27 }
 0xe5f   :  { %v13662_v3 = vsub.f32 %v13660_v21, %v13661_v22  ;;  %v13571_v31 = vmul.f32 %v43848_v2, %v45486_v40  ;;  %v9809_v40 = vpop.permute.xlu0 %9808 }
 0xe61   :  { %v13579_v46 = vmul.f32 %v45518_v8, %v13571_v31  ;;  %v13663_v29 = vand.u32 4294901760, %v13662_v3 }
 0xe63   :  { %14494 = vrot.lane.b32.xlu1 %v13579_v46, %s44103_s27  ;;  %40250 = vmatmul.mubr.f32.vlgmr.msra.gmra.mrb[26].mxu0 %v13663_v29 }
 0xe64   :  { %40253 = vmatpush3.msra.mxu0 %v13674_v7  ;;  %40254 = vmatprep.mubr.msk.f32.mxu0 %vm44102_vm1, %v44101_v51 }
 0xe65   :  { %40257 = vmatprep.subr.mxu0 %v44101_v51 }
 0xe6b   :  { %40255 = vmatmul.mubr.f32.vlgmr.msra.gmra.mrb[26].mxu0 %v13659_v59 }
 0xe6c   :  { %40258 = vmatpush3.msra.mxu0 %v13671_v44  ;;  %40259 = vmatprep.mubr.msk.f32.mxu0 %vm44102_vm1, %v44101_v51 }
 0xe6d   :  { %40262 = vmatprep.subr.mxu0 %v44101_v51 }
 0xe73   :  { %40260 = vmatmul.mubr.f32.vlgmr.msra.gmra.mrb[26].mxu0 %v13660_v21 }
 0xe74   :  { %40263 = vmatpush3.msra.mxu0 %v45438_v54  ;;  %40264 = vmatprep.mubr.msk.f32.mxu0 %vm44102_vm1, %v44101_v51 }
 0xe75   :  { %40267 = vmatprep.subr.mxu0 %v44101_v51 }
 0xe7b   :  { %40265 = vmatmul.mubr.f32.vlgmr.msra.gmra.mrb[26].mxu0 %v13661_v22 }
 0xe7c   :  { %40268 = vmatpush3.msra.mxu0 %v13672_v60  ;;  %40269 = vmatprep.mubr.msk.f32.mxu0 %vm44102_vm1, %v44101_v51 }
 0xe7d   :  { %40272 = vmatprep.subr.mxu0 %v44101_v51 }
 0xe83   :  { %40270 = vmatmul.mubr.f32.vlgmr.msra.gmra.mrb[26].mxu0 %v13659_v59  ;;  %v13551_v1 = vpop.xlane.xlu0 %13550 }
 0xe84   :  { %40273 = vmatpush3.msra.mxu0 %v45438_v54  ;;  %40274 = vmatprep.mubr.msk.f32.mxu0 %vm44102_vm1, %v44101_v51  ;;  %43849 = vrcp.f32 %v13551_v1 }
 0xe85   :  { %40307 = vmatprep.subr.mxu0 %v44101_v51 }
 0xe87   :  { %13559 = vadd.xlane.f32.xlu1 %v13558_v10  ;;  %v9811_v20 = vpop.permute.xlu0 %9810 }
 0xe88   :  { %v13554_v14 = vpop.xlane.xlu1 %13553 }
 0xe89   :  { %43851 = vrcp.f32 %v13554_v14 }
 0xe8b   :  { %40275 = vmatmul.mubr.f32.vlgmr.msra.gmra.mrb[26].mxu0 %v13659_v59 }
 0xe8c   :  { %40309 = vmatprep.mubr.msk.f32.mxu0 %vm44102_vm1, %v44101_v51 }
 0xe8e   :  { %v43850_v16 = vpop.eup %43849 }
 0xe8f   :  { %v13573_v37 = vmul.f32 %v43850_v16, %v45495_v49 }
 0xe91   :  { %v13581_v33 = vmul.f32 %v45518_v8, %v13573_v37 }
 0xe93   :  { %v43852_v18 = vpop.eup %43851 }
 0xe94   :  { %v13574_v54 = vmul.f32 %v43852_v18, %v45499_v53 }
 0xe96   :  { %v13582_v19 = vmul.f32 %v45533_v24, %v13574_v54 }
 0xe98   :  { %14950 = vrot.lane.b32.xlu1 %v45426_v17, %s44104_s28  ;;  %15856 = vrot.lane.b32.xlu0 %v13582_v19, %s44103_s27 }
 0xe9c   :  { %15402 = vrot.lane.b32.xlu1 %v13581_v33, %s44103_s27  ;;  %15858 = vrot.lane.b32.xlu0 %v9811_v20, %s44104_s28 }
 0xea0   :  { %15404 = vrot.lane.b32.xlu1 %v9809_v40, %s44104_s28  ;;  %v14041_v53 = vpop.permute.xlu1 %14040 }
 0xea1   :  { %v14045_v49 = vsel %vm725_vm2, %v14041_v53, 0 }
 0xea2   :  { %v14113_v47 = vand.u32 4294901760, %v14045_v49 }
 0xea4   :  { %v14114_v17 = vsub.f32 %v14045_v49, %v14113_v47 }
 0xea6   :  { %v14115_v36 = vand.u32 4294901760, %v14114_v17 }
 0xea8   :  { %v14116_v15 = vsub.f32 %v14114_v17, %v14115_v36 }
 0xeaa   :  { %v14117_v44 = vand.u32 4294901760, %v14116_v15 }
 0xeac   :  { %40280 = vmatmul.mubr.f32.vlgmr.msra.gmra.mrb[30].mxu1 %v14117_v44 }
 0xead   :  { %40283 = vmatpush3.msra.mxu1 %v14128_v32  ;;  %40284 = vmatprep.mubr.msk.f32.mxu1 %vm44102_vm1, %v44101_v51 }
 0xeae   :  { %40287 = vmatprep.subr.mxu1 %v44101_v51 }
 0xeb4   :  { %40285 = vmatmul.mubr.f32.vlgmr.msra.gmra.mrb[30].mxu1 %v14113_v47 }
 0xeb5   :  { %40288 = vmatpush3.msra.mxu1 %v14125_v23  ;;  %40289 = vmatprep.mubr.msk.f32.mxu1 %vm44102_vm1, %v44101_v51 }
 0xeb6   :  { %40292 = vmatprep.subr.mxu1 %v44101_v51 }
 0xeb8   :  { %v13557_v12 = vpop.xlane.xlu0 %13556 }
 0xeb9   :  { %43853 = vrcp.f32 %v13557_v12 }
 0xebc   :  { %v14497_v27 = vpop.permute.xlu0 %14496  ;;  %40290 = vmatmul.mubr.f32.vlgmr.msra.gmra.mrb[30].mxu1 %v14114_v17 }
 0xebd   :  { %v14502_v41 = vand.u32 4294901760, %v14497_v27  ;;  %40293 = vmatpush3.msra.mxu1 %v45441_v55  ;;  %40294 = vmatprep.mubr.msk.f32.mxu1 %vm44102_vm1, %v44101_v51 }
 0xebe   :  { %40297 = vmatprep.subr.mxu1 %v44101_v51 }
 0xebf   :  { %40308 = vmatpush3.msra.mxu0 %v14502_v41  ;;  %v14579_v43 = vsub.f32 %v14497_v27, %v14502_v41 }
 0xec0   :  { %40312 = vmatprep.subr.mxu0 %v44101_v51  ;;  %v9813_v21 = vpop.permute.xlu0 %9812 }
 0xec1   :  { %v14580_v30 = vand.u32 4294901760, %v14579_v43 }
 0xec3   :  { %v43854_v59 = vpop.eup %43853  ;;  %v14581_v46 = vsub.f32 %v14579_v43, %v14580_v30 }
 0xec4   :  { %40295 = vmatmul.mubr.f32.vlgmr.msra.gmra.mrb[30].mxu1 %v14115_v36  ;;  %v13575_v60 = vmul.f32 %v43854_v59, %v45506_v0 }
 0xec5   :  { %40298 = vmatpush3.msra.mxu1 %v14126_v25  ;;  %40299 = vmatprep.mubr.msk.f32.mxu1 %vm44102_vm1, %v44101_v51  ;;  %v14582_v7 = vand.u32 4294901760, %v14581_v46 }
 0xec6   :  { %v13583_v61 = vmul.f32 %v45518_v8, %v13575_v60  ;;  %40302 = vmatprep.subr.mxu1 %v44101_v51 }
 0xec8   :  { %16310 = vrot.lane.b32.xlu1 %v13583_v61, %s44103_s27 }
 0xecc   :  { %16312 = vrot.lane.b32.xlu1 %v9813_v21, %s44104_s28  ;;  %40300 = vmatmul.mubr.f32.vlgmr.msra.gmra.mrb[30].mxu1 %v14113_v47 }
 0xecd   :  { %40303 = vmatpush3.msra.mxu1 %v45441_v55  ;;  %40304 = vmatprep.mubr.msk.f32.mxu1 %vm44102_vm1, %v44101_v51 }
 0xece   :  { %40337 = vmatprep.subr.mxu1 %v44101_v51 }
 0xed0   :  { %v14949_v0 = vpop.permute.xlu1 %14948 }
 0xed1   :  { %v14953_v40 = vsel %vm725_vm2, %v14949_v0, 0 }
 0xed2   :  { %v45626_v1 = vand.u32 4294901760, %v14953_v40 }
 0xed4   :  { %40305 = vmatmul.mubr.f32.vlgmr.msra.gmra.mrb[30].mxu1 %v14113_v47  ;;  %v15022_v10 = vsub.f32 %v14953_v40, %v45626_v1 }
 0xed5   :  { %v14495_v22 = vpop.permute.xlu1 %14494  ;;  %40339 = vmatprep.mubr.msk.f32.mxu1 %vm44102_vm1, %v44101_v51 }
 0xed6   :  { %v14499_v8 = vsel %vm725_vm2, %v14495_v22, 0  ;;  %v15023_v14 = vand.u32 4294901760, %v15022_v10 }
 0xed7   :  { %v14567_v2 = vand.u32 4294901760, %v14499_v8 }
 0xed8   :  { %v15024_v18 = vsub.f32 %v15022_v10, %v15023_v14 }
 0xed9   :  { %v14568_v3 = vsub.f32 %v14499_v8, %v14567_v2 }
 0xeda   :  { %v15025_v37 = vand.u32 4294901760, %v15024_v18 }
 0xedb   :  { %v14569_v31 = vand.u32 4294901760, %v14568_v3 }
 0xedd   :  { %v14570_v55 = vsub.f32 %v14568_v3, %v14569_v31 }
 0xedf   :  { %v14571_v29 = vand.u32 4294901760, %v14570_v55 }
 0xee1   :  { %40310 = vmatmul.mubr.f32.vlgmr.msra.gmra.mrb[28].mxu0 %v14571_v29 }
 0xee2   :  { %40313 = vmatpush3.msra.mxu0 %v14582_v7  ;;  %40314 = vmatprep.mubr.msk.f32.mxu0 %vm44102_vm1, %v44101_v51 }
 0xee3   :  { %40317 = vmatprep.subr.mxu0 %v44101_v51 }
 0xee9   :  { %40315 = vmatmul.mubr.f32.vlgmr.msra.gmra.mrb[28].mxu0 %v14567_v2 }
 0xeea   :  { %40318 = vmatpush3.msra.mxu0 %v14579_v43  ;;  %40319 = vmatprep.mubr.msk.f32.mxu0 %vm44102_vm1, %v44101_v51 }
 0xeeb   :  { %40322 = vmatprep.subr.mxu0 %v44101_v51 }
 0xef1   :  { %40320 = vmatmul.mubr.f32.vlgmr.msra.gmra.mrb[28].mxu0 %v14568_v3 }
 0xef2   :  { %40323 = vmatpush3.msra.mxu0 %v14502_v41  ;;  %40324 = vmatprep.mubr.msk.f32.mxu0 %vm44102_vm1, %v44101_v51 }
 0xef3   :  { %40327 = vmatprep.subr.mxu0 %v44101_v51 }
 0xef9   :  { %40325 = vmatmul.mubr.f32.vlgmr.msra.gmra.mrb[28].mxu0 %v14569_v31 }
 0xefa   :  { %40328 = vmatpush3.msra.mxu0 %v14580_v30  ;;  %40329 = vmatprep.mubr.msk.f32.mxu0 %vm44102_vm1, %v44101_v51 }
 0xefb   :  { %40332 = vmatprep.subr.mxu0 %v44101_v51 }
 0xf01   :  { %40330 = vmatmul.mubr.f32.vlgmr.msra.gmra.mrb[28].mxu0 %v14567_v2 }
 0xf02   :  { %40333 = vmatpush3.msra.mxu0 %v14502_v41  ;;  %40334 = vmatprep.mubr.msk.f32.mxu0 %vm44102_vm1, %v44101_v51 }
 0xf03   :  { %40367 = vmatprep.subr.mxu0 %v44101_v51 }
 0xf09   :  { %40335 = vmatmul.mubr.f32.vlgmr.msra.gmra.mrb[28].mxu0 %v14567_v2 }
 0xf0a   :  { %40369 = vmatprep.mubr.msk.f32.mxu0 %vm44102_vm1, %v44101_v51 }
 0xf14   :  { %v13560_v16 = vpop.xlane.xlu1 %13559 }
 0xf15   :  { %43855 = vrcp.f32 %v13560_v16 }
 0xf18   :  { %v14951_v54 = vpop.permute.xlu1 %14950 }
 0xf19   :  { %v45631_v19 = vand.u32 4294901760, %v14951_v54 }
 0xf1b   :  { %v15033_v33 = vsub.f32 %v14951_v54, %v45631_v19  ;;  %40338 = vmatpush3.msra.mxu1 %v45631_v19 }
 0xf1c   :  { %40340 = vmatmul.mubr.f32.vlgmr.msra.gmra.mrb[32].mxu1 %v15025_v37  ;;  %v15403_v20 = vpop.permute.xlu1 %15402  ;;  %40342 = vmatprep.subr.mxu1 %v44101_v51 }
 0xf1d   :  { %v15034_v23 = vand.u32 4294901760, %v15033_v33  ;;  %v15407_v53 = vsel %vm725_vm2, %v15403_v20, 0  ;;  %40344 = vmatprep.mubr.msk.f32.mxu1 %vm44102_vm1, %v44101_v51 }
 0xf1e   :  { %v45639_v49 = vand.u32 4294901760, %v15407_v53 }
 0xf1f   :  { %v43856_v47 = vpop.eup %43855  ;;  %v15035_v25 = vsub.f32 %v15033_v33, %v15034_v23 }
 0xf20   :  { %v15476_v17 = vsub.f32 %v15407_v53, %v45639_v49  ;;  %v15405_v36 = vpop.permute.xlu1 %15404  ;;  %v13576_v26 = vmul.f32 %v43856_v47, %v45504_v57 }
 0xf21   :  { %v45643_v15 = vand.u32 4294901760, %v15405_v36  ;;  %v15036_v44 = vand.u32 4294901760, %v15035_v25 }
 0xf22   :  { %v15477_v32 = vand.u32 4294901760, %v15476_v17  ;;  %v13584_v12 = vmul.f32 %v45533_v24, %v13576_v26  ;;  %v9815_v24 = vpop.permute.xlu0 %9814 }
 0xf23   :  { %v15487_v27 = vsub.f32 %v15405_v36, %v45643_v15  ;;  %40343 = vmatpush3.msra.mxu1 %v15036_v44  ;;  %40368 = vmatpush3.msra.mxu0 %v45643_v15 }
 0xf24   :  { %v15478_v41 = vsub.f32 %v15476_v17, %v15477_v32  ;;  %16764 = vrot.lane.b32.xlu0 %v13584_v12, %s44103_s27  ;;  %40345 = vmatmul.mubr.f32.vlgmr.msra.gmra.mrb[32].mxu1 %v45626_v1 }
 0xf25   :  { %v15488_v59 = vand.u32 4294901760, %v15487_v27  ;;  %40347 = vmatprep.subr.mxu1 %v44101_v51  ;;  %40372 = vmatprep.subr.mxu0 %v44101_v51 }
 0xf26   :  { %40348 = vmatpush3.msra.mxu1 %v15033_v33  ;;  %v15479_v57 = vand.u32 4294901760, %v15478_v41  ;;  %40349 = vmatprep.mubr.msk.f32.mxu1 %vm44102_vm1, %v44101_v51  ;;  %v15857_v21 = vpop.permute.xlu0 %15856 }
 0xf27   :  { %40352 = vmatprep.subr.mxu1 %v44101_v51  ;;  %v15489_v60 = vsub.f32 %v15487_v27, %v15488_v59  ;;  %v15861_v0 = vsel %vm725_vm2, %v15857_v21, 0 }
 0xf28   :  { %16766 = vrot.lane.b32.xlu0 %v9815_v24, %s44104_s28  ;;  %40370 = vmatmul.mubr.f32.vlgmr.msra.gmra.mrb[30].mxu0 %v15479_v57  ;;  %v45670_v22 = vand.u32 4294901760, %v15861_v0 }
 0xf29   :  { %v15490_v61 = vand.u32 4294901760, %v15489_v60  ;;  %40374 = vmatprep.mubr.msk.f32.mxu0 %vm44102_vm1, %v44101_v51 }
 0xf2a   :  { %v15859_v43 = vpop.permute.xlu0 %15858  ;;  %v45679_v2 = vsub.f32 %v15861_v0, %v45670_v22 }
 0xf2b   :  { %40373 = vmatpush3.msra.mxu0 %v15490_v61  ;;  %v45673_v8 = vand.u32 4294901760, %v15859_v43 }
 0xf2c   :  { %40350 = vmatmul.mubr.f32.vlgmr.msra.gmra.mrb[32].mxu1 %v15022_v10  ;;  %40377 = vmatprep.subr.mxu0 %v44101_v51  ;;  %v15931_v31 = vand.u32 4294901760, %v45679_v2 }
 0xf2d   :  { %40353 = vmatpush3.msra.mxu1 %v45631_v19  ;;  %40354 = vmatprep.mubr.msk.f32.mxu1 %vm44102_vm1, %v44101_v51  ;;  %v15941_v3 = vsub.f32 %v15859_v43, %v45673_v8 }
 0xf2e   :  { %40357 = vmatprep.subr.mxu1 %v44101_v51  ;;  %v15932_v7 = vsub.f32 %v45679_v2, %v15931_v31 }
 0xf2f   :  { %v15942_v46 = vand.u32 4294901760, %v15941_v3 }
 0xf30   :  { %40375 = vmatmul.mubr.f32.vlgmr.msra.gmra.mrb[30].mxu0 %v45639_v49  ;;  %v15933_v18 = vand.u32 4294901760, %v15932_v7 }
 0xf31   :  { %40378 = vmatpush3.msra.mxu0 %v15487_v27  ;;  %40379 = vmatprep.mubr.msk.f32.mxu0 %vm44102_vm1, %v44101_v51 }
 0xf32   :  { %40382 = vmatprep.subr.mxu0 %v44101_v51 }
 0xf34   :  { %40355 = vmatmul.mubr.f32.vlgmr.msra.gmra.mrb[32].mxu1 %v15023_v14  ;;  %v15943_v14 = vsub.f32 %v15941_v3, %v15942_v46 }
 0xf35   :  { %40358 = vmatpush3.msra.mxu1 %v15034_v23  ;;  %40359 = vmatprep.mubr.msk.f32.mxu1 %vm44102_vm1, %v44101_v51 }
 0xf36   :  { %40362 = vmatprep.subr.mxu1 %v44101_v51 }
 0xf38   :  { %40380 = vmatmul.mubr.f32.vlgmr.msra.gmra.mrb[30].mxu0 %v15476_v17 }
 0xf39   :  { %40383 = vmatpush3.msra.mxu0 %v45643_v15  ;;  %40384 = vmatprep.mubr.msk.f32.mxu0 %vm44102_vm1, %v44101_v51 }
 0xf3a   :  { %v16311_v30 = vpop.permute.xlu1 %16310  ;;  %40387 = vmatprep.subr.mxu0 %v44101_v51 }
 0xf3b   :  { %v16315_v55 = vsel %vm725_vm2, %v16311_v30, 0 }
 0xf3c   :  { %40360 = vmatmul.mubr.f32.vlgmr.msra.gmra.mrb[32].mxu1 %v45626_v1  ;;  %v45693_v40 = vand.u32 4294901760, %v16315_v55 }
 0xf3d   :  { %40363 = vmatpush3.msra.mxu1 %v45631_v19  ;;  %40364 = vmatprep.mubr.msk.f32.mxu1 %vm44102_vm1, %v44101_v51  ;;  %v15944_v19 = vand.u32 4294901760, %v15943_v14 }
 0xf3e   :  { %40397 = vmatprep.subr.mxu1 %v44101_v51  ;;  %v16313_v29 = vpop.permute.xlu1 %16312  ;;  %v16384_v16 = vsub.f32 %v16315_v55, %v45693_v40  ;;  %v37919_v55 = vld [vmem:[%s47554_s6 + $0x20] sm:$0xff] }
 0xf3f   :  { %v45696_v10 = vand.u32 4294901760, %v16313_v29  ;;  %v17258_v7 = vand.u32 4294901760, %v37919_v55 }
 0xf40   :  { %40385 = vmatmul.mubr.f32.vlgmr.msra.gmra.mrb[30].mxu0 %v15477_v32 }
 0xf41   :  { %40388 = vmatpush3.msra.mxu0 %v15488_v59  ;;  %40389 = vmatprep.mubr.msk.f32.mxu0 %vm44102_vm1, %v44101_v51  ;;  %v16395_v54 = vsub.f32 %v16313_v29, %v45696_v10  ;;  %v37920_v29 = vld [vmem:[%s47554_s6 + $0x28] sm:$0xff]  ;;  %v17348_v14 = vsub.f32 %v37919_v55, %v17258_v7 }
 0xf42   :  { %40392 = vmatprep.subr.mxu0 %v44101_v51 }
 0xf43   :  { %v16396_v37 = vand.u32 4294901760, %v16395_v54 }
 0xf44   :  { %40365 = vmatmul.mubr.f32.vlgmr.msra.gmra.mrb[32].mxu1 %v45626_v1  ;;  %v16385_v1 = vand.u32 4294901760, %v16384_v16 }
 0xf45   :  { %40398 = vmatpush3.msra.mxu1 %v45673_v8  ;;  %40399 = vmatprep.mubr.msk.f32.mxu1 %vm44102_vm1, %v44101_v51  ;;  %v16397_v20 = vsub.f32 %v16395_v54, %v16396_v37 }
 0xf46   :  { %40402 = vmatprep.subr.mxu1 %v44101_v51  ;;  %v16386_v33 = vsub.f32 %v16384_v16, %v16385_v1 }
 0xf47   :  { %v16398_v53 = vand.u32 4294901760, %v16397_v20 }
 0xf48   :  { %40390 = vmatmul.mubr.f32.vlgmr.msra.gmra.mrb[30].mxu0 %v45639_v49  ;;  %40400 = vmatmul.mubr.f32.vlgmr.msra.gmra.mrb[34].mxu1 %v15933_v18  ;;  %v16387_v23 = vand.u32 4294901760, %v16386_v33  ;;  %v37921_v18 = vld [vmem:[%s47554_s6 + $0x30] sm:$0xff] }
 0xf49   :  { %40393 = vmatpush3.msra.mxu0 %v45643_v15  ;;  %40403 = vmatpush3.msra.mxu1 %v15944_v19  ;;  %v17264_v19 = vand.u32 4294901760, %v37921_v18 }
 0xf4a   :  { %40394 = vmatprep.mubr.msk.f32.mxu0 %vm44102_vm1, %v44101_v51  ;;  %40404 = vmatprep.mubr.msk.f32.mxu1 %vm44102_vm1, %v44101_v51 }
 0xf4b   :  { %40407 = vmatprep.subr.mxu1 %v44101_v51  ;;  %40427 = vmatprep.subr.mxu0 %v44101_v51 }
 0xf50   :  { %40395 = vmatmul.mubr.f32.vlgmr.msra.gmra.mrb[30].mxu0 %v45639_v49  ;;  %40405 = vmatmul.mubr.f32.vlgmr.msra.gmra.mrb[34].mxu1 %v45670_v22 }
 0xf51   :  { %40408 = vmatpush3.msra.mxu1 %v15941_v3  ;;  %40428 = vmatpush3.msra.mxu0 %v45696_v10 }
 0xf52   :  { %40429 = vmatprep.mubr.msk.f32.mxu0 %vm44102_vm1, %v44101_v51  ;;  %40432 = vmatprep.subr.mxu0 %v44101_v51 }
 0xf53   :  { %40409 = vmatprep.mubr.msk.f32.mxu1 %vm44102_vm1, %v44101_v51  ;;  %40412 = vmatprep.subr.mxu1 %v44101_v51 }
 0xf54   :  { %40430 = vmatmul.mubr.f32.vlgmr.msra.gmra.mrb[32].mxu0 %v16387_v23 }
 0xf55   :  { %40433 = vmatpush3.msra.mxu0 %v16398_v53  ;;  %40434 = vmatprep.mubr.msk.f32.mxu0 %vm44102_vm1, %v44101_v51  ;;  %v17362_v53 = vsub.f32 %v37921_v18, %v17264_v19 }
 0xf56   :  { %40437 = vmatprep.subr.mxu0 %v44101_v51 }
 0xf58   :  { %40410 = vmatmul.mubr.f32.vlgmr.msra.gmra.mrb[34].mxu1 %v45679_v2 }
 0xf59   :  { %40413 = vmatpush3.msra.mxu1 %v45673_v8  ;;  %40414 = vmatprep.mubr.msk.f32.mxu1 %vm44102_vm1, %v44101_v51 }
 0xf5a   :  { %40417 = vmatprep.subr.mxu1 %v44101_v51 }
 0xf5c   :  { %40435 = vmatmul.mubr.f32.vlgmr.msra.gmra.mrb[32].mxu0 %v45693_v40 }
 0xf5d   :  { %40438 = vmatpush3.msra.mxu0 %v16395_v54  ;;  %40439 = vmatprep.mubr.msk.f32.mxu0 %vm44102_vm1, %v44101_v51  ;;  %v37922_v54 = vld [vmem:[%s47554_s6 + $0x38] sm:$0xff] }
 0xf5e   :  { %v45733_v49 = vpop.f32.mrb[26].mxu0  ;;  %40442 = vmatprep.subr.mxu0 %v44101_v51 }
 0xf5f   :  { %v40276_v47 = vpop.f32.mrb[27].mxu0 }
 0xf60   :  { %40415 = vmatmul.mubr.f32.vlgmr.msra.gmra.mrb[34].mxu1 %v15931_v31 }
 0xf61   :  { %40418 = vmatpush3.msra.mxu1 %v15942_v46  ;;  %40419 = vmatprep.mubr.msk.f32.mxu1 %vm44102_vm1, %v44101_v51 }
 0xf62   :  { %40422 = vmatprep.subr.mxu1 %v44101_v51 }
 0xf64   :  { %40440 = vmatmul.mubr.f32.vlgmr.msra.gmra.mrb[32].mxu0 %v16384_v16 }
 0xf65   :  { %40443 = vmatpush3.msra.mxu0 %v45696_v10  ;;  %40444 = vmatprep.mubr.msk.f32.mxu0 %vm44102_vm1, %v44101_v51 }
 0xf66   :  { %40447 = vmatprep.subr.mxu0 %v44101_v51 }
 0xf68   :  { %40420 = vmatmul.mubr.f32.vlgmr.msra.gmra.mrb[34].mxu1 %v45670_v22 }
 0xf69   :  { %40423 = vmatpush3.msra.mxu1 %v45673_v8  ;;  %40424 = vmatprep.mubr.msk.f32.mxu1 %vm44102_vm1, %v44101_v51 }
 0xf6a   :  { %40457 = vmatprep.subr.mxu1 %v44101_v51 }
 0xf6c   :  { %40445 = vmatmul.mubr.f32.vlgmr.msra.gmra.mrb[32].mxu0 %v16385_v1  ;;  %v17267_v1 = vand.u32 4294901760, %v37922_v54 }
 0xf6d   :  { %40448 = vmatpush3.msra.mxu0 %v16396_v37  ;;  %40449 = vmatprep.mubr.msk.f32.mxu0 %vm44102_vm1, %v44101_v51  ;;  %v17349_v37 = vand.u32 4294901760, %v17348_v14 }
 0xf6e   :  { %40452 = vmatprep.subr.mxu0 %v44101_v51  ;;  %v45798_v20 = vpack.c.bf16 %v17267_v1, %v17264_v19  ;;  %v17369_v47 = vsub.f32 %v37922_v54, %v17267_v1 }
 0xf6f   :  { %v17350_v23 = vsub.f32 %v17348_v14, %v17349_v37 }
 0xf70   :  { %40425 = vmatmul.mubr.f32.vlgmr.msra.gmra.mrb[34].mxu1 %v45670_v22 }
 0xf71   :  { %40459 = vmatprep.mubr.msk.f32.mxu1 %vm44102_vm1, %v44101_v51 }
 0xf74   :  { %40450 = vmatmul.mubr.f32.vlgmr.msra.gmra.mrb[32].mxu0 %v45693_v40 }
 0xf75   :  { %40453 = vmatpush3.msra.mxu0 %v45696_v10  ;;  %40454 = vmatprep.mubr.msk.f32.mxu0 %vm44102_vm1, %v44101_v51 }
 0xf7c   :  { %40455 = vmatmul.mubr.f32.vlgmr.msra.gmra.mrb[32].mxu0 %v45693_v40  ;;  %v17261_v40 = vand.u32 4294901760, %v37920_v29 }
 0xf7e   :  { %v45788_v10 = vpack.c.bf16 %v17261_v40, %v17258_v7  ;;  %v17355_v16 = vsub.f32 %v37920_v29, %v17261_v40 }
 0xf80   :  { %42396 = vmatprep.subr.bf16.mxu0 %v45788_v10  ;;  %v17356_v33 = vand.u32 4294901760, %v17355_v16 }
 0xf81   :  { %42398 = vmatpush3.bf16.msra.mxu0 %v45788_v10 }
 0xf82   :  { %42400 = vmatprep.subr.bf16.mxu0 %v45798_v20 }
 0xf85   :  { %42402 = vmatpush3.bf16.msra.mxu0 %v45798_v20 }
 0xf96   :  { %v16765_v25 = vpop.permute.xlu0 %16764 }
 0xf97   :  { %v16769_v17 = vsel %vm725_vm2, %v16765_v25, 0  ;;  %v17357_v25 = vsub.f32 %v17355_v16, %v17356_v33 }
 0xf98   :  { %v16837_v36 = vand.u32 4294901760, %v16769_v17 }
 0xf9a   :  { %v16838_v26 = vsub.f32 %v16769_v17, %v16837_v36  ;;  %v16767_v15 = vpop.permute.xlu0 %16766  ;;  %v17351_v17 = vand.u32 4294901760, %v17350_v23 }
 0xf9b   :  { %v16772_v44 = vand.u32 4294901760, %v16767_v15 }
 0xf9c   :  { %v16839_v32 = vand.u32 4294901760, %v16838_v26 }
 0xf9d   :  { %v16849_v12 = vsub.f32 %v16767_v15, %v16772_v44  ;;  %40458 = vmatpush3.msra.mxu1 %v16772_v44  ;;  %v17358_v15 = vand.u32 4294901760, %v17357_v25 }
 0xf9e   :  { %v16840_v27 = vsub.f32 %v16838_v26, %v16839_v32  ;;  %40462 = vmatprep.subr.mxu1 %v44101_v51 }
 0xf9f   :  { %v16850_v41 = vand.u32 4294901760, %v16849_v12 }
 0xfa0   :  { %v16841_v59 = vand.u32 4294901760, %v16840_v27 }
 0xfa1   :  { %v16851_v57 = vsub.f32 %v16849_v12, %v16850_v41 }
 0xfa2   :  { %40460 = vmatmul.mubr.f32.vlgmr.msra.gmra.mrb[36].mxu1 %v16841_v59 }
 0xfa3   :  { %v16852_v24 = vand.u32 4294901760, %v16851_v57  ;;  %40464 = vmatprep.mubr.msk.f32.mxu1 %vm44102_vm1, %v44101_v51 }
 0xfa5   :  { %40463 = vmatpush3.msra.mxu1 %v16852_v24 }
 0xfa6   :  { %40467 = vmatprep.subr.mxu1 %v44101_v51 }
 0xfa7   :  { %v45764_v60 = vpop.f32.mrb[30].mxu1 }
 0xfa8   :  { %v40306_v61 = vpop.f32.mrb[31].mxu1 }
 0xfa9   :  { %v42411_v61 = vpack.c.bf16 %v17355_v16, %v17348_v14 }
 0xfaa   :  { %40465 = vmatmul.mubr.f32.vlgmr.msra.gmra.mrb[36].mxu1 %v16837_v36 }
 0xfab   :  { %40468 = vmatpush3.msra.mxu1 %v16849_v12  ;;  %40469 = vmatprep.mubr.msk.f32.mxu1 %vm44102_vm1, %v44101_v51 }
 0xfac   :  { %40472 = vmatprep.subr.mxu1 %v44101_v51 }
 0xfb2   :  { %40470 = vmatmul.mubr.f32.vlgmr.msra.gmra.mrb[36].mxu1 %v16838_v26  ;;  %v17370_v26 = vand.u32 4294901760, %v17369_v47 }
 0xfb3   :  { %40473 = vmatpush3.msra.mxu1 %v16772_v44  ;;  %40474 = vmatprep.mubr.msk.f32.mxu1 %vm44102_vm1, %v44101_v51 }
 0xfb4   :  { %40477 = vmatprep.subr.mxu1 %v44101_v51  ;;  %v17371_v12 = vsub.f32 %v17369_v47, %v17370_v26 }
 0xfb6   :  { %v17372_v57 = vand.u32 4294901760, %v17371_v12 }
 0xfba   :  { %40475 = vmatmul.mubr.f32.vlgmr.msra.gmra.mrb[36].mxu1 %v16839_v32 }
 0xfbb   :  { %40478 = vmatpush3.msra.mxu1 %v16850_v41  ;;  %40479 = vmatprep.mubr.msk.f32.mxu1 %vm44102_vm1, %v44101_v51  ;;  %v42403_v41 = vpack.c.bf16 %v17358_v15, %v17351_v17 }
 0xfbc   :  { %40482 = vmatprep.subr.mxu1 %v44101_v51 }
 0xfbd   :  { %42404 = vmatprep.subr.bf16.mxu0 %v42403_v41 }
 0xfc2   :  { %40480 = vmatmul.mubr.f32.vlgmr.msra.gmra.mrb[36].mxu1 %v16837_v36 }
 0xfc3   :  { %40483 = vmatpush3.msra.mxu1 %v16772_v44  ;;  %40484 = vmatprep.mubr.msk.f32.mxu1 %vm44102_vm1, %v44101_v51 }
 0xfca   :  { %40485 = vmatmul.mubr.f32.vlgmr.msra.gmra.mrb[36].mxu1 %v16837_v36  ;;  %v17363_v36 = vand.u32 4294901760, %v17362_v53 }
 0xfcc   :  { %v17364_v32 = vsub.f32 %v17362_v53, %v17363_v36 }
 0xfce   :  { %v17365_v59 = vand.u32 4294901760, %v17364_v32 }
 0xfd0   :  { %v42407_v24 = vpack.c.bf16 %v17372_v57, %v17365_v59 }
 0xfdc   :  { %v14943_v21 = vpop.f32.mrb[28].mxu0 }
 0xfdd   :  { %17219 = vrot.lane.b32.xlu1 %v14943_v21, %s44096_s26  ;;  %v40336_v0 = vpop.f32.mrb[29].mxu0  ;;  %v42415_v21 = vpack.c.bf16 %v17369_v47, %v17362_v53 }
 0xfde   :  { %v42427_v0 = vpack.c.bf16 %v17356_v33, %v17349_v37 }
0x1017   :  { %v15397_v43 = vpop.f32.mrb[32].mxu1 }
0x1018   :  { %17221 = vrot.lane.b32.xlu0 %v15397_v43, %s44096_s26  ;;  %v40366_v22 = vpop.f32.mrb[33].mxu1  ;;  %v42431_v43 = vpack.c.bf16 %v17370_v26, %v17363_v36 }
0x1023   :  { %v15851_v8 = vpop.f32.mrb[30].mxu0 }
0x1024   :  { %17227 = vrot.lane.b32.xlu1 %v15851_v8, %s44108_s22  ;;  %v40396_v2 = vpop.f32.mrb[31].mxu0 }
0x1043   :  { %v16305_v30 = vpop.f32.mrb[34].mxu1 }
0x1044   :  { %17229 = vrot.lane.b32.xlu0 %v16305_v30, %s44108_s22  ;;  %v40426_v3 = vpop.f32.mrb[35].mxu1 }
0x104f   :  { %v16759_v31 = vpop.f32.mrb[32].mxu0  ;;  %v17220_v22 = vpop.permute.xlu1 %17219 }
0x1050   :  { %17235 = vrot.lane.b32.xlu1 %v16759_v31, %s44109_s21  ;;  %v40456_v46 = vpop.f32.mrb[33].mxu0  ;;  %v17241_v2 = vsel %vm725_vm2, %v45733_v49, %v17220_v22  ;;  %v17826_v22 = vld [vmem:[#allocation8 + $0x8] sm:$0xff] }
0x108a   :  { %v17222_v16 = vpop.permute.xlu0 %17221 }
0x108b   :  { %v17242_v54 = vsel %vm725_vm2, %v45764_v60, %v17222_v16  ;;  %v45821_v60 = vld [vmem:[#allocation10 + $0x8] sm:$0xff] }
0x108c   :  { %v17250_v17 = vrot.slane %v45821_v60, %v44267_v5 }
0x1096   :  { %v17228_v8 = vpop.permute.xlu1 %17227 }
0x1097   :  { %v17243_v30 = vsel %vm8088_vm5, %v17241_v2, %v17228_v8  ;;  %v17827_v8 = vld [vmem:[#allocation8 + $0x10] sm:$0xff] }
0x109d   :  { %v17213_v44 = vpop.f32.mrb[36].mxu1 }
0x109e   :  { %17237 = vrot.lane.b32.xlu0 %v17213_v44, %s44109_s21  ;;  %v40486_v27 = vpop.f32.mrb[37].mxu1 }
0x10b6   :  { %v17230_v18 = vpop.permute.xlu0 %17229 }
0x10b7   :  { %v17244_v49 = vsel %vm8088_vm5, %v17242_v54, %v17230_v18 }
0x10c2   :  { %v17236_v3 = vpop.permute.xlu1 %17235 }
0x10c3   :  { %v17245_v31 = vsel %vm8091_vm6, %v17243_v30, %v17236_v3  ;;  %v17843_v30 = vand.u32 4294901760, %v17826_v22  ;;  %v17828_v3 = vld [vmem:[#allocation8 + $0x18] sm:$0xff] }
0x10c4   :  { %v17252_v46 = vsel %vm116_vm0, %v17245_v31, 0  ;;  %v17846_v31 = vand.u32 4294901760, %v17827_v8 }
0x10c5   :  { %v17326_v55 = vand.u32 4294901760, %v17252_v46 }
0x10c7   :  { %v17327_v29 = vsub.f32 %v17252_v46, %v17326_v55  ;;  %v17849_v46 = vand.u32 4294901760, %v17828_v3 }
0x10c9   :  { %v17328_v7 = vand.u32 4294901760, %v17327_v29 }
0x10cb   :  { %v17329_v40 = vsub.f32 %v17327_v29, %v17328_v7 }
0x10cd   :  { %v17330_v14 = vand.u32 4294901760, %v17329_v40  ;;  %v17937_v40 = vsub.f32 %v17826_v22, %v17843_v30  ;;  %v17816_v22 = vrot.slane %v45821_v60, %v44603_v11 }
0x10cf   :  { %40495 = vmatprep.mubr.f32.mxu0 %v17330_v14  ;;  %v17938_v16 = vand.u32 4294901760, %v17937_v40 }
0x10d1   :  { %v17939_v54 = vsub.f32 %v17937_v40, %v17938_v16 }
0x1110   :  { %v17238_v19 = vpop.permute.xlu0 %17237 }
0x1111   :  { %v17246_v1 = vsel %vm8091_vm6, %v17244_v49, %v17238_v19  ;;  %v17944_v49 = vsub.f32 %v17827_v8, %v17846_v31  ;;  %v17951_v19 = vsub.f32 %v17828_v3, %v17849_v46  ;;  %v17822_v3 = vrot.slane %v45821_v60, %v45137_v58 }
0x1112   :  { %v17255_v37 = vsel %vm116_vm0, %v17246_v1, 0 }
0x1113   :  { %v17336_v33 = vand.u32 4294901760, %v17255_v37 }
0x1115   :  { %v17337_v23 = vsub.f32 %v17255_v37, %v17336_v33  ;;  %v17940_v37 = vand.u32 4294901760, %v17939_v54 }
0x1117   :  { %v17338_v53 = vand.u32 4294901760, %v17337_v23 }
0x1119   :  { %v17339_v47 = vsub.f32 %v17337_v23, %v17338_v53 }
0x111b   :  { %v17340_v25 = vand.u32 4294901760, %v17339_v47 }
0x111d   :  { %40496 = vmatmul.mubr.f32.vlgmr.msra.gmra.mrb[34].mxu0 %v17340_v25 }
0x111e   :  { %42406 = vmatpush3.bf16.msra.mxu0 %v42403_v41  ;;  %40506 = vmatprep.mubr.f32.mxu0 %v17326_v55 }
0x111f   :  { %42408 = vmatprep.subr.bf16.mxu0 %v42407_v24 }
0x1122   :  { %42410 = vmatpush3.bf16.msra.mxu0 %v42407_v24 }
0x1123   :  { %42412 = vmatprep.subr.bf16.mxu0 %v42411_v61 }
0x1125   :  { %40507 = vmatmul.mubr.f32.vlgmr.msra.gmra.mrb[34].mxu0 %v17336_v33 }
0x1126   :  { %42414 = vmatpush3.bf16.msra.mxu0 %v42411_v61  ;;  %40517 = vmatprep.mubr.f32.mxu0 %v17327_v29  ;;  %v45841_v29 = vpack.c.bf16 %v17849_v46, %v17846_v31 }
0x1127   :  { %42416 = vmatprep.subr.bf16.mxu0 %v42415_v21 }
0x112a   :  { %42418 = vmatpush3.bf16.msra.mxu0 %v42415_v21 }
0x112b   :  { %42420 = vmatprep.subr.bf16.mxu0 %v45788_v10 }
0x112d   :  { %40518 = vmatmul.mubr.f32.vlgmr.msra.gmra.mrb[34].mxu0 %v17337_v23  ;;  %v17952_v23 = vand.u32 4294901760, %v17951_v19 }
0x112e   :  { %42422 = vmatpush3.bf16.msra.mxu0 %v45788_v10  ;;  %40528 = vmatprep.mubr.f32.mxu0 %v17328_v7 }
0x112f   :  { %42424 = vmatprep.subr.bf16.mxu0 %v45798_v20  ;;  %v17953_v25 = vsub.f32 %v17951_v19, %v17952_v23 }
0x1132   :  { %42426 = vmatpush3.bf16.msra.mxu0 %v45798_v20 }
0x1133   :  { %42428 = vmatprep.subr.bf16.mxu0 %v42427_v0 }
0x1135   :  { %40529 = vmatmul.mubr.f32.vlgmr.msra.gmra.mrb[34].mxu0 %v17338_v53 }
0x1136   :  { %42430 = vmatpush3.bf16.msra.mxu0 %v42427_v0  ;;  %40539 = vmatprep.mubr.f32.mxu0 %v17326_v55 }
0x1137   :  { %42432 = vmatprep.subr.bf16.mxu0 %v42431_v43 }
0x113a   :  { %42434 = vmatpush3.bf16.msra.mxu0 %v42431_v43  ;;  %v17825_v43 = vld [vmem:[#allocation8] sm:$0xff] }
0x113b   :  { %42436 = vmatprep.subr.bf16.mxu0 %v45788_v10  ;;  %v17840_v2 = vand.u32 4294901760, %v17825_v43 }
0x113d   :  { %40540 = vmatmul.mubr.f32.vlgmr.msra.gmra.mrb[34].mxu0 %v17336_v33  ;;  %v17930_v7 = vsub.f32 %v17825_v43, %v17840_v2 }
0x113e   :  { %42438 = vmatpush3.bf16.msra.mxu0 %v45788_v10  ;;  %40550 = vmatprep.mubr.f32.mxu0 %v17326_v55  ;;  %v45839_v55 = vpack.c.bf16 %v17843_v30, %v17840_v2 }
0x113f   :  { %42440 = vmatprep.subr.bf16.mxu0 %v45798_v20  ;;  %v17931_v14 = vand.u32 4294901760, %v17930_v7 }
0x1140   :  { %42444 = vmatprep.subr.bf16.mxu1 %v45839_v55 }
0x1141   :  { %42446 = vmatpush3.bf16.msra.mxu1 %v45839_v55  ;;  %v17932_v18 = vsub.f32 %v17930_v7, %v17931_v14 }
0x1142   :  { %42442 = vmatpush3.bf16.msra.mxu0 %v45798_v20  ;;  %42448 = vmatprep.subr.bf16.mxu1 %v45841_v29 }
0x1143   :  { %v17933_v1 = vand.u32 4294901760, %v17932_v18 }
0x1145   :  { %40551 = vmatmul.mubr.f32.vlgmr.msra.gmra.mrb[34].mxu0 %v17336_v33  ;;  %42450 = vmatpush3.bf16.msra.mxu1 %v45841_v29  ;;  %v17945_v33 = vand.u32 4294901760, %v17944_v49  ;;  %v42451_v53 = vpack.c.bf16 %v17940_v37, %v17933_v1 }
0x1147   :  { %v17946_v47 = vsub.f32 %v17944_v49, %v17945_v33  ;;  %42452 = vmatprep.subr.bf16.mxu1 %v42451_v53 }
0x1218   :  { %v40552_v36 = vpop.f32.mrb[34].mxu0 }
0x1219   :  { %v42975_v26 = vadd.f32 %v40552_v36, %v17250_v17  ;;  %v17775_v15 = vpop.f32.mrb[35].mxu0  ;;  %v17954_v36 = vand.u32 4294901760, %v17953_v25  ;;  %v18372_v25 = vld [vmem:[%s47556_s8 + $0x18] sm:$0xff] }
0x121a   :  { %v42976_v44 = vadd.f32 %v17775_v15, %v17250_v17  ;;  %v17947_v17 = vand.u32 4294901760, %v17946_v47  ;;  %v42459_v15 = vpack.c.bf16 %v17937_v40, %v17930_v7 }
0x121b   :  { %v17786_v32 = vadd.f32 %v42975_v26, %v45108_v4 }
0x121c   :  { %v17785_v12 = vadd.f32 %v42976_v44, %v45104_v42  ;;  %v42455_v26 = vpack.c.bf16 %v17954_v36, %v17947_v17  ;;  %v42463_v44 = vpack.c.bf16 %v17951_v19, %v17944_v49 }
0x121d   :  { %v17790_v10 = vsel %vm116_vm0, %v17786_v32, 0.0 }
0x121e   :  { %17791 = vadd.xlane.f32.xlu0 %v17790_v10  ;;  %v17787_v27 = vsel %vm116_vm0, %v17785_v12, 0.0  ;;  %v45850_v10 = vld [vmem:[%s47556_s8] sm:$0xff] }
0x121f   :  { %17788 = vadd.xlane.f32.xlu1 %v17787_v27  ;;  %v45855_v27 = vld [vmem:[%s47556_s8 + $0x8] sm:$0xff] }
0x12ab   :  { %v17792_v20 = vpop.xlane.xlu0 %17791 }
0x12ac   :  { %v17794_v41 = vmul.f32 0.03125, %v17792_v20  ;;  %v17789_v59 = vpop.xlane.xlu1 %17788  ;;  %v18389_v20 = vand.u32 4294901760, %v45850_v10 }
0x12ad   :  { %v17793_v57 = vmul.f32 0.03125, %v17789_v59 }
0x12ae   :  { %v45829_v24 = vsub.f32 %v17786_v32, %v17794_v41  ;;  %v42475_v32 = vpack.c.bf16 %v17938_v16, %v17931_v14  ;;  %v18392_v41 = vand.u32 4294901760, %v45855_v27 }
0x12af   :  { %v45831_v61 = vsub.f32 %v17785_v12, %v17793_v57  ;;  %v42479_v12 = vpack.c.bf16 %v17952_v23, %v17945_v33 }
0x12b0   :  { %v17798_v21 = vmul.f32 %v45829_v24, %v45829_v24  ;;  %v45863_v59 = vpack.c.bf16 %v18392_v41, %v18389_v20 }
0x12b1   :  { %v17797_v42 = vmul.f32 %v45831_v61, %v45831_v61 }
0x12b2   :  { %v17802_v4 = vsel %vm116_vm0, %v17798_v21, 0.0  ;;  %42540 = vmatprep.subr.bf16.mxu0 %v45863_v59 }
0x12b3   :  { %17803 = vadd.xlane.f32.xlu1 %v17802_v4  ;;  %v17799_v0 = vsel %vm116_vm0, %v17797_v42, 0.0  ;;  %42542 = vmatpush3.bf16.msra.mxu0 %v45863_v59 }
0x12b4   :  { %17800 = vadd.xlane.f32.xlu0 %v17799_v0 }
0x1340   :  { %v17804_v57 = vpop.xlane.xlu1 %17803 }
0x1341   :  { %v17806_v21 = vmul.f32 0.03125, %v17804_v57  ;;  %v17801_v42 = vpop.xlane.xlu0 %17800  ;;  %v18376_v57 = vld [vmem:[%s47556_s8 + $0x38] sm:$0xff] }
0x1342   :  { %v17805_v4 = vmul.f32 0.03125, %v17801_v42  ;;  %v18410_v42 = vand.u32 4294901760, %v18376_v57 }
0x1343   :  { %v17808_v0 = vadd.f32 1e-05, %v17806_v21 }
0x1344   :  { %v17807_v43 = vadd.f32 1e-05, %v17805_v4 }
0x1345   :  { %43857 = vrsqrt.f32 %v17808_v0  ;;  %v18483_v0 = vsub.f32 %v45850_v10, %v18389_v20 }
0x1346   :  { %43859 = vrsqrt.f32 %v17807_v43  ;;  %v18490_v43 = vsub.f32 %v45855_v27, %v18392_v41 }
0x134f   :  { %v43858_v8 = vpop.eup %43857 }
0x1350   :  { %v43860_v2 = vpop.eup %43859  ;;  %v17812_v30 = vmul.f32 %v43858_v8, %v45829_v24  ;;  %v18491_v8 = vand.u32 4294901760, %v18490_v43 }
0x1351   :  { %v17811_v31 = vmul.f32 %v43860_v2, %v45831_v61 }
0x1352   :  { %v17818_v46 = vmul.f32 %v17816_v22, %v17812_v30 }
0x1353   :  { %v17817_v7 = vmul.f32 %v17816_v22, %v17811_v31  ;;  %v18484_v22 = vand.u32 4294901760, %v18483_v0 }
0x1354   :  { %v45873_v40 = vadd.f32 %v17822_v3, %v17818_v46 }
0x1355   :  { %v45875_v14 = vadd.f32 %v17822_v3, %v17817_v7  ;;  %v42555_v2 = vpack.c.bf16 %v18491_v8, %v18484_v22  ;;  %v18485_v30 = vsub.f32 %v18483_v0, %v18484_v22  ;;  %v18492_v3 = vsub.f32 %v18490_v43, %v18491_v8 }
0x1356   :  { %v17837_v16 = vsel %vm116_vm0, %v45873_v40, 0 }
0x1357   :  { %v17834_v18 = vsel %vm116_vm0, %v45875_v14, 0  ;;  %v17918_v54 = vand.u32 4294901760, %v17837_v16  ;;  %v18486_v10 = vand.u32 4294901760, %v18485_v30  ;;  %v18493_v20 = vand.u32 4294901760, %v18492_v3 }
0x1358   :  { %v17908_v49 = vand.u32 4294901760, %v17834_v18 }
0x1359   :  { %v17919_v24 = vsub.f32 %v17837_v16, %v17918_v54  ;;  %v42507_v41 = vpack.c.bf16 %v18493_v20, %v18486_v10 }
0x135a   :  { %v17909_v19 = vsub.f32 %v17834_v18, %v17908_v49 }
0x135b   :  { %v17920_v1 = vand.u32 4294901760, %v17919_v24 }
0x135c   :  { %v17910_v37 = vand.u32 4294901760, %v17909_v19 }
0x135d   :  { %v17921_v33 = vsub.f32 %v17919_v24, %v17920_v1 }
0x135e   :  { %v17911_v61 = vsub.f32 %v17909_v19, %v17910_v37 }
0x135f   :  { %v17922_v47 = vand.u32 4294901760, %v17921_v33 }
0x1360   :  { %v17912_v23 = vand.u32 4294901760, %v17911_v61 }
0x1362   :  { %40561 = vmatprep.mubr.f32.mxu1 %v17912_v23 }
0x1363   :  { %40562 = vmatmul.mubr.f32.vlgmr.msra.gmra.mrb[38].mxu1 %v17922_v47 }
0x1364   :  { %42454 = vmatpush3.bf16.msra.mxu1 %v42451_v53  ;;  %40572 = vmatprep.mubr.f32.mxu1 %v17908_v49  ;;  %v18371_v53 = vld [vmem:[%s47556_s8 + $0x10] sm:$0xff] }
0x1365   :  { %42456 = vmatprep.subr.bf16.mxu1 %v42455_v26  ;;  %v18395_v17 = vand.u32 4294901760, %v18371_v53 }
0x1367   :  { %v18497_v31 = vsub.f32 %v18371_v53, %v18395_v17 }
0x1368   :  { %42458 = vmatpush3.bf16.msra.mxu1 %v42455_v26  ;;  %v18374_v26 = vld [vmem:[%s47556_s8 + $0x28] sm:$0xff] }
0x1369   :  { %42460 = vmatprep.subr.bf16.mxu1 %v42459_v15  ;;  %v18498_v7 = vand.u32 4294901760, %v18497_v31 }
0x136b   :  { %40573 = vmatmul.mubr.f32.vlgmr.msra.gmra.mrb[38].mxu1 %v17918_v54  ;;  %v18499_v16 = vsub.f32 %v18497_v31, %v18498_v7 }
0x136c   :  { %42462 = vmatpush3.bf16.msra.mxu1 %v42459_v15  ;;  %40583 = vmatprep.mubr.f32.mxu1 %v17909_v19 }
0x136d   :  { %42464 = vmatprep.subr.bf16.mxu1 %v42463_v44  ;;  %v18500_v19 = vand.u32 4294901760, %v18499_v16 }
0x1370   :  { %42466 = vmatpush3.bf16.msra.mxu1 %v42463_v44  ;;  %v18404_v44 = vand.u32 4294901760, %v18374_v26 }
0x1371   :  { %42468 = vmatprep.subr.bf16.mxu1 %v45839_v55 }
0x1373   :  { %40584 = vmatmul.mubr.f32.vlgmr.msra.gmra.mrb[38].mxu1 %v17919_v24 }
0x1374   :  { %42470 = vmatpush3.bf16.msra.mxu1 %v45839_v55  ;;  %40594 = vmatprep.mubr.f32.mxu1 %v17910_v37 }
0x1375   :  { %42472 = vmatprep.subr.bf16.mxu1 %v45841_v29 }
0x1378   :  { %42474 = vmatpush3.bf16.msra.mxu1 %v45841_v29 }
0x1379   :  { %42476 = vmatprep.subr.bf16.mxu1 %v42475_v32 }
0x137b   :  { %40595 = vmatmul.mubr.f32.vlgmr.msra.gmra.mrb[38].mxu1 %v17920_v1 }
0x137c   :  { %42478 = vmatpush3.bf16.msra.mxu1 %v42475_v32  ;;  %40605 = vmatprep.mubr.f32.mxu1 %v17908_v49 }
0x137d   :  { %42480 = vmatprep.subr.bf16.mxu1 %v42479_v12 }
0x1380   :  { %42482 = vmatpush3.bf16.msra.mxu1 %v42479_v12  ;;  %v18375_v12 = vld [vmem:[%s47556_s8 + $0x30] sm:$0xff] }
0x1381   :  { %42484 = vmatprep.subr.bf16.mxu1 %v45839_v55  ;;  %v18407_v21 = vand.u32 4294901760, %v18375_v12 }
0x1383   :  { %40606 = vmatmul.mubr.f32.vlgmr.msra.gmra.mrb[38].mxu1 %v17918_v54  ;;  %v45921_v4 = vpack.c.bf16 %v18410_v42, %v18407_v21  ;;  %v18525_v53 = vsub.f32 %v18375_v12, %v18407_v21  ;;  %v17832_v12 = vrot.slane %v45821_v60, %v45124_v45 }
0x1384   :  { %42486 = vmatpush3.bf16.msra.mxu1 %v45839_v55  ;;  %40616 = vmatprep.mubr.f32.mxu1 %v17908_v49  ;;  %v18398_v55 = vand.u32 4294901760, %v18372_v25 }
0x1385   :  { %42488 = vmatprep.subr.bf16.mxu1 %v45841_v29  ;;  %v18526_v8 = vand.u32 4294901760, %v18525_v53 }
0x1386   :  { %v45897_v36 = vpack.c.bf16 %v18398_v55, %v18395_v17  ;;  %v18504_v46 = vsub.f32 %v18372_v25, %v18398_v55  ;;  %v18532_v17 = vsub.f32 %v18376_v57, %v18410_v42 }
0x1388   :  { %42490 = vmatpush3.bf16.msra.mxu1 %v45841_v29  ;;  %v18373_v29 = vld [vmem:[%s47556_s8 + $0x20] sm:$0xff]  ;;  %42544 = vmatprep.subr.bf16.mxu0 %v45897_v36  ;;  %v18505_v27 = vand.u32 4294901760, %v18504_v46  ;;  %v18533_v30 = vand.u32 4294901760, %v18532_v17 }
0x1389   :  { %42492 = vmatprep.subr.bf16.mxu1 %v45863_v59  ;;  %v18401_v15 = vand.u32 4294901760, %v18373_v29  ;;  %42546 = vmatpush3.bf16.msra.mxu0 %v45897_v36 }
0x138a   :  { %v42559_v49 = vpack.c.bf16 %v18505_v27, %v18498_v7  ;;  %v18506_v24 = vsub.f32 %v18504_v46, %v18505_v27  ;;  %v42523_v7 = vpack.c.bf16 %v18490_v43, %v18483_v0  ;;  %v42527_v27 = vpack.c.bf16 %v18504_v46, %v18497_v31 }
0x138b   :  { %40617 = vmatmul.mubr.f32.vlgmr.msra.gmra.mrb[38].mxu1 %v17918_v54  ;;  %v45909_v32 = vpack.c.bf16 %v18404_v44, %v18401_v15  ;;  %v18511_v18 = vsub.f32 %v18373_v29, %v18401_v15  ;;  %v18518_v54 = vsub.f32 %v18374_v26, %v18404_v44  ;;  %v18527_v29 = vsub.f32 %v18525_v53, %v18526_v8 }
0x138c   :  { %42494 = vmatpush3.bf16.msra.mxu1 %v45863_v59  ;;  %v18507_v33 = vand.u32 4294901760, %v18506_v24  ;;  %v42567_v26 = vpack.c.bf16 %v18533_v30, %v18526_v8  ;;  %v18534_v15 = vsub.f32 %v18532_v17, %v18533_v30  ;;  %v42535_v24 = vpack.c.bf16 %v18532_v17, %v18525_v53 }
0x138d   :  { %42496 = vmatprep.subr.bf16.mxu1 %v45897_v36  ;;  %42548 = vmatprep.subr.bf16.mxu0 %v45909_v32  ;;  %v18512_v1 = vand.u32 4294901760, %v18511_v18  ;;  %v18519_v37 = vand.u32 4294901760, %v18518_v54  ;;  %v18528_v44 = vand.u32 4294901760, %v18527_v29  ;;  %v42531_v16 = vpack.c.bf16 %v18518_v54, %v18511_v18 }
0x138e   :  { %42550 = vmatpush3.bf16.msra.mxu0 %v45909_v32  ;;  %v42511_v25 = vpack.c.bf16 %v18507_v33, %v18500_v19  ;;  %v18535_v10 = vand.u32 4294901760, %v18534_v15 }
0x138f   :  { %42552 = vmatprep.subr.bf16.mxu0 %v45921_v4  ;;  %v42563_v61 = vpack.c.bf16 %v18519_v37, %v18512_v1  ;;  %v18513_v23 = vsub.f32 %v18511_v18, %v18512_v1  ;;  %v18520_v47 = vsub.f32 %v18518_v54, %v18519_v37 }
0x1390   :  { %42498 = vmatpush3.bf16.msra.mxu1 %v45897_v36  ;;  %v42519_v20 = vpack.c.bf16 %v18535_v10, %v18528_v44 }
0x1391   :  { %42500 = vmatprep.subr.bf16.mxu1 %v45909_v32  ;;  %v18514_v55 = vand.u32 4294901760, %v18513_v23  ;;  %v18521_v22 = vand.u32 4294901760, %v18520_v47 }
0x1392   :  { %42554 = vmatpush3.bf16.msra.mxu0 %v45921_v4 }
0x1393   :  { %42556 = vmatprep.subr.bf16.mxu0 %v42555_v2  ;;  %v42515_v3 = vpack.c.bf16 %v18521_v22, %v18514_v55 }
0x1394   :  { %42502 = vmatpush3.bf16.msra.mxu1 %v45909_v32 }
0x1395   :  { %42504 = vmatprep.subr.bf16.mxu1 %v45921_v4 }
0x1398   :  { %42506 = vmatpush3.bf16.msra.mxu1 %v45921_v4 }
0x1399   :  { %42508 = vmatprep.subr.bf16.mxu1 %v42507_v41 }
0x145e   :  { %v40618_v21 = vpop.f32.mrb[38].mxu1 }
0x145f   :  { %v42977_v57 = vadd.f32 %v40618_v21, %v17832_v12  ;;  %v18357_v42 = vpop.f32.mrb[39].mxu1 }
0x1460   :  { %v42978_v19 = vadd.f32 %v18357_v42, %v17832_v12  ;;  %v37925_v12 = vld [vmem:[%s47551_s3 + $0x30] sm:$0xff]  ;;  %v37926_v42 = vld [vmem:[%s47551_s3 + $0x38] sm:$0xff] }
0x1461   :  { %v18368_v1 = vmax.f32 %v42977_v57, 0.0 }
0x1462   :  { %v18367_v37 = vmax.f32 %v42978_v19, 0.0  ;;  %v19029_v19 = vand.u32 4294901760, %v37925_v12 }
0x1463   :  { %v18386_v33 = vsel %vm18381_vm8, %v18368_v1, 0  ;;  %v19032_v1 = vand.u32 4294901760, %v37926_v42 }
0x1464   :  { %v18471_v23 = vand.u32 4294901760, %v18386_v33  ;;  %v18383_v47 = vsel %vm18381_vm8, %v18367_v37, 0 }
0x1465   :  { %v18461_v55 = vand.u32 4294901760, %v18383_v47 }
0x1466   :  { %v18472_v0 = vsub.f32 %v18386_v33, %v18471_v23  ;;  %v45970_v33 = vpack.c.bf16 %v19032_v1, %v19029_v19 }
0x1467   :  { %v18462_v43 = vsub.f32 %v18383_v47, %v18461_v55 }
0x1468   :  { %v18473_v31 = vand.u32 4294901760, %v18472_v0 }
0x1469   :  { %v18463_v46 = vand.u32 4294901760, %v18462_v43 }
0x146a   :  { %v18474_v18 = vsub.f32 %v18472_v0, %v18473_v31 }
0x146b   :  { %40692 = vmatprep.mubr.f32.mxu0 %v18463_v46  ;;  %v18464_v54 = vsub.f32 %v18462_v43, %v18463_v46  ;;  %v19127_v46 = vsub.f32 %v37925_v12, %v19029_v19  ;;  %v19005_v12 = vrot.slane %v45821_v60, %v45097_v62 }
0x146c   :  { %40693 = vmatmul.mubr.f32.vlgmr.msra.gmra.mrb[36].mxu0 %v18473_v31  ;;  %v18475_v17 = vand.u32 4294901760, %v18474_v18  ;;  %v19134_v18 = vsub.f32 %v37926_v42, %v19032_v1 }
0x146d   :  { %42558 = vmatpush3.bf16.msra.mxu0 %v42555_v2  ;;  %40711 = vmatprep.mubr.f32.mxu0 %v18461_v55  ;;  %v18465_v53 = vand.u32 4294901760, %v18464_v54 }
0x146e   :  { %42560 = vmatprep.subr.bf16.mxu0 %v42559_v49 }
0x146f   :  { %40635 = vmatprep.mubr.f32.mxu1 %v18465_v53 }
0x1470   :  { %40636 = vmatmul.mubr.f32.vlgmr.msra.gmra.mrb[40].mxu1 %v18475_v17  ;;  %v19128_v17 = vand.u32 4294901760, %v19127_v46 }
0x1471   :  { %42510 = vmatpush3.bf16.msra.mxu1 %v42507_v41  ;;  %42562 = vmatpush3.bf16.msra.mxu0 %v42559_v49 }
0x1472   :  { %40654 = vmatprep.mubr.f32.mxu1 %v18461_v55  ;;  %42512 = vmatprep.subr.bf16.mxu1 %v42511_v25 }
0x1473   :  { %42564 = vmatprep.subr.bf16.mxu0 %v42563_v61 }
0x1475   :  { %42514 = vmatpush3.bf16.msra.mxu1 %v42511_v25  ;;  %42566 = vmatpush3.bf16.msra.mxu0 %v42563_v61 }
0x1476   :  { %42516 = vmatprep.subr.bf16.mxu1 %v42515_v3  ;;  %42568 = vmatprep.subr.bf16.mxu0 %v42567_v26 }
0x1479   :  { %42518 = vmatpush3.bf16.msra.mxu1 %v42515_v3  ;;  %42570 = vmatpush3.bf16.msra.mxu0 %v42567_v26 }
0x147a   :  { %42520 = vmatprep.subr.bf16.mxu1 %v42519_v20  ;;  %42572 = vmatprep.subr.bf16.mxu0 %v45863_v59 }
0x147c   :  { %40712 = vmatmul.mubr.f32.vlgmr.msra.gmra.mrb[36].mxu0 %v18471_v23 }
0x147d   :  { %42522 = vmatpush3.bf16.msra.mxu1 %v42519_v20  ;;  %42574 = vmatpush3.bf16.msra.mxu0 %v45863_v59 }
0x147e   :  { %40730 = vmatprep.mubr.f32.mxu0 %v18461_v55  ;;  %42524 = vmatprep.subr.bf16.mxu1 %v42523_v7 }
0x147f   :  { %42576 = vmatprep.subr.bf16.mxu0 %v45897_v36 }
0x1480   :  { %40655 = vmatmul.mubr.f32.vlgmr.msra.gmra.mrb[40].mxu1 %v18471_v23 }
0x1481   :  { %42526 = vmatpush3.bf16.msra.mxu1 %v42523_v7  ;;  %40673 = vmatprep.mubr.f32.mxu1 %v18462_v43 }
0x1482   :  { %42578 = vmatpush3.bf16.msra.mxu0 %v45897_v36  ;;  %42528 = vmatprep.subr.bf16.mxu1 %v42527_v27  ;;  %v18380_v36 = vrot.slane %v45821_v60, %v45157_v13 }
0x1483   :  { %42580 = vmatprep.subr.bf16.mxu0 %v45909_v32 }
0x1485   :  { %42530 = vmatpush3.bf16.msra.mxu1 %v42527_v27 }
0x1486   :  { %42582 = vmatpush3.bf16.msra.mxu0 %v45909_v32  ;;  %42532 = vmatprep.subr.bf16.mxu1 %v42531_v16 }
0x1487   :  { %42584 = vmatprep.subr.bf16.mxu0 %v45921_v4 }
0x1489   :  { %42534 = vmatpush3.bf16.msra.mxu1 %v42531_v16 }
0x148a   :  { %42586 = vmatpush3.bf16.msra.mxu0 %v45921_v4  ;;  %42536 = vmatprep.subr.bf16.mxu1 %v42535_v24 }
0x148b   :  { %40859 = vmatprep.subr.mxu0 %v44101_v51 }
0x148d   :  { %40731 = vmatmul.mubr.f32.vlgmr.msra.gmra.mrb[36].mxu0 %v18471_v23  ;;  %42538 = vmatpush3.bf16.msra.mxu1 %v42535_v24  ;;  %v37924_v24 = vld [vmem:[%s47551_s3 + $0x28] sm:$0xff] }
0x148e   :  { %40861 = vmatprep.mubr.msk.f32.mxu0 %vm44102_vm1, %v44101_v51  ;;  %v19026_v57 = vand.u32 4294901760, %v37924_v24 }
0x1490   :  { %40674 = vmatmul.mubr.f32.vlgmr.msra.gmra.mrb[40].mxu1 %v18472_v0  ;;  %v19120_v47 = vsub.f32 %v37924_v24, %v19026_v57 }
0x1492   :  { %v19121_v0 = vand.u32 4294901760, %v19120_v47 }
0x1494   :  { %v19122_v31 = vsub.f32 %v19120_v47, %v19121_v0 }
0x1496   :  { %v19123_v53 = vand.u32 4294901760, %v19122_v31 }
0x1560   :  { %v40732_v59 = vpop.f32.mrb[36].mxu0 }
0x1561   :  { %v18958_v32 = vpop.f32.mrb[37].mxu0 }
0x1563   :  { %v40675_v2 = vpop.f32.mrb[40].mxu1 }
0x1564   :  { %v42979_v41 = vadd.f32 %v40675_v2, %v18380_v36  ;;  %v18682_v49 = vpop.f32.mrb[41].mxu1 }
0x1565   :  { %v42981_v61 = vadd.f32 %v18682_v49, %v18380_v36 }
0x1566   :  { %v42980_v25 = vadd.f32 %v42979_v41, %v40732_v59  ;;  %v19135_v59 = vand.u32 4294901760, %v19134_v18 }
0x1567   :  { %v42982_v4 = vadd.f32 %v42981_v61, %v18958_v32  ;;  %v19129_v32 = vsub.f32 %v19127_v46, %v19128_v17 }
0x1568   :  { %v18969_v22 = vadd.f32 %v42980_v25, %v45873_v40  ;;  %v19136_v2 = vsub.f32 %v19134_v18, %v19135_v59 }
0x1569   :  { %v18968_v8 = vadd.f32 %v42982_v4, %v45875_v14  ;;  %v37923_v14 = vld [vmem:[%s47551_s3 + $0x20] sm:$0xff]  ;;  %v19130_v41 = vand.u32 4294901760, %v19129_v32  ;;  %v42607_v4 = vpack.c.bf16 %v19134_v18, %v19127_v46 }
0x156a   :  { %v18973_v30 = vsel %vm116_vm0, %v18969_v22, 0.0  ;;  %v19023_v21 = vand.u32 4294901760, %v37923_v14  ;;  %v19137_v49 = vand.u32 4294901760, %v19136_v2 }
0x156b   :  { %18974 = vadd.xlane.f32.xlu1 %v18973_v30  ;;  %v18970_v3 = vsel %vm116_vm0, %v18968_v8, 0.0  ;;  %v45976_v30 = vld [vmem:[#allocation10 + $0x10] sm:$0xff] }
0x156c   :  { %18971 = vadd.xlane.f32.xlu0 %v18970_v3  ;;  %v45968_v37 = vpack.c.bf16 %v19026_v57, %v19023_v21  ;;  %v19113_v23 = vsub.f32 %v37923_v14, %v19023_v21  ;;  %v42599_v61 = vpack.c.bf16 %v19137_v49, %v19130_v41  ;;  %v19559_v3 = vrot.slane %v45976_v30, %v44267_v5 }
0x156e   :  { %42588 = vmatprep.subr.bf16.mxu1 %v45968_v37  ;;  %v19114_v55 = vand.u32 4294901760, %v19113_v23  ;;  %v42603_v25 = vpack.c.bf16 %v19120_v47, %v19113_v23 }
0x156f   :  { %42590 = vmatpush3.bf16.msra.mxu1 %v45968_v37 }
0x1570   :  { %42592 = vmatprep.subr.bf16.mxu1 %v45970_v33  ;;  %v19115_v43 = vsub.f32 %v19113_v23, %v19114_v55 }
0x1572   :  { %v19116_v54 = vand.u32 4294901760, %v19115_v43 }
0x1573   :  { %42594 = vmatpush3.bf16.msra.mxu1 %v45970_v33 }
0x1574   :  { %v42595_v36 = vpack.c.bf16 %v19123_v53, %v19116_v54 }
0x1576   :  { %42596 = vmatprep.subr.bf16.mxu1 %v42595_v36 }
0x15f8   :  { %v18975_v29 = vpop.xlane.xlu1 %18974 }
0x15f9   :  { %v18977_v26 = vmul.f32 0.03125, %v18975_v29  ;;  %v18972_v15 = vpop.xlane.xlu0 %18971 }
0x15fa   :  { %v18976_v44 = vmul.f32 0.03125, %v18972_v15 }
0x15fb   :  { %v18979_v10 = vsub.f32 %v18969_v22, %v18977_v26  ;;  %v42619_v22 = vpack.c.bf16 %v19121_v0, %v19114_v55 }
0x15fc   :  { %v18978_v20 = vsub.f32 %v18968_v8, %v18976_v44  ;;  %v42623_v8 = vpack.c.bf16 %v19135_v59, %v19128_v17 }
0x15fd   :  { %v18981_v7 = vmul.f32 %v18979_v10, %v18979_v10 }
0x15fe   :  { %v18980_v27 = vmul.f32 %v18978_v20, %v18978_v20 }
0x15ff   :  { %v18985_v16 = vsel %vm116_vm0, %v18981_v7, 0.0 }
0x1600   :  { %18986 = vadd.xlane.f32.xlu1 %v18985_v16  ;;  %v18982_v40 = vsel %vm116_vm0, %v18980_v27, 0.0  ;;  %v18999_v16 = vrot.slane %v45821_v60, %v44997_v48 }
0x1601   :  { %18983 = vadd.xlane.f32.xlu0 %v18982_v40 }
0x1617   :  { %19561 = vrot.lane.b32.xlu0 %v19559_v3, %s44100_s24 }
0x168d   :  { %v18987_v29 = vpop.xlane.xlu1 %18986 }
0x168e   :  { %v18989_v26 = vmul.f32 0.03125, %v18987_v29  ;;  %v18984_v15 = vpop.xlane.xlu0 %18983 }
0x168f   :  { %v18988_v44 = vmul.f32 0.03125, %v18984_v15 }
0x1690   :  { %v18991_v7 = vadd.f32 1e-05, %v18989_v26 }
0x1691   :  { %v18990_v27 = vadd.f32 1e-05, %v18988_v44 }
0x1692   :  { %43861 = vrsqrt.f32 %v18991_v7  ;;  %v19562_v53 = vpop.permute.xlu0 %19561 }
0x1693   :  { %43863 = vrsqrt.f32 %v18990_v27 }
0x169c   :  { %v43862_v40 = vpop.eup %43861 }
0x169d   :  { %v43864_v14 = vpop.eup %43863  ;;  %v18995_v24 = vmul.f32 %v43862_v40, %v18979_v10 }
0x169e   :  { %v18994_v21 = vmul.f32 %v43864_v14, %v18978_v20 }
0x169f   :  { %v19001_v57 = vmul.f32 %v18999_v16, %v18995_v24 }
0x16a0   :  { %v19000_v42 = vmul.f32 %v18999_v16, %v18994_v21 }
0x16a1   :  { %v45985_v19 = vadd.f32 %v19005_v12, %v19001_v57 }
0x16a2   :  { %v45987_v1 = vadd.f32 %v19005_v12, %v19000_v42 }
0x16a3   :  { %v19020_v23 = vsel %vm116_vm0, %v45985_v19, 0 }
0x16a4   :  { %v19017_v47 = vsel %vm116_vm0, %v45987_v1, 0  ;;  %v19101_v55 = vand.u32 4294901760, %v19020_v23 }
0x16a5   :  { %v19091_v0 = vand.u32 4294901760, %v19017_v47 }
0x16a6   :  { %v19102_v43 = vsub.f32 %v19020_v23, %v19101_v55 }
0x16a7   :  { %v19092_v10 = vsub.f32 %v19017_v47, %v19091_v0 }
0x16a8   :  { %v19103_v31 = vand.u32 4294901760, %v19102_v43 }
0x16a9   :  { %v19093_v46 = vand.u32 4294901760, %v19092_v10 }
0x16aa   :  { %v19104_v60 = vsub.f32 %v19102_v43, %v19103_v31 }
0x16ab   :  { %v19094_v20 = vsub.f32 %v19092_v10, %v19093_v46 }
0x16ac   :  { %v19105_v54 = vand.u32 4294901760, %v19104_v60 }
0x16ad   :  { %v19095_v18 = vand.u32 4294901760, %v19094_v20 }
0x16af   :  { %40741 = vmatprep.mubr.f32.mxu1 %v19095_v18 }
0x16b0   :  { %40742 = vmatmul.mubr.f32.vlgmr.msra.gmra.mrb[42].mxu1 %v19105_v54 }
0x16b1   :  { %42598 = vmatpush3.bf16.msra.mxu1 %v42595_v36  ;;  %40752 = vmatprep.mubr.f32.mxu1 %v19091_v0 }
0x16b2   :  { %42600 = vmatprep.subr.bf16.mxu1 %v42599_v61 }
0x16b5   :  { %42602 = vmatpush3.bf16.msra.mxu1 %v42599_v61 }
0x16b6   :  { %42604 = vmatprep.subr.bf16.mxu1 %v42603_v25 }
0x16b8   :  { %40753 = vmatmul.mubr.f32.vlgmr.msra.gmra.mrb[42].mxu1 %v19101_v55 }
0x16b9   :  { %42606 = vmatpush3.bf16.msra.mxu1 %v42603_v25  ;;  %40763 = vmatprep.mubr.f32.mxu1 %v19092_v10 }
0x16ba   :  { %42608 = vmatprep.subr.bf16.mxu1 %v42607_v4 }
0x16bd   :  { %42610 = vmatpush3.bf16.msra.mxu1 %v42607_v4 }
0x16be   :  { %42612 = vmatprep.subr.bf16.mxu1 %v45968_v37 }
0x16c0   :  { %40764 = vmatmul.mubr.f32.vlgmr.msra.gmra.mrb[42].mxu1 %v19102_v43 }
0x16c1   :  { %42614 = vmatpush3.bf16.msra.mxu1 %v45968_v37  ;;  %40774 = vmatprep.mubr.f32.mxu1 %v19093_v46 }
0x16c2   :  { %42616 = vmatprep.subr.bf16.mxu1 %v45970_v33 }
0x16c5   :  { %42618 = vmatpush3.bf16.msra.mxu1 %v45970_v33 }
0x16c6   :  { %42620 = vmatprep.subr.bf16.mxu1 %v42619_v22 }
0x16c8   :  { %40775 = vmatmul.mubr.f32.vlgmr.msra.gmra.mrb[42].mxu1 %v19103_v31 }
0x16c9   :  { %42622 = vmatpush3.bf16.msra.mxu1 %v42619_v22  ;;  %40785 = vmatprep.mubr.f32.mxu1 %v19091_v0 }
0x16ca   :  { %42624 = vmatprep.subr.bf16.mxu1 %v42623_v8 }
0x16cd   :  { %42626 = vmatpush3.bf16.msra.mxu1 %v42623_v8 }
0x16ce   :  { %42628 = vmatprep.subr.bf16.mxu1 %v45968_v37 }
0x16d0   :  { %40786 = vmatmul.mubr.f32.vlgmr.msra.gmra.mrb[42].mxu1 %v19101_v55 }
0x16d1   :  { %42630 = vmatpush3.bf16.msra.mxu1 %v45968_v37  ;;  %40796 = vmatprep.mubr.f32.mxu1 %v19091_v0 }
0x16d2   :  { %42632 = vmatprep.subr.bf16.mxu1 %v45970_v33 }
0x16d5   :  { %42634 = vmatpush3.bf16.msra.mxu1 %v45970_v33  ;;  %v19553_v33 = vrot.slane %v45976_v30, %v44327_v56 }
0x16d6   :  { %40799 = vmatprep.subr.mxu1 %v44101_v51 }
0x16d8   :  { %40797 = vmatmul.mubr.f32.vlgmr.msra.gmra.mrb[42].mxu1 %v19101_v55 }
0x16d9   :  { %40801 = vmatprep.mubr.msk.f32.mxu1 %vm44102_vm1, %v44101_v51 }
0x17ab   :  { %v46004_v17 = vpop.f32.mrb[42].mxu1 }
0x17ac   :  { %v19565_v59 = vadd.f32 %v46004_v17, %v19562_v53  ;;  %v46007_v36 = vpop.f32.mrb[43].mxu1  ;;  %v19555_v2 = vadd.f32 %v46004_v17, %v19553_v33 }
0x17ad   :  { %v19564_v37 = vadd.f32 %v19562_v53, %v46007_v36  ;;  %v19554_v32 = vadd.f32 %v19553_v33, %v46007_v36 }
0x17ae   :  { %19599 = vrot.lane.b32.xlu0 %v19565_v59, %s44103_s27  ;;  %v20077_v12 = vsel %vm725_vm2, %v19555_v2, 0 }
0x17af   :  { %19623 = vrot.lane.b32.xlu1 %v19564_v37, %s44104_s28  ;;  %v19625_v41 = vsel %vm725_vm2, %v19554_v32, 0  ;;  %v20147_v57 = vand.u32 4294901760, %v20077_v12 }
0x17b0   :  { %v19695_v49 = vand.u32 4294901760, %v19625_v41 }
0x17b1   :  { %v20148_v23 = vsub.f32 %v20077_v12, %v20147_v57 }
0x17b2   :  { %19601 = vrot.lane.b32.xlu0 %v19564_v37, %s44105_s29  ;;  %v19696_v61 = vsub.f32 %v19625_v41, %v19695_v49 }
0x17b3   :  { %19597 = vrot.lane.b32.xlu1 %v19564_v37, %s44103_s27  ;;  %v20149_v55 = vand.u32 4294901760, %v20148_v23 }
0x17b4   :  { %v19697_v25 = vand.u32 4294901760, %v19696_v61 }
0x17b5   :  { %v20150_v43 = vsub.f32 %v20148_v23, %v20149_v55 }
0x17b6   :  { %19583 = vrot.lane.b32.xlu0 %v19554_v32, %s44103_s27  ;;  %v19698_v3 = vsub.f32 %v19696_v61, %v19697_v25 }
0x17b7   :  { %20075 = vrot.lane.b32.xlu1 %v19565_v59, %s44104_s28  ;;  %v20151_v31 = vand.u32 4294901760, %v20150_v43 }
0x17b8   :  { %v19699_v44 = vand.u32 4294901760, %v19698_v3 }
0x17bb   :  { %19603 = vrot.lane.b32.xlu1 %v19565_v59, %s44105_s29 }
0x17bf   :  { %19585 = vrot.lane.b32.xlu1 %v19555_v2, %s44103_s27 }
0x1820   :  { %v19600_v4 = vpop.permute.xlu0 %19599 }
0x1821   :  { %20979 = vrot.lane.b32.xlu1 %v19600_v4, %s44104_s28  ;;  %v19624_v22 = vpop.permute.xlu1 %19623 }
0x1822   :  { %v19627_v8 = vsel %vm725_vm2, %v19624_v22, 0 }
0x1823   :  { %v19630_v29 = vand.u32 4294901760, %v19627_v8 }
0x1824   :  { %v19602_v24 = vpop.permute.xlu0 %19601 }
0x1825   :  { %v19707_v26 = vsub.f32 %v19627_v8, %v19630_v29  ;;  %19607 = vrot.lane.b32.xlu1 %v19565_v59, %s44106_s30  ;;  %40800 = vmatpush3.xpose.msra.mxu1 %v19630_v29  ;;  %v19598_v15 = vpop.permute.xlu1 %19597 }
0x1826   :  { %20527 = vrot.lane.b32.xlu0 %v19598_v15, %s44104_s28  ;;  %40804 = vmatprep.subr.mxu1 %v44101_v51 }
0x1827   :  { %v19708_v7 = vand.u32 4294901760, %v19707_v26 }
0x1828   :  { %40802 = vmatmul.mubr.f32.vlgmr.msra.gmra.mrb[44].mxu1 %v19699_v44  ;;  %v19584_v18 = vpop.permute.xlu0 %19583 }
0x1829   :  { %v19709_v27 = vsub.f32 %v19707_v26, %v19708_v7  ;;  %19589 = vrot.lane.b32.xlu1 %v19555_v2, %s44105_s29  ;;  %v20076_v16 = vpop.permute.xlu1 %20075  ;;  %40806 = vmatprep.mubr.msk.f32.mxu1 %vm44102_vm1, %v44101_v51  ;;  %v20529_v53 = vsel %vm725_vm2, %v19584_v18, 0 }
0x182a   :  { %19605 = vrot.lane.b32.xlu0 %v19564_v37, %s44106_s30  ;;  %v20079_v21 = vsel %vm725_vm2, %v20076_v16, 0  ;;  %v46077_v37 = vand.u32 4294901760, %v20529_v53 }
0x182b   :  { %v19710_v40 = vand.u32 4294901760, %v19709_v27  ;;  %v20082_v42 = vand.u32 4294901760, %v20079_v21 }
0x182d   :  { %40805 = vmatpush3.xpose.msra.mxu1 %v19710_v40  ;;  %v19604_v14 = vpop.permute.xlu1 %19603  ;;  %v20159_v47 = vsub.f32 %v20079_v21, %v20082_v42 }
0x182e   :  { %19587 = vrot.lane.b32.xlu0 %v19554_v32, %s44105_s29  ;;  %21883 = vrot.lane.b32.xlu1 %v19604_v14, %s44104_s28 }
0x182f   :  { %40809 = vmatprep.subr.mxu1 %v44101_v51  ;;  %v20160_v0 = vand.u32 4294901760, %v20159_v47 }
0x1830   :  { %40807 = vmatmul.mubr.f32.vlgmr.msra.gmra.mrb[44].mxu1 %v19695_v49 }
0x1831   :  { %40810 = vmatpush3.xpose.msra.mxu1 %v19707_v26  ;;  %40811 = vmatprep.mubr.msk.f32.mxu1 %vm44102_vm1, %v44101_v51  ;;  %v20161_v10 = vsub.f32 %v20159_v47, %v20160_v0  ;;  %v19586_v60 = vpop.permute.xlu1 %19585 }
0x1832   :  { %21431 = vrot.lane.b32.xlu0 %v19602_v24, %s44104_s28  ;;  %19593 = vrot.lane.b32.xlu1 %v19555_v2, %s44106_s30  ;;  %v20981_v20 = vsel %vm725_vm2, %v19586_v60, 0 }
0x1833   :  { %40814 = vmatprep.subr.mxu1 %v44101_v51  ;;  %v20162_v46 = vand.u32 4294901760, %v20161_v10  ;;  %v46073_v54 = vand.u32 4294901760, %v20981_v20 }
0x1835   :  { %v21052_v59 = vsub.f32 %v20981_v20, %v46073_v54 }
0x1836   :  { %19591 = vrot.lane.b32.xlu0 %v19554_v32, %s44106_s30  ;;  %v46080_v32 = vsub.f32 %v20529_v53, %v46077_v37 }
0x1837   :  { %v21053_v33 = vand.u32 4294901760, %v21052_v59 }
0x1838   :  { %40812 = vmatmul.mubr.f32.vlgmr.msra.gmra.mrb[44].mxu1 %v19696_v61  ;;  %v20601_v61 = vand.u32 4294901760, %v46080_v32 }
0x1839   :  { %40815 = vmatpush3.xpose.msra.mxu1 %v19630_v29  ;;  %40816 = vmatprep.mubr.msk.f32.mxu1 %vm44102_vm1, %v44101_v51  ;;  %v21054_v41 = vsub.f32 %v21052_v59, %v21053_v33 }
0x183a   :  { %40819 = vmatprep.subr.mxu1 %v44101_v51 }
0x183b   :  { %v21055_v3 = vand.u32 4294901760, %v21054_v41 }
0x1840   :  { %40817 = vmatmul.mubr.f32.vlgmr.msra.gmra.mrb[44].mxu1 %v19697_v25 }
0x1841   :  { %40820 = vmatpush3.xpose.msra.mxu1 %v19708_v7  ;;  %40821 = vmatprep.mubr.msk.f32.mxu1 %vm44102_vm1, %v44101_v51 }
0x1842   :  { %40824 = vmatprep.subr.mxu1 %v44101_v51 }
0x1848   :  { %40822 = vmatmul.mubr.f32.vlgmr.msra.gmra.mrb[44].mxu1 %v19695_v49 }
0x1849   :  { %40825 = vmatpush3.xpose.msra.mxu1 %v19630_v29  ;;  %40826 = vmatprep.mubr.msk.f32.mxu1 %vm44102_vm1, %v44101_v51  ;;  %v20602_v29 = vsub.f32 %v46080_v32, %v20601_v61 }
0x184a   :  { %40829 = vmatprep.subr.mxu1 %v44101_v51 }
0x184b   :  { %v20603_v40 = vand.u32 4294901760, %v20602_v29 }
0x1850   :  { %40827 = vmatmul.mubr.f32.vlgmr.msra.gmra.mrb[44].mxu1 %v19695_v49 }
0x1851   :  { %40830 = vmatpush3.xpose.msra.mxu1 %v20082_v42  ;;  %40831 = vmatprep.mubr.msk.f32.mxu1 %vm44102_vm1, %v44101_v51 }
0x1852   :  { %40834 = vmatprep.subr.mxu1 %v44101_v51 }
0x1854   :  { %40832 = vmatmul.mubr.f32.vlgmr.msra.gmra.mrb[46].mxu1 %v20151_v31 }
0x1855   :  { %40835 = vmatpush3.xpose.msra.mxu1 %v20162_v46  ;;  %40836 = vmatprep.mubr.msk.f32.mxu1 %vm44102_vm1, %v44101_v51 }
0x1856   :  { %40839 = vmatprep.subr.mxu1 %v44101_v51 }
0x185c   :  { %40837 = vmatmul.mubr.f32.vlgmr.msra.gmra.mrb[46].mxu1 %v20147_v57 }
0x185d   :  { %40840 = vmatpush3.xpose.msra.mxu1 %v20159_v47  ;;  %40841 = vmatprep.mubr.msk.f32.mxu1 %vm44102_vm1, %v44101_v51 }
0x185e   :  { %40844 = vmatprep.subr.mxu1 %v44101_v51 }
0x1864   :  { %40842 = vmatmul.mubr.f32.vlgmr.msra.gmra.mrb[46].mxu1 %v20148_v23 }
0x1865   :  { %40845 = vmatpush3.xpose.msra.mxu1 %v20082_v42  ;;  %40846 = vmatprep.mubr.msk.f32.mxu1 %vm44102_vm1, %v44101_v51 }
0x1866   :  { %40849 = vmatprep.subr.mxu1 %v44101_v51 }
0x186c   :  { %40847 = vmatmul.mubr.f32.vlgmr.msra.gmra.mrb[46].mxu1 %v20149_v55 }
0x186d   :  { %40850 = vmatpush3.xpose.msra.mxu1 %v20160_v0  ;;  %40851 = vmatprep.mubr.msk.f32.mxu1 %vm44102_vm1, %v44101_v51 }
0x186e   :  { %40854 = vmatprep.subr.mxu1 %v44101_v51 }
0x1874   :  { %40852 = vmatmul.mubr.f32.vlgmr.msra.gmra.mrb[46].mxu1 %v20147_v57 }
0x1875   :  { %40855 = vmatpush3.xpose.msra.mxu1 %v20082_v42  ;;  %40856 = vmatprep.mubr.msk.f32.mxu1 %vm44102_vm1, %v44101_v51 }
0x1876   :  { %40889 = vmatprep.subr.mxu1 %v44101_v51 }
0x187c   :  { %40857 = vmatmul.mubr.f32.vlgmr.msra.gmra.mrb[46].mxu1 %v20147_v57 }
0x187d   :  { %40891 = vmatprep.mubr.msk.f32.mxu1 %vm44102_vm1, %v44101_v51 }
0x1893   :  { %v20980_v2 = vpop.permute.xlu1 %20979 }
0x1894   :  { %v20983_v49 = vsel %vm725_vm2, %v20980_v2, 0 }
0x1895   :  { %v46084_v25 = vand.u32 4294901760, %v20983_v49 }
0x1897   :  { %v21063_v4 = vsub.f32 %v20983_v49, %v46084_v25  ;;  %40890 = vmatpush3.xpose.msra.mxu1 %v46084_v25  ;;  %v19608_v22 = vpop.permute.xlu1 %19607 }
0x1898   :  { %v20528_v8 = vpop.permute.xlu0 %20527  ;;  %22787 = vrot.lane.b32.xlu1 %v19608_v22, %s44104_s28  ;;  %40894 = vmatprep.subr.mxu1 %v44101_v51 }
0x1899   :  { %v21064_v26 = vand.u32 4294901760, %v21063_v4  ;;  %v20531_v15 = vsel %vm725_vm2, %v20528_v8, 0 }
0x189a   :  { %v46092_v44 = vand.u32 4294901760, %v20531_v15  ;;  %40892 = vmatmul.mubr.f32.vlgmr.msra.gmra.mrb[48].mxu1 %v21055_v3 }
0x189b   :  { %v21065_v7 = vsub.f32 %v21063_v4, %v21064_v26  ;;  %40896 = vmatprep.mubr.msk.f32.mxu1 %vm44102_vm1, %v44101_v51  ;;  %v19590_v57 = vpop.permute.xlu1 %19589 }
0x189c   :  { %v20611_v27 = vsub.f32 %v20531_v15, %v46092_v44  ;;  %40860 = vmatpush3.xpose.msra.mxu0 %v46092_v44  ;;  %v19606_v16 = vpop.permute.xlu0 %19605  ;;  %v21885_v47 = vsel %vm725_vm2, %v19590_v57, 0 }
0x189d   :  { %22335 = vrot.lane.b32.xlu0 %v19606_v16, %s44104_s28  ;;  %v21066_v14 = vand.u32 4294901760, %v21065_v7  ;;  %40864 = vmatprep.subr.mxu0 %v44101_v51  ;;  %v46125_v0 = vand.u32 4294901760, %v21885_v47 }
0x189e   :  { %v20612_v24 = vand.u32 4294901760, %v20611_v27 }
0x189f   :  { %40862 = vmatmul.mubr.f32.vlgmr.msra.gmra.mrb[38].mxu0 %v20603_v40  ;;  %40895 = vmatpush3.xpose.msra.mxu1 %v21066_v14  ;;  %v21956_v60 = vsub.f32 %v21885_v47, %v46125_v0 }
0x18a0   :  { %v20613_v12 = vsub.f32 %v20611_v27, %v20612_v24  ;;  %40899 = vmatprep.subr.mxu1 %v44101_v51  ;;  %40866 = vmatprep.mubr.msk.f32.mxu0 %vm44102_vm1, %v44101_v51  ;;  %v19588_v42 = vpop.permute.xlu0 %19587  ;;  %v21884_v23 = vpop.permute.xlu1 %21883 }
0x18a1   :  { %v21887_v55 = vsel %vm725_vm2, %v21884_v23, 0  ;;  %v21433_v31 = vsel %vm725_vm2, %v19588_v42, 0 }
0x18a2   :  { %40897 = vmatmul.mubr.f32.vlgmr.msra.gmra.mrb[48].mxu1 %v46073_v54  ;;  %v20614_v21 = vand.u32 4294901760, %v20613_v12  ;;  %v46128_v10 = vand.u32 4294901760, %v21887_v55  ;;  %v46135_v20 = vand.u32 4294901760, %v21433_v31 }
0x18a3   :  { %40900 = vmatpush3.xpose.msra.mxu1 %v21063_v4  ;;  %40901 = vmatprep.mubr.msk.f32.mxu1 %vm44102_vm1, %v44101_v51 }
0x18a4   :  { %40865 = vmatpush3.xpose.msra.mxu0 %v20614_v21  ;;  %40904 = vmatprep.subr.mxu1 %v44101_v51  ;;  %v21432_v43 = vpop.permute.xlu0 %21431  ;;  %v21967_v18 = vsub.f32 %v21887_v55, %v46128_v10 }
0x18a5   :  { %40869 = vmatprep.subr.mxu0 %v44101_v51  ;;  %v21435_v46 = vsel %vm725_vm2, %v21432_v43, 0 }
0x18a6   :  { %v46139_v53 = vand.u32 4294901760, %v21435_v46 }
0x18a7   :  { %40867 = vmatmul.mubr.f32.vlgmr.msra.gmra.mrb[38].mxu0 %v46077_v37 }
0x18a8   :  { %40870 = vmatpush3.xpose.msra.mxu0 %v20611_v27  ;;  %40871 = vmatprep.mubr.msk.f32.mxu0 %vm44102_vm1, %v44101_v51  ;;  %v21515_v2 = vsub.f32 %v21435_v46, %v46139_v53  ;;  %v19592_v15 = vpop.permute.xlu0 %19591 }
0x18a9   :  { %40874 = vmatprep.subr.mxu0 %v44101_v51  ;;  %v22337_v7 = vsel %vm725_vm2, %v19592_v15, 0 }
0x18aa   :  { %40902 = vmatmul.mubr.f32.vlgmr.msra.gmra.mrb[48].mxu1 %v21052_v59  ;;  %v21957_v59 = vand.u32 4294901760, %v21956_v60  ;;  %v46212_v16 = vand.u32 4294901760, %v22337_v7 }
0x18ab   :  { %40905 = vmatpush3.xpose.msra.mxu1 %v46084_v25  ;;  %40906 = vmatprep.mubr.msk.f32.mxu1 %vm44102_vm1, %v44101_v51 }
0x18ac   :  { %40909 = vmatprep.subr.mxu1 %v44101_v51  ;;  %v21958_v41 = vsub.f32 %v21956_v60, %v21957_v59  ;;  %v22408_v14 = vsub.f32 %v22337_v7, %v46212_v16 }
0x18ae   :  { %v21959_v4 = vand.u32 4294901760, %v21958_v41  ;;  %v22409_v57 = vand.u32 4294901760, %v22408_v14 }
0x18af   :  { %40872 = vmatmul.mubr.f32.vlgmr.msra.gmra.mrb[38].mxu0 %v46080_v32  ;;  %v21968_v32 = vand.u32 4294901760, %v21967_v18 }
0x18b0   :  { %40875 = vmatpush3.xpose.msra.mxu0 %v46092_v44  ;;  %40876 = vmatprep.mubr.msk.f32.mxu0 %vm44102_vm1, %v44101_v51 }
0x18b1   :  { %40879 = vmatprep.subr.mxu0 %v44101_v51 }
0x18b2   :  { %40907 = vmatmul.mubr.f32.vlgmr.msra.gmra.mrb[48].mxu1 %v21053_v33  ;;  %v21504_v33 = vsub.f32 %v21433_v31, %v46135_v20 }
0x18b3   :  { %40910 = vmatpush3.xpose.msra.mxu1 %v21064_v26  ;;  %40911 = vmatprep.mubr.msk.f32.mxu1 %vm44102_vm1, %v44101_v51 }
0x18b4   :  { %40914 = vmatprep.subr.mxu1 %v44101_v51  ;;  %v21505_v49 = vand.u32 4294901760, %v21504_v33 }
0x18b6   :  { %v21506_v22 = vsub.f32 %v21504_v33, %v21505_v49 }
0x18b7   :  { %40877 = vmatmul.mubr.f32.vlgmr.msra.gmra.mrb[38].mxu0 %v20601_v61  ;;  %v21969_v61 = vsub.f32 %v21967_v18, %v21968_v32 }
0x18b8   :  { %40880 = vmatpush3.xpose.msra.mxu0 %v20612_v24  ;;  %40881 = vmatprep.mubr.msk.f32.mxu0 %vm44102_vm1, %v44101_v51 }
0x18b9   :  { %40884 = vmatprep.subr.mxu0 %v44101_v51  ;;  %v21970_v8 = vand.u32 4294901760, %v21969_v61 }
0x18ba   :  { %40912 = vmatmul.mubr.f32.vlgmr.msra.gmra.mrb[48].mxu1 %v46073_v54 }
0x18bb   :  { %40915 = vmatpush3.xpose.msra.mxu1 %v46084_v25  ;;  %40916 = vmatprep.mubr.msk.f32.mxu1 %vm44102_vm1, %v44101_v51  ;;  %v21516_v25 = vand.u32 4294901760, %v21515_v2 }
0x18bc   :  { %40949 = vmatprep.subr.mxu1 %v44101_v51 }
0x18bd   :  { %v21517_v3 = vsub.f32 %v21515_v2, %v21516_v25 }
0x18bf   :  { %40882 = vmatmul.mubr.f32.vlgmr.msra.gmra.mrb[38].mxu0 %v46077_v37  ;;  %v21518_v29 = vand.u32 4294901760, %v21517_v3 }
0x18c0   :  { %40885 = vmatpush3.xpose.msra.mxu0 %v46092_v44  ;;  %40886 = vmatprep.mubr.msk.f32.mxu0 %vm44102_vm1, %v44101_v51 }
0x18c1   :  { %40919 = vmatprep.subr.mxu0 %v44101_v51 }
0x18c2   :  { %40917 = vmatmul.mubr.f32.vlgmr.msra.gmra.mrb[48].mxu1 %v46073_v54  ;;  %v21507_v54 = vand.u32 4294901760, %v21506_v22 }
0x18c3   :  { %40950 = vmatpush3.xpose.msra.mxu1 %v46128_v10  ;;  %40951 = vmatprep.mubr.msk.f32.mxu1 %vm44102_vm1, %v44101_v51 }
0x18c4   :  { %40954 = vmatprep.subr.mxu1 %v44101_v51 }
0x18c6   :  { %40952 = vmatmul.mubr.f32.vlgmr.msra.gmra.mrb[50].mxu1 %v21959_v4 }
0x18c7   :  { %40955 = vmatpush3.xpose.msra.mxu1 %v21970_v8  ;;  %40887 = vmatmul.mubr.f32.vlgmr.msra.gmra.mrb[38].mxu0 %v46077_v37  ;;  %v19594_v37 = vpop.permute.xlu1 %19593  ;;  %v19569_v8 = vrot.slane %v45976_v30, %v44603_v11 }
0x18c8   :  { %40920 = vmatpush3.xpose.msra.mxu0 %v46139_v53  ;;  %40921 = vmatprep.mubr.msk.f32.mxu0 %vm44102_vm1, %v44101_v51  ;;  %v22789_v26 = vsel %vm725_vm2, %v19594_v37, 0 }
0x18c9   :  { %40924 = vmatprep.subr.mxu0 %v44101_v51  ;;  %40956 = vmatprep.mubr.msk.f32.mxu1 %vm44102_vm1, %v44101_v51  ;;  %v46208_v44 = vand.u32 4294901760, %v22789_v26 }
0x18ca   :  { %40959 = vmatprep.subr.mxu1 %v44101_v51 }
0x18cb   :  { %40922 = vmatmul.mubr.f32.vlgmr.msra.gmra.mrb[40].mxu0 %v21507_v54  ;;  %v22860_v27 = vsub.f32 %v22789_v26, %v46208_v44 }
0x18cc   :  { %40925 = vmatpush3.xpose.msra.mxu0 %v21518_v29  ;;  %40926 = vmatprep.mubr.msk.f32.mxu0 %vm44102_vm1, %v44101_v51 }
0x18cd   :  { %40929 = vmatprep.subr.mxu0 %v44101_v51  ;;  %v22861_v40 = vand.u32 4294901760, %v22860_v27 }
0x18ce   :  { %40957 = vmatmul.mubr.f32.vlgmr.msra.gmra.mrb[50].mxu1 %v46125_v0 }
0x18cf   :  { %40960 = vmatpush3.xpose.msra.mxu1 %v21967_v18  ;;  %40961 = vmatprep.mubr.msk.f32.mxu1 %vm44102_vm1, %v44101_v51  ;;  %v22862_v12 = vsub.f32 %v22860_v27, %v22861_v40 }
0x18d0   :  { %40964 = vmatprep.subr.mxu1 %v44101_v51 }
0x18d1   :  { %v22863_v55 = vand.u32 4294901760, %v22862_v12 }
0x18d3   :  { %40927 = vmatmul.mubr.f32.vlgmr.msra.gmra.mrb[40].mxu0 %v46135_v20 }
0x18d4   :  { %40930 = vmatpush3.xpose.msra.mxu0 %v21515_v2  ;;  %40931 = vmatprep.mubr.msk.f32.mxu0 %vm44102_vm1, %v44101_v51 }
0x18d5   :  { %40934 = vmatprep.subr.mxu0 %v44101_v51 }
0x18d6   :  { %40962 = vmatmul.mubr.f32.vlgmr.msra.gmra.mrb[50].mxu1 %v21956_v60 }
0x18d7   :  { %40965 = vmatpush3.xpose.msra.mxu1 %v46128_v10  ;;  %40966 = vmatprep.mubr.msk.f32.mxu1 %vm44102_vm1, %v44101_v51 }
0x18d8   :  { %40969 = vmatprep.subr.mxu1 %v44101_v51 }
0x18db   :  { %40932 = vmatmul.mubr.f32.vlgmr.msra.gmra.mrb[40].mxu0 %v21504_v33 }
0x18dc   :  { %40935 = vmatpush3.xpose.msra.mxu0 %v46139_v53  ;;  %40936 = vmatprep.mubr.msk.f32.mxu0 %vm44102_vm1, %v44101_v51 }
0x18dd   :  { %40939 = vmatprep.subr.mxu0 %v44101_v51 }
0x18de   :  { %40967 = vmatmul.mubr.f32.vlgmr.msra.gmra.mrb[50].mxu1 %v21957_v59 }
0x18df   :  { %40970 = vmatpush3.xpose.msra.mxu1 %v21968_v32  ;;  %40971 = vmatprep.mubr.msk.f32.mxu1 %vm44102_vm1, %v44101_v51 }
0x18e0   :  { %40974 = vmatprep.subr.mxu1 %v44101_v51 }
0x18e3   :  { %40937 = vmatmul.mubr.f32.vlgmr.msra.gmra.mrb[40].mxu0 %v21505_v49 }
0x18e4   :  { %40940 = vmatpush3.xpose.msra.mxu0 %v21516_v25  ;;  %40941 = vmatprep.mubr.msk.f32.mxu0 %vm44102_vm1, %v44101_v51 }
0x18e5   :  { %40944 = vmatprep.subr.mxu0 %v44101_v51 }
0x18e6   :  { %40972 = vmatmul.mubr.f32.vlgmr.msra.gmra.mrb[50].mxu1 %v46125_v0 }
0x18e7   :  { %40975 = vmatpush3.xpose.msra.mxu1 %v46128_v10  ;;  %40976 = vmatprep.mubr.msk.f32.mxu1 %vm44102_vm1, %v44101_v51 }
0x18e8   :  { %41009 = vmatprep.subr.mxu1 %v44101_v51 }
0x18eb   :  { %40942 = vmatmul.mubr.f32.vlgmr.msra.gmra.mrb[40].mxu0 %v46135_v20 }
0x18ec   :  { %40945 = vmatpush3.xpose.msra.mxu0 %v46139_v53  ;;  %40946 = vmatprep.mubr.msk.f32.mxu0 %vm44102_vm1, %v44101_v51 }
0x18ed   :  { %40979 = vmatprep.subr.mxu0 %v44101_v51 }
0x18ee   :  { %40977 = vmatmul.mubr.f32.vlgmr.msra.gmra.mrb[50].mxu1 %v46125_v0  ;;  %v22410_v0 = vsub.f32 %v22408_v14, %v22409_v57 }
0x18ef   :  { %41011 = vmatprep.mubr.msk.f32.mxu1 %vm44102_vm1, %v44101_v51 }
0x18f3   :  { %40947 = vmatmul.mubr.f32.vlgmr.msra.gmra.mrb[40].mxu0 %v46135_v20  ;;  %v22411_v20 = vand.u32 4294901760, %v22410_v0 }
0x18f4   :  { %40981 = vmatprep.mubr.msk.f32.mxu0 %vm44102_vm1, %v44101_v51 }
0x190a   :  { %v22788_v24 = vpop.permute.xlu1 %22787 }
0x190b   :  { %v22791_v21 = vsel %vm725_vm2, %v22788_v24, 0 }
0x190c   :  { %v22794_v42 = vand.u32 4294901760, %v22791_v21 }
0x190e   :  { %v22871_v23 = vsub.f32 %v22791_v21, %v22794_v42  ;;  %41010 = vmatpush3.xpose.msra.mxu1 %v22794_v42 }
0x190f   :  { %v22336_v47 = vpop.permute.xlu0 %22335  ;;  %41014 = vmatprep.subr.mxu1 %v44101_v51 }
0x1910   :  { %v22872_v43 = vand.u32 4294901760, %v22871_v23  ;;  %v22339_v10 = vsel %vm725_vm2, %v22336_v47, 0 }
0x1911   :  { %v22342_v31 = vand.u32 4294901760, %v22339_v10  ;;  %41012 = vmatmul.mubr.f32.vlgmr.msra.gmra.mrb[52].mxu1 %v22863_v55 }
0x1912   :  { %v22873_v46 = vsub.f32 %v22871_v23, %v22872_v43  ;;  %41016 = vmatprep.mubr.msk.f32.mxu1 %vm44102_vm1, %v44101_v51 }
0x1913   :  { %v22419_v60 = vsub.f32 %v22339_v10, %v22342_v31  ;;  %40980 = vmatpush3.xpose.msra.mxu0 %v22342_v31 }
0x1914   :  { %v22874_v18 = vand.u32 4294901760, %v22873_v46  ;;  %40984 = vmatprep.subr.mxu0 %v44101_v51 }
0x1915   :  { %v22420_v53 = vand.u32 4294901760, %v22419_v60 }
0x1916   :  { %40982 = vmatmul.mubr.f32.vlgmr.msra.gmra.mrb[42].mxu0 %v22411_v20  ;;  %41015 = vmatpush3.xpose.msra.mxu1 %v22874_v18 }
0x1917   :  { %v22421_v59 = vsub.f32 %v22419_v60, %v22420_v53  ;;  %41019 = vmatprep.subr.mxu1 %v44101_v51  ;;  %40986 = vmatprep.mubr.msk.f32.mxu0 %vm44102_vm1, %v44101_v51 }
0x1919   :  { %41017 = vmatmul.mubr.f32.vlgmr.msra.gmra.mrb[52].mxu1 %v46208_v44  ;;  %v22422_v33 = vand.u32 4294901760, %v22421_v59 }
0x191a   :  { %41020 = vmatpush3.xpose.msra.mxu1 %v22871_v23  ;;  %41021 = vmatprep.mubr.msk.f32.mxu1 %vm44102_vm1, %v44101_v51 }
0x191b   :  { %40985 = vmatpush3.xpose.msra.mxu0 %v22422_v33  ;;  %41024 = vmatprep.subr.mxu1 %v44101_v51 }
0x191c   :  { %40989 = vmatprep.subr.mxu0 %v44101_v51 }
0x191e   :  { %40987 = vmatmul.mubr.f32.vlgmr.msra.gmra.mrb[42].mxu0 %v46212_v16 }
0x191f   :  { %40990 = vmatpush3.xpose.msra.mxu0 %v22419_v60  ;;  %40991 = vmatprep.mubr.msk.f32.mxu0 %vm44102_vm1, %v44101_v51 }
0x1920   :  { %40994 = vmatprep.subr.mxu0 %v44101_v51 }
0x1921   :  { %41022 = vmatmul.mubr.f32.vlgmr.msra.gmra.mrb[52].mxu1 %v22860_v27 }
0x1922   :  { %41025 = vmatpush3.xpose.msra.mxu1 %v22794_v42  ;;  %41026 = vmatprep.mubr.msk.f32.mxu1 %vm44102_vm1, %v44101_v51 }
0x1923   :  { %v20071_v32 = vpop.f32.mrb[44].mxu1  ;;  %41029 = vmatprep.subr.mxu1 %v44101_v51 }
0x1924   :  { %v46238_v2 = vsel %vm4340_vm3, %v20071_v32, -1.7014117e+38  ;;  %v40828_v41 = vpop.f32.mrb[45].mxu1 }
0x1925   :  { %v23247_v49 = vsel %vm725_vm2, %v46238_v2, -inf }
0x1926   :  { %23248 = vmax.xlane.f32.xlu0 %v23247_v49  ;;  %40992 = vmatmul.mubr.f32.vlgmr.msra.gmra.mrb[42].mxu0 %v22408_v14 }
0x1927   :  { %40995 = vmatpush3.xpose.msra.mxu0 %v22342_v31  ;;  %40996 = vmatprep.mubr.msk.f32.mxu0 %vm44102_vm1, %v44101_v51 }
0x1928   :  { %40999 = vmatprep.subr.mxu0 %v44101_v51 }
0x1929   :  { %41027 = vmatmul.mubr.f32.vlgmr.msra.gmra.mrb[52].mxu1 %v22861_v40 }
0x192a   :  { %41030 = vmatpush3.xpose.msra.mxu1 %v22872_v43  ;;  %41031 = vmatprep.mubr.msk.f32.mxu1 %vm44102_vm1, %v44101_v51 }
0x192b   :  { %41034 = vmatprep.subr.mxu1 %v44101_v51 }
0x192e   :  { %40997 = vmatmul.mubr.f32.vlgmr.msra.gmra.mrb[42].mxu0 %v22409_v57 }
0x192f   :  { %41000 = vmatpush3.xpose.msra.mxu0 %v22420_v53  ;;  %41001 = vmatprep.mubr.msk.f32.mxu0 %vm44102_vm1, %v44101_v51 }
0x1930   :  { %41004 = vmatprep.subr.mxu0 %v44101_v51 }
0x1931   :  { %41032 = vmatmul.mubr.f32.vlgmr.msra.gmra.mrb[52].mxu1 %v46208_v44 }
0x1932   :  { %41035 = vmatpush3.xpose.msra.mxu1 %v22794_v42  ;;  %41036 = vmatprep.mubr.msk.f32.mxu1 %vm44102_vm1, %v44101_v51 }
0x1933   :  { %41069 = vmatprep.subr.mxu1 %v44101_v51 }
0x1936   :  { %41002 = vmatmul.mubr.f32.vlgmr.msra.gmra.mrb[42].mxu0 %v46212_v16 }
0x1937   :  { %41005 = vmatpush3.xpose.msra.mxu0 %v22342_v31  ;;  %41006 = vmatprep.mubr.msk.f32.mxu0 %vm44102_vm1, %v44101_v51 }
0x1938   :  { %41039 = vmatprep.subr.mxu0 %v44101_v51 }
0x1939   :  { %41037 = vmatmul.mubr.f32.vlgmr.msra.gmra.mrb[52].mxu1 %v46208_v44 }
0x193a   :  { %41071 = vmatprep.mubr.msk.f32.mxu1 %vm44102_vm1, %v44101_v51 }
0x193e   :  { %41007 = vmatmul.mubr.f32.vlgmr.msra.gmra.mrb[42].mxu0 %v46212_v16 }
0x193f   :  { %41041 = vmatprep.mubr.msk.f32.mxu0 %vm44102_vm1, %v44101_v51 }
0x194f   :  { %v20523_v61 = vpop.f32.mrb[46].mxu1 }
0x1950   :  { %v23240_v25 = vsel %vm4341_vm4, %v20523_v61, -1.7014117e+38  ;;  %v40858_v4 = vpop.f32.mrb[47].mxu1 }
0x1951   :  { %v23250_v22 = vsel %vm725_vm2, %v23240_v25, -inf }
0x1952   :  { %23251 = vmax.xlane.f32.xlu1 %v23250_v22 }
0x1963   :  { %19571 = vrot.lane.b32.xlu1 %v19569_v8, %s44107_s5 }
0x1995   :  { %v21427_v3 = vpop.f32.mrb[48].mxu1 }
0x1996   :  { %v40918_v54 = vpop.f32.mrb[49].mxu1  ;;  %v23242_v30 = vsel %vm4341_vm4, %v21427_v3, -1.7014117e+38 }
0x199a   :  { %v20975_v29 = vpop.f32.mrb[38].mxu0 }
0x199b   :  { %v40888_v37 = vpop.f32.mrb[39].mxu0 }
0x19b3   :  { %v23249_v23 = vpop.xlane.xlu0 %23248 }
0x19b4   :  { %v23271_v47 = vsub.f32 %v46238_v2, %v23249_v23 }
0x19b6   :  { %v23279_v55 = vmul.f32 1.442695, %v23271_v47 }
0x19b8   :  { %43865 = vpow2.f32 %v23279_v55 }
0x19c1   :  { %v22331_v26 = vpop.f32.mrb[50].mxu1 }
0x19c2   :  { %v40978_v15 = vpop.f32.mrb[51].mxu1  ;;  %v43866_v10 = vpop.eup %43865  ;;  %v23244_v46 = vsel %vm4341_vm4, %v22331_v26, -1.7014117e+38 }
0x19c3   :  { %v23295_v31 = vsel %vm725_vm2, %v43866_v10, 0.0  ;;  %v23262_v60 = vsel %vm725_vm2, %v23244_v46, -inf }
0x19c6   :  { %v21879_v44 = vpop.f32.mrb[40].mxu0 }
0x19c7   :  { %v40948_v7 = vpop.f32.mrb[41].mxu0  ;;  %v23243_v20 = vsel %vm4340_vm3, %v21879_v44, -1.7014117e+38 }
0x19c8   :  { %v23259_v18 = vsel %vm725_vm2, %v23243_v20, -inf }
0x19df   :  { %v23252_v27 = vpop.xlane.xlu1 %23251 }
0x19e0   :  { %v23272_v0 = vsub.f32 %v23240_v25, %v23252_v27 }
0x19e2   :  { %v23281_v43 = vmul.f32 1.442695, %v23272_v0 }
0x19e3   :  { %v19572_v16 = vpop.permute.xlu1 %19571 }
0x19e4   :  { %v46272_v40 = vadd.f32 %v19572_v16, %v46007_v36  ;;  %v46275_v14 = vadd.f32 %v46004_v17, %v19572_v16  ;;  %v23256_v17 = vsel %vm725_vm2, %v23242_v30, -inf  ;;  %v23241_v36 = vsel %vm4340_vm3, %v20975_v29, -1.7014117e+38 }
0x19e5   :  { %v23253_v24 = vsel %vm725_vm2, %v23241_v36, -inf  ;;  %43867 = vpow2.f32 %v23281_v43 }
0x19e6   :  { %19613 = vrot.lane.b32.xlu0 %v46275_v14, %s44103_s27  ;;  %19611 = vrot.lane.b32.xlu1 %v46272_v40, %s44103_s27 }
0x19ea   :  { %23343 = vrot.lane.b32.xlu1 %v46272_v40, %s44107_s5 }
0x19ee   :  { %23795 = vrot.lane.b32.xlu1 %v46275_v14, %s44107_s5 }
0x19ef   :  { %v46303_v53 = vpop.eup %43867 }
0x19f0   :  { %v23298_v59 = vsel %vm725_vm2, %v46303_v53, 0.0 }
0x19f2   :  { %19617 = vrot.lane.b32.xlu1 %v46275_v14, %s44105_s29 }
0x1a05   :  { %23257 = vmax.xlane.f32.xlu0 %v23256_v17 }
0x1a09   :  { %23254 = vmax.xlane.f32.xlu0 %v23253_v24 }
0x1a0c   :  { %v23235_v12 = vpop.f32.mrb[52].mxu1 }
0x1a0d   :  { %v41038_v21 = vpop.f32.mrb[53].mxu1  ;;  %v46319_v25 = vsel %vm4341_vm4, %v23235_v12, -1.7014117e+38 }
0x1a0e   :  { %v23268_v4 = vsel %vm725_vm2, %v46319_v25, -inf }
0x1a11   :  { %v22783_v57 = vpop.f32.mrb[42].mxu0 }
0x1a12   :  { %v41008_v42 = vpop.f32.mrb[43].mxu0  ;;  %v46325_v22 = vsel %vm4340_vm3, %v22783_v57, -1.7014117e+38 }
0x1a13   :  { %v23265_v8 = vsel %vm725_vm2, %v46325_v22, -inf }
0x1a1f   :  { %19615 = vrot.lane.b32.xlu0 %v46272_v40, %s44105_s29 }
0x1a3e   :  { %23296 = vadd.xlane.f32.xlu0 %v23295_v31 }
0x1a42   :  { %23263 = vmax.xlane.f32.xlu0 %v23262_v60 }
0x1a46   :  { %23260 = vmax.xlane.f32.xlu0 %v23259_v18 }
0x1a4a   :  { %23299 = vadd.xlane.f32.xlu0 %v23298_v59 }
0x1a58   :  { %v19612_v33 = vpop.permute.xlu1 %19611  ;;  %v19614_v41 = vpop.permute.xlu0 %19613 }
0x1a59   :  { %24247 = vrot.lane.b32.xlu1 %v19612_v33, %s44107_s5 }
0x1a5c   :  { %v23344_v32 = vpop.permute.xlu1 %23343 }
0x1a5d   :  { %v46308_v2 = vand.u32 4294901760, %v23344_v32 }
0x1a5f   :  { %41040 = vmatpush3.msra.mxu0 %v46308_v2  ;;  %v23427_v0 = vsub.f32 %v23344_v32, %v46308_v2 }
0x1a60   :  { %24699 = vrot.lane.b32.xlu0 %v19614_v41, %s44107_s5  ;;  %v23796_v49 = vpop.permute.xlu1 %23795  ;;  %41044 = vmatprep.subr.mxu0 %v44101_v51 }
0x1a61   :  { %v46313_v61 = vand.u32 4294901760, %v23796_v49 }
0x1a63   :  { %41070 = vmatpush3.msra.mxu1 %v46313_v61 }
0x1a64   :  { %41074 = vmatprep.subr.mxu1 %v44101_v51 }
0x1a7d   :  { %23269 = vmax.xlane.f32.xlu1 %v23268_v4 }
0x1a81   :  { %23266 = vmax.xlane.f32.xlu1 %v23265_v8 }
0x1a92   :  { %v23258_v3 = vpop.xlane.xlu0 %23257 }
0x1a93   :  { %v23274_v54 = vsub.f32 %v23242_v30, %v23258_v3 }
0x1a95   :  { %v23285_v29 = vmul.f32 1.442695, %v23274_v54 }
0x1a96   :  { %v23255_v37 = vpop.xlane.xlu0 %23254 }
0x1a97   :  { %43869 = vpow2.f32 %v23285_v29  ;;  %v23273_v26 = vsub.f32 %v23241_v36, %v23255_v37  ;;  %v23879_v29 = vsub.f32 %v23796_v49, %v46313_v61  ;;  %v46365_v37 = vld [vmem:[%s47550_s2 + $0x8] sm:$0xff] }
0x1a99   :  { %v23283_v15 = vmul.f32 1.442695, %v23273_v26 }
0x1a9a   :  { %v19616_v30 = vpop.permute.xlu0 %19615 }
0x1a9b   :  { %43871 = vpow2.f32 %v23283_v15 }
0x1aa1   :  { %v46329_v44 = vpop.eup %43869 }
0x1aa2   :  { %v23304_v7 = vsel %vm725_vm2, %v46329_v44, 0.0 }
0x1aa3   :  { %23305 = vadd.xlane.f32.xlu1 %v23304_v7  ;;  %v23880_v7 = vand.u32 4294901760, %v23879_v29 }
0x1aa5   :  { %v46333_v27 = vpop.eup %43871 }
0x1aa6   :  { %v23301_v16 = vsel %vm725_vm2, %v46333_v27, 0.0 }
0x1aa7   :  { %23302 = vadd.xlane.f32.xlu0 %v23301_v16 }
0x1ab4   :  { %19621 = vrot.lane.b32.xlu1 %v46275_v14, %s44106_s30 }
0x1abd   :  { %19619 = vrot.lane.b32.xlu0 %v46272_v40, %s44106_s30  ;;  %v46345_v40 = vld [vmem:[%s47550_s2] sm:$0xff] }
0x1acb   :  { %v23297_v17 = vpop.xlane.xlu0 %23296 }
0x1acc   :  { %43873 = vrcp.f32 %v23297_v17  ;;  %v23881_v17 = vsub.f32 %v23879_v29, %v23880_v7 }
0x1acf   :  { %v23264_v36 = vpop.xlane.xlu0 %23263 }
0x1ad0   :  { %v23276_v24 = vsub.f32 %v23244_v46, %v23264_v36  ;;  %v23428_v46 = vand.u32 4294901760, %v23427_v0 }
0x1ad2   :  { %v23289_v12 = vmul.f32 1.442695, %v23276_v24  ;;  %v23429_v59 = vsub.f32 %v23427_v0, %v23428_v46 }
0x1ad3   :  { %v23261_v21 = vpop.xlane.xlu0 %23260 }
0x1ad4   :  { %43875 = vpow2.f32 %v23289_v12  ;;  %v23275_v57 = vsub.f32 %v23243_v20, %v23261_v21  ;;  %v23430_v54 = vand.u32 4294901760, %v23429_v59  ;;  %v23882_v12 = vand.u32 4294901760, %v23881_v17  ;;  %v19618_v21 = vpop.permute.xlu1 %19617 }
0x1ad6   :  { %v43874_v42 = vpop.eup %43873  ;;  %v23287_v23 = vmul.f32 1.442695, %v23275_v57 }
0x1ad7   :  { %v23327_v47 = vmul.f32 %v43874_v42, %v43866_v10  ;;  %v23300_v55 = vpop.xlane.xlu0 %23299 }
0x1ad8   :  { %43877 = vpow2.f32 %v23287_v23 }
0x1ad9   :  { %v23335_v14 = vmul.f32 %v46345_v40, %v23327_v47  ;;  %43879 = vrcp.f32 %v23300_v55 }
0x1adb   :  { %v23347_v43 = vsel %vm725_vm2, %v23335_v14, 0 }
0x1adc   :  { %v46349_v31 = vand.u32 4294901760, %v23347_v43 }
0x1ade   :  { %v46351_v60 = vpop.eup %43875  ;;  %v23416_v10 = vsub.f32 %v23347_v43, %v46349_v31 }
0x1adf   :  { %v23310_v20 = vsel %vm725_vm2, %v46351_v60, 0.0 }
0x1ae0   :  { %23311 = vadd.xlane.f32.xlu0 %v23310_v20  ;;  %v23417_v18 = vand.u32 4294901760, %v23416_v10 }
0x1ae2   :  { %v46356_v33 = vpop.eup %43877  ;;  %v23418_v32 = vsub.f32 %v23416_v10, %v23417_v18 }
0x1ae3   :  { %v43880_v41 = vpop.eup %43879  ;;  %v23307_v4 = vsel %vm725_vm2, %v46356_v33, 0.0 }
0x1ae4   :  { %v23328_v8 = vmul.f32 %v43880_v41, %v46303_v53  ;;  %23308 = vadd.xlane.f32.xlu1 %v23307_v4  ;;  %v23419_v3 = vand.u32 4294901760, %v23418_v32 }
0x1ae6   :  { %v23336_v26 = vmul.f32 %v46365_v37, %v23328_v8  ;;  %41042 = vmatmul.mubr.f32.vlgmr.msra.gmra.mrb[44].mxu0 %v23419_v3 }
0x1ae7   :  { %41045 = vmatpush3.msra.mxu0 %v23430_v54  ;;  %41046 = vmatprep.mubr.msk.f32.mxu0 %vm44102_vm1, %v44101_v51 }
0x1ae8   :  { %41049 = vmatprep.subr.mxu0 %v44101_v51  ;;  %v23799_v53 = vsel %vm725_vm2, %v23336_v26, 0 }
0x1ae9   :  { %v46372_v15 = vand.u32 4294901760, %v23799_v53 }
0x1aeb   :  { %v23868_v49 = vsub.f32 %v23799_v53, %v46372_v15 }
0x1aed   :  { %v23869_v16 = vand.u32 4294901760, %v23868_v49 }
0x1aee   :  { %41047 = vmatmul.mubr.f32.vlgmr.msra.gmra.mrb[44].mxu0 %v46349_v31 }
0x1aef   :  { %41050 = vmatpush3.msra.mxu0 %v23427_v0  ;;  %v23870_v36 = vsub.f32 %v23868_v49, %v23869_v16  ;;  %41051 = vmatprep.mubr.msk.f32.mxu0 %vm44102_vm1, %v44101_v51  ;;  %v24700_v0 = vpop.permute.xlu0 %24699 }
0x1af0   :  { %41054 = vmatprep.subr.mxu0 %v44101_v51 }
0x1af1   :  { %v23871_v24 = vand.u32 4294901760, %v23870_v36 }
0x1af3   :  { %41072 = vmatmul.mubr.f32.vlgmr.msra.gmra.mrb[54].mxu1 %v23871_v24 }
0x1af4   :  { %41075 = vmatpush3.msra.mxu1 %v23882_v12  ;;  %41076 = vmatprep.mubr.msk.f32.mxu1 %vm44102_vm1, %v44101_v51 }
0x1af5   :  { %25151 = vrot.lane.b32.xlu1 %v19616_v30, %s44107_s5  ;;  %41079 = vmatprep.subr.mxu1 %v44101_v51  ;;  %v24248_v30 = vpop.permute.xlu1 %24247 }
0x1af6   :  { %41052 = vmatmul.mubr.f32.vlgmr.msra.gmra.mrb[44].mxu0 %v23416_v10  ;;  %25603 = vrot.lane.b32.xlu0 %v19618_v21, %s44107_s5  ;;  %v46407_v23 = vand.u32 4294901760, %v24248_v30 }
0x1af7   :  { %41055 = vmatpush3.msra.mxu0 %v46308_v2  ;;  %41056 = vmatprep.mubr.msk.f32.mxu0 %vm44102_vm1, %v44101_v51 }
0x1af8   :  { %41059 = vmatprep.subr.mxu0 %v44101_v51  ;;  %v24331_v26 = vsub.f32 %v24248_v30, %v46407_v23 }
0x1afa   :  { %v24332_v17 = vand.u32 4294901760, %v24331_v26 }
0x1afb   :  { %41077 = vmatmul.mubr.f32.vlgmr.msra.gmra.mrb[54].mxu1 %v46372_v15 }
0x1afc   :  { %41080 = vmatpush3.msra.mxu1 %v23879_v29  ;;  %41081 = vmatprep.mubr.msk.f32.mxu1 %vm44102_vm1, %v44101_v51 }
0x1afd   :  { %41084 = vmatprep.subr.mxu1 %v44101_v51 }
0x1afe   :  { %41057 = vmatmul.mubr.f32.vlgmr.msra.gmra.mrb[44].mxu0 %v23417_v18 }
0x1aff   :  { %41060 = vmatpush3.msra.mxu0 %v23428_v46  ;;  %41061 = vmatprep.mubr.msk.f32.mxu0 %vm44102_vm1, %v44101_v51 }
0x1b00   :  { %41064 = vmatprep.subr.mxu0 %v44101_v51 }
0x1b03   :  { %41082 = vmatmul.mubr.f32.vlgmr.msra.gmra.mrb[54].mxu1 %v23868_v49 }
0x1b04   :  { %41085 = vmatpush3.msra.mxu1 %v46313_v61  ;;  %41086 = vmatprep.mubr.msk.f32.mxu1 %vm44102_vm1, %v44101_v51 }
0x1b05   :  { %41089 = vmatprep.subr.mxu1 %v44101_v51 }
0x1b06   :  { %41062 = vmatmul.mubr.f32.vlgmr.msra.gmra.mrb[44].mxu0 %v46349_v31 }
0x1b07   :  { %41065 = vmatpush3.msra.mxu0 %v46308_v2  ;;  %41066 = vmatprep.mubr.msk.f32.mxu0 %vm44102_vm1, %v44101_v51 }
0x1b08   :  { %41099 = vmatprep.subr.mxu0 %v44101_v51 }
0x1b0a   :  { %v23270_v57 = vpop.xlane.xlu1 %23269 }
0x1b0b   :  { %41087 = vmatmul.mubr.f32.vlgmr.msra.gmra.mrb[54].mxu1 %v23869_v16  ;;  %v23278_v42 = vsub.f32 %v46319_v25, %v23270_v57 }
0x1b0c   :  { %41090 = vmatpush3.msra.mxu1 %v23880_v7  ;;  %41091 = vmatprep.mubr.msk.f32.mxu1 %vm44102_vm1, %v44101_v51 }
0x1b0d   :  { %v23293_v47 = vmul.f32 1.442695, %v23278_v42  ;;  %41094 = vmatprep.subr.mxu1 %v44101_v51  ;;  %v24333_v42 = vsub.f32 %v24331_v26, %v24332_v17 }
0x1b0e   :  { %41067 = vmatmul.mubr.f32.vlgmr.msra.gmra.mrb[44].mxu0 %v46349_v31  ;;  %v23267_v2 = vpop.xlane.xlu1 %23266 }
0x1b0f   :  { %43881 = vpow2.f32 %v23293_v47  ;;  %41100 = vmatpush3.msra.mxu0 %v46407_v23  ;;  %v23277_v55 = vsub.f32 %v46325_v22, %v23267_v2  ;;  %41101 = vmatprep.mubr.msk.f32.mxu0 %vm44102_vm1, %v44101_v51  ;;  %v46423_v22 = vand.u32 4294901760, %v24700_v0  ;;  %v24334_v2 = vand.u32 4294901760, %v24333_v42 }
0x1b10   :  { %41104 = vmatprep.subr.mxu0 %v44101_v51 }
0x1b11   :  { %v23291_v25 = vmul.f32 1.442695, %v23277_v55  ;;  %v24783_v41 = vsub.f32 %v24700_v0, %v46423_v22 }
0x1b13   :  { %43883 = vpow2.f32 %v23291_v25  ;;  %41092 = vmatmul.mubr.f32.vlgmr.msra.gmra.mrb[54].mxu1 %v46372_v15  ;;  %v24784_v53 = vand.u32 4294901760, %v24783_v41 }
0x1b14   :  { %41095 = vmatpush3.msra.mxu1 %v46313_v61  ;;  %41096 = vmatprep.mubr.msk.f32.mxu1 %vm44102_vm1, %v44101_v51 }
0x1b15   :  { %41129 = vmatprep.subr.mxu1 %v44101_v51  ;;  %v24785_v36 = vsub.f32 %v24783_v41, %v24784_v53 }
0x1b17   :  { %v24786_v57 = vand.u32 4294901760, %v24785_v36 }
0x1b19   :  { %v46421_v14 = vpop.eup %43881 }
0x1b1a   :  { %v23316_v43 = vsel %vm725_vm2, %v46421_v14, 0.0 }
0x1b1b   :  { %41097 = vmatmul.mubr.f32.vlgmr.msra.gmra.mrb[54].mxu1 %v46372_v15  ;;  %23317 = vadd.xlane.f32.xlu0 %v23316_v43 }
0x1b1c   :  { %41130 = vmatpush3.msra.mxu1 %v46423_v22  ;;  %41131 = vmatprep.mubr.msk.f32.mxu1 %vm44102_vm1, %v44101_v51 }
0x1b1d   :  { %v46431_v61 = vpop.eup %43883  ;;  %41134 = vmatprep.subr.mxu1 %v44101_v51 }
0x1b1e   :  { %v23313_v31 = vsel %vm725_vm2, %v46431_v61, 0.0 }
0x1b1f   :  { %23314 = vadd.xlane.f32.xlu1 %v23313_v31 }
0x1b30   :  { %v23306_v46 = vpop.xlane.xlu1 %23305 }
0x1b31   :  { %43885 = vrcp.f32 %v23306_v46 }
0x1b34   :  { %v23303_v10 = vpop.xlane.xlu0 %23302  ;;  %v19622_v20 = vpop.permute.xlu1 %19621 }
0x1b35   :  { %43887 = vrcp.f32 %v23303_v10  ;;  %26507 = vrot.lane.b32.xlu1 %v19622_v20, %s44107_s5 }
0x1b38   :  { %v19620_v18 = vpop.permute.xlu0 %19619 }
0x1b39   :  { %26055 = vrot.lane.b32.xlu0 %v19620_v18, %s44107_s5 }
0x1b3b   :  { %v43886_v59 = vpop.eup %43885 }
0x1b3c   :  { %v23330_v32 = vmul.f32 %v43886_v59, %v46329_v44 }
0x1b3e   :  { %v23338_v4 = vmul.f32 %v46365_v37, %v23330_v32 }
0x1b3f   :  { %v43888_v8 = vpop.eup %43887 }
0x1b40   :  { %v23329_v3 = vmul.f32 %v43888_v8, %v46333_v27  ;;  %v24703_v54 = vsel %vm725_vm2, %v23338_v4, 0 }
0x1b41   :  { %v46443_v29 = vand.u32 4294901760, %v24703_v54 }
0x1b42   :  { %v23337_v15 = vmul.f32 %v46345_v40, %v23329_v3 }
0x1b43   :  { %v24772_v7 = vsub.f32 %v24703_v54, %v46443_v29 }
0x1b44   :  { %v24251_v44 = vsel %vm725_vm2, %v23337_v15, 0 }
0x1b45   :  { %v24773_v49 = vand.u32 4294901760, %v24772_v7  ;;  %v46449_v16 = vand.u32 4294901760, %v24251_v44 }
0x1b47   :  { %v24774_v24 = vsub.f32 %v24772_v7, %v24773_v49  ;;  %v24320_v27 = vsub.f32 %v24251_v44, %v46449_v16 }
0x1b49   :  { %v24775_v12 = vand.u32 4294901760, %v24774_v24  ;;  %v24321_v21 = vand.u32 4294901760, %v24320_v27 }
0x1b4b   :  { %41132 = vmatmul.mubr.f32.vlgmr.msra.gmra.mrb[56].mxu1 %v24775_v12  ;;  %v24322_v30 = vsub.f32 %v24320_v27, %v24321_v21 }
0x1b4c   :  { %41135 = vmatpush3.msra.mxu1 %v24786_v57  ;;  %41136 = vmatprep.mubr.msk.f32.mxu1 %vm44102_vm1, %v44101_v51 }
0x1b4d   :  { %v24323_v47 = vand.u32 4294901760, %v24322_v30  ;;  %41139 = vmatprep.subr.mxu1 %v44101_v51 }
0x1b4f   :  { %41102 = vmatmul.mubr.f32.vlgmr.msra.gmra.mrb[46].mxu0 %v24323_v47 }
0x1b50   :  { %41105 = vmatpush3.msra.mxu0 %v24334_v2  ;;  %41106 = vmatprep.mubr.msk.f32.mxu0 %vm44102_vm1, %v44101_v51 }
0x1b51   :  { %41109 = vmatprep.subr.mxu0 %v44101_v51 }
0x1b53   :  { %41137 = vmatmul.mubr.f32.vlgmr.msra.gmra.mrb[56].mxu1 %v46443_v29 }
0x1b54   :  { %41140 = vmatpush3.msra.mxu1 %v24783_v41  ;;  %41141 = vmatprep.mubr.msk.f32.mxu1 %vm44102_vm1, %v44101_v51 }
0x1b55   :  { %41144 = vmatprep.subr.mxu1 %v44101_v51 }
0x1b57   :  { %41107 = vmatmul.mubr.f32.vlgmr.msra.gmra.mrb[46].mxu0 %v46449_v16 }
0x1b58   :  { %41110 = vmatpush3.msra.mxu0 %v24331_v26  ;;  %41111 = vmatprep.mubr.msk.f32.mxu0 %vm44102_vm1, %v44101_v51 }
0x1b59   :  { %41114 = vmatprep.subr.mxu0 %v44101_v51 }
0x1b5b   :  { %41142 = vmatmul.mubr.f32.vlgmr.msra.gmra.mrb[56].mxu1 %v24772_v7 }
0x1b5c   :  { %41145 = vmatpush3.msra.mxu1 %v46423_v22  ;;  %41146 = vmatprep.mubr.msk.f32.mxu1 %vm44102_vm1, %v44101_v51 }
0x1b5d   :  { %41149 = vmatprep.subr.mxu1 %v44101_v51 }
0x1b5f   :  { %41112 = vmatmul.mubr.f32.vlgmr.msra.gmra.mrb[46].mxu0 %v24320_v27 }
0x1b60   :  { %41115 = vmatpush3.msra.mxu0 %v46407_v23  ;;  %41116 = vmatprep.mubr.msk.f32.mxu0 %vm44102_vm1, %v44101_v51 }
0x1b61   :  { %41119 = vmatprep.subr.mxu0 %v44101_v51 }
0x1b63   :  { %41147 = vmatmul.mubr.f32.vlgmr.msra.gmra.mrb[56].mxu1 %v24773_v49 }
0x1b64   :  { %41150 = vmatpush3.msra.mxu1 %v24784_v53  ;;  %41151 = vmatprep.mubr.msk.f32.mxu1 %vm44102_vm1, %v44101_v51 }
0x1b65   :  { %41154 = vmatprep.subr.mxu1 %v44101_v51 }
0x1b67   :  { %41117 = vmatmul.mubr.f32.vlgmr.msra.gmra.mrb[46].mxu0 %v24321_v21 }
0x1b68   :  { %41120 = vmatpush3.msra.mxu0 %v24332_v17  ;;  %41121 = vmatprep.mubr.msk.f32.mxu0 %vm44102_vm1, %v44101_v51 }
0x1b69   :  { %41124 = vmatprep.subr.mxu0 %v44101_v51 }
0x1b6b   :  { %41152 = vmatmul.mubr.f32.vlgmr.msra.gmra.mrb[56].mxu1 %v46443_v29 }
0x1b6c   :  { %41155 = vmatpush3.msra.mxu1 %v46423_v22  ;;  %41156 = vmatprep.mubr.msk.f32.mxu1 %vm44102_vm1, %v44101_v51 }
0x1b6d   :  { %v23312_v55 = vpop.xlane.xlu0 %23311  ;;  %41189 = vmatprep.subr.mxu1 %v44101_v51 }
0x1b6e   :  { %43889 = vrcp.f32 %v23312_v55 }
0x1b6f   :  { %41122 = vmatmul.mubr.f32.vlgmr.msra.gmra.mrb[46].mxu0 %v46449_v16 }
0x1b70   :  { %41125 = vmatpush3.msra.mxu0 %v46407_v23  ;;  %41126 = vmatprep.mubr.msk.f32.mxu0 %vm44102_vm1, %v44101_v51 }
0x1b71   :  { %v25604_v25 = vpop.permute.xlu0 %25603  ;;  %v23309_v0 = vpop.xlane.xlu1 %23308  ;;  %41159 = vmatprep.subr.mxu0 %v44101_v51 }
0x1b72   :  { %v46490_v43 = vand.u32 4294901760, %v25604_v25  ;;  %43891 = vrcp.f32 %v23309_v0 }
0x1b73   :  { %41157 = vmatmul.mubr.f32.vlgmr.msra.gmra.mrb[56].mxu1 %v46443_v29 }
0x1b74   :  { %41190 = vmatpush3.msra.mxu1 %v46490_v43  ;;  %41191 = vmatprep.mubr.msk.f32.mxu1 %vm44102_vm1, %v44101_v51  ;;  %v25687_v20 = vsub.f32 %v25604_v25, %v46490_v43 }
0x1b75   :  { %v25152_v22 = vpop.permute.xlu1 %25151  ;;  %41194 = vmatprep.subr.mxu1 %v44101_v51 }
0x1b76   :  { %v46497_v23 = vand.u32 4294901760, %v25152_v22  ;;  %v25688_v4 = vand.u32 4294901760, %v25687_v20 }
0x1b77   :  { %41127 = vmatmul.mubr.f32.vlgmr.msra.gmra.mrb[46].mxu0 %v46449_v16 }
0x1b78   :  { %v43890_v31 = vpop.eup %43889  ;;  %41160 = vmatpush3.msra.mxu0 %v46497_v23  ;;  %41161 = vmatprep.mubr.msk.f32.mxu0 %vm44102_vm1, %v44101_v51  ;;  %v25235_v3 = vsub.f32 %v25152_v22, %v46497_v23  ;;  %v25689_v53 = vsub.f32 %v25687_v20, %v25688_v4 }
0x1b79   :  { %v23332_v46 = vmul.f32 %v43890_v31, %v46351_v60  ;;  %41164 = vmatprep.subr.mxu0 %v44101_v51 }
0x1b7a   :  { %v25236_v15 = vand.u32 4294901760, %v25235_v3  ;;  %v25690_v16 = vand.u32 4294901760, %v25689_v53 }
0x1b7b   :  { %v23340_v10 = vmul.f32 %v46365_v37, %v23332_v46 }
0x1b7c   :  { %v43892_v18 = vpop.eup %43891  ;;  %v25237_v17 = vsub.f32 %v25235_v3, %v25236_v15 }
0x1b7d   :  { %v23331_v59 = vmul.f32 %v43892_v18, %v46356_v33  ;;  %v25607_v32 = vsel %vm725_vm2, %v23340_v10, 0 }
0x1b7e   :  { %v46509_v41 = vand.u32 4294901760, %v25607_v32  ;;  %v25238_v27 = vand.u32 4294901760, %v25237_v17 }
0x1b7f   :  { %v23339_v8 = vmul.f32 %v46345_v40, %v23331_v59 }
0x1b80   :  { %v25676_v60 = vsub.f32 %v25607_v32, %v46509_v41 }
0x1b81   :  { %v25155_v54 = vsel %vm725_vm2, %v23339_v8, 0 }
0x1b82   :  { %v25677_v29 = vand.u32 4294901760, %v25676_v60  ;;  %v46515_v26 = vand.u32 4294901760, %v25155_v54 }
0x1b84   :  { %v25678_v7 = vsub.f32 %v25676_v60, %v25677_v29  ;;  %v25224_v33 = vsub.f32 %v25155_v54, %v46515_v26 }
0x1b86   :  { %v25679_v44 = vand.u32 4294901760, %v25678_v7  ;;  %v25225_v49 = vand.u32 4294901760, %v25224_v33 }
0x1b88   :  { %41192 = vmatmul.mubr.f32.vlgmr.msra.gmra.mrb[58].mxu1 %v25679_v44  ;;  %v25226_v36 = vsub.f32 %v25224_v33, %v25225_v49 }
0x1b89   :  { %41195 = vmatpush3.msra.mxu1 %v25690_v16  ;;  %41196 = vmatprep.mubr.msk.f32.mxu1 %vm44102_vm1, %v44101_v51 }
0x1b8a   :  { %v25227_v24 = vand.u32 4294901760, %v25226_v36  ;;  %41199 = vmatprep.subr.mxu1 %v44101_v51 }
0x1b8c   :  { %41162 = vmatmul.mubr.f32.vlgmr.msra.gmra.mrb[48].mxu0 %v25227_v24 }
0x1b8d   :  { %41165 = vmatpush3.msra.mxu0 %v25238_v27  ;;  %41166 = vmatprep.mubr.msk.f32.mxu0 %vm44102_vm1, %v44101_v51 }
0x1b8e   :  { %41169 = vmatprep.subr.mxu0 %v44101_v51 }
0x1b90   :  { %41197 = vmatmul.mubr.f32.vlgmr.msra.gmra.mrb[58].mxu1 %v46509_v41 }
0x1b91   :  { %41200 = vmatpush3.msra.mxu1 %v25687_v20  ;;  %41201 = vmatprep.mubr.msk.f32.mxu1 %vm44102_vm1, %v44101_v51 }
0x1b92   :  { %41204 = vmatprep.subr.mxu1 %v44101_v51 }
0x1b94   :  { %41167 = vmatmul.mubr.f32.vlgmr.msra.gmra.mrb[48].mxu0 %v46515_v26 }
0x1b95   :  { %41170 = vmatpush3.msra.mxu0 %v25235_v3  ;;  %41171 = vmatprep.mubr.msk.f32.mxu0 %vm44102_vm1, %v44101_v51 }
0x1b96   :  { %41174 = vmatprep.subr.mxu0 %v44101_v51 }
0x1b98   :  { %41202 = vmatmul.mubr.f32.vlgmr.msra.gmra.mrb[58].mxu1 %v25676_v60 }
0x1b99   :  { %41205 = vmatpush3.msra.mxu1 %v46490_v43  ;;  %41206 = vmatprep.mubr.msk.f32.mxu1 %vm44102_vm1, %v44101_v51 }
0x1b9a   :  { %41209 = vmatprep.subr.mxu1 %v44101_v51 }
0x1b9c   :  { %41172 = vmatmul.mubr.f32.vlgmr.msra.gmra.mrb[48].mxu0 %v25224_v33 }
0x1b9d   :  { %41175 = vmatpush3.msra.mxu0 %v46497_v23  ;;  %41176 = vmatprep.mubr.msk.f32.mxu0 %vm44102_vm1, %v44101_v51 }
0x1b9e   :  { %41179 = vmatprep.subr.mxu0 %v44101_v51 }
0x1ba0   :  { %41207 = vmatmul.mubr.f32.vlgmr.msra.gmra.mrb[58].mxu1 %v25677_v29 }
0x1ba1   :  { %41210 = vmatpush3.msra.mxu1 %v25688_v4  ;;  %41211 = vmatprep.mubr.msk.f32.mxu1 %vm44102_vm1, %v44101_v51 }
0x1ba2   :  { %41214 = vmatprep.subr.mxu1 %v44101_v51 }
0x1ba4   :  { %41177 = vmatmul.mubr.f32.vlgmr.msra.gmra.mrb[48].mxu0 %v25225_v49 }
0x1ba5   :  { %41180 = vmatpush3.msra.mxu0 %v25236_v15  ;;  %41181 = vmatprep.mubr.msk.f32.mxu0 %vm44102_vm1, %v44101_v51 }
0x1ba6   :  { %41184 = vmatprep.subr.mxu0 %v44101_v51 }
0x1ba8   :  { %v23318_v12 = vpop.xlane.xlu0 %23317  ;;  %41212 = vmatmul.mubr.f32.vlgmr.msra.gmra.mrb[58].mxu1 %v46509_v41 }
0x1ba9   :  { %43893 = vrcp.f32 %v23318_v12  ;;  %41215 = vmatpush3.msra.mxu1 %v46490_v43  ;;  %41216 = vmatprep.mubr.msk.f32.mxu1 %vm44102_vm1, %v44101_v51 }
0x1baa   :  { %41249 = vmatprep.subr.mxu1 %v44101_v51 }
0x1bac   :  { %41182 = vmatmul.mubr.f32.vlgmr.msra.gmra.mrb[48].mxu0 %v46515_v26  ;;  %v23315_v21 = vpop.xlane.xlu1 %23314  ;;  %v26056_v57 = vpop.permute.xlu0 %26055 }
0x1bad   :  { %41185 = vmatpush3.msra.mxu0 %v46497_v23  ;;  %43895 = vrcp.f32 %v23315_v21  ;;  %41186 = vmatprep.mubr.msk.f32.mxu0 %vm44102_vm1, %v44101_v51  ;;  %v46561_v2 = vand.u32 4294901760, %v26056_v57  ;;  %v37927_v21 = vld [vmem:[%s47554_s6 + $0x40] sm:$0xff] }
0x1bae   :  { %41219 = vmatprep.subr.mxu0 %v44101_v51 }
0x1baf   :  { %v26139_v31 = vsub.f32 %v26056_v57, %v46561_v2  ;;  %v37928_v57 = vld [vmem:[%s47554_s6 + $0x48] sm:$0xff] }
0x1bb0   :  { %41217 = vmatmul.mubr.f32.vlgmr.msra.gmra.mrb[58].mxu1 %v46509_v41  ;;  %v26508_v42 = vpop.permute.xlu1 %26507 }
0x1bb1   :  { %v46557_v30 = vand.u32 4294901760, %v26508_v42  ;;  %41251 = vmatprep.mubr.msk.f32.mxu1 %vm44102_vm1, %v44101_v51  ;;  %v26140_v32 = vand.u32 4294901760, %v26139_v31 }
0x1bb3   :  { %v43894_v47 = vpop.eup %43893  ;;  %41250 = vmatpush3.msra.mxu1 %v46557_v30  ;;  %v26591_v0 = vsub.f32 %v26508_v42, %v46557_v30  ;;  %v27000_v42 = vand.u32 4294901760, %v37927_v21 }
0x1bb4   :  { %v23334_v55 = vmul.f32 %v43894_v47, %v46421_v14  ;;  %41187 = vmatmul.mubr.f32.vlgmr.msra.gmra.mrb[48].mxu0 %v46515_v26  ;;  %41254 = vmatprep.subr.mxu1 %v44101_v51  ;;  %v37929_v47 = vld [vmem:[%s47554_s6 + $0x50] sm:$0xff] }
0x1bb5   :  { %41220 = vmatpush3.msra.mxu0 %v46561_v2  ;;  %41221 = vmatprep.mubr.msk.f32.mxu0 %vm44102_vm1, %v44101_v51  ;;  %v26592_v10 = vand.u32 4294901760, %v26591_v0 }
0x1bb6   :  { %v23342_v25 = vmul.f32 %v46365_v37, %v23334_v55  ;;  %41224 = vmatprep.subr.mxu0 %v44101_v51 }
0x1bb7   :  { %v43896_v43 = vpop.eup %43895  ;;  %v26593_v41 = vsub.f32 %v26591_v0, %v26592_v10 }
0x1bb8   :  { %v23333_v22 = vmul.f32 %v43896_v43, %v46431_v61  ;;  %v26511_v14 = vsel %vm725_vm2, %v23342_v25, 0  ;;  %v26141_v61 = vsub.f32 %v26139_v31, %v26140_v32  ;;  %v27006_v25 = vand.u32 4294901760, %v37929_v47 }
0x1bb9   :  { %v26579_v23 = vand.u32 4294901760, %v26511_v14  ;;  %v26594_v54 = vand.u32 4294901760, %v26593_v41  ;;  %v27090_v43 = vsub.f32 %v37927_v21, %v27000_v42 }
0x1bba   :  { %v23341_v46 = vmul.f32 %v46345_v40, %v23333_v22  ;;  %v26142_v26 = vand.u32 4294901760, %v26141_v61 }
0x1bbb   :  { %v26580_v20 = vsub.f32 %v26511_v14, %v26579_v23 }
0x1bbc   :  { %v26059_v18 = vsel %vm725_vm2, %v23341_v46, 0 }
0x1bbd   :  { %v26581_v59 = vand.u32 4294901760, %v26580_v20  ;;  %v26127_v37 = vand.u32 4294901760, %v26059_v18 }
0x1bbf   :  { %v26582_v4 = vsub.f32 %v26580_v20, %v26581_v59  ;;  %v26128_v8 = vsub.f32 %v26059_v18, %v26127_v37  ;;  %v27104_v18 = vsub.f32 %v37929_v47, %v27006_v25 }
0x1bc1   :  { %v26583_v3 = vand.u32 4294901760, %v26582_v4  ;;  %v26129_v60 = vand.u32 4294901760, %v26128_v8  ;;  %v27105_v41 = vand.u32 4294901760, %v27104_v18 }
0x1bc3   :  { %41252 = vmatmul.mubr.f32.vlgmr.msra.gmra.mrb[60].mxu1 %v26583_v3  ;;  %v26130_v29 = vsub.f32 %v26128_v8, %v26129_v60  ;;  %v27106_v61 = vsub.f32 %v27104_v18, %v27105_v41 }
0x1bc4   :  { %41255 = vmatpush3.msra.mxu1 %v26594_v54  ;;  %41256 = vmatprep.mubr.msk.f32.mxu1 %vm44102_vm1, %v44101_v51 }
0x1bc5   :  { %v26131_v40 = vand.u32 4294901760, %v26130_v29  ;;  %41259 = vmatprep.subr.mxu1 %v44101_v51 }
0x1bc7   :  { %41222 = vmatmul.mubr.f32.vlgmr.msra.gmra.mrb[50].mxu0 %v26131_v40  ;;  %v27107_v40 = vand.u32 4294901760, %v27106_v61 }
0x1bc8   :  { %41225 = vmatpush3.msra.mxu0 %v26142_v26  ;;  %41226 = vmatprep.mubr.msk.f32.mxu0 %vm44102_vm1, %v44101_v51 }
0x1bc9   :  { %41229 = vmatprep.subr.mxu0 %v44101_v51 }
0x1bcb   :  { %41257 = vmatmul.mubr.f32.vlgmr.msra.gmra.mrb[60].mxu1 %v26579_v23 }
0x1bcc   :  { %41260 = vmatpush3.msra.mxu1 %v26591_v0  ;;  %41261 = vmatprep.mubr.msk.f32.mxu1 %vm44102_vm1, %v44101_v51 }
0x1bcd   :  { %41264 = vmatprep.subr.mxu1 %v44101_v51 }
0x1bcf   :  { %41227 = vmatmul.mubr.f32.vlgmr.msra.gmra.mrb[50].mxu0 %v26127_v37 }
0x1bd0   :  { %41230 = vmatpush3.msra.mxu0 %v26139_v31  ;;  %41231 = vmatprep.mubr.msk.f32.mxu0 %vm44102_vm1, %v44101_v51 }
0x1bd1   :  { %41234 = vmatprep.subr.mxu0 %v44101_v51 }
0x1bd3   :  { %41262 = vmatmul.mubr.f32.vlgmr.msra.gmra.mrb[60].mxu1 %v26580_v20 }
0x1bd4   :  { %41265 = vmatpush3.msra.mxu1 %v46557_v30  ;;  %41266 = vmatprep.mubr.msk.f32.mxu1 %vm44102_vm1, %v44101_v51 }
0x1bd5   :  { %41269 = vmatprep.subr.mxu1 %v44101_v51 }
0x1bd7   :  { %41232 = vmatmul.mubr.f32.vlgmr.msra.gmra.mrb[50].mxu0 %v26128_v8 }
0x1bd8   :  { %41235 = vmatpush3.msra.mxu0 %v46561_v2  ;;  %41236 = vmatprep.mubr.msk.f32.mxu0 %vm44102_vm1, %v44101_v51 }
0x1bd9   :  { %41239 = vmatprep.subr.mxu0 %v44101_v51 }
0x1bdb   :  { %41267 = vmatmul.mubr.f32.vlgmr.msra.gmra.mrb[60].mxu1 %v26581_v59 }
0x1bdc   :  { %41270 = vmatpush3.msra.mxu1 %v26592_v10  ;;  %41271 = vmatprep.mubr.msk.f32.mxu1 %vm44102_vm1, %v44101_v51 }
0x1bdd   :  { %41274 = vmatprep.subr.mxu1 %v44101_v51 }
0x1bdf   :  { %41237 = vmatmul.mubr.f32.vlgmr.msra.gmra.mrb[50].mxu0 %v26129_v60 }
0x1be0   :  { %41240 = vmatpush3.msra.mxu0 %v26140_v32  ;;  %41241 = vmatprep.mubr.msk.f32.mxu0 %vm44102_vm1, %v44101_v51 }
0x1be1   :  { %v46603_v53 = vpop.f32.mrb[44].mxu0  ;;  %41244 = vmatprep.subr.mxu0 %v44101_v51 }
0x1be2   :  { %v41068_v15 = vpop.f32.mrb[45].mxu0 }
0x1be3   :  { %41272 = vmatmul.mubr.f32.vlgmr.msra.gmra.mrb[60].mxu1 %v26579_v23 }
0x1be4   :  { %41275 = vmatpush3.msra.mxu1 %v46557_v30  ;;  %41276 = vmatprep.mubr.msk.f32.mxu1 %vm44102_vm1, %v44101_v51  ;;  %v27003_v30 = vand.u32 4294901760, %v37928_v57 }
0x1be6   :  { %v46628_v55 = vpack.c.bf16 %v27003_v30, %v27000_v42  ;;  %v27097_v22 = vsub.f32 %v37928_v57, %v27003_v30 }
0x1be7   :  { %41242 = vmatmul.mubr.f32.vlgmr.msra.gmra.mrb[50].mxu0 %v26127_v37 }
0x1be8   :  { %41245 = vmatpush3.msra.mxu0 %v46561_v2  ;;  %41246 = vmatprep.mubr.msk.f32.mxu0 %vm44102_vm1, %v44101_v51  ;;  %v37930_v2 = vld [vmem:[%s47554_s6 + $0x58] sm:$0xff]  ;;  %v27098_v46 = vand.u32 4294901760, %v27097_v22 }
0x1be9   :  { %v27009_v0 = vand.u32 4294901760, %v37930_v2  ;;  %42636 = vmatprep.subr.bf16.mxu0 %v46628_v55 }
0x1beb   :  { %41277 = vmatmul.mubr.f32.vlgmr.msra.gmra.mrb[60].mxu1 %v26579_v23  ;;  %v46631_v14 = vpack.c.bf16 %v27009_v0, %v27006_v25  ;;  %v27091_v23 = vand.u32 4294901760, %v27090_v43  ;;  %v27111_v59 = vsub.f32 %v37930_v2, %v27009_v0 }
0x1bed   :  { %v27092_v20 = vsub.f32 %v27090_v43, %v27091_v23  ;;  %v27112_v4 = vand.u32 4294901760, %v27111_v59 }
0x1bee   :  { %v24243_v7 = vpop.f32.mrb[54].mxu1 }
0x1bef   :  { %v41098_v33 = vpop.f32.mrb[55].mxu1  ;;  %41247 = vmatmul.mubr.f32.vlgmr.msra.gmra.mrb[50].mxu0 %v26127_v37  ;;  %v27099_v37 = vsub.f32 %v27097_v22, %v27098_v46  ;;  %v27093_v32 = vand.u32 4294901760, %v27092_v20  ;;  %v27113_v54 = vsub.f32 %v27111_v59, %v27112_v4 }
0x1bf0   :  { %42638 = vmatpush3.bf16.msra.mxu0 %v46628_v55  ;;  %v42651_v33 = vpack.c.bf16 %v27097_v22, %v27090_v43 }
0x1bf1   :  { %42640 = vmatprep.subr.bf16.mxu0 %v46631_v14  ;;  %v27100_v3 = vand.u32 4294901760, %v27099_v37  ;;  %v27114_v26 = vand.u32 4294901760, %v27113_v54  ;;  %v28112_v54 = vld [vmem:[#allocation7 + $0x28] sm:$0xff] }
0x1bf3   :  { %v42643_v29 = vpack.c.bf16 %v27100_v3, %v27093_v32  ;;  %v42647_v15 = vpack.c.bf16 %v27114_v26, %v27107_v40  ;;  %v28119_v26 = vand.u32 4294901760, %v28112_v54 }
0x1bf4   :  { %42642 = vmatpush3.bf16.msra.mxu0 %v46631_v14 }
0x1bf5   :  { %42644 = vmatprep.subr.bf16.mxu0 %v42643_v29 }
0x1c46   :  { %v25147_v44 = vpop.f32.mrb[56].mxu1 }
0x1c47   :  { %26963 = vrot.lane.b32.xlu0 %v25147_v44, %s44096_s26  ;;  %v41158_v49 = vpop.f32.mrb[57].mxu1  ;;  %v42655_v44 = vpack.c.bf16 %v27111_v59, %v27104_v18 }
0x1c48   :  { %v42667_v49 = vpack.c.bf16 %v27098_v46, %v27091_v23 }
0x1c4a   :  { %v24695_v16 = vpop.f32.mrb[46].mxu0 }
0x1c4b   :  { %v41128_v17 = vpop.f32.mrb[47].mxu0  ;;  %26961 = vrot.lane.b32.xlu1 %v24695_v16, %s44096_s26  ;;  %v42671_v16 = vpack.c.bf16 %v27112_v4, %v27105_v41 }
0x1c83   :  { %v26051_v36 = vpop.f32.mrb[58].mxu1 }
0x1c84   :  { %26971 = vrot.lane.b32.xlu0 %v26051_v36, %s44108_s22  ;;  %v41218_v24 = vpop.f32.mrb[59].mxu1 }
0x1c87   :  { %v25599_v27 = vpop.f32.mrb[48].mxu0 }
0x1c88   :  { %26969 = vrot.lane.b32.xlu1 %v25599_v27, %s44108_s22  ;;  %v41188_v12 = vpop.f32.mrb[49].mxu0 }
0x1cb9   :  { %v26964_v17 = vpop.permute.xlu0 %26963 }
0x1cba   :  { %v26984_v27 = vsel %vm725_vm2, %v24243_v7, %v26964_v17 }
0x1cbd   :  { %v26962_v36 = vpop.permute.xlu1 %26961 }
0x1cbe   :  { %v26955_v31 = vpop.f32.mrb[60].mxu1  ;;  %v26983_v47 = vsel %vm725_vm2, %v46603_v53, %v26962_v36  ;;  %v46656_v53 = vld [vmem:[#allocation10 + $0x10] sm:$0xff] }
0x1cbf   :  { %26979 = vrot.lane.b32.xlu0 %v26955_v31, %s44109_s21  ;;  %v41278_v10 = vpop.f32.mrb[61].mxu1  ;;  %v26992_v32 = vrot.slane %v46656_v53, %v44997_v48 }
0x1cc2   :  { %v26503_v8 = vpop.f32.mrb[50].mxu0 }
0x1cc3   :  { %26977 = vrot.lane.b32.xlu1 %v26503_v8, %s44109_s21  ;;  %v41248_v60 = vpop.f32.mrb[51].mxu0 }
0x1cf6   :  { %v26972_v24 = vpop.permute.xlu0 %26971 }
0x1cf7   :  { %v26986_v12 = vsel %vm8088_vm5, %v26984_v27, %v26972_v24 }
0x1cfa   :  { %v26970_v21 = vpop.permute.xlu1 %26969 }
0x1cfb   :  { %v26985_v25 = vsel %vm8088_vm5, %v26983_v47, %v26970_v21 }
0x1d31   :  { %v26980_v57 = vpop.permute.xlu0 %26979 }
0x1d32   :  { %v26988_v42 = vsel %vm8091_vm6, %v26986_v12, %v26980_v57 }
0x1d33   :  { %v26997_v30 = vsel %vm116_vm0, %v26988_v42, 0 }
0x1d34   :  { %v27078_v2 = vand.u32 4294901760, %v26997_v30 }
0x1d35   :  { %v26978_v0 = vpop.permute.xlu1 %26977 }
0x1d36   :  { %v27079_v43 = vsub.f32 %v26997_v30, %v27078_v2  ;;  %v26987_v22 = vsel %vm8091_vm6, %v26985_v25, %v26978_v0 }
0x1d37   :  { %v26994_v7 = vsel %vm116_vm0, %v26987_v22, 0 }
0x1d38   :  { %v27068_v23 = vand.u32 4294901760, %v26994_v7  ;;  %v27080_v31 = vand.u32 4294901760, %v27079_v43 }
0x1d3a   :  { %v27069_v46 = vsub.f32 %v26994_v7, %v27068_v23  ;;  %v27081_v20 = vsub.f32 %v27079_v43, %v27080_v31 }
0x1d3c   :  { %v27070_v10 = vand.u32 4294901760, %v27069_v46  ;;  %v27082_v37 = vand.u32 4294901760, %v27081_v20 }
0x1d3e   :  { %v27071_v18 = vsub.f32 %v27069_v46, %v27070_v10 }
0x1d40   :  { %v27072_v59 = vand.u32 4294901760, %v27071_v18 }
0x1d42   :  { %41287 = vmatprep.mubr.f32.mxu0 %v27072_v59 }
0x1d43   :  { %41288 = vmatmul.mubr.f32.vlgmr.msra.gmra.mrb[52].mxu0 %v27082_v37 }
0x1d44   :  { %42646 = vmatpush3.bf16.msra.mxu0 %v42643_v29  ;;  %41298 = vmatprep.mubr.f32.mxu0 %v27068_v23  ;;  %v28113_v29 = vld [vmem:[#allocation7 + $0x30] sm:$0xff] }
0x1d45   :  { %42648 = vmatprep.subr.bf16.mxu0 %v42647_v15 }
0x1d48   :  { %42650 = vmatpush3.bf16.msra.mxu0 %v42647_v15  ;;  %v28114_v15 = vld [vmem:[#allocation7 + $0x38] sm:$0xff] }
0x1d49   :  { %42652 = vmatprep.subr.bf16.mxu0 %v42651_v33 }
0x1d4b   :  { %41299 = vmatmul.mubr.f32.vlgmr.msra.gmra.mrb[52].mxu0 %v27078_v2 }
0x1d4c   :  { %42654 = vmatpush3.bf16.msra.mxu0 %v42651_v33  ;;  %41309 = vmatprep.mubr.f32.mxu0 %v27069_v46  ;;  %v28122_v33 = vand.u32 4294901760, %v28113_v29 }
0x1d4d   :  { %42656 = vmatprep.subr.bf16.mxu0 %v42655_v44 }
0x1d4e   :  { %v28220_v17 = vsub.f32 %v28113_v29, %v28122_v33 }
0x1d50   :  { %42658 = vmatpush3.bf16.msra.mxu0 %v42655_v44  ;;  %v28125_v44 = vand.u32 4294901760, %v28114_v15  ;;  %v28221_v12 = vand.u32 4294901760, %v28220_v17 }
0x1d51   :  { %42660 = vmatprep.subr.bf16.mxu0 %v46628_v55 }
0x1d52   :  { %v28227_v36 = vsub.f32 %v28114_v15, %v28125_v44  ;;  %v28222_v30 = vsub.f32 %v28220_v17, %v28221_v12 }
0x1d53   :  { %41310 = vmatmul.mubr.f32.vlgmr.msra.gmra.mrb[52].mxu0 %v27079_v43 }
0x1d54   :  { %42662 = vmatpush3.bf16.msra.mxu0 %v46628_v55  ;;  %41320 = vmatprep.mubr.f32.mxu0 %v27070_v10  ;;  %v28228_v21 = vand.u32 4294901760, %v28227_v36  ;;  %v28223_v0 = vand.u32 4294901760, %v28222_v30 }
0x1d55   :  { %42664 = vmatprep.subr.bf16.mxu0 %v46631_v14 }
0x1d56   :  { %v28229_v47 = vsub.f32 %v28227_v36, %v28228_v21 }
0x1d58   :  { %42666 = vmatpush3.bf16.msra.mxu0 %v46631_v14  ;;  %v28230_v43 = vand.u32 4294901760, %v28229_v47 }
0x1d59   :  { %42668 = vmatprep.subr.bf16.mxu0 %v42667_v49 }
0x1d5a   :  { %v42743_v7 = vpack.c.bf16 %v28230_v43, %v28223_v0 }
0x1d5b   :  { %41321 = vmatmul.mubr.f32.vlgmr.msra.gmra.mrb[52].mxu0 %v27080_v31 }
0x1d5c   :  { %42670 = vmatpush3.bf16.msra.mxu0 %v42667_v49  ;;  %41331 = vmatprep.mubr.f32.mxu0 %v27068_v23 }
0x1d5d   :  { %42672 = vmatprep.subr.bf16.mxu0 %v42671_v16 }
0x1d60   :  { %42674 = vmatpush3.bf16.msra.mxu0 %v42671_v16 }
0x1d61   :  { %42676 = vmatprep.subr.bf16.mxu0 %v46628_v55 }
0x1d63   :  { %41332 = vmatmul.mubr.f32.vlgmr.msra.gmra.mrb[52].mxu0 %v27078_v2 }
0x1d64   :  { %42678 = vmatpush3.bf16.msra.mxu0 %v46628_v55  ;;  %41342 = vmatprep.mubr.f32.mxu0 %v27068_v23 }
0x1d65   :  { %42680 = vmatprep.subr.bf16.mxu0 %v46631_v14 }
0x1d68   :  { %42682 = vmatpush3.bf16.msra.mxu0 %v46631_v14 }
0x1d6b   :  { %41343 = vmatmul.mubr.f32.vlgmr.msra.gmra.mrb[52].mxu0 %v27078_v2 }
0x1d6c   :  { %41419 = vmatprep.mubr.f32.mxu0 %v45049_v50  ;;  %v28111_v50 = vld [vmem:[#allocation7 + $0x20] sm:$0xff] }
0x1d6d   :  { %v28116_v40 = vand.u32 4294901760, %v28111_v50 }
0x1d6f   :  { %v46664_v49 = vpack.c.bf16 %v28119_v26, %v28116_v40  ;;  %v28206_v16 = vsub.f32 %v28111_v50, %v28116_v40  ;;  %v27571_v50 = vld [vmem:[#allocation5 + $0x38] sm:$0xff] }
0x1d70   :  { %v27592_v29 = vand.u32 4294901760, %v27571_v50 }
0x1d71   :  { %42732 = vmatprep.subr.bf16.mxu0 %v46664_v49  ;;  %v28207_v24 = vand.u32 4294901760, %v28206_v16 }
0x1d72   :  { %42734 = vmatpush3.bf16.msra.mxu0 %v46664_v49 }
0x1d73   :  { %v28208_v57 = vsub.f32 %v28206_v16, %v28207_v24 }
0x1d75   :  { %v28209_v2 = vand.u32 4294901760, %v28208_v57 }
0x1e3e   :  { %v41344_v41 = vpop.f32.mrb[52].mxu0 }
0x1e3f   :  { %v42983_v4 = vadd.f32 %v41344_v41, %v26992_v32  ;;  %v27517_v8 = vpop.f32.mrb[53].mxu0  ;;  %v42751_v41 = vpack.c.bf16 %v28227_v36, %v28220_v17 }
0x1e40   :  { %v42984_v3 = vadd.f32 %v27517_v8, %v26992_v32  ;;  %v27568_v8 = vld [vmem:[#allocation5 + $0x20] sm:$0xff] }
0x1e41   :  { %v27528_v60 = vadd.f32 %v42983_v4, %v45985_v19  ;;  %v28213_v19 = vsub.f32 %v28112_v54, %v28119_v26 }
0x1e42   :  { %v27527_v55 = vadd.f32 %v42984_v3, %v45987_v1  ;;  %v46666_v1 = vpack.c.bf16 %v28125_v44, %v28122_v33  ;;  %v27569_v3 = vld [vmem:[#allocation5 + $0x28] sm:$0xff] }
0x1e43   :  { %v27532_v61 = vsel %vm116_vm0, %v27528_v60, 0.0  ;;  %v28214_v27 = vand.u32 4294901760, %v28213_v19 }
0x1e44   :  { %27533 = vadd.xlane.f32.xlu0 %v27532_v61  ;;  %v27529_v14 = vsel %vm116_vm0, %v27527_v55, 0.0  ;;  %42736 = vmatprep.subr.bf16.mxu0 %v46666_v1  ;;  %v27583_v61 = vand.u32 4294901760, %v27568_v8 }
0x1e45   :  { %27530 = vadd.xlane.f32.xlu1 %v27529_v14  ;;  %v28215_v42 = vsub.f32 %v28213_v19, %v28214_v27  ;;  %42738 = vmatpush3.bf16.msra.mxu0 %v46666_v1  ;;  %v42763_v4 = vpack.c.bf16 %v28214_v27, %v28207_v24  ;;  %v27586_v14 = vand.u32 4294901760, %v27569_v3 }
0x1e46   :  { %v27673_v40 = vsub.f32 %v27568_v8, %v27583_v61 }
0x1e47   :  { %v28216_v25 = vand.u32 4294901760, %v28215_v42  ;;  %v27680_v26 = vsub.f32 %v27569_v3, %v27586_v14 }
0x1e48   :  { %41420 = vmatmul.mubr.f32.vlgmr.msra.gmra.mrb[54].mxu0 %v45051_v52 }
0x1e49   :  { %v42739_v22 = vpack.c.bf16 %v28216_v25, %v28209_v2  ;;  %41430 = vmatprep.mubr.f32.mxu0 %v45015_v9  ;;  %v27681_v15 = vand.u32 4294901760, %v27680_v26  ;;  %v42699_v30 = vpack.c.bf16 %v27680_v26, %v27673_v40 }
0x1e4b   :  { %42740 = vmatprep.subr.bf16.mxu0 %v42739_v22  ;;  %v27682_v44 = vsub.f32 %v27680_v26, %v27681_v15 }
0x1e4c   :  { %42742 = vmatpush3.bf16.msra.mxu0 %v42739_v22 }
0x1e4d   :  { %42744 = vmatprep.subr.bf16.mxu0 %v42743_v7  ;;  %v27683_v36 = vand.u32 4294901760, %v27682_v44  ;;  %v27575_v44 = vrot.slane %v46656_v53, %v45137_v58 }
0x1e50   :  { %42746 = vmatpush3.bf16.msra.mxu0 %v42743_v7 }
0x1e53   :  { %41431 = vmatmul.mubr.f32.vlgmr.msra.gmra.mrb[54].mxu0 %v45017_v28 }
0x1e54   :  { %41441 = vmatprep.mubr.f32.mxu0 %v45027_v34  ;;  %v42747_v34 = vpack.c.bf16 %v28213_v19, %v28206_v16  ;;  %v27694_v19 = vsub.f32 %v27571_v50, %v27592_v29 }
0x1e56   :  { %42748 = vmatprep.subr.bf16.mxu0 %v42747_v34  ;;  %v27695_v27 = vand.u32 4294901760, %v27694_v19 }
0x1e57   :  { %42750 = vmatpush3.bf16.msra.mxu0 %v42747_v34 }
0x1e58   :  { %42752 = vmatprep.subr.bf16.mxu0 %v42751_v41  ;;  %v27696_v57 = vsub.f32 %v27694_v19, %v27695_v27 }
0x1e5b   :  { %42754 = vmatpush3.bf16.msra.mxu0 %v42751_v41 }
0x1e5c   :  { %42756 = vmatprep.subr.bf16.mxu0 %v46664_v49 }
0x1e5e   :  { %41442 = vmatmul.mubr.f32.vlgmr.msra.gmra.mrb[54].mxu0 %v45030_v35  ;;  %v46693_v35 = vpack.c.bf16 %v27586_v14, %v27583_v61 }
0x1e5f   :  { %42758 = vmatpush3.bf16.msra.mxu0 %v46664_v49  ;;  %41452 = vmatprep.mubr.f32.mxu0 %v45037_v38 }
0x1e60   :  { %42760 = vmatprep.subr.bf16.mxu0 %v46666_v1  ;;  %42684 = vmatprep.subr.bf16.mxu1 %v46693_v35 }
0x1e61   :  { %42686 = vmatpush3.bf16.msra.mxu1 %v46693_v35 }
0x1e63   :  { %42762 = vmatpush3.bf16.msra.mxu0 %v46666_v1 }
0x1e64   :  { %42764 = vmatprep.subr.bf16.mxu0 %v42763_v4 }
0x1e66   :  { %41453 = vmatmul.mubr.f32.vlgmr.msra.gmra.mrb[54].mxu0 %v45040_v39  ;;  %v27674_v39 = vand.u32 4294901760, %v27673_v40 }
0x1e67   :  { %42766 = vmatpush3.bf16.msra.mxu0 %v42763_v4  ;;  %41463 = vmatprep.mubr.f32.mxu0 %v45015_v9 }
0x1e68   :  { %v27675_v33 = vsub.f32 %v27673_v40, %v27674_v39  ;;  %v42715_v2 = vpack.c.bf16 %v27681_v15, %v27674_v39  ;;  %v28646_v40 = vrot.slane %v46656_v53, %v45124_v45 }
0x1e6a   :  { %v27676_v17 = vand.u32 4294901760, %v27675_v33 }
0x1ed1   :  { %v27534_v23 = vpop.xlane.xlu0 %27533 }
0x1ed2   :  { %v27536_v31 = vmul.f32 0.03125, %v27534_v23  ;;  %v27531_v46 = vpop.xlane.xlu1 %27530 }
0x1ed3   :  { %v27535_v10 = vmul.f32 0.03125, %v27531_v46 }
0x1ed4   :  { %v46676_v20 = vsub.f32 %v27528_v60, %v27536_v31  ;;  %v27570_v60 = vld [vmem:[#allocation5 + $0x30] sm:$0xff]  ;;  %v19010_v31 = vld [vmem:[#allocation10 + $0x18] sm:$0xff] }
0x1ed5   :  { %v46678_v18 = vsub.f32 %v27527_v55, %v27535_v10  ;;  %v42767_v55 = vpack.c.bf16 %v28228_v21, %v28221_v12  ;;  %v27589_v54 = vand.u32 4294901760, %v27570_v60  ;;  %v42691_v12 = vpack.c.bf16 %v27683_v36, %v27676_v17 }
0x1ed6   :  { %v27540_v52 = vmul.f32 %v46676_v20, %v46676_v20 }
0x1ed7   :  { %v27539_v59 = vmul.f32 %v46678_v18, %v46678_v18  ;;  %v46696_v38 = vpack.c.bf16 %v27592_v29, %v27589_v54  ;;  %42768 = vmatprep.subr.bf16.mxu0 %v42767_v55  ;;  %v27687_v16 = vsub.f32 %v27570_v60, %v27589_v54 }
0x1ed8   :  { %v27544_v37 = vsel %vm116_vm0, %v27540_v52, 0.0  ;;  %42770 = vmatpush3.bf16.msra.mxu0 %v42767_v55 }
0x1ed9   :  { %27545 = vadd.xlane.f32.xlu1 %v27544_v37  ;;  %v27541_v32 = vsel %vm116_vm0, %v27539_v59, 0.0  ;;  %42688 = vmatprep.subr.bf16.mxu1 %v46696_v38  ;;  %v27688_v24 = vand.u32 4294901760, %v27687_v16  ;;  %v42703_v47 = vpack.c.bf16 %v27694_v19, %v27687_v16  ;;  %v27564_v59 = vrot.slane %v19010_v31, %v44327_v56 }
0x1eda   :  { %27542 = vadd.xlane.f32.xlu0 %v27541_v32  ;;  %42772 = vmatprep.subr.bf16.mxu0 %v46664_v49 }
0x1edb   :  { %42690 = vmatpush3.bf16.msra.mxu1 %v46696_v38  ;;  %41464 = vmatmul.mubr.f32.vlgmr.msra.gmra.mrb[54].mxu0 %v45017_v28  ;;  %v27689_v21 = vsub.f32 %v27687_v16, %v27688_v24  ;;  %v42719_v25 = vpack.c.bf16 %v27695_v27, %v27688_v24 }
0x1edc   :  { %42774 = vmatpush3.bf16.msra.mxu0 %v46664_v49  ;;  %41474 = vmatprep.mubr.f32.mxu0 %v45015_v9  ;;  %v27697_v49 = vand.u32 4294901760, %v27696_v57 }
0x1edd   :  { %42776 = vmatprep.subr.bf16.mxu0 %v46666_v1  ;;  %42692 = vmatprep.subr.bf16.mxu1 %v42691_v12  ;;  %v27690_v9 = vand.u32 4294901760, %v27689_v21 }
0x1edf   :  { %v42695_v42 = vpack.c.bf16 %v27697_v49, %v27690_v9 }
0x1ee0   :  { %42778 = vmatpush3.bf16.msra.mxu0 %v46666_v1 }
0x1ee1   :  { %41537 = vmatprep.subr.mxu0 %v44101_v51 }
0x1ee3   :  { %41475 = vmatmul.mubr.f32.vlgmr.msra.gmra.mrb[54].mxu0 %v45017_v28  ;;  %v27558_v28 = vrot.slane %v46656_v53, %v45097_v62 }
0x1ee4   :  { %41539 = vmatprep.mubr.msk.f32.mxu0 %vm44102_vm1, %v44101_v51 }
0x1f66   :  { %v27546_v0 = vpop.xlane.xlu1 %27545 }
0x1f67   :  { %v27548_v1 = vmul.f32 0.03125, %v27546_v0  ;;  %v27543_v43 = vpop.xlane.xlu0 %27542 }
0x1f68   :  { %v27547_v22 = vmul.f32 0.03125, %v27543_v43 }
0x1f69   :  { %v27550_v7 = vadd.f32 1e-05, %v27548_v1 }
0x1f6a   :  { %v27549_v23 = vadd.f32 1e-05, %v27547_v22 }
0x1f6b   :  { %43897 = vrsqrt.f32 %v27550_v7 }
0x1f6c   :  { %43899 = vrsqrt.f32 %v27549_v23 }
0x1f75   :  { %v43898_v46 = vpop.eup %43897 }
0x1f76   :  { %v43900_v10 = vpop.eup %43899  ;;  %v27554_v52 = vmul.f32 %v43898_v46, %v46676_v20 }
0x1f77   :  { %v27553_v37 = vmul.f32 %v43900_v10, %v46678_v18 }
0x1f78   :  { %v27560_v32 = vmul.f32 %v27558_v28, %v27554_v52 }
0x1f79   :  { %v27559_v34 = vmul.f32 %v27558_v28, %v27553_v37 }
0x1f7a   :  { %v46717_v41 = vadd.f32 %v27564_v59, %v27560_v32 }
0x1f7b   :  { %v46719_v4 = vadd.f32 %v27564_v59, %v27559_v34 }
0x1f7c   :  { %v27580_v8 = vsel %vm116_vm0, %v46717_v41, 0 }
0x1f7d   :  { %v27577_v3 = vsel %vm116_vm0, %v46719_v4, 0  ;;  %v27661_v60 = vand.u32 4294901760, %v27580_v8 }
0x1f7e   :  { %v27651_v55 = vand.u32 4294901760, %v27577_v3 }
0x1f7f   :  { %v27662_v61 = vsub.f32 %v27580_v8, %v27661_v60 }
0x1f80   :  { %v27652_v20 = vsub.f32 %v27577_v3, %v27651_v55 }
0x1f81   :  { %v27663_v14 = vand.u32 4294901760, %v27662_v61 }
0x1f82   :  { %v27653_v56 = vand.u32 4294901760, %v27652_v20 }
0x1f83   :  { %v27664_v50 = vsub.f32 %v27662_v61, %v27663_v14 }
0x1f84   :  { %v27654_v18 = vsub.f32 %v27652_v20, %v27653_v56 }
0x1f85   :  { %v27665_v29 = vand.u32 4294901760, %v27664_v50 }
0x1f86   :  { %v27655_v54 = vand.u32 4294901760, %v27654_v18 }
0x1f88   :  { %41353 = vmatprep.mubr.f32.mxu1 %v27655_v54 }
0x1f89   :  { %41354 = vmatmul.mubr.f32.vlgmr.msra.gmra.mrb[62].mxu1 %v27665_v29 }
0x1f8a   :  { %42694 = vmatpush3.bf16.msra.mxu1 %v42691_v12  ;;  %41364 = vmatprep.mubr.f32.mxu1 %v27651_v55 }
0x1f8b   :  { %42696 = vmatprep.subr.bf16.mxu1 %v42695_v42 }
0x1f8e   :  { %42698 = vmatpush3.bf16.msra.mxu1 %v42695_v42 }
0x1f8f   :  { %42700 = vmatprep.subr.bf16.mxu1 %v42699_v30 }
0x1f91   :  { %41365 = vmatmul.mubr.f32.vlgmr.msra.gmra.mrb[62].mxu1 %v27661_v60 }
0x1f92   :  { %42702 = vmatpush3.bf16.msra.mxu1 %v42699_v30  ;;  %41375 = vmatprep.mubr.f32.mxu1 %v27652_v20 }
0x1f93   :  { %42704 = vmatprep.subr.bf16.mxu1 %v42703_v47 }
0x1f96   :  { %42706 = vmatpush3.bf16.msra.mxu1 %v42703_v47 }
0x1f97   :  { %42708 = vmatprep.subr.bf16.mxu1 %v46693_v35 }
0x1f99   :  { %41376 = vmatmul.mubr.f32.vlgmr.msra.gmra.mrb[62].mxu1 %v27662_v61 }
0x1f9a   :  { %42710 = vmatpush3.bf16.msra.mxu1 %v46693_v35  ;;  %41386 = vmatprep.mubr.f32.mxu1 %v27653_v56 }
0x1f9b   :  { %42712 = vmatprep.subr.bf16.mxu1 %v46696_v38 }
0x1f9e   :  { %42714 = vmatpush3.bf16.msra.mxu1 %v46696_v38 }
0x1f9f   :  { %42716 = vmatprep.subr.bf16.mxu1 %v42715_v2 }
0x1fa1   :  { %41387 = vmatmul.mubr.f32.vlgmr.msra.gmra.mrb[62].mxu1 %v27663_v14 }
0x1fa2   :  { %42718 = vmatpush3.bf16.msra.mxu1 %v42715_v2  ;;  %41397 = vmatprep.mubr.f32.mxu1 %v27651_v55  ;;  %v28652_v2 = vrot.slane %v46656_v53, %v45157_v13 }
0x1fa3   :  { %42720 = vmatprep.subr.bf16.mxu1 %v42719_v25 }
0x1fa6   :  { %42722 = vmatpush3.bf16.msra.mxu1 %v42719_v25 }
0x1fa7   :  { %42724 = vmatprep.subr.bf16.mxu1 %v46693_v35 }
0x1fa9   :  { %41398 = vmatmul.mubr.f32.vlgmr.msra.gmra.mrb[62].mxu1 %v27661_v60 }
0x1faa   :  { %42726 = vmatpush3.bf16.msra.mxu1 %v46693_v35  ;;  %41408 = vmatprep.mubr.f32.mxu1 %v27651_v55 }
0x1fab   :  { %42728 = vmatprep.subr.bf16.mxu1 %v46696_v38 }
0x1fae   :  { %42730 = vmatpush3.bf16.msra.mxu1 %v46696_v38 }
0x1faf   :  { %41477 = vmatprep.subr.mxu1 %v44101_v51 }
0x1fb1   :  { %41409 = vmatmul.mubr.f32.vlgmr.msra.gmra.mrb[62].mxu1 %v27661_v60 }
0x1fb2   :  { %41479 = vmatprep.mubr.msk.f32.mxu1 %vm44102_vm1, %v44101_v51 }
0x1fb6   :  { %v46738_v26 = vpop.f32.mrb[54].mxu0 }
0x1fb7   :  { %v28648_v39 = vadd.f32 %v46738_v26, %v28646_v40  ;;  %v46741_v15 = vpop.f32.mrb[55].mxu0 }
0x1fb8   :  { %v28647_v35 = vadd.f32 %v28646_v40, %v46741_v15 }
0x1fb9   :  { %v29158_v0 = vsel %vm725_vm2, %v28648_v39, 0 }
0x1fba   :  { %v28708_v33 = vsel %vm725_vm2, %v28647_v35, 0  ;;  %v29161_v1 = vand.u32 4294901760, %v29158_v0 }
0x1fbb   :  { %v28711_v38 = vand.u32 4294901760, %v28708_v33 }
0x1fbc   :  { %v29238_v22 = vsub.f32 %v29158_v0, %v29161_v1 }
0x1fbd   :  { %41478 = vmatpush3.xpose.msra.mxu1 %v28711_v38  ;;  %v28788_v36 = vsub.f32 %v28708_v33, %v28711_v38 }
0x1fbe   :  { %41482 = vmatprep.subr.mxu1 %v44101_v51  ;;  %v29239_v23 = vand.u32 4294901760, %v29238_v22 }
0x1fbf   :  { %v28789_v21 = vand.u32 4294901760, %v28788_v36 }
0x1fc0   :  { %v29240_v28 = vsub.f32 %v29238_v22, %v29239_v23 }
0x1fc1   :  { %v28790_v49 = vsub.f32 %v28788_v36, %v28789_v21 }
0x1fc2   :  { %v29241_v10 = vand.u32 4294901760, %v29240_v28 }
0x1fc3   :  { %v28791_v47 = vand.u32 4294901760, %v28790_v49 }
0x2084   :  { %v41410_v16 = vpop.f32.mrb[62].mxu1 }
0x2085   :  { %v42985_v19 = vadd.f32 %v41410_v16, %v27575_v44  ;;  %v28100_v17 = vpop.f32.mrb[63].mxu1 }
0x2086   :  { %v42986_v24 = vadd.f32 %v28100_v17, %v27575_v44 }
0x2087   :  { %28668 = vrot.lane.b32.xlu1 %v42985_v19, %s44103_s27  ;;  %v29156_v25 = vsel %vm725_vm2, %v42985_v19, 0 }
0x2088   :  { %v28706_v27 = vsel %vm725_vm2, %v42986_v24, 0  ;;  %28666 = vrot.lane.b32.xlu0 %v42986_v24, %s44103_s27  ;;  %v29226_v53 = vand.u32 4294901760, %v29156_v25 }
0x2089   :  { %v28776_v12 = vand.u32 4294901760, %v28706_v27 }
0x208a   :  { %v29227_v43 = vsub.f32 %v29156_v25, %v29226_v53 }
0x208b   :  { %v28777_v57 = vsub.f32 %v28706_v27, %v28776_v12  ;;  %28680 = vrot.lane.b32.xlu1 %v28647_v35, %s44103_s27 }
0x208c   :  { %28682 = vrot.lane.b32.xlu0 %v28648_v39, %s44103_s27  ;;  %v29228_v7 = vand.u32 4294901760, %v29227_v43 }
0x208d   :  { %v28778_v9 = vand.u32 4294901760, %v28777_v57 }
0x208e   :  { %v29229_v31 = vsub.f32 %v29227_v43, %v29228_v7 }
0x208f   :  { %28670 = vrot.lane.b32.xlu1 %v42986_v24, %s44105_s29  ;;  %v28779_v42 = vsub.f32 %v28777_v57, %v28778_v9 }
0x2090   :  { %28672 = vrot.lane.b32.xlu0 %v42985_v19, %s44105_s29  ;;  %v29230_v46 = vand.u32 4294901760, %v29229_v31 }
0x2091   :  { %v28780_v30 = vand.u32 4294901760, %v28779_v42 }
0x2093   :  { %28684 = vrot.lane.b32.xlu1 %v28647_v35, %s44105_s29  ;;  %41480 = vmatmul.mubr.f32.vlgmr.msra.gmra.mrb[64].mxu1 %v28780_v30 }
0x2094   :  { %41483 = vmatpush3.xpose.msra.mxu1 %v28791_v47  ;;  %28686 = vrot.lane.b32.xlu0 %v28648_v39, %s44105_s29 }
0x2095   :  { %41484 = vmatprep.mubr.msk.f32.mxu1 %vm44102_vm1, %v44101_v51  ;;  %41487 = vmatprep.subr.mxu1 %v44101_v51 }
0x2097   :  { %28674 = vrot.lane.b32.xlu1 %v42986_v24, %s44106_s30 }
0x2098   :  { %28676 = vrot.lane.b32.xlu0 %v42985_v19, %s44106_s30 }
0x209b   :  { %28688 = vrot.lane.b32.xlu1 %v28647_v35, %s44106_s30  ;;  %41485 = vmatmul.mubr.f32.vlgmr.msra.gmra.mrb[64].mxu1 %v28776_v12 }
0x209c   :  { %41488 = vmatpush3.xpose.msra.mxu1 %v28788_v36  ;;  %28690 = vrot.lane.b32.xlu0 %v28648_v39, %s44106_s30 }
0x209d   :  { %41489 = vmatprep.mubr.msk.f32.mxu1 %vm44102_vm1, %v44101_v51  ;;  %41492 = vmatprep.subr.mxu1 %v44101_v51 }
0x20a0   :  { %28654 = vrot.lane.b32.xlu0 %v28652_v2, %s44100_s24 }
0x20a3   :  { %41490 = vmatmul.mubr.f32.vlgmr.msra.gmra.mrb[64].mxu1 %v28777_v57 }
0x20a4   :  { %41493 = vmatpush3.xpose.msra.mxu1 %v28711_v38  ;;  %41494 = vmatprep.mubr.msk.f32.mxu1 %vm44102_vm1, %v44101_v51 }
0x20a5   :  { %41497 = vmatprep.subr.mxu1 %v44101_v51 }
0x20ab   :  { %41495 = vmatmul.mubr.f32.vlgmr.msra.gmra.mrb[64].mxu1 %v28778_v9 }
0x20ac   :  { %41498 = vmatpush3.xpose.msra.mxu1 %v28789_v21  ;;  %41499 = vmatprep.mubr.msk.f32.mxu1 %vm44102_vm1, %v44101_v51 }
0x20ad   :  { %41502 = vmatprep.subr.mxu1 %v44101_v51 }
0x20b3   :  { %41500 = vmatmul.mubr.f32.vlgmr.msra.gmra.mrb[64].mxu1 %v28776_v12 }
0x20b4   :  { %41503 = vmatpush3.xpose.msra.mxu1 %v28711_v38  ;;  %41504 = vmatprep.mubr.msk.f32.mxu1 %vm44102_vm1, %v44101_v51 }
0x20b5   :  { %41507 = vmatprep.subr.mxu1 %v44101_v51 }
0x20bb   :  { %41505 = vmatmul.mubr.f32.vlgmr.msra.gmra.mrb[64].mxu1 %v28776_v12 }
0x20bc   :  { %41508 = vmatpush3.xpose.msra.mxu1 %v29161_v1  ;;  %41509 = vmatprep.mubr.msk.f32.mxu1 %vm44102_vm1, %v44101_v51 }
0x20bd   :  { %41512 = vmatprep.subr.mxu1 %v44101_v51 }
0x20bf   :  { %41510 = vmatmul.mubr.f32.vlgmr.msra.gmra.mrb[66].mxu1 %v29230_v46 }
0x20c0   :  { %41513 = vmatpush3.xpose.msra.mxu1 %v29241_v10  ;;  %41514 = vmatprep.mubr.msk.f32.mxu1 %vm44102_vm1, %v44101_v51 }
0x20c1   :  { %41517 = vmatprep.subr.mxu1 %v44101_v51 }
0x20c7   :  { %41515 = vmatmul.mubr.f32.vlgmr.msra.gmra.mrb[66].mxu1 %v29226_v53 }
0x20c8   :  { %41518 = vmatpush3.xpose.msra.mxu1 %v29238_v22  ;;  %41519 = vmatprep.mubr.msk.f32.mxu1 %vm44102_vm1, %v44101_v51 }
0x20c9   :  { %41522 = vmatprep.subr.mxu1 %v44101_v51 }
0x20cf   :  { %41520 = vmatmul.mubr.f32.vlgmr.msra.gmra.mrb[66].mxu1 %v29227_v43 }
0x20d0   :  { %41523 = vmatpush3.xpose.msra.mxu1 %v29161_v1  ;;  %41524 = vmatprep.mubr.msk.f32.mxu1 %vm44102_vm1, %v44101_v51 }
0x20d1   :  { %41527 = vmatprep.subr.mxu1 %v44101_v51 }
0x20d7   :  { %41525 = vmatmul.mubr.f32.vlgmr.msra.gmra.mrb[66].mxu1 %v29228_v7 }
0x20d8   :  { %41528 = vmatpush3.xpose.msra.mxu1 %v29239_v23  ;;  %41529 = vmatprep.mubr.msk.f32.mxu1 %vm44102_vm1, %v44101_v51 }
0x20d9   :  { %41532 = vmatprep.subr.mxu1 %v44101_v51 }
0x20df   :  { %41530 = vmatmul.mubr.f32.vlgmr.msra.gmra.mrb[66].mxu1 %v29226_v53 }
0x20e0   :  { %41533 = vmatpush3.xpose.msra.mxu1 %v29161_v1  ;;  %41534 = vmatprep.mubr.msk.f32.mxu1 %vm44102_vm1, %v44101_v51 }
0x20e1   :  { %41567 = vmatprep.subr.mxu1 %v44101_v51 }
0x20e7   :  { %41535 = vmatmul.mubr.f32.vlgmr.msra.gmra.mrb[66].mxu1 %v29226_v53 }
0x20e8   :  { %41569 = vmatprep.mubr.msk.f32.mxu1 %vm44102_vm1, %v44101_v51 }
0x20f9   :  { %v28669_v52 = vpop.permute.xlu1 %28668 }
0x20fa   :  { %v30056_v59 = vsel %vm725_vm2, %v28669_v52, 0  ;;  %v28667_v37 = vpop.permute.xlu0 %28666 }
0x20fb   :  { %v46802_v32 = vand.u32 4294901760, %v30056_v59  ;;  %v29606_v34 = vsel %vm725_vm2, %v28667_v37, 0 }
0x20fc   :  { %v46805_v8 = vand.u32 4294901760, %v29606_v34 }
0x20fd   :  { %v46808_v3 = vsub.f32 %v30056_v59, %v46802_v32  ;;  %v28681_v60 = vpop.permute.xlu1 %28680 }
0x20fe   :  { %v46811_v55 = vsub.f32 %v29606_v34, %v46805_v8  ;;  %v29608_v61 = vsel %vm725_vm2, %v28681_v60, 0  ;;  %v28683_v20 = vpop.permute.xlu0 %28682 }
0x20ff   :  { %v30128_v14 = vand.u32 4294901760, %v46808_v3  ;;  %v46815_v56 = vand.u32 4294901760, %v29608_v61  ;;  %v30058_v50 = vsel %vm725_vm2, %v28683_v20, 0 }
0x2100   :  { %v29678_v18 = vand.u32 4294901760, %v46811_v55  ;;  %v46819_v54 = vand.u32 4294901760, %v30058_v50 }
0x2101   :  { %v30129_v29 = vsub.f32 %v46808_v3, %v30128_v14  ;;  %v29688_v40 = vsub.f32 %v29608_v61, %v46815_v56  ;;  %41538 = vmatpush3.xpose.msra.mxu0 %v46815_v56  ;;  %v28671_v30 = vpop.permute.xlu1 %28670 }
0x2102   :  { %v29679_v39 = vsub.f32 %v46811_v55, %v29678_v18  ;;  %v30138_v35 = vsub.f32 %v30058_v50, %v46819_v54  ;;  %v28673_v33 = vpop.permute.xlu0 %28672  ;;  %41568 = vmatpush3.xpose.msra.mxu1 %v46819_v54  ;;  %41542 = vmatprep.subr.mxu0 %v44101_v51 }
0x2103   :  { %v30130_v38 = vand.u32 4294901760, %v30129_v29  ;;  %v29689_v44 = vand.u32 4294901760, %v29688_v40  ;;  %41572 = vmatprep.subr.mxu1 %v44101_v51  ;;  %v30956_v47 = vsel %vm725_vm2, %v28673_v33, 0 }
0x2104   :  { %v29680_v16 = vand.u32 4294901760, %v29679_v39  ;;  %v30139_v19 = vand.u32 4294901760, %v30138_v35  ;;  %v46877_v53 = vand.u32 4294901760, %v30956_v47 }
0x2105   :  { %v29690_v17 = vsub.f32 %v29688_v40, %v29689_v44  ;;  %41570 = vmatmul.mubr.f32.vlgmr.msra.gmra.mrb[68].mxu1 %v30130_v38 }
0x2106   :  { %v30140_v36 = vsub.f32 %v30138_v35, %v30139_v19  ;;  %41540 = vmatmul.mubr.f32.vlgmr.msra.gmra.mrb[56].mxu0 %v29680_v16  ;;  %v28687_v24 = vpop.permute.xlu0 %28686  ;;  %41574 = vmatprep.mubr.msk.f32.mxu1 %vm44102_vm1, %v44101_v51  ;;  %v31027_v7 = vsub.f32 %v30956_v47, %v46877_v53 }
0x2107   :  { %v29691_v27 = vand.u32 4294901760, %v29690_v17  ;;  %41544 = vmatprep.mubr.msk.f32.mxu0 %vm44102_vm1, %v44101_v51  ;;  %v30958_v25 = vsel %vm725_vm2, %v28687_v24, 0 }
0x2108   :  { %v30141_v12 = vand.u32 4294901760, %v30140_v36  ;;  %v46884_v43 = vand.u32 4294901760, %v30958_v25  ;;  %v31028_v46 = vand.u32 4294901760, %v31027_v7 }
0x2109   :  { %41543 = vmatpush3.xpose.msra.mxu0 %v29691_v27 }
0x210a   :  { %v46833_v21 = vpop.permute.xlu0 %28676  ;;  %41573 = vmatpush3.xpose.msra.mxu1 %v30141_v12  ;;  %41547 = vmatprep.subr.mxu0 %v44101_v51  ;;  %v31038_v31 = vsub.f32 %v30958_v25, %v46884_v43  ;;  %v31029_v37 = vsub.f32 %v31027_v7, %v31028_v46 }
0x210b   :  { %41577 = vmatprep.subr.mxu1 %v44101_v51 }
0x210c   :  { %v31039_v52 = vand.u32 4294901760, %v31038_v31 }
0x210d   :  { %41575 = vmatmul.mubr.f32.vlgmr.msra.gmra.mrb[68].mxu1 %v46802_v32 }
0x210e   :  { %41545 = vmatmul.mubr.f32.vlgmr.msra.gmra.mrb[56].mxu0 %v46805_v8  ;;  %v46839_v57 = vpop.permute.xlu0 %28690  ;;  %41578 = vmatpush3.xpose.msra.mxu1 %v30138_v35 }
0x210f   :  { %41548 = vmatpush3.xpose.msra.mxu0 %v29688_v40  ;;  %41579 = vmatprep.mubr.msk.f32.mxu1 %vm44102_vm1, %v44101_v51 }
0x2110   :  { %41582 = vmatprep.subr.mxu1 %v44101_v51  ;;  %41549 = vmatprep.mubr.msk.f32.mxu0 %vm44102_vm1, %v44101_v51 }
0x2111   :  { %41552 = vmatprep.subr.mxu0 %v44101_v51 }
0x2112   :  { %v28655_v9 = vpop.permute.xlu0 %28654 }
0x2113   :  { %v46848_v49 = vadd.f32 %v28655_v9, %v46741_v15  ;;  %v46851_v42 = vadd.f32 %v46738_v26, %v28655_v9  ;;  %v28685_v26 = vpop.permute.xlu1 %28684  ;;  %v30506_v15 = vsel %vm725_vm2, %v28671_v30, 0 }
0x2114   :  { %v30508_v2 = vsel %vm725_vm2, %v28685_v26, 0  ;;  %v46875_v0 = vand.u32 4294901760, %v30506_v15 }
0x2115   :  { %28696 = vrot.lane.b32.xlu1 %v46851_v42, %s44103_s27  ;;  %28694 = vrot.lane.b32.xlu0 %v46848_v49, %s44103_s27  ;;  %v46882_v1 = vand.u32 4294901760, %v30508_v2 }
0x2116   :  { %41580 = vmatmul.mubr.f32.vlgmr.msra.gmra.mrb[68].mxu1 %v46808_v3  ;;  %41550 = vmatmul.mubr.f32.vlgmr.msra.gmra.mrb[56].mxu0 %v46811_v55  ;;  %v46890_v22 = vsub.f32 %v30506_v15, %v46875_v0  ;;  %v31040_v3 = vsub.f32 %v31038_v31, %v31039_v52  ;;  %v31030_v55 = vand.u32 4294901760, %v31029_v37 }
0x2117   :  { %41583 = vmatpush3.xpose.msra.mxu1 %v46819_v54  ;;  %41553 = vmatpush3.xpose.msra.mxu0 %v46815_v56  ;;  %v46894_v23 = vsub.f32 %v30508_v2, %v46882_v1 }
0x2118   :  { %41584 = vmatprep.mubr.msk.f32.mxu1 %vm44102_vm1, %v44101_v51  ;;  %41587 = vmatprep.subr.mxu1 %v44101_v51  ;;  %v30578_v28 = vand.u32 4294901760, %v46890_v22  ;;  %v31041_v20 = vand.u32 4294901760, %v31040_v3 }
0x2119   :  { %32477 = vrot.lane.b32.xlu1 %v46848_v49, %s44104_s28  ;;  %32931 = vrot.lane.b32.xlu0 %v46851_v42, %s44104_s28  ;;  %v30589_v10 = vand.u32 4294901760, %v46894_v23 }
0x211a   :  { %41554 = vmatprep.mubr.msk.f32.mxu0 %vm44102_vm1, %v44101_v51  ;;  %41557 = vmatprep.subr.mxu0 %v44101_v51  ;;  %v30579_v59 = vsub.f32 %v46890_v22, %v30578_v28 }
0x211b   :  { %v30590_v34 = vsub.f32 %v46894_v23, %v30589_v10 }
0x211c   :  { %v30580_v60 = vand.u32 4294901760, %v30579_v59 }
0x211d   :  { %v30591_v61 = vand.u32 4294901760, %v30590_v34 }
0x211e   :  { %41585 = vmatmul.mubr.f32.vlgmr.msra.gmra.mrb[68].mxu1 %v30128_v14  ;;  %41555 = vmatmul.mubr.f32.vlgmr.msra.gmra.mrb[56].mxu0 %v29678_v18  ;;  %v31858_v18 = vsel %vm725_vm2, %v46839_v57, 0 }
0x211f   :  { %41588 = vmatpush3.xpose.msra.mxu1 %v30139_v19  ;;  %41558 = vmatpush3.xpose.msra.mxu0 %v29689_v44  ;;  %v46960_v39 = vand.u32 4294901760, %v31858_v18 }
0x2120   :  { %41589 = vmatprep.mubr.msk.f32.mxu1 %vm44102_vm1, %v44101_v51  ;;  %41592 = vmatprep.subr.mxu1 %v44101_v51 }
0x2121   :  { %41559 = vmatprep.mubr.msk.f32.mxu0 %vm44102_vm1, %v44101_v51  ;;  %41562 = vmatprep.subr.mxu0 %v44101_v51  ;;  %v31938_v44 = vsub.f32 %v31858_v18, %v46960_v39 }
0x2123   :  { %v31939_v36 = vand.u32 4294901760, %v31938_v44 }
0x2126   :  { %41590 = vmatmul.mubr.f32.vlgmr.msra.gmra.mrb[68].mxu1 %v46802_v32  ;;  %41560 = vmatmul.mubr.f32.vlgmr.msra.gmra.mrb[56].mxu0 %v46805_v8 }
0x2127   :  { %41593 = vmatpush3.xpose.msra.mxu1 %v46819_v54  ;;  %41563 = vmatpush3.xpose.msra.mxu0 %v46815_v56  ;;  %v31856_v56 = vsel %vm725_vm2, %v46833_v21, 0  ;;  %v31940_v21 = vsub.f32 %v31938_v44, %v31939_v36 }
0x2128   :  { %41594 = vmatprep.mubr.msk.f32.mxu1 %vm44102_vm1, %v44101_v51  ;;  %41627 = vmatprep.subr.mxu1 %v44101_v51  ;;  %v46953_v29 = vand.u32 4294901760, %v31856_v56 }
0x2129   :  { %41564 = vmatprep.mubr.msk.f32.mxu0 %vm44102_vm1, %v44101_v51  ;;  %41597 = vmatprep.subr.mxu0 %v44101_v51  ;;  %v31941_v26 = vand.u32 4294901760, %v31940_v21 }
0x212a   :  { %v31927_v33 = vsub.f32 %v31856_v56, %v46953_v29 }
0x212c   :  { %v31928_v19 = vand.u32 4294901760, %v31927_v33 }
0x212e   :  { %41595 = vmatmul.mubr.f32.vlgmr.msra.gmra.mrb[68].mxu1 %v46802_v32  ;;  %41565 = vmatmul.mubr.f32.vlgmr.msra.gmra.mrb[56].mxu0 %v46805_v8  ;;  %v28675_v32 = vpop.permute.xlu1 %28674  ;;  %v31929_v27 = vsub.f32 %v31927_v33, %v31928_v19 }
0x212f   :  { %41628 = vmatpush3.xpose.msra.mxu1 %v46884_v43  ;;  %41598 = vmatpush3.xpose.msra.mxu0 %v46882_v1  ;;  %v31406_v14 = vsel %vm725_vm2, %v28675_v32, 0 }
0x2130   :  { %41629 = vmatprep.mubr.msk.f32.mxu1 %vm44102_vm1, %v44101_v51  ;;  %41632 = vmatprep.subr.mxu1 %v44101_v51  ;;  %v46951_v54 = vand.u32 4294901760, %v31406_v14  ;;  %v31930_v9 = vand.u32 4294901760, %v31929_v27 }
0x2131   :  { %41599 = vmatprep.mubr.msk.f32.mxu0 %vm44102_vm1, %v44101_v51  ;;  %41602 = vmatprep.subr.mxu0 %v44101_v51 }
0x2132   :  { %41630 = vmatmul.mubr.f32.vlgmr.msra.gmra.mrb[70].mxu1 %v31030_v55  ;;  %41600 = vmatmul.mubr.f32.vlgmr.msra.gmra.mrb[58].mxu0 %v30580_v60  ;;  %v28689_v8 = vpop.permute.xlu1 %28688  ;;  %v31477_v35 = vsub.f32 %v31406_v14, %v46951_v54 }
0x2133   :  { %41633 = vmatpush3.xpose.msra.mxu1 %v31041_v20  ;;  %41603 = vmatpush3.xpose.msra.mxu0 %v30591_v61  ;;  %v31408_v50 = vsel %vm725_vm2, %v28689_v8, 0 }
0x2134   :  { %41634 = vmatprep.mubr.msk.f32.mxu1 %vm44102_vm1, %v44101_v51  ;;  %41637 = vmatprep.subr.mxu1 %v44101_v51  ;;  %v46958_v40 = vand.u32 4294901760, %v31408_v50  ;;  %v31478_v16 = vand.u32 4294901760, %v31477_v35 }
0x2135   :  { %41604 = vmatprep.mubr.msk.f32.mxu0 %vm44102_vm1, %v44101_v51  ;;  %41607 = vmatprep.subr.mxu0 %v44101_v51 }
0x2136   :  { %v31488_v38 = vsub.f32 %v31408_v50, %v46958_v40  ;;  %v31479_v24 = vsub.f32 %v31477_v35, %v31478_v16 }
0x2138   :  { %v31489_v17 = vand.u32 4294901760, %v31488_v38  ;;  %v31480_v57 = vand.u32 4294901760, %v31479_v24 }
0x213a   :  { %41635 = vmatmul.mubr.f32.vlgmr.msra.gmra.mrb[70].mxu1 %v46877_v53  ;;  %41605 = vmatmul.mubr.f32.vlgmr.msra.gmra.mrb[58].mxu0 %v46875_v0  ;;  %v31490_v12 = vsub.f32 %v31488_v38, %v31489_v17 }
0x213b   :  { %41638 = vmatpush3.xpose.msra.mxu1 %v31038_v31  ;;  %41608 = vmatpush3.xpose.msra.mxu0 %v46894_v23 }
0x213c   :  { %41639 = vmatprep.mubr.msk.f32.mxu1 %vm44102_vm1, %v44101_v51  ;;  %41642 = vmatprep.subr.mxu1 %v44101_v51  ;;  %v31491_v30 = vand.u32 4294901760, %v31490_v12 }
0x213d   :  { %41609 = vmatprep.mubr.msk.f32.mxu0 %vm44102_vm1, %v44101_v51  ;;  %41612 = vmatprep.subr.mxu0 %v44101_v51 }
0x2142   :  { %41640 = vmatmul.mubr.f32.vlgmr.msra.gmra.mrb[70].mxu1 %v31027_v7  ;;  %41610 = vmatmul.mubr.f32.vlgmr.msra.gmra.mrb[58].mxu0 %v46890_v22 }
0x2143   :  { %41643 = vmatpush3.xpose.msra.mxu1 %v46884_v43  ;;  %41613 = vmatpush3.xpose.msra.mxu0 %v46882_v1 }
0x2144   :  { %41644 = vmatprep.mubr.msk.f32.mxu1 %vm44102_vm1, %v44101_v51  ;;  %41647 = vmatprep.subr.mxu1 %v44101_v51 }
0x2145   :  { %41614 = vmatprep.mubr.msk.f32.mxu0 %vm44102_vm1, %v44101_v51  ;;  %41617 = vmatprep.subr.mxu0 %v44101_v51 }
0x214a   :  { %41645 = vmatmul.mubr.f32.vlgmr.msra.gmra.mrb[70].mxu1 %v31028_v46  ;;  %41615 = vmatmul.mubr.f32.vlgmr.msra.gmra.mrb[58].mxu0 %v30578_v28 }
0x214b   :  { %41648 = vmatpush3.xpose.msra.mxu1 %v31039_v52  ;;  %41618 = vmatpush3.xpose.msra.mxu0 %v30589_v10 }
0x214c   :  { %41649 = vmatprep.mubr.msk.f32.mxu1 %vm44102_vm1, %v44101_v51  ;;  %41652 = vmatprep.subr.mxu1 %v44101_v51 }
0x214d   :  { %41619 = vmatprep.mubr.msk.f32.mxu0 %vm44102_vm1, %v44101_v51  ;;  %41622 = vmatprep.subr.mxu0 %v44101_v51 }
0x2152   :  { %41650 = vmatmul.mubr.f32.vlgmr.msra.gmra.mrb[70].mxu1 %v46877_v53  ;;  %41620 = vmatmul.mubr.f32.vlgmr.msra.gmra.mrb[58].mxu0 %v46875_v0 }
0x2153   :  { %41653 = vmatpush3.xpose.msra.mxu1 %v46884_v43  ;;  %41623 = vmatpush3.xpose.msra.mxu0 %v46882_v1 }
0x2154   :  { %41654 = vmatprep.mubr.msk.f32.mxu1 %vm44102_vm1, %v44101_v51  ;;  %41687 = vmatprep.subr.mxu1 %v44101_v51 }
0x2155   :  { %41624 = vmatprep.mubr.msk.f32.mxu0 %vm44102_vm1, %v44101_v51  ;;  %41657 = vmatprep.subr.mxu0 %v44101_v51 }
0x215a   :  { %41655 = vmatmul.mubr.f32.vlgmr.msra.gmra.mrb[70].mxu1 %v46877_v53  ;;  %41625 = vmatmul.mubr.f32.vlgmr.msra.gmra.mrb[58].mxu0 %v46875_v0 }
0x215b   :  { %41688 = vmatpush3.xpose.msra.mxu1 %v46960_v39  ;;  %41658 = vmatpush3.xpose.msra.mxu0 %v46958_v40 }
0x215c   :  { %41689 = vmatprep.mubr.msk.f32.mxu1 %vm44102_vm1, %v44101_v51  ;;  %41692 = vmatprep.subr.mxu1 %v44101_v51 }
0x215d   :  { %41659 = vmatprep.mubr.msk.f32.mxu0 %vm44102_vm1, %v44101_v51  ;;  %41662 = vmatprep.subr.mxu0 %v44101_v51 }
0x215e   :  { %41690 = vmatmul.mubr.f32.vlgmr.msra.gmra.mrb[72].mxu1 %v31930_v9  ;;  %41660 = vmatmul.mubr.f32.vlgmr.msra.gmra.mrb[60].mxu0 %v31480_v57 }
0x215f   :  { %41693 = vmatpush3.xpose.msra.mxu1 %v31941_v26  ;;  %41663 = vmatpush3.xpose.msra.mxu0 %v31491_v30 }
0x2160   :  { %41694 = vmatprep.mubr.msk.f32.mxu1 %vm44102_vm1, %v44101_v51  ;;  %41697 = vmatprep.subr.mxu1 %v44101_v51 }
0x2161   :  { %41664 = vmatprep.mubr.msk.f32.mxu0 %vm44102_vm1, %v44101_v51  ;;  %41667 = vmatprep.subr.mxu0 %v44101_v51 }
0x2166   :  { %41695 = vmatmul.mubr.f32.vlgmr.msra.gmra.mrb[72].mxu1 %v46953_v29  ;;  %41665 = vmatmul.mubr.f32.vlgmr.msra.gmra.mrb[60].mxu0 %v46951_v54 }
0x2167   :  { %41698 = vmatpush3.xpose.msra.mxu1 %v31938_v44  ;;  %41668 = vmatpush3.xpose.msra.mxu0 %v31488_v38 }
0x2168   :  { %41699 = vmatprep.mubr.msk.f32.mxu1 %vm44102_vm1, %v44101_v51  ;;  %41702 = vmatprep.subr.mxu1 %v44101_v51 }
0x2169   :  { %41669 = vmatprep.mubr.msk.f32.mxu0 %vm44102_vm1, %v44101_v51  ;;  %41672 = vmatprep.subr.mxu0 %v44101_v51 }
0x216e   :  { %41700 = vmatmul.mubr.f32.vlgmr.msra.gmra.mrb[72].mxu1 %v31927_v33  ;;  %41670 = vmatmul.mubr.f32.vlgmr.msra.gmra.mrb[60].mxu0 %v31477_v35 }
0x216f   :  { %41703 = vmatpush3.xpose.msra.mxu1 %v46960_v39  ;;  %41673 = vmatpush3.xpose.msra.mxu0 %v46958_v40 }
0x2170   :  { %41704 = vmatprep.mubr.msk.f32.mxu1 %vm44102_vm1, %v44101_v51  ;;  %41707 = vmatprep.subr.mxu1 %v44101_v51 }
0x2171   :  { %41674 = vmatprep.mubr.msk.f32.mxu0 %vm44102_vm1, %v44101_v51  ;;  %41677 = vmatprep.subr.mxu0 %v44101_v51 }
0x2176   :  { %41705 = vmatmul.mubr.f32.vlgmr.msra.gmra.mrb[72].mxu1 %v31928_v19  ;;  %41675 = vmatmul.mubr.f32.vlgmr.msra.gmra.mrb[60].mxu0 %v31478_v16 }
0x2177   :  { %41708 = vmatpush3.xpose.msra.mxu1 %v31939_v36  ;;  %41678 = vmatpush3.xpose.msra.mxu0 %v31489_v17 }
0x2178   :  { %41709 = vmatprep.mubr.msk.f32.mxu1 %vm44102_vm1, %v44101_v51  ;;  %41712 = vmatprep.subr.mxu1 %v44101_v51 }
0x2179   :  { %41679 = vmatprep.mubr.msk.f32.mxu0 %vm44102_vm1, %v44101_v51  ;;  %41682 = vmatprep.subr.mxu0 %v44101_v51 }
0x217e   :  { %41710 = vmatmul.mubr.f32.vlgmr.msra.gmra.mrb[72].mxu1 %v46953_v29  ;;  %41680 = vmatmul.mubr.f32.vlgmr.msra.gmra.mrb[60].mxu0 %v46951_v54 }
0x217f   :  { %41713 = vmatpush3.xpose.msra.mxu1 %v46960_v39  ;;  %41683 = vmatpush3.xpose.msra.mxu0 %v46958_v40 }
0x2180   :  { %41714 = vmatprep.mubr.msk.f32.mxu1 %vm44102_vm1, %v44101_v51  ;;  %41684 = vmatprep.mubr.msk.f32.mxu0 %vm44102_vm1, %v44101_v51 }
0x2181   :  { %41717 = vmatprep.subr.mxu0 %v44101_v51  ;;  %41747 = vmatprep.subr.mxu1 %v44101_v51 }
0x2186   :  { %41715 = vmatmul.mubr.f32.vlgmr.msra.gmra.mrb[72].mxu1 %v46953_v29  ;;  %41685 = vmatmul.mubr.f32.vlgmr.msra.gmra.mrb[60].mxu0 %v46951_v54 }
0x2187   :  { %v47029_v15 = vpop.permute.xlu1 %28696  ;;  %v47031_v47 = vpop.permute.xlu0 %28694  ;;  %41719 = vmatprep.mubr.msk.f32.mxu0 %vm44102_vm1, %v44101_v51  ;;  %41749 = vmatprep.mubr.msk.f32.mxu1 %vm44102_vm1, %v44101_v51 }
0x218b   :  { %v47037_v2 = vpop.permute.xlu1 %32477  ;;  %v47039_v25 = vpop.permute.xlu0 %32931 }
0x218c   :  { %v47042_v0 = vand.u32 4294901760, %v47037_v2  ;;  %v47045_v53 = vand.u32 4294901760, %v47039_v25 }
0x218e   :  { %v29152_v1 = vpop.f32.mrb[64].mxu1  ;;  %41718 = vmatpush3.msra.mxu0 %v47042_v0  ;;  %41748 = vmatpush3.msra.mxu1 %v47045_v53 }
0x218f   :  { %32314 = vrot.lane.b32.xlu1 %v29152_v1, %s44096_s26  ;;  %v41506_v43 = vpop.f32.mrb[65].mxu1  ;;  %41722 = vmatprep.subr.mxu0 %v44101_v51 }
0x2190   :  { %41752 = vmatprep.subr.mxu1 %v44101_v51 }
0x21ba   :  { %v29602_v22 = vpop.f32.mrb[66].mxu1 }
0x21bb   :  { %32316 = vrot.lane.b32.xlu0 %v29602_v22, %s44096_s26  ;;  %v41536_v7 = vpop.f32.mrb[67].mxu1 }
0x2201   :  { %v30502_v23 = vpop.f32.mrb[68].mxu1  ;;  %v30052_v31 = vpop.f32.mrb[56].mxu0 }
0x2202   :  { %32320 = vrot.lane.b32.xlu0 %v30502_v23, %s44096_s26  ;;  %v41596_v28 = vpop.f32.mrb[69].mxu1  ;;  %32318 = vrot.lane.b32.xlu1 %v30052_v31, %s44096_s26  ;;  %v41566_v46 = vpop.f32.mrb[57].mxu0 }
0x2203   :  { %v32315_v10 = vpop.permute.xlu1 %32314 }
0x2204   :  { %v32338_v52 = vsel %vm4340_vm3, %v32315_v10, -1.7014117e+38 }
0x2205   :  { %v32346_v59 = vsel %vm13456_vm7, %v32338_v52, -inf }
0x2226   :  { %32347 = vmax.xlane.f32.xlu1 %v32346_v59 }
0x222d   :  { %v31402_v37 = vpop.f32.mrb[70].mxu1  ;;  %v30952_v34 = vpop.f32.mrb[58].mxu0 }
0x222e   :  { %v41656_v3 = vpop.f32.mrb[71].mxu1  ;;  %32322 = vrot.lane.b32.xlu0 %v30952_v34, %s44096_s26  ;;  %v41626_v60 = vpop.f32.mrb[59].mxu0 }
0x222f   :  { %v32317_v55 = vpop.permute.xlu0 %32316 }
0x2230   :  { %v32339_v61 = vsel %vm4341_vm4, %v32317_v55, -1.7014117e+38 }
0x2231   :  { %v32349_v20 = vsel %vm13456_vm7, %v32339_v61, -inf }
0x2237   :  { %32324 = vrot.lane.b32.xlu1 %v31402_v37, %s44096_s26 }
0x224d   :  { %32350 = vmax.xlane.f32.xlu0 %v32349_v20 }
0x2259   :  { %v32302_v32 = vpop.f32.mrb[72].mxu1  ;;  %v31852_v8 = vpop.f32.mrb[60].mxu0 }
0x225a   :  { %32328 = vrot.lane.b32.xlu1 %v32302_v32, %s44096_s26  ;;  %v41716_v14 = vpop.f32.mrb[73].mxu1  ;;  %v41686_v56 = vpop.f32.mrb[61].mxu0 }
0x2263   :  { %32326 = vrot.lane.b32.xlu0 %v31852_v8, %s44096_s26 }
0x2274   :  { %v32319_v50 = vpop.permute.xlu1 %32318  ;;  %v32321_v54 = vpop.permute.xlu0 %32320 }
0x2275   :  { %v32340_v18 = vsel %vm4340_vm3, %v32319_v50, -1.7014117e+38  ;;  %v32341_v40 = vsel %vm4341_vm4, %v32321_v54, -1.7014117e+38 }
0x2276   :  { %v32352_v29 = vsel %vm13456_vm7, %v32340_v18, -inf  ;;  %v32355_v39 = vsel %vm13456_vm7, %v32341_v40, -inf }
0x227e   :  { %32353 = vmax.xlane.f32.xlu1 %v32352_v29 }
0x2282   :  { %32356 = vmax.xlane.f32.xlu0 %v32355_v39 }
0x22a0   :  { %v32323_v35 = vpop.permute.xlu0 %32322 }
0x22a1   :  { %v32342_v33 = vsel %vm4340_vm3, %v32323_v35, -1.7014117e+38 }
0x22a2   :  { %v32358_v38 = vsel %vm13456_vm7, %v32342_v33, -inf }
0x22a3   :  { %32359 = vmax.xlane.f32.xlu0 %v32358_v38 }
0x22b3   :  { %v32348_v44 = vpop.xlane.xlu1 %32347 }
0x22b4   :  { %v32370_v16 = vsub.f32 %v32338_v52, %v32348_v44 }
0x22b6   :  { %v32378_v19 = vmul.f32 1.442695, %v32370_v16 }
0x22b7   :  { %v32325_v36 = vpop.permute.xlu1 %32324 }
0x22b8   :  { %43901 = vpow2.f32 %v32378_v19  ;;  %v32343_v57 = vsel %vm4341_vm4, %v32325_v36, -1.7014117e+38 }
0x22b9   :  { %v32361_v30 = vsel %vm13456_vm7, %v32343_v57, -inf }
0x22c2   :  { %v47074_v17 = vpop.eup %43901 }
0x22c3   :  { %32402 = vrot.lane.b32.xlu1 %v47074_v17, %s44103_s27 }
0x22cc   :  { %v32329_v24 = vpop.permute.xlu1 %32328 }
0x22cd   :  { %v32345_v27 = vsel %vm4341_vm4, %v32329_v24, -1.7014117e+38 }
0x22ce   :  { %v32367_v12 = vsel %vm13456_vm7, %v32345_v27, -inf }
0x22cf   :  { %32368 = vmax.xlane.f32.xlu0 %v32367_v12 }
0x22da   :  { %v32351_v21 = vpop.xlane.xlu0 %32350 }
0x22db   :  { %v32371_v9 = vsub.f32 %v32339_v61, %v32351_v21 }
0x22dd   :  { %v32380_v26 = vmul.f32 1.442695, %v32371_v9 }
0x22de   :  { %v32327_v23 = vpop.permute.xlu0 %32326 }
0x22df   :  { %43903 = vpow2.f32 %v32380_v26  ;;  %v32344_v6 = vsel %vm4340_vm3, %v32327_v23, -1.7014117e+38 }
0x22e0   :  { %v32364_v10 = vsel %vm13456_vm7, %v32344_v6, -inf }
0x22e7   :  { %32362 = vmax.xlane.f32.xlu1 %v32361_v30 }
0x22e9   :  { %v47084_v1 = vpop.eup %43903 }
0x22f8   :  { %32404 = vrot.lane.b32.xlu1 %v47084_v1, %s44103_s27 }
0x230b   :  { %v32354_v43 = vpop.xlane.xlu1 %32353 }
0x230c   :  { %v32372_v22 = vsub.f32 %v32340_v18, %v32354_v43 }
0x230e   :  { %v32382_v7 = vmul.f32 1.442695, %v32372_v22 }
0x230f   :  { %v32357_v31 = vpop.xlane.xlu0 %32356 }
0x2310   :  { %43905 = vpow2.f32 %v32382_v7  ;;  %v32373_v46 = vsub.f32 %v32341_v40, %v32357_v31 }
0x2312   :  { %v32384_v52 = vmul.f32 1.442695, %v32373_v46  ;;  %v47138_v46 = vld [vmem:[%s47550_s2 + $0x8] sm:$0xff] }
0x2314   :  { %43907 = vpow2.f32 %v32384_v52 }
0x231a   :  { %v47090_v28 = vpop.eup %43905 }
0x231b   :  { %32406 = vrot.lane.b32.xlu0 %v47090_v28, %s44103_s27 }
0x231c   :  { %32365 = vmax.xlane.f32.xlu1 %v32364_v10 }
0x231e   :  { %v47095_v59 = vpop.eup %43907 }
0x232d   :  { %32408 = vrot.lane.b32.xlu1 %v47095_v59, %s44103_s27 }
0x2330   :  { %v32360_v37 = vpop.xlane.xlu0 %32359 }
0x2331   :  { %v32374_v63 = vsub.f32 %v32342_v33, %v32360_v37 }
0x2333   :  { %v32386_v60 = vmul.f32 1.442695, %v32374_v63  ;;  %v32560_v63 = vsub.f32 %v47037_v2, %v47042_v0 }
0x2335   :  { %v32403_v34 = vpop.permute.xlu1 %32402  ;;  %43909 = vpow2.f32 %v32386_v60 }
0x2336   :  { %v32426_v3 = vsel %vm725_vm2, %v32403_v34, 0.0 }
0x233f   :  { %v47100_v32 = vpop.eup %43909 }
0x2351   :  { %32427 = vadd.xlane.f32.xlu1 %v32426_v3 }
0x235c   :  { %v32369_v55 = vpop.xlane.xlu0 %32368 }
0x235d   :  { %v32377_v61 = vsub.f32 %v32345_v27, %v32369_v55 }
0x235f   :  { %v32392_v20 = vmul.f32 1.442695, %v32377_v61 }
0x2361   :  { %43911 = vpow2.f32 %v32392_v20 }
0x2362   :  { %32410 = vrot.lane.b32.xlu1 %v47100_v32, %s44103_s27 }
0x236b   :  { %v47104_v8 = vpop.eup %43911 }
0x236c   :  { %32416 = vrot.lane.b32.xlu1 %v47104_v8, %s44103_s27 }
0x2374   :  { %v32363_v14 = vpop.xlane.xlu1 %32362 }
0x2375   :  { %v32375_v56 = vsub.f32 %v32343_v57, %v32363_v14  ;;  %v47126_v57 = vld [vmem:[%s47550_s2] sm:$0xff] }
0x2377   :  { %v32388_v50 = vmul.f32 1.442695, %v32375_v56 }
0x2378   :  { %v32405_v54 = vpop.permute.xlu1 %32404 }
0x2379   :  { %43913 = vpow2.f32 %v32388_v50  ;;  %v32429_v29 = vsel %vm725_vm2, %v32405_v54, 0.0 }
0x2383   :  { %v47108_v18 = vpop.eup %43913 }
0x2384   :  { %32412 = vrot.lane.b32.xlu0 %v47108_v18, %s44103_s27 }
0x238d   :  { %v32407_v16 = vpop.permute.xlu0 %32406 }
0x238e   :  { %v32432_v19 = vsel %vm725_vm2, %v32407_v16, 0.0 }
0x23a3   :  { %32430 = vadd.xlane.f32.xlu0 %v32429_v29 }
0x23a9   :  { %v32366_v40 = vpop.xlane.xlu1 %32365 }
0x23aa   :  { %v32376_v39 = vsub.f32 %v32344_v6, %v32366_v40 }
0x23ac   :  { %v32390_v35 = vmul.f32 1.442695, %v32376_v39 }
0x23ad   :  { %v32409_v33 = vpop.permute.xlu1 %32408 }
0x23ae   :  { %43915 = vpow2.f32 %v32390_v35  ;;  %v32435_v38 = vsel %vm725_vm2, %v32409_v33, 0.0 }
0x23af   :  { %32436 = vadd.xlane.f32.xlu1 %v32435_v38 }
0x23b8   :  { %v47114_v44 = vpop.eup %43915 }
0x23b9   :  { %32414 = vrot.lane.b32.xlu0 %v47114_v44, %s44103_s27 }
0x23c0   :  { %28698 = vrot.lane.b32.xlu1 %v46848_v49, %s44105_s29 }
0x23d8   :  { %32433 = vadd.xlane.f32.xlu0 %v32432_v19 }
0x23de   :  { %v32428_v36 = vpop.xlane.xlu1 %32427 }
0x23df   :  { %43917 = vrcp.f32 %v32428_v36  ;;  %v33014_v36 = vsub.f32 %v47039_v25, %v47045_v53 }
0x23e2   :  { %v32411_v24 = vpop.permute.xlu1 %32410 }
0x23e3   :  { %v32438_v27 = vsel %vm725_vm2, %v32411_v24, 0.0 }
0x23e4   :  { %32439 = vadd.xlane.f32.xlu1 %v32438_v27  ;;  %v33015_v27 = vand.u32 4294901760, %v33014_v36 }
0x23e6   :  { %v32417_v7 = vpop.permute.xlu1 %32416 }
0x23e7   :  { %v32447_v2 = vsel %vm725_vm2, %v32417_v7, 0.0 }
0x23e9   :  { %v43918_v12 = vpop.eup %43917 }
0x23ea   :  { %v32458_v21 = vmul.f32 %v43918_v12, %v47074_v17 }
0x23ec   :  { %v32466_v9 = vmul.f32 %v47126_v57, %v32458_v21 }
0x23ee   :  { %32475 = vrot.lane.b32.xlu0 %v32466_v9, %s44103_s27 }
0x23f5   :  { %28700 = vrot.lane.b32.xlu1 %v46851_v42, %s44105_s29 }
0x23f6   :  { %v32413_v30 = vpop.permute.xlu0 %32412 }
0x23f7   :  { %v32441_v26 = vsel %vm725_vm2, %v32413_v30, 0.0 }
0x240d   :  { %32442 = vadd.xlane.f32.xlu0 %v32441_v26 }
0x2430   :  { %v32431_v43 = vpop.xlane.xlu0 %32430 }
0x2431   :  { %43919 = vrcp.f32 %v32431_v43 }
0x2434   :  { %v32415_v22 = vpop.permute.xlu0 %32414 }
0x2435   :  { %v32444_v17 = vsel %vm725_vm2, %v32415_v22, 0.0 }
0x2436   :  { %32445 = vadd.xlane.f32.xlu1 %v32444_v17 }
0x243b   :  { %v43920_v23 = vpop.eup %43919 }
0x243c   :  { %v32437_v31 = vpop.xlane.xlu1 %32436  ;;  %v32459_v6 = vmul.f32 %v43920_v23, %v47084_v1 }
0x243d   :  { %43921 = vrcp.f32 %v32437_v31 }
0x243e   :  { %v32467_v10 = vmul.f32 %v47138_v46, %v32459_v6 }
0x2440   :  { %32929 = vrot.lane.b32.xlu0 %v32467_v10, %s44103_s27 }
0x2447   :  { %v43922_v52 = vpop.eup %43921  ;;  %33385 = vrot.lane.b32.xlu1 %v47031_v47, %s44104_s28 }
0x2448   :  { %v32461_v37 = vmul.f32 %v43922_v52, %v47095_v59  ;;  %v32561_v59 = vand.u32 4294901760, %v32560_v63 }
0x244a   :  { %v32469_v34 = vmul.f32 %v47138_v46, %v32461_v37  ;;  %v32562_v14 = vsub.f32 %v32560_v63, %v32561_v59 }
0x244b   :  { %28702 = vrot.lane.b32.xlu1 %v46848_v49, %s44106_s30 }
0x244c   :  { %33837 = vrot.lane.b32.xlu0 %v32469_v34, %s44103_s27  ;;  %v32563_v54 = vand.u32 4294901760, %v32562_v14 }
0x244f   :  { %28704 = vrot.lane.b32.xlu1 %v46851_v42, %s44106_s30 }
0x2465   :  { %v32434_v1 = vpop.xlane.xlu0 %32433 }
0x2466   :  { %43923 = vrcp.f32 %v32434_v1 }
0x2469   :  { %v32476_v3 = vpop.permute.xlu0 %32475 }
0x246a   :  { %v32480_v47 = vsel %vm725_vm2, %v32476_v3, 0 }
0x246b   :  { %v32548_v60 = vand.u32 4294901760, %v32480_v47 }
0x246d   :  { %v32549_v55 = vsub.f32 %v32480_v47, %v32548_v60 }
0x246f   :  { %v32550_v61 = vand.u32 4294901760, %v32549_v55 }
0x2470   :  { %v43924_v20 = vpop.eup %43923 }
0x2471   :  { %v32551_v49 = vsub.f32 %v32549_v55, %v32550_v61  ;;  %v32460_v56 = vmul.f32 %v43924_v20, %v47090_v28  ;;  %v28699_v28 = vpop.permute.xlu1 %28698 }
0x2473   :  { %v32552_v50 = vand.u32 4294901760, %v32551_v49  ;;  %v32468_v42 = vmul.f32 %v47126_v57, %v32460_v56 }
0x2475   :  { %41720 = vmatmul.mubr.f32.vlgmr.msra.gmra.mrb[62].mxu0 %v32552_v50  ;;  %33383 = vrot.lane.b32.xlu0 %v32468_v42, %s44103_s27  ;;  %v32440_v29 = vpop.xlane.xlu1 %32439 }
0x2476   :  { %41723 = vmatpush3.msra.mxu0 %v32563_v54  ;;  %41724 = vmatprep.mubr.msk.f32.mxu0 %vm44102_vm1, %v44101_v51  ;;  %43925 = vrcp.f32 %v32440_v29 }
0x2477   :  { %41727 = vmatprep.subr.mxu0 %v44101_v51 }
0x2479   :  { %v28701_v19 = vpop.permute.xlu1 %28700 }
0x247d   :  { %41725 = vmatmul.mubr.f32.vlgmr.msra.gmra.mrb[62].mxu0 %v32548_v60 }
0x247e   :  { %41728 = vmatpush3.msra.mxu0 %v32560_v63  ;;  %41729 = vmatprep.mubr.msk.f32.mxu0 %vm44102_vm1, %v44101_v51 }
0x247f   :  { %41732 = vmatprep.subr.mxu0 %v44101_v51 }
0x2480   :  { %v43926_v39 = vpop.eup %43925 }
0x2485   :  { %41730 = vmatmul.mubr.f32.vlgmr.msra.gmra.mrb[62].mxu0 %v32549_v55 }
0x2486   :  { %41733 = vmatpush3.msra.mxu0 %v47042_v0  ;;  %41734 = vmatprep.mubr.msk.f32.mxu0 %vm44102_vm1, %v44101_v51 }
0x2487   :  { %41737 = vmatprep.subr.mxu0 %v44101_v51 }
0x248d   :  { %41735 = vmatmul.mubr.f32.vlgmr.msra.gmra.mrb[62].mxu0 %v32550_v61 }
0x248e   :  { %41738 = vmatpush3.msra.mxu0 %v32561_v59  ;;  %41739 = vmatprep.mubr.msk.f32.mxu0 %vm44102_vm1, %v44101_v51 }
0x248f   :  { %41742 = vmatprep.subr.mxu0 %v44101_v51 }
0x2494   :  { %32448 = vadd.xlane.f32.xlu0 %v32447_v2 }
0x2495   :  { %41740 = vmatmul.mubr.f32.vlgmr.msra.gmra.mrb[62].mxu0 %v32548_v60 }
0x2496   :  { %41743 = vmatpush3.msra.mxu0 %v47042_v0  ;;  %41744 = vmatprep.mubr.msk.f32.mxu0 %vm44102_vm1, %v44101_v51  ;;  %v32462_v0 = vmul.f32 %v43926_v39, %v47100_v32 }
0x2497   :  { %41777 = vmatprep.subr.mxu0 %v44101_v51 }
0x2498   :  { %v32470_v16 = vmul.f32 %v47126_v57, %v32462_v0 }
0x249a   :  { %v32443_v40 = vpop.xlane.xlu0 %32442 }
0x249b   :  { %43927 = vrcp.f32 %v32443_v40 }
0x249d   :  { %41745 = vmatmul.mubr.f32.vlgmr.msra.gmra.mrb[62].mxu0 %v32548_v60 }
0x249e   :  { %41779 = vmatprep.mubr.msk.f32.mxu0 %vm44102_vm1, %v44101_v51 }
0x24a5   :  { %v43928_v35 = vpop.eup %43927 }
0x24a6   :  { %v32463_v33 = vmul.f32 %v43928_v35, %v47108_v18 }
0x24a8   :  { %v32471_v38 = vmul.f32 %v47138_v46, %v32463_v33 }
0x24aa   :  { %34745 = vrot.lane.b32.xlu1 %v32471_v38, %s44103_s27  ;;  %33839 = vrot.lane.b32.xlu0 %v47029_v15, %s44104_s28  ;;  %v33016_v15 = vsub.f32 %v33014_v36, %v33015_v27 }
0x24ac   :  { %v33017_v26 = vand.u32 4294901760, %v33016_v15 }
0x24ae   :  { %34291 = vrot.lane.b32.xlu0 %v32470_v16, %s44103_s27  ;;  %34747 = vrot.lane.b32.xlu1 %v28701_v19, %s44104_s28 }
0x24b2   :  { %v32930_v18 = vpop.permute.xlu0 %32929  ;;  %34293 = vrot.lane.b32.xlu0 %v28699_v28, %s44104_s28 }
0x24b3   :  { %v32934_v32 = vsel %vm725_vm2, %v32930_v18, 0 }
0x24b4   :  { %v33002_v24 = vand.u32 4294901760, %v32934_v32 }
0x24b6   :  { %v33003_v12 = vsub.f32 %v32934_v32, %v33002_v24 }
0x24b8   :  { %v33004_v21 = vand.u32 4294901760, %v33003_v12 }
0x24ba   :  { %v33005_v9 = vsub.f32 %v33003_v12, %v33004_v21 }
0x24bc   :  { %v33006_v30 = vand.u32 4294901760, %v33005_v9 }
0x24be   :  { %41750 = vmatmul.mubr.f32.vlgmr.msra.gmra.mrb[74].mxu1 %v33006_v30 }
0x24bf   :  { %41753 = vmatpush3.msra.mxu1 %v33017_v26  ;;  %41754 = vmatprep.mubr.msk.f32.mxu1 %vm44102_vm1, %v44101_v51 }
0x24c0   :  { %41757 = vmatprep.subr.mxu1 %v44101_v51 }
0x24c3   :  { %v32446_v25 = vpop.xlane.xlu1 %32445 }
0x24c4   :  { %43929 = vrcp.f32 %v32446_v25 }
0x24c6   :  { %41755 = vmatmul.mubr.f32.vlgmr.msra.gmra.mrb[74].mxu1 %v33002_v24 }
0x24c7   :  { %41758 = vmatpush3.msra.mxu1 %v33014_v36  ;;  %v33386_v43 = vpop.permute.xlu1 %33385  ;;  %41759 = vmatprep.mubr.msk.f32.mxu1 %vm44102_vm1, %v44101_v51 }
0x24c8   :  { %v33391_v22 = vand.u32 4294901760, %v33386_v43  ;;  %41762 = vmatprep.subr.mxu1 %v44101_v51 }
0x24ca   :  { %41778 = vmatpush3.msra.mxu0 %v33391_v22 }
0x24cb   :  { %41782 = vmatprep.subr.mxu0 %v44101_v51  ;;  %v28703_v31 = vpop.permute.xlu1 %28702 }
0x24ce   :  { %v43930_v17 = vpop.eup %43929  ;;  %41760 = vmatmul.mubr.f32.vlgmr.msra.gmra.mrb[74].mxu1 %v33003_v12 }
0x24cf   :  { %41763 = vmatpush3.msra.mxu1 %v47045_v53  ;;  %v32464_v7 = vmul.f32 %v43930_v17, %v47114_v44  ;;  %41764 = vmatprep.mubr.msk.f32.mxu1 %vm44102_vm1, %v44101_v51  ;;  %v33838_v44 = vpop.permute.xlu0 %33837 }
0x24d0   :  { %41767 = vmatprep.subr.mxu1 %v44101_v51  ;;  %v33842_v60 = vsel %vm725_vm2, %v33838_v44, 0 }
0x24d1   :  { %v32472_v23 = vmul.f32 %v47126_v57, %v32464_v7  ;;  %v33468_v57 = vsub.f32 %v33386_v43, %v33391_v22  ;;  %v47231_v59 = vand.u32 4294901760, %v33842_v60 }
0x24d3   :  { %35199 = vrot.lane.b32.xlu0 %v32472_v23, %s44103_s27  ;;  %v33469_v37 = vand.u32 4294901760, %v33468_v57  ;;  %v33911_v55 = vsub.f32 %v33842_v60, %v47231_v59 }
0x24d5   :  { %v33470_v63 = vsub.f32 %v33468_v57, %v33469_v37  ;;  %v33912_v61 = vand.u32 4294901760, %v33911_v55 }
0x24d6   :  { %41765 = vmatmul.mubr.f32.vlgmr.msra.gmra.mrb[74].mxu1 %v33004_v21 }
0x24d7   :  { %41768 = vmatpush3.msra.mxu1 %v33015_v27  ;;  %35201 = vrot.lane.b32.xlu0 %v28703_v31, %s44104_s28  ;;  %v33471_v47 = vand.u32 4294901760, %v33470_v63  ;;  %v33913_v14 = vsub.f32 %v33911_v55, %v33912_v61  ;;  %v28705_v27 = vpop.permute.xlu1 %28704 }
0x24d8   :  { %41769 = vmatprep.mubr.msk.f32.mxu1 %vm44102_vm1, %v44101_v51  ;;  %41772 = vmatprep.subr.mxu1 %v44101_v51 }
0x24d9   :  { %v33914_v50 = vand.u32 4294901760, %v33913_v14 }
0x24de   :  { %41770 = vmatmul.mubr.f32.vlgmr.msra.gmra.mrb[74].mxu1 %v33002_v24 }
0x24df   :  { %41773 = vmatpush3.msra.mxu1 %v47045_v53  ;;  %41774 = vmatprep.mubr.msk.f32.mxu1 %vm44102_vm1, %v44101_v51 }
0x24e0   :  { %41807 = vmatprep.subr.mxu1 %v44101_v51 }
0x24e6   :  { %41775 = vmatmul.mubr.f32.vlgmr.msra.gmra.mrb[74].mxu1 %v33002_v24 }
0x24e7   :  { %v33384_v6 = vpop.permute.xlu0 %33383  ;;  %41809 = vmatprep.mubr.msk.f32.mxu1 %vm44102_vm1, %v44101_v51 }
0x24e8   :  { %v33388_v10 = vsel %vm725_vm2, %v33384_v6, 0 }
0x24e9   :  { %v33456_v52 = vand.u32 4294901760, %v33388_v10 }
0x24eb   :  { %v33457_v34 = vsub.f32 %v33388_v10, %v33456_v52 }
0x24ed   :  { %v33458_v1 = vand.u32 4294901760, %v33457_v34 }
0x24ef   :  { %v33459_v53 = vsub.f32 %v33457_v34, %v33458_v1 }
0x24f1   :  { %v33460_v3 = vand.u32 4294901760, %v33459_v53 }
0x24f3   :  { %41780 = vmatmul.mubr.f32.vlgmr.msra.gmra.mrb[64].mxu0 %v33460_v3 }
0x24f4   :  { %41783 = vmatpush3.msra.mxu0 %v33471_v47  ;;  %41784 = vmatprep.mubr.msk.f32.mxu0 %vm44102_vm1, %v44101_v51 }
0x24f5   :  { %41787 = vmatprep.subr.mxu0 %v44101_v51 }
0x24fb   :  { %41785 = vmatmul.mubr.f32.vlgmr.msra.gmra.mrb[64].mxu0 %v33456_v52 }
0x24fc   :  { %41788 = vmatpush3.msra.mxu0 %v33468_v57  ;;  %41789 = vmatprep.mubr.msk.f32.mxu0 %vm44102_vm1, %v44101_v51 }
0x24fd   :  { %41792 = vmatprep.subr.mxu0 %v44101_v51 }
0x2503   :  { %41790 = vmatmul.mubr.f32.vlgmr.msra.gmra.mrb[64].mxu0 %v33457_v34 }
0x2504   :  { %41793 = vmatpush3.msra.mxu0 %v33391_v22  ;;  %41794 = vmatprep.mubr.msk.f32.mxu0 %vm44102_vm1, %v44101_v51 }
0x2505   :  { %41797 = vmatprep.subr.mxu0 %v44101_v51 }
0x250b   :  { %41795 = vmatmul.mubr.f32.vlgmr.msra.gmra.mrb[64].mxu0 %v33458_v1 }
0x250c   :  { %41798 = vmatpush3.msra.mxu0 %v33469_v37  ;;  %41799 = vmatprep.mubr.msk.f32.mxu0 %vm44102_vm1, %v44101_v51 }
0x250d   :  { %41802 = vmatprep.subr.mxu0 %v44101_v51 }
0x2513   :  { %41800 = vmatmul.mubr.f32.vlgmr.msra.gmra.mrb[64].mxu0 %v33456_v52 }
0x2514   :  { %41803 = vmatpush3.msra.mxu0 %v33391_v22  ;;  %41804 = vmatprep.mubr.msk.f32.mxu0 %vm44102_vm1, %v44101_v51 }
0x2515   :  { %41837 = vmatprep.subr.mxu0 %v44101_v51 }
0x251b   :  { %41805 = vmatmul.mubr.f32.vlgmr.msra.gmra.mrb[64].mxu0 %v33456_v52 }
0x251c   :  { %41839 = vmatprep.mubr.msk.f32.mxu0 %vm44102_vm1, %v44101_v51  ;;  %v34746_v21 = vpop.permute.xlu1 %34745 }
0x251d   :  { %v34750_v15 = vsel %vm725_vm2, %v34746_v21, 0 }
0x251e   :  { %v47275_v30 = vand.u32 4294901760, %v34750_v15 }
0x2520   :  { %v34748_v9 = vpop.permute.xlu1 %34747  ;;  %v34819_v25 = vsub.f32 %v34750_v15, %v47275_v30 }
0x2521   :  { %v32449_v20 = vpop.xlane.xlu0 %32448  ;;  %v47278_v26 = vand.u32 4294901760, %v34748_v9 }
0x2522   :  { %43931 = vrcp.f32 %v32449_v20  ;;  %v34820_v17 = vand.u32 4294901760, %v34819_v25 }
0x2523   :  { %v34830_v22 = vsub.f32 %v34748_v9, %v47278_v26 }
0x2524   :  { %v34821_v44 = vsub.f32 %v34819_v25, %v34820_v17 }
0x2525   :  { %v33840_v49 = vpop.permute.xlu0 %33839  ;;  %v34831_v7 = vand.u32 4294901760, %v34830_v22 }
0x2526   :  { %v47236_v56 = vand.u32 4294901760, %v33840_v49  ;;  %v34822_v52 = vand.u32 4294901760, %v34821_v44 }
0x2527   :  { %v34832_v6 = vsub.f32 %v34830_v22, %v34831_v7 }
0x2528   :  { %v33922_v42 = vsub.f32 %v33840_v49, %v47236_v56  ;;  %41808 = vmatpush3.msra.mxu1 %v47236_v56 }
0x2529   :  { %41810 = vmatmul.mubr.f32.vlgmr.msra.gmra.mrb[76].mxu1 %v33914_v50  ;;  %v34292_v54 = vpop.permute.xlu0 %34291  ;;  %41812 = vmatprep.subr.mxu1 %v44101_v51  ;;  %v34833_v34 = vand.u32 4294901760, %v34832_v6 }
0x252a   :  { %v33923_v2 = vand.u32 4294901760, %v33922_v42  ;;  %v34296_v28 = vsel %vm725_vm2, %v34292_v54, 0  ;;  %41814 = vmatprep.mubr.msk.f32.mxu1 %vm44102_vm1, %v44101_v51 }
0x252b   :  { %v47244_v29 = vand.u32 4294901760, %v34296_v28 }
0x252c   :  { %v43932_v40 = vpop.eup %43931  ;;  %v33924_v39 = vsub.f32 %v33922_v42, %v33923_v2 }
0x252d   :  { %v34365_v35 = vsub.f32 %v34296_v28, %v47244_v29  ;;  %v34294_v33 = vpop.permute.xlu0 %34293  ;;  %v32465_v38 = vmul.f32 %v43932_v40, %v47104_v8 }
0x252e   :  { %v33925_v0 = vand.u32 4294901760, %v33924_v39  ;;  %v47248_v16 = vand.u32 4294901760, %v34294_v33 }
0x252f   :  { %v34366_v19 = vand.u32 4294901760, %v34365_v35  ;;  %v32473_v36 = vmul.f32 %v47138_v46, %v32465_v38 }
0x2530   :  { %v34376_v18 = vsub.f32 %v34294_v33, %v47248_v16  ;;  %41813 = vmatpush3.msra.mxu1 %v33925_v0  ;;  %41838 = vmatpush3.msra.mxu0 %v47248_v16 }
0x2531   :  { %v34367_v32 = vsub.f32 %v34365_v35, %v34366_v19  ;;  %41815 = vmatmul.mubr.f32.vlgmr.msra.gmra.mrb[76].mxu1 %v47231_v59  ;;  %41817 = vmatprep.subr.mxu1 %v44101_v51 }
0x2532   :  { %v34377_v24 = vand.u32 4294901760, %v34376_v18  ;;  %35653 = vrot.lane.b32.xlu1 %v32473_v36, %s44103_s27  ;;  %41818 = vmatpush3.msra.mxu1 %v33922_v42 }
0x2533   :  { %v34368_v8 = vand.u32 4294901760, %v34367_v32  ;;  %41842 = vmatprep.subr.mxu0 %v44101_v51  ;;  %41819 = vmatprep.mubr.msk.f32.mxu1 %vm44102_vm1, %v44101_v51 }
0x2534   :  { %v34378_v46 = vsub.f32 %v34376_v18, %v34377_v24  ;;  %41822 = vmatprep.subr.mxu1 %v44101_v51 }
0x2535   :  { %41840 = vmatmul.mubr.f32.vlgmr.msra.gmra.mrb[66].mxu0 %v34368_v8 }
0x2536   :  { %v34379_v12 = vand.u32 4294901760, %v34378_v46  ;;  %35655 = vrot.lane.b32.xlu1 %v28705_v27, %s44104_s28  ;;  %41844 = vmatprep.mubr.msk.f32.mxu0 %vm44102_vm1, %v44101_v51  ;;  %v37931_v27 = vld [vmem:[%s47554_s6 + $0x60] sm:$0xff] }
0x2537   :  { %v36147_v21 = vand.u32 4294901760, %v37931_v27 }
0x2538   :  { %41843 = vmatpush3.msra.mxu0 %v34379_v12  ;;  %v37932_v12 = vld [vmem:[%s47554_s6 + $0x68] sm:$0xff] }
0x2539   :  { %41820 = vmatmul.mubr.f32.vlgmr.msra.gmra.mrb[76].mxu1 %v33911_v55  ;;  %41847 = vmatprep.subr.mxu0 %v44101_v51  ;;  %v36150_v15 = vand.u32 4294901760, %v37932_v12 }
0x253a   :  { %41823 = vmatpush3.msra.mxu1 %v47236_v56  ;;  %41824 = vmatprep.mubr.msk.f32.mxu1 %vm44102_vm1, %v44101_v51 }
0x253b   :  { %41827 = vmatprep.subr.mxu1 %v44101_v51  ;;  %v47388_v9 = vpack.c.bf16 %v36150_v15, %v36147_v21 }
0x253d   :  { %41845 = vmatmul.mubr.f32.vlgmr.msra.gmra.mrb[66].mxu0 %v47244_v29 }
0x253e   :  { %41848 = vmatpush3.msra.mxu0 %v34376_v18  ;;  %41849 = vmatprep.mubr.msk.f32.mxu0 %vm44102_vm1, %v44101_v51 }
0x253f   :  { %41852 = vmatprep.subr.mxu0 %v44101_v51 }
0x2541   :  { %41825 = vmatmul.mubr.f32.vlgmr.msra.gmra.mrb[76].mxu1 %v33912_v61 }
0x2542   :  { %41828 = vmatpush3.msra.mxu1 %v33923_v2  ;;  %41829 = vmatprep.mubr.msk.f32.mxu1 %vm44102_vm1, %v44101_v51 }
0x2543   :  { %41832 = vmatprep.subr.mxu1 %v44101_v51 }
0x2545   :  { %41850 = vmatmul.mubr.f32.vlgmr.msra.gmra.mrb[66].mxu0 %v34365_v35  ;;  %v35200_v43 = vpop.permute.xlu0 %35199 }
0x2546   :  { %41853 = vmatpush3.msra.mxu0 %v47248_v16  ;;  %41854 = vmatprep.mubr.msk.f32.mxu0 %vm44102_vm1, %v44101_v51  ;;  %v35204_v23 = vsel %vm725_vm2, %v35200_v43, 0  ;;  %v37934_v43 = vld [vmem:[%s47554_s6 + $0x78] sm:$0xff] }
0x2547   :  { %41857 = vmatprep.subr.mxu0 %v44101_v51  ;;  %v47294_v57 = vand.u32 4294901760, %v35204_v23 }
0x2549   :  { %41830 = vmatmul.mubr.f32.vlgmr.msra.gmra.mrb[76].mxu1 %v47231_v59  ;;  %v35202_v31 = vpop.permute.xlu0 %35201  ;;  %v35273_v37 = vsub.f32 %v35204_v23, %v47294_v57 }
0x254a   :  { %41833 = vmatpush3.msra.mxu1 %v47236_v56  ;;  %41834 = vmatprep.mubr.msk.f32.mxu1 %vm44102_vm1, %v44101_v51  ;;  %v47297_v10 = vand.u32 4294901760, %v35202_v31 }
0x254b   :  { %41867 = vmatprep.subr.mxu1 %v44101_v51  ;;  %v35274_v63 = vand.u32 4294901760, %v35273_v37 }
0x254c   :  { %v35284_v1 = vsub.f32 %v35202_v31, %v47297_v10 }
0x254d   :  { %41855 = vmatmul.mubr.f32.vlgmr.msra.gmra.mrb[66].mxu0 %v34366_v19  ;;  %v35275_v3 = vsub.f32 %v35273_v37, %v35274_v63 }
0x254e   :  { %41858 = vmatpush3.msra.mxu0 %v34377_v24  ;;  %41859 = vmatprep.mubr.msk.f32.mxu0 %vm44102_vm1, %v44101_v51  ;;  %v35285_v53 = vand.u32 4294901760, %v35284_v1 }
0x254f   :  { %41862 = vmatprep.subr.mxu0 %v44101_v51  ;;  %v35276_v60 = vand.u32 4294901760, %v35275_v3 }
0x2550   :  { %v35286_v47 = vsub.f32 %v35284_v1, %v35285_v53 }
0x2551   :  { %41835 = vmatmul.mubr.f32.vlgmr.msra.gmra.mrb[76].mxu1 %v47231_v59 }
0x2552   :  { %41868 = vmatpush3.msra.mxu1 %v47278_v26  ;;  %41869 = vmatprep.mubr.msk.f32.mxu1 %vm44102_vm1, %v44101_v51  ;;  %v35287_v59 = vand.u32 4294901760, %v35286_v47 }
0x2553   :  { %41872 = vmatprep.subr.mxu1 %v44101_v51 }
0x2555   :  { %41860 = vmatmul.mubr.f32.vlgmr.msra.gmra.mrb[66].mxu0 %v47244_v29  ;;  %41870 = vmatmul.mubr.f32.vlgmr.msra.gmra.mrb[78].mxu1 %v34822_v52 }
0x2556   :  { %41863 = vmatpush3.msra.mxu0 %v47248_v16  ;;  %41873 = vmatpush3.msra.mxu1 %v34833_v34 }
0x2557   :  { %41864 = vmatprep.mubr.msk.f32.mxu0 %vm44102_vm1, %v44101_v51  ;;  %41874 = vmatprep.mubr.msk.f32.mxu1 %vm44102_vm1, %v44101_v51 }
0x2558   :  { %41877 = vmatprep.subr.mxu1 %v44101_v51  ;;  %41897 = vmatprep.subr.mxu0 %v44101_v51 }
0x255d   :  { %41865 = vmatmul.mubr.f32.vlgmr.msra.gmra.mrb[66].mxu0 %v47244_v29  ;;  %41875 = vmatmul.mubr.f32.vlgmr.msra.gmra.mrb[78].mxu1 %v47275_v30 }
0x255e   :  { %41878 = vmatpush3.msra.mxu1 %v34830_v22  ;;  %41898 = vmatpush3.msra.mxu0 %v47297_v10 }
0x255f   :  { %41899 = vmatprep.mubr.msk.f32.mxu0 %vm44102_vm1, %v44101_v51  ;;  %41902 = vmatprep.subr.mxu0 %v44101_v51 }
0x2560   :  { %41879 = vmatprep.mubr.msk.f32.mxu1 %vm44102_vm1, %v44101_v51  ;;  %41882 = vmatprep.subr.mxu1 %v44101_v51 }
0x2561   :  { %41900 = vmatmul.mubr.f32.vlgmr.msra.gmra.mrb[68].mxu0 %v35276_v60 }
0x2562   :  { %41903 = vmatpush3.msra.mxu0 %v35287_v59  ;;  %41904 = vmatprep.mubr.msk.f32.mxu0 %vm44102_vm1, %v44101_v51 }
0x2563   :  { %41907 = vmatprep.subr.mxu0 %v44101_v51 }
0x2565   :  { %41880 = vmatmul.mubr.f32.vlgmr.msra.gmra.mrb[78].mxu1 %v34819_v25  ;;  %v37933_v25 = vld [vmem:[%s47554_s6 + $0x70] sm:$0xff] }
0x2566   :  { %41883 = vmatpush3.msra.mxu1 %v47278_v26  ;;  %41884 = vmatprep.mubr.msk.f32.mxu1 %vm44102_vm1, %v44101_v51  ;;  %v36153_v22 = vand.u32 4294901760, %v37933_v25 }
0x2567   :  { %41887 = vmatprep.subr.mxu1 %v44101_v51 }
0x2569   :  { %41905 = vmatmul.mubr.f32.vlgmr.msra.gmra.mrb[68].mxu0 %v47294_v57 }
0x256a   :  { %41908 = vmatpush3.msra.mxu0 %v35284_v1  ;;  %41909 = vmatprep.mubr.msk.f32.mxu0 %vm44102_vm1, %v44101_v51 }
0x256b   :  { %41912 = vmatprep.subr.mxu0 %v44101_v51 }
0x256d   :  { %41885 = vmatmul.mubr.f32.vlgmr.msra.gmra.mrb[78].mxu1 %v34820_v17  ;;  %v36156_v17 = vand.u32 4294901760, %v37934_v43 }
0x256e   :  { %41888 = vmatpush3.msra.mxu1 %v34831_v7  ;;  %41889 = vmatprep.mubr.msk.f32.mxu1 %vm44102_vm1, %v44101_v51 }
0x256f   :  { %41892 = vmatprep.subr.mxu1 %v44101_v51  ;;  %v47398_v31 = vpack.c.bf16 %v36156_v17, %v36153_v22  ;;  %v36258_v6 = vsub.f32 %v37934_v43, %v36156_v17 }
0x2570   :  { %v47337_v55 = vpop.f32.mrb[62].mxu0 }
0x2571   :  { %v41746_v61 = vpop.f32.mrb[63].mxu0  ;;  %41910 = vmatmul.mubr.f32.vlgmr.msra.gmra.mrb[68].mxu0 %v35273_v37  ;;  %v36259_v34 = vand.u32 4294901760, %v36258_v6 }
0x2572   :  { %41913 = vmatpush3.msra.mxu0 %v47297_v10  ;;  %41914 = vmatprep.mubr.msk.f32.mxu0 %vm44102_vm1, %v44101_v51 }
0x2573   :  { %41917 = vmatprep.subr.mxu0 %v44101_v51 }
0x2575   :  { %41890 = vmatmul.mubr.f32.vlgmr.msra.gmra.mrb[78].mxu1 %v47275_v30 }
0x2576   :  { %41893 = vmatpush3.msra.mxu1 %v47278_v26  ;;  %41894 = vmatprep.mubr.msk.f32.mxu1 %vm44102_vm1, %v44101_v51  ;;  %v36244_v26 = vsub.f32 %v37932_v12, %v36150_v15 }
0x2577   :  { %41927 = vmatprep.subr.mxu1 %v44101_v51 }
0x2578   :  { %v36245_v23 = vand.u32 4294901760, %v36244_v26 }
0x2579   :  { %41915 = vmatmul.mubr.f32.vlgmr.msra.gmra.mrb[68].mxu0 %v35274_v63 }
0x257a   :  { %41918 = vmatpush3.msra.mxu0 %v35285_v53  ;;  %41919 = vmatprep.mubr.msk.f32.mxu0 %vm44102_vm1, %v44101_v51  ;;  %v36260_v53 = vsub.f32 %v36258_v6, %v36259_v34 }
0x257b   :  { %41922 = vmatprep.subr.mxu0 %v44101_v51 }
0x257c   :  { %v36261_v61 = vand.u32 4294901760, %v36260_v53 }
0x257d   :  { %41895 = vmatmul.mubr.f32.vlgmr.msra.gmra.mrb[78].mxu1 %v47275_v30  ;;  %v36237_v30 = vsub.f32 %v37931_v27, %v36147_v21 }
0x257e   :  { %41929 = vmatprep.mubr.msk.f32.mxu1 %vm44102_vm1, %v44101_v51 }
0x257f   :  { %v36238_v7 = vand.u32 4294901760, %v36237_v30 }
0x2581   :  { %41920 = vmatmul.mubr.f32.vlgmr.msra.gmra.mrb[68].mxu0 %v47294_v57  ;;  %v36239_v44 = vsub.f32 %v36237_v30, %v36238_v7 }
0x2582   :  { %41923 = vmatpush3.msra.mxu0 %v47297_v10  ;;  %41924 = vmatprep.mubr.msk.f32.mxu0 %vm44102_vm1, %v44101_v51  ;;  %v36246_v10 = vsub.f32 %v36244_v26, %v36245_v23 }
0x2583   :  { %42780 = vmatprep.subr.bf16.mxu0 %v47388_v9  ;;  %v36240_v52 = vand.u32 4294901760, %v36239_v44 }
0x2584   :  { %v36247_v1 = vand.u32 4294901760, %v36246_v10 }
0x2586   :  { %v42787_v47 = vpack.c.bf16 %v36247_v1, %v36240_v52  ;;  %v36716_v1 = vld [vmem:[#allocation8 + $0x28] sm:$0xff] }
0x2589   :  { %41925 = vmatmul.mubr.f32.vlgmr.msra.gmra.mrb[68].mxu0 %v47294_v57  ;;  %v36251_v57 = vsub.f32 %v37933_v25, %v36153_v22 }
0x258a   :  { %42782 = vmatpush3.bf16.msra.mxu0 %v47388_v9 }
0x258b   :  { %42784 = vmatprep.subr.bf16.mxu0 %v47398_v31  ;;  %v36252_v37 = vand.u32 4294901760, %v36251_v57 }
0x258d   :  { %v36253_v63 = vsub.f32 %v36251_v57, %v36252_v37 }
0x258e   :  { %42786 = vmatpush3.bf16.msra.mxu0 %v47398_v31 }
0x258f   :  { %v36254_v59 = vand.u32 4294901760, %v36253_v63  ;;  %42788 = vmatprep.subr.bf16.mxu0 %v42787_v47  ;;  %v36717_v63 = vld [vmem:[#allocation8 + $0x30] sm:$0xff] }
0x25a4   :  { %v35654_v20 = vpop.permute.xlu1 %35653 }
0x25a5   :  { %v35658_v14 = vsel %vm725_vm2, %v35654_v20, 0  ;;  %v42791_v20 = vpack.c.bf16 %v36261_v61, %v36254_v59 }
0x25a6   :  { %v35726_v49 = vand.u32 4294901760, %v35658_v14 }
0x25a8   :  { %v35727_v56 = vsub.f32 %v35658_v14, %v35726_v49  ;;  %v35656_v50 = vpop.permute.xlu1 %35655  ;;  %v42795_v14 = vpack.c.bf16 %v36244_v26, %v36237_v30 }
0x25a9   :  { %v35661_v42 = vand.u32 4294901760, %v35656_v50 }
0x25aa   :  { %v35728_v54 = vand.u32 4294901760, %v35727_v56 }
0x25ab   :  { %v35738_v2 = vsub.f32 %v35656_v50, %v35661_v42  ;;  %41928 = vmatpush3.msra.mxu1 %v35661_v42  ;;  %v42815_v50 = vpack.c.bf16 %v36259_v34, %v36252_v37 }
0x25ac   :  { %v35729_v28 = vsub.f32 %v35727_v56, %v35728_v54  ;;  %41932 = vmatprep.subr.mxu1 %v44101_v51 }
0x25ad   :  { %v35739_v29 = vand.u32 4294901760, %v35738_v2 }
0x25ae   :  { %v35730_v40 = vand.u32 4294901760, %v35729_v28 }
0x25af   :  { %v35740_v39 = vsub.f32 %v35738_v2, %v35739_v29 }
0x25b0   :  { %41930 = vmatmul.mubr.f32.vlgmr.msra.gmra.mrb[80].mxu1 %v35730_v40 }
0x25b1   :  { %v35741_v35 = vand.u32 4294901760, %v35740_v39  ;;  %41934 = vmatprep.mubr.msk.f32.mxu1 %vm44102_vm1, %v44101_v51 }
0x25b3   :  { %41933 = vmatpush3.msra.mxu1 %v35741_v35 }
0x25b4   :  { %41937 = vmatprep.subr.mxu1 %v44101_v51 }
0x25b8   :  { %41935 = vmatmul.mubr.f32.vlgmr.msra.gmra.mrb[80].mxu1 %v35726_v49 }
0x25b9   :  { %41938 = vmatpush3.msra.mxu1 %v35738_v2  ;;  %v47364_v33 = vpop.f32.mrb[74].mxu1  ;;  %41939 = vmatprep.mubr.msk.f32.mxu1 %vm44102_vm1, %v44101_v51 }
0x25ba   :  { %v41776_v38 = vpop.f32.mrb[75].mxu1  ;;  %41942 = vmatprep.subr.mxu1 %v44101_v51 }
0x25c0   :  { %41940 = vmatmul.mubr.f32.vlgmr.msra.gmra.mrb[80].mxu1 %v35727_v56  ;;  %v42811_v56 = vpack.c.bf16 %v36245_v23, %v36238_v7 }
0x25c1   :  { %41943 = vmatpush3.msra.mxu1 %v35661_v42  ;;  %41944 = vmatprep.mubr.msk.f32.mxu1 %vm44102_vm1, %v44101_v51 }
0x25c2   :  { %41947 = vmatprep.subr.mxu1 %v44101_v51 }
0x25c8   :  { %41945 = vmatmul.mubr.f32.vlgmr.msra.gmra.mrb[80].mxu1 %v35728_v54 }
0x25c9   :  { %41948 = vmatpush3.msra.mxu1 %v35739_v29  ;;  %41949 = vmatprep.mubr.msk.f32.mxu1 %vm44102_vm1, %v44101_v51 }
0x25ca   :  { %41952 = vmatprep.subr.mxu1 %v44101_v51 }
0x25d0   :  { %41950 = vmatmul.mubr.f32.vlgmr.msra.gmra.mrb[80].mxu1 %v35726_v49 }
0x25d1   :  { %41953 = vmatpush3.msra.mxu1 %v35661_v42  ;;  %41954 = vmatprep.mubr.msk.f32.mxu1 %vm44102_vm1, %v44101_v51 }
0x25d8   :  { %41955 = vmatmul.mubr.f32.vlgmr.msra.gmra.mrb[80].mxu1 %v35726_v49  ;;  %v42799_v49 = vpack.c.bf16 %v36258_v6, %v36251_v57 }
0x25ee   :  { %v33832_v0 = vpop.f32.mrb[64].mxu0 }
0x25ef   :  { %v41806_v16 = vpop.f32.mrb[65].mxu0  ;;  %36108 = vrot.lane.b32.xlu0 %v33832_v0, %s44096_s26 }
0x2624   :  { %v34286_v19 = vpop.f32.mrb[76].mxu1 }
0x2625   :  { %36110 = vrot.lane.b32.xlu1 %v34286_v19, %s44096_s26  ;;  %v41836_v36 = vpop.f32.mrb[77].mxu1 }
0x2630   :  { %v34740_v18 = vpop.f32.mrb[66].mxu0 }
0x2631   :  { %v41866_v32 = vpop.f32.mrb[67].mxu0  ;;  %36116 = vrot.lane.b32.xlu0 %v34740_v18, %s44108_s22 }
0x2650   :  { %v35194_v24 = vpop.f32.mrb[78].mxu1 }
0x2651   :  { %36118 = vrot.lane.b32.xlu1 %v35194_v24, %s44108_s22  ;;  %v41896_v8 = vpop.f32.mrb[79].mxu1 }
0x265c   :  { %v35648_v46 = vpop.f32.mrb[68].mxu0 }
0x265d   :  { %36124 = vrot.lane.b32.xlu0 %v35648_v46, %s44109_s21  ;;  %v41926_v51 = vpop.f32.mrb[69].mxu0 }
0x2661   :  { %v36109_v42 = vpop.permute.xlu0 %36108 }
0x2662   :  { %v36130_v2 = vsel %vm725_vm2, %v47337_v55, %v36109_v42 }
0x2697   :  { %v36111_v36 = vpop.permute.xlu1 %36110 }
0x2698   :  { %v36131_v32 = vsel %vm725_vm2, %v47364_v33, %v36111_v36  ;;  %v47421_v33 = vld [vmem:[#allocation10 + $0x18] sm:$0xff] }
0x2699   :  { %v36139_v30 = vrot.slane %v47421_v33, %v44267_v5 }
0x26a3   :  { %v36117_v54 = vpop.permute.xlu0 %36116 }
0x26a4   :  { %v36132_v28 = vsel %vm8088_vm5, %v36130_v2, %v36117_v54 }
0x26ab   :  { %v36102_v3 = vpop.f32.mrb[80].mxu1 }
0x26ac   :  { %36126 = vrot.lane.b32.xlu1 %v36102_v3, %s44109_s21  ;;  %v41956_v60 = vpop.f32.mrb[81].mxu1  ;;  %v36733_v3 = vand.u32 4294901760, %v36716_v1 }
0x26ad   :  { %v36736_v60 = vand.u32 4294901760, %v36717_v63 }
0x26af   :  { %v36834_v2 = vsub.f32 %v36717_v63, %v36736_v60  ;;  %v37936_v63 = vld [vmem:[%s47556_s8 + $0x48] sm:$0xff] }
0x26c3   :  { %v36119_v18 = vpop.permute.xlu1 %36118 }
0x26c4   :  { %v36133_v55 = vsel %vm8088_vm5, %v36131_v32, %v36119_v18 }
0x26cf   :  { %v36125_v29 = vpop.permute.xlu0 %36124 }
0x26d0   :  { %v36134_v40 = vsel %vm8091_vm6, %v36132_v28, %v36125_v29 }
0x26d1   :  { %v36141_v39 = vsel %vm116_vm0, %v36134_v40, 0 }
0x26d2   :  { %v36215_v35 = vand.u32 4294901760, %v36141_v39 }
0x26d4   :  { %v36216_v38 = vsub.f32 %v36141_v39, %v36215_v35  ;;  %v36835_v39 = vand.u32 4294901760, %v36834_v2 }
0x26d6   :  { %v36217_v0 = vand.u32 4294901760, %v36216_v38 }
0x26d8   :  { %v36218_v16 = vsub.f32 %v36216_v38, %v36217_v0 }
0x26da   :  { %v36219_v19 = vand.u32 4294901760, %v36218_v16 }
0x26dc   :  { %41965 = vmatprep.mubr.f32.mxu0 %v36219_v19 }
0x271e   :  { %v36127_v24 = vpop.permute.xlu1 %36126 }
0x271f   :  { %v36135_v8 = vsel %vm8091_vm6, %v36133_v55, %v36127_v24 }
0x2720   :  { %v36144_v46 = vsel %vm116_vm0, %v36135_v8, 0 }
0x2721   :  { %v36225_v51 = vand.u32 4294901760, %v36144_v46 }
0x2723   :  { %v36226_v27 = vsub.f32 %v36144_v46, %v36225_v51 }
0x2725   :  { %v36227_v12 = vand.u32 4294901760, %v36226_v27 }
0x2727   :  { %v36228_v21 = vsub.f32 %v36226_v27, %v36227_v12 }
0x2729   :  { %v36229_v15 = vand.u32 4294901760, %v36228_v21 }
0x272b   :  { %41966 = vmatmul.mubr.f32.vlgmr.msra.gmra.mrb[70].mxu0 %v36229_v15 }
0x272c   :  { %42790 = vmatpush3.bf16.msra.mxu0 %v42787_v47  ;;  %41976 = vmatprep.mubr.f32.mxu0 %v36215_v35  ;;  %v36718_v47 = vld [vmem:[#allocation8 + $0x38] sm:$0xff] }
0x272d   :  { %42792 = vmatprep.subr.bf16.mxu0 %v42791_v20  ;;  %v36739_v59 = vand.u32 4294901760, %v36718_v47 }
0x272f   :  { %v36841_v28 = vsub.f32 %v36718_v47, %v36739_v59 }
0x2730   :  { %42794 = vmatpush3.bf16.msra.mxu0 %v42791_v20  ;;  %v47433_v20 = vpack.c.bf16 %v36739_v59, %v36736_v60  ;;  %v37937_v60 = vld [vmem:[%s47556_s8 + $0x50] sm:$0xff]  ;;  %v37938_v59 = vld [vmem:[%s47556_s8 + $0x58] sm:$0xff] }
0x2731   :  { %42796 = vmatprep.subr.bf16.mxu0 %v42795_v14  ;;  %v42847_v55 = vpack.c.bf16 %v36841_v28, %v36834_v2 }
0x2733   :  { %41977 = vmatmul.mubr.f32.vlgmr.msra.gmra.mrb[70].mxu0 %v36225_v51 }
0x2734   :  { %42798 = vmatpush3.bf16.msra.mxu0 %v42795_v14  ;;  %41987 = vmatprep.mubr.f32.mxu0 %v36216_v38 }
0x2735   :  { %42800 = vmatprep.subr.bf16.mxu0 %v42799_v49 }
0x2738   :  { %42802 = vmatpush3.bf16.msra.mxu0 %v42799_v49  ;;  %v36827_v49 = vsub.f32 %v36716_v1, %v36733_v3  ;;  %v37935_v1 = vld [vmem:[%s47556_s8 + $0x40] sm:$0xff] }
0x2739   :  { %42804 = vmatprep.subr.bf16.mxu0 %v47388_v9 }
0x273b   :  { %41988 = vmatmul.mubr.f32.vlgmr.msra.gmra.mrb[70].mxu0 %v36226_v27 }
0x273c   :  { %42806 = vmatpush3.bf16.msra.mxu0 %v47388_v9  ;;  %41998 = vmatprep.mubr.f32.mxu0 %v36217_v0  ;;  %v36836_v0 = vsub.f32 %v36834_v2, %v36835_v39 }
0x273d   :  { %42808 = vmatprep.subr.bf16.mxu0 %v47398_v31 }
0x273e   :  { %v36837_v19 = vand.u32 4294901760, %v36836_v0 }
0x2740   :  { %42810 = vmatpush3.bf16.msra.mxu0 %v47398_v31 }
0x2741   :  { %42812 = vmatprep.subr.bf16.mxu0 %v42811_v56 }
0x2743   :  { %41999 = vmatmul.mubr.f32.vlgmr.msra.gmra.mrb[70].mxu0 %v36227_v12 }
0x2744   :  { %42814 = vmatpush3.bf16.msra.mxu0 %v42811_v56  ;;  %42009 = vmatprep.mubr.f32.mxu0 %v36215_v35 }
0x2745   :  { %42816 = vmatprep.subr.bf16.mxu0 %v42815_v50 }
0x2748   :  { %42818 = vmatpush3.bf16.msra.mxu0 %v42815_v50  ;;  %v36828_v50 = vand.u32 4294901760, %v36827_v49 }
0x2749   :  { %42820 = vmatprep.subr.bf16.mxu0 %v47388_v9 }
0x274a   :  { %v36829_v54 = vsub.f32 %v36827_v49, %v36828_v50 }
0x274b   :  { %42010 = vmatmul.mubr.f32.vlgmr.msra.gmra.mrb[70].mxu0 %v36225_v51 }
0x274c   :  { %42822 = vmatpush3.bf16.msra.mxu0 %v47388_v9  ;;  %42020 = vmatprep.mubr.f32.mxu0 %v36215_v35  ;;  %v36830_v40 = vand.u32 4294901760, %v36829_v54  ;;  %v36842_v35 = vand.u32 4294901760, %v36841_v28 }
0x274d   :  { %42824 = vmatprep.subr.bf16.mxu0 %v47398_v31 }
0x274e   :  { %v36843_v16 = vsub.f32 %v36841_v28, %v36842_v35  ;;  %v42863_v8 = vpack.c.bf16 %v36842_v35, %v36835_v39 }
0x2750   :  { %42826 = vmatpush3.bf16.msra.mxu0 %v47398_v31  ;;  %v36844_v36 = vand.u32 4294901760, %v36843_v16 }
0x2752   :  { %v42839_v18 = vpack.c.bf16 %v36844_v36, %v36837_v19 }
0x2753   :  { %42021 = vmatmul.mubr.f32.vlgmr.msra.gmra.mrb[70].mxu0 %v36225_v51 }
0x2826   :  { %v42022_v26 = vpop.f32.mrb[70].mxu0 }
0x2827   :  { %v42987_v25 = vadd.f32 %v42022_v26, %v36139_v30  ;;  %v36664_v43 = vpop.f32.mrb[71].mxu0 }
0x2828   :  { %v42988_v22 = vadd.f32 %v36664_v43, %v36139_v30  ;;  %v36705_v30 = vrot.slane %v47421_v33, %v44603_v11  ;;  %v36711_v43 = vrot.slane %v47421_v33, %v45137_v58 }
0x2829   :  { %v36675_v17 = vadd.f32 %v42987_v25, %v46717_v41 }
0x282a   :  { %v36674_v7 = vadd.f32 %v42988_v22, %v46719_v4  ;;  %v36715_v4 = vld [vmem:[#allocation8 + $0x20] sm:$0xff] }
0x282b   :  { %v36679_v9 = vsel %vm116_vm0, %v36675_v17, 0.0  ;;  %v36730_v53 = vand.u32 4294901760, %v36715_v4 }
0x282c   :  { %36680 = vadd.xlane.f32.xlu1 %v36679_v9  ;;  %v36676_v23 = vsel %vm116_vm0, %v36674_v7, 0.0 }
0x282d   :  { %36677 = vadd.xlane.f32.xlu0 %v36676_v23  ;;  %v47431_v61 = vpack.c.bf16 %v36733_v3, %v36730_v53  ;;  %v36820_v14 = vsub.f32 %v36715_v4, %v36730_v53  ;;  %v37279_v53 = vand.u32 4294901760, %v37935_v1  ;;  %v37282_v3 = vand.u32 4294901760, %v37936_v63 }
0x282f   :  { %42828 = vmatprep.subr.bf16.mxu1 %v47431_v61  ;;  %v36821_v56 = vand.u32 4294901760, %v36820_v14  ;;  %v42843_v32 = vpack.c.bf16 %v36827_v49, %v36820_v14  ;;  %v47465_v47 = vpack.c.bf16 %v37282_v3, %v37279_v53  ;;  %v37939_v49 = vld [vmem:[%s47556_s8 + $0x60] sm:$0xff]  ;;  %v37373_v2 = vsub.f32 %v37935_v1, %v37279_v53 }
0x2830   :  { %42830 = vmatpush3.bf16.msra.mxu1 %v47431_v61  ;;  %v37380_v28 = vsub.f32 %v37936_v63, %v37282_v3 }
0x2831   :  { %42832 = vmatprep.subr.bf16.mxu1 %v47433_v20  ;;  %v36822_v42 = vsub.f32 %v36820_v14, %v36821_v56  ;;  %v42859_v24 = vpack.c.bf16 %v36828_v50, %v36821_v56  ;;  %42876 = vmatprep.subr.bf16.mxu0 %v47465_v47  ;;  %v37940_v56 = vld [vmem:[%s47556_s8 + $0x68] sm:$0xff]  ;;  %v37291_v50 = vand.u32 4294901760, %v37939_v49 }
0x2832   :  { %42878 = vmatpush3.bf16.msra.mxu0 %v47465_v47  ;;  %v37381_v0 = vand.u32 4294901760, %v37380_v28 }
0x2833   :  { %v36823_v29 = vand.u32 4294901760, %v36822_v42  ;;  %v37294_v42 = vand.u32 4294901760, %v37940_v56 }
0x2834   :  { %42834 = vmatpush3.bf16.msra.mxu1 %v47433_v20  ;;  %v37382_v36 = vsub.f32 %v37380_v28, %v37381_v0 }
0x2835   :  { %v42835_v38 = vpack.c.bf16 %v36830_v40, %v36823_v29  ;;  %v47485_v54 = vpack.c.bf16 %v37294_v42, %v37291_v50  ;;  %v37941_v29 = vld [vmem:[%s47556_s8 + $0x70] sm:$0xff]  ;;  %v37942_v40 = vld [vmem:[%s47556_s8 + $0x78] sm:$0xff]  ;;  %s44110_s8 = smov [#allocation11]  }
0x2836   :  { %v37297_v39 = vand.u32 4294901760, %v37941_v29  ;;  %v37300_v35 = vand.u32 4294901760, %v37942_v40  ;;  %s37905_s23 = sshll.u32 %s44110_s8, 4  ;;  %s37906_s23 = int_to_ptr.vmem [resolvable:$true] %s37905_s23 }
0x2837   :  { %42836 = vmatprep.subr.bf16.mxu1 %v42835_v38  ;;  %s44063_s11 = scalar_lea.vmem %s37906_s23, 256  ;;  %p44068_p13 = scmp.lt.s32.totalorder %s37906_s23, %s37906_s23 }
0x2838   :  { %v47495_v16 = vpack.c.bf16 %v37300_v35, %v37297_v39  ;;  %p44064_p12 = scmp.ne.s32.totalorder %s37906_s23, %s44063_s11  ;;  %p44069_p0 = scmp.lt.s32.totalorder %s44063_s11, %s44063_s11 }
0x283a   :  { %p44070_p1 = por %p44069_p0, %p44068_p13 }
0x283c   :  { %p44071_p2 = pnand %p44070_p1, %p44064_p12 }
0x28b9   :  { %v36681_v31 = vpop.xlane.xlu1 %36680 }
0x28ba   :  { %v36683_v44 = vmul.f32 0.03125, %v36681_v31  ;;  %v36678_v57 = vpop.xlane.xlu0 %36677 }
0x28bb   :  { %v36682_v6 = vmul.f32 0.03125, %v36678_v57 }
0x28bc   :  { %v36685_v10 = vsub.f32 %v36675_v17, %v36683_v44 }
0x28bd   :  { %v36684_v5 = vsub.f32 %v36674_v7, %v36682_v6 }
0x28be   :  { %v36687_v34 = vmul.f32 %v36685_v10, %v36685_v10 }
0x28bf   :  { %v36686_v52 = vmul.f32 %v36684_v5, %v36684_v5 }
0x28c0   :  { %v36691_v41 = vsel %vm116_vm0, %v36687_v34, 0.0 }
0x28c1   :  { %v36688_v37 = vsel %vm116_vm0, %v36686_v52, 0.0 }
0x28c2   :  { %36689 = vadd.xlane.f32.xlu0 %v36688_v37 }
0x28c6   :  { %36692 = vadd.xlane.f32.xlu0 %v36691_v41 }
0x294f   :  { %v36690_v46 = vpop.xlane.xlu0 %36689 }
0x2950   :  { %v36694_v51 = vmul.f32 0.03125, %v36690_v46 }
0x2952   :  { %v36696_v27 = vadd.f32 1e-05, %v36694_v51 }
0x2953   :  { %v36693_v12 = vpop.xlane.xlu0 %36692 }
0x2954   :  { %43933 = vrsqrt.f32 %v36696_v27  ;;  %v36695_v21 = vmul.f32 0.03125, %v36693_v12  ;;  %v37401_v12 = vsub.f32 %v37939_v49, %v37291_v50 }
0x2956   :  { %v36697_v15 = vadd.f32 1e-05, %v36695_v21  ;;  %v37408_v21 = vsub.f32 %v37940_v56, %v37294_v42 }
0x2958   :  { %43935 = vrsqrt.f32 %v36697_v15  ;;  %v42915_v63 = vpack.c.bf16 %v37408_v21, %v37401_v12 }
0x295e   :  { %v43934_v26 = vpop.eup %43933 }
0x295f   :  { %v36700_v25 = vmul.f32 %v43934_v26, %v36684_v5  ;;  %v37402_v26 = vand.u32 4294901760, %v37401_v12 }
0x2961   :  { %v36706_v22 = vmul.f32 %v36705_v30, %v36700_v25  ;;  %v37409_v25 = vand.u32 4294901760, %v37408_v21 }
0x2962   :  { %v43936_v17 = vpop.eup %43935 }
0x2963   :  { %v36701_v7 = vmul.f32 %v43936_v17, %v36685_v10  ;;  %v47443_v9 = vadd.f32 %v36711_v43, %v36706_v22  ;;  %v37403_v22 = vsub.f32 %v37401_v12, %v37402_v26  ;;  %v37410_v17 = vsub.f32 %v37408_v21, %v37409_v25 }
0x2965   :  { %v36707_v23 = vmul.f32 %v36705_v30, %v36701_v7  ;;  %v36724_v31 = vsel %vm116_vm0, %v47443_v9, 0  ;;  %v37415_v7 = vsub.f32 %v37941_v29, %v37297_v39 }
0x2966   :  { %v36798_v44 = vand.u32 4294901760, %v36724_v31 }
0x2967   :  { %v47447_v57 = vadd.f32 %v36711_v43, %v36707_v23  ;;  %v37422_v23 = vsub.f32 %v37942_v40, %v37300_v35 }
0x2968   :  { %v36799_v6 = vsub.f32 %v36724_v31, %v36798_v44 }
0x2969   :  { %v36727_v11 = vsel %vm116_vm0, %v47447_v57, 0  ;;  %v42919_v53 = vpack.c.bf16 %v37422_v23, %v37415_v7 }
0x296a   :  { %v36800_v5 = vand.u32 4294901760, %v36799_v6  ;;  %v36808_v52 = vand.u32 4294901760, %v36727_v11 }
0x296c   :  { %v36801_v37 = vsub.f32 %v36799_v6, %v36800_v5  ;;  %v36809_v58 = vsub.f32 %v36727_v11, %v36808_v52  ;;  %v37416_v11 = vand.u32 4294901760, %v37415_v7 }
0x296e   :  { %v36802_v34 = vand.u32 4294901760, %v36801_v37  ;;  %v36810_v41 = vand.u32 4294901760, %v36809_v58  ;;  %v37417_v37 = vsub.f32 %v37415_v7, %v37416_v11 }
0x2970   :  { %42031 = vmatprep.mubr.f32.mxu1 %v36802_v34  ;;  %v36811_v10 = vsub.f32 %v36809_v58, %v36810_v41  ;;  %v37418_v34 = vand.u32 4294901760, %v37417_v37  ;;  %v37895_v37 = vrot.slane %v47421_v33, %v45097_v62 }
0x2972   :  { %v36812_v4 = vand.u32 4294901760, %v36811_v10 }
0x2974   :  { %42032 = vmatmul.mubr.f32.vlgmr.msra.gmra.mrb[82].mxu1 %v36812_v4  ;;  %v42907_v4 = vpack.c.bf16 %v37380_v28, %v37373_v2 }
0x2975   :  { %42838 = vmatpush3.bf16.msra.mxu1 %v42835_v38  ;;  %42042 = vmatprep.mubr.f32.mxu1 %v36798_v44  ;;  %v37374_v38 = vand.u32 4294901760, %v37373_v2 }
0x2976   :  { %42840 = vmatprep.subr.bf16.mxu1 %v42839_v18 }
0x2977   :  { %v37375_v19 = vsub.f32 %v37373_v2, %v37374_v38  ;;  %v42939_v3 = vpack.c.bf16 %v37381_v0, %v37374_v38 }
0x2979   :  { %42842 = vmatpush3.bf16.msra.mxu1 %v42839_v18 }
0x297a   :  { %42844 = vmatprep.subr.bf16.mxu1 %v42843_v32 }
0x297c   :  { %42043 = vmatmul.mubr.f32.vlgmr.msra.gmra.mrb[82].mxu1 %v36808_v52 }
0x297d   :  { %42846 = vmatpush3.bf16.msra.mxu1 %v42843_v32  ;;  %42053 = vmatprep.mubr.f32.mxu1 %v36799_v6  ;;  %v37411_v6 = vand.u32 4294901760, %v37410_v17 }
0x297e   :  { %42848 = vmatprep.subr.bf16.mxu1 %v42847_v55 }
0x2981   :  { %42850 = vmatpush3.bf16.msra.mxu1 %v42847_v55  ;;  %v37376_v55 = vand.u32 4294901760, %v37375_v19 }
0x2982   :  { %42852 = vmatprep.subr.bf16.mxu1 %v47431_v61 }
0x2984   :  { %42054 = vmatmul.mubr.f32.vlgmr.msra.gmra.mrb[82].mxu1 %v36809_v58 }
0x2985   :  { %42854 = vmatpush3.bf16.msra.mxu1 %v47431_v61  ;;  %42064 = vmatprep.mubr.f32.mxu1 %v36800_v5  ;;  %v37423_v5 = vand.u32 4294901760, %v37422_v23 }
0x2986   :  { %42856 = vmatprep.subr.bf16.mxu1 %v47433_v20 }
0x2987   :  { %v37424_v58 = vsub.f32 %v37422_v23, %v37423_v5 }
0x2989   :  { %42858 = vmatpush3.bf16.msra.mxu1 %v47433_v20 }
0x298a   :  { %42860 = vmatprep.subr.bf16.mxu1 %v42859_v24 }
0x298c   :  { %42065 = vmatmul.mubr.f32.vlgmr.msra.gmra.mrb[82].mxu1 %v36810_v41  ;;  %v37425_v41 = vand.u32 4294901760, %v37424_v58 }
0x298d   :  { %42862 = vmatpush3.bf16.msra.mxu1 %v42859_v24  ;;  %42075 = vmatprep.mubr.f32.mxu1 %v36798_v44  ;;  %v37383_v24 = vand.u32 4294901760, %v37382_v36 }
0x298e   :  { %42864 = vmatprep.subr.bf16.mxu1 %v42863_v8  ;;  %v42903_v10 = vpack.c.bf16 %v37425_v41, %v37418_v34 }
0x298f   :  { %v42891_v51 = vpack.c.bf16 %v37383_v24, %v37376_v55  ;;  %v37271_v24 = vrot.slane %v47421_v33, %v45157_v13 }
0x2991   :  { %42866 = vmatpush3.bf16.msra.mxu1 %v42863_v8 }
0x2992   :  { %42868 = vmatprep.subr.bf16.mxu1 %v47431_v61 }
0x2994   :  { %42076 = vmatmul.mubr.f32.vlgmr.msra.gmra.mrb[82].mxu1 %v36808_v52 }
0x2995   :  { %42870 = vmatpush3.bf16.msra.mxu1 %v47431_v61  ;;  %42086 = vmatprep.mubr.f32.mxu1 %v36798_v44  ;;  %v37285_v61 = vand.u32 4294901760, %v37937_v60  ;;  %v37404_v44 = vand.u32 4294901760, %v37403_v22 }
0x2996   :  { %42872 = vmatprep.subr.bf16.mxu1 %v47433_v20 }
0x2997   :  { %v37387_v18 = vsub.f32 %v37937_v60, %v37285_v61 }
0x2999   :  { %42874 = vmatpush3.bf16.msra.mxu1 %v47433_v20  ;;  %v37288_v20 = vand.u32 4294901760, %v37938_v59  ;;  %v37388_v8 = vand.u32 4294901760, %v37387_v18 }
0x299b   :  { %v47475_v14 = vpack.c.bf16 %v37288_v20, %v37285_v61  ;;  %v37394_v32 = vsub.f32 %v37938_v59, %v37288_v20  ;;  %v37389_v27 = vsub.f32 %v37387_v18, %v37388_v8  ;;  %v42947_v59 = vpack.c.bf16 %v37409_v25, %v37402_v26 }
0x299c   :  { %42087 = vmatmul.mubr.f32.vlgmr.msra.gmra.mrb[82].mxu1 %v36808_v52  ;;  %v42899_v52 = vpack.c.bf16 %v37411_v6, %v37404_v44  ;;  %v42951_v61 = vpack.c.bf16 %v37423_v5, %v37416_v11  ;;  %v36722_v20 = vrot.slane %v47421_v33, %v45124_v45  ;;  %v37889_v6 = vrot.slane %v47421_v33, %v44997_v48 }
0x299d   :  { %42880 = vmatprep.subr.bf16.mxu0 %v47475_v14  ;;  %v37395_v46 = vand.u32 4294901760, %v37394_v32  ;;  %v37390_v30 = vand.u32 4294901760, %v37389_v27  ;;  %v42911_v1 = vpack.c.bf16 %v37394_v32, %v37387_v18 }
0x299e   :  { %42882 = vmatpush3.bf16.msra.mxu0 %v47475_v14 }
0x299f   :  { %42884 = vmatprep.subr.bf16.mxu0 %v47485_v54  ;;  %v37396_v15 = vsub.f32 %v37394_v32, %v37395_v46  ;;  %v42943_v60 = vpack.c.bf16 %v37395_v46, %v37388_v8 }
0x29a1   :  { %v37397_v43 = vand.u32 4294901760, %v37396_v15 }
0x29a2   :  { %42886 = vmatpush3.bf16.msra.mxu0 %v47485_v54 }
0x29a3   :  { %42888 = vmatprep.subr.bf16.mxu0 %v47495_v16  ;;  %v42895_v31 = vpack.c.bf16 %v37397_v43, %v37390_v30 }
0x29a6   :  { %42890 = vmatpush3.bf16.msra.mxu0 %v47495_v16 }
0x29a7   :  { %42892 = vmatprep.subr.bf16.mxu0 %v42891_v51 }
0x2a6f   :  { %v42088_v49 = vpop.f32.mrb[82].mxu1 }
0x2a70   :  { %v42989_v56 = vadd.f32 %v42088_v49, %v36722_v20  ;;  %v37247_v50 = vpop.f32.mrb[83].mxu1 }
0x2a71   :  { %v42990_v42 = vadd.f32 %v37247_v50, %v36722_v20 }
0x2a72   :  { %v37258_v29 = vmax.f32 %v42989_v56, 0.0 }
0x2a73   :  { %v37257_v40 = vmax.f32 %v42990_v42, 0.0 }
0x2a74   :  { %v37276_v39 = vsel %vm18381_vm8, %v37258_v29, 0 }
0x2a75   :  { %v37361_v35 = vand.u32 4294901760, %v37276_v39  ;;  %v37273_v2 = vsel %vm18381_vm8, %v37257_v40, 0 }
0x2a76   :  { %v37351_v28 = vand.u32 4294901760, %v37273_v2 }
0x2a77   :  { %v37362_v19 = vsub.f32 %v37276_v39, %v37361_v35 }
0x2a78   :  { %v37352_v38 = vsub.f32 %v37273_v2, %v37351_v28 }
0x2a79   :  { %v37363_v0 = vand.u32 4294901760, %v37362_v19 }
0x2a7a   :  { %v37353_v36 = vand.u32 4294901760, %v37352_v38 }
0x2a7b   :  { %v37364_v18 = vsub.f32 %v37362_v19, %v37363_v0 }
0x2a7c   :  { %v37354_v32 = vsub.f32 %v37352_v38, %v37353_v36 }
0x2a7d   :  { %v37365_v45 = vand.u32 4294901760, %v37364_v18 }
0x2a7e   :  { %v37355_v55 = vand.u32 4294901760, %v37354_v32 }
0x2a80   :  { %42105 = vmatprep.mubr.f32.mxu0 %v37355_v55 }
0x2a81   :  { %42106 = vmatmul.mubr.f32.vlgmr.msra.gmra.mrb[72].mxu0 %v37365_v45 }
0x2a82   :  { %42894 = vmatpush3.bf16.msra.mxu0 %v42891_v51  ;;  %42124 = vmatprep.mubr.f32.mxu0 %v37351_v28 }
0x2a83   :  { %42896 = vmatprep.subr.bf16.mxu0 %v42895_v31 }
0x2a86   :  { %42898 = vmatpush3.bf16.msra.mxu0 %v42895_v31 }
0x2a87   :  { %42900 = vmatprep.subr.bf16.mxu0 %v42899_v52 }
0x2a8a   :  { %42902 = vmatpush3.bf16.msra.mxu0 %v42899_v52 }
0x2a8b   :  { %42904 = vmatprep.subr.bf16.mxu0 %v42903_v10 }
0x2a8e   :  { %42906 = vmatpush3.bf16.msra.mxu0 %v42903_v10 }
0x2a8f   :  { %42908 = vmatprep.subr.bf16.mxu0 %v42907_v4 }
0x2a91   :  { %42125 = vmatmul.mubr.f32.vlgmr.msra.gmra.mrb[72].mxu0 %v37361_v35 }
0x2a92   :  { %42910 = vmatpush3.bf16.msra.mxu0 %v42907_v4  ;;  %42143 = vmatprep.mubr.f32.mxu0 %v37352_v38 }
0x2a93   :  { %42912 = vmatprep.subr.bf16.mxu0 %v42911_v1 }
0x2a96   :  { %42914 = vmatpush3.bf16.msra.mxu0 %v42911_v1 }
0x2a97   :  { %42916 = vmatprep.subr.bf16.mxu0 %v42915_v63 }
0x2a9a   :  { %42918 = vmatpush3.bf16.msra.mxu0 %v42915_v63 }
0x2a9b   :  { %42920 = vmatprep.subr.bf16.mxu0 %v42919_v53 }
0x2a9e   :  { %42922 = vmatpush3.bf16.msra.mxu0 %v42919_v53 }
0x2a9f   :  { %42924 = vmatprep.subr.bf16.mxu0 %v47465_v47 }
0x2aa1   :  { %42144 = vmatmul.mubr.f32.vlgmr.msra.gmra.mrb[72].mxu0 %v37362_v19 }
0x2aa2   :  { %42926 = vmatpush3.bf16.msra.mxu0 %v47465_v47  ;;  %42162 = vmatprep.mubr.f32.mxu0 %v37353_v36 }
0x2aa3   :  { %42928 = vmatprep.subr.bf16.mxu0 %v47475_v14 }
0x2aa6   :  { %42930 = vmatpush3.bf16.msra.mxu0 %v47475_v14 }
0x2aa7   :  { %42932 = vmatprep.subr.bf16.mxu0 %v47485_v54 }
0x2aaa   :  { %42934 = vmatpush3.bf16.msra.mxu0 %v47485_v54 }
0x2aab   :  { %42936 = vmatprep.subr.bf16.mxu0 %v47495_v16 }
0x2aae   :  { %42938 = vmatpush3.bf16.msra.mxu0 %v47495_v16 }
0x2aaf   :  { %42940 = vmatprep.subr.bf16.mxu0 %v42939_v3 }
0x2ab1   :  { %42163 = vmatmul.mubr.f32.vlgmr.msra.gmra.mrb[72].mxu0 %v37363_v0 }
0x2ab2   :  { %42942 = vmatpush3.bf16.msra.mxu0 %v42939_v3  ;;  %42181 = vmatprep.mubr.f32.mxu0 %v37351_v28 }
0x2ab3   :  { %42944 = vmatprep.subr.bf16.mxu0 %v42943_v60 }
0x2ab6   :  { %42946 = vmatpush3.bf16.msra.mxu0 %v42943_v60 }
0x2ab7   :  { %42948 = vmatprep.subr.bf16.mxu0 %v42947_v59 }
0x2aba   :  { %42950 = vmatpush3.bf16.msra.mxu0 %v42947_v59 }
0x2abb   :  { %42952 = vmatprep.subr.bf16.mxu0 %v42951_v61 }
0x2abe   :  { %42954 = vmatpush3.bf16.msra.mxu0 %v42951_v61 }
0x2abf   :  { %42956 = vmatprep.subr.bf16.mxu0 %v47465_v47 }
0x2ac1   :  { %42182 = vmatmul.mubr.f32.vlgmr.msra.gmra.mrb[72].mxu0 %v37361_v35 }
0x2ac2   :  { %42958 = vmatpush3.bf16.msra.mxu0 %v47465_v47  ;;  %42200 = vmatprep.mubr.f32.mxu0 %v37351_v28 }
0x2ac3   :  { %42960 = vmatprep.subr.bf16.mxu0 %v47475_v14 }
0x2ac6   :  { %42962 = vmatpush3.bf16.msra.mxu0 %v47475_v14 }
0x2ac7   :  { %42964 = vmatprep.subr.bf16.mxu0 %v47485_v54 }
0x2aca   :  { %42966 = vmatpush3.bf16.msra.mxu0 %v47485_v54 }
0x2acb   :  { %42968 = vmatprep.subr.bf16.mxu0 %v47495_v16 }
0x2ace   :  { %42970 = vmatpush3.bf16.msra.mxu0 %v47495_v16 }
0x2ad1   :  { %42201 = vmatmul.mubr.f32.vlgmr.msra.gmra.mrb[72].mxu0 %v37361_v35 }
0x2ba4   :  { %v42202_v8 = vpop.f32.mrb[72].mxu0 }
0x2ba5   :  { %v42991_v46 = vadd.f32 %v42202_v8, %v37271_v24  ;;  %v37848_v47 = vpop.f32.mrb[73].mxu0 }
0x2ba6   :  { %v42992_v51 = vadd.f32 %v37848_v47, %v37271_v24 }
0x2ba7   :  { %v37859_v27 = vadd.f32 %v42991_v46, %v47447_v57 }
0x2ba8   :  { %v37858_v14 = vadd.f32 %v42992_v51, %v47443_v9 }
0x2ba9   :  { %v37863_v12 = vsel %vm116_vm0, %v37859_v27, 0.0 }
0x2baa   :  { %37864 = vadd.xlane.f32.xlu0 %v37863_v12  ;;  %v37860_v54 = vsel %vm116_vm0, %v37858_v14, 0.0 }
0x2bab   :  { %37861 = vadd.xlane.f32.xlu1 %v37860_v54 }
0x2c37   :  { %v37865_v21 = vpop.xlane.xlu0 %37864 }
0x2c38   :  { %v37867_v16 = vmul.f32 0.03125, %v37865_v21  ;;  %v37862_v15 = vpop.xlane.xlu1 %37861 }
0x2c39   :  { %v37866_v30 = vmul.f32 0.03125, %v37862_v15 }
0x2c3a   :  { %v37869_v26 = vsub.f32 %v37859_v27, %v37867_v16 }
0x2c3b   :  { %v37868_v13 = vsub.f32 %v37858_v14, %v37866_v30 }
0x2c3c   :  { %v37871_v25 = vmul.f32 %v37869_v26, %v37869_v26 }
0x2c3d   :  { %v37870_v43 = vmul.f32 %v37868_v13, %v37868_v13 }
0x2c3e   :  { %v37875_v22 = vsel %vm116_vm0, %v37871_v25, 0.0 }
0x2c3f   :  { %37876 = vadd.xlane.f32.xlu0 %v37875_v22  ;;  %v37872_v57 = vsel %vm116_vm0, %v37870_v43, 0.0 }
0x2c40   :  { %37873 = vadd.xlane.f32.xlu1 %v37872_v57 }
0x2ccc   :  { %v37877_v9 = vpop.xlane.xlu0 %37876 }
0x2ccd   :  { %v37879_v17 = vmul.f32 0.03125, %v37877_v9  ;;  %v37874_v7 = vpop.xlane.xlu1 %37873 }
0x2cce   :  { %v37878_v23 = vmul.f32 0.03125, %v37874_v7 }
0x2ccf   :  { %v37881_v31 = vadd.f32 1e-05, %v37879_v17 }
0x2cd0   :  { %v37880_v44 = vadd.f32 1e-05, %v37878_v23 }
0x2cd1   :  { %43937 = vrsqrt.f32 %v37881_v31 }
0x2cd2   :  { %43939 = vrsqrt.f32 %v37880_v44 }
0x2cdb   :  { %v43938_v11 = vpop.eup %43937 }
0x2cdc   :  { %v43940_v5 = vpop.eup %43939  ;;  %v37885_v52 = vmul.f32 %v43938_v11, %v37869_v26 }
0x2cdd   :  { %v37884_v58 = vmul.f32 %v43940_v5, %v37868_v13 }
0x2cde   :  { %v37891_v34 = vmul.f32 %v37889_v6, %v37885_v52 }
0x2cdf   :  { %v37890_v41 = vmul.f32 %v37889_v6, %v37884_v58 }
0x2ce0   :  { %v37897_v10 = vadd.f32 %v37895_v37, %v37891_v34 }
0x2ce1   :  { %v37896_v4 = vadd.f32 %v37895_v37, %v37890_v41 }
0x2ce2   :  { %37899 = vst.msk [vmem:[#allocation11 + $0x8] sm:$0xff] %vm116_vm0, %v37897_v10 }
0x2ce3   :  { %37898 = vst.msk [vmem:[#allocation11] sm:$0xff] %vm116_vm0, %v37896_v4 }
0x2ce4   :  { %44074 = shalt.err (!%p44071_p2)
}
0x2ce5   :  { %s44075_s27 = scalar_lea.hbm %s47558_s10, 256 }
0x2ce6   :  { %p44076_p3 = scmp.ne.s32.totalorder %s47558_s10, %s44075_s27  ;;  %p44079_p4 = scmp.lt.u32.totalorder %s44075_s27, %s47558_s10 }
0x2ce8   :  { %p44081_p5 = pnand %p44079_p4, %p44076_p3 }
0x2cea   :  { %44084 = shalt.err (!%p44081_p5)
}
0x2ceb   :  { %37911 = dma.vmem_to_hbm [thread:$0]  %s37906_s23, 256, %s47558_s10, [#allocation4], %s44095_s25, %s44095_s25, %s44096_s26  }
0x2cec   :  { %44091 = dma.done.wait [#allocation4], 256  }
0x2ced   :  { %44092 = vsyncadd [#allocation4], 4294967040 }
0x2cee   :  { %37915 = vsyncpa [#allocation3], 1 }
0x2cef   :  { %37916 = vsyncpa [#allocation6], 1 }
0x2cf0   :  { %37917 = vsyncpa [#allocation9], 1 }
0x2cf1   :  { %37918 = vsyncpa [#allocation4], 1 }

</bundles_post_ra>
